<compile_context>
chip_gen: v5e
topology: v5e:2x2
jax: 0.10.0
libtpu: 0.0.40
codegen_flags: <defaults>
</compile_context>

<pallas_src>
import jax
import jax.numpy as jnp
from jax.experimental import pallas as pl
from jax.experimental.pallas import tpu as pltpu


def _round_up(x, m):
    return ((x + m - 1) // m) * m


# -----------------------------------------------------------------------------
# Kernel: one batch tile through the whole MLP; weights stay resident in VMEM.
# -----------------------------------------------------------------------------
def _fused_mlp_kernel(x_ref, w1_ref, b1_ref, w2_ref, b2_ref,
                      w3_ref, b3_ref, w4_ref, b4_ref, o_ref):
    cdt = w1_ref.dtype  # MXU input dtype (bf16)
    h = x_ref[...].astype(cdt)

    # fc1 + relu
    a = jnp.dot(h, w1_ref[...], preferred_element_type=jnp.float32) + b1_ref[...]
    h = jnp.maximum(a, 0.0).astype(cdt)

    # fc2 + relu
    a = jnp.dot(h, w2_ref[...], preferred_element_type=jnp.float32) + b2_ref[...]
    h = jnp.maximum(a, 0.0).astype(cdt)

    # fc3 + relu
    a = jnp.dot(h, w3_ref[...], preferred_element_type=jnp.float32) + b3_ref[...]
    h = jnp.maximum(a, 0.0).astype(cdt)

    # Dropout(p=0.25): identity in inference mode (model.eval()).
    # TODO(synk): training-mode dropout (pltpu.prng_random_bits mask * 1/(1-p)) not implemented.

    # fc4 (no activation)
    y = jnp.dot(h, w4_ref[...], preferred_element_type=jnp.float32) + b4_ref[...]
    o_ref[...] = y.astype(o_ref.dtype)


def _weight_spec(shape, single_buffer):
    """BlockSpec for a weight/bias loaded once and kept VMEM-resident."""
    idx = lambda i: (0, 0)  # same block every grid step -> no re-DMA
    if single_buffer and hasattr(pl, "Buffered"):
        # Constant block: no need for double buffering -> save VMEM.
        return pl.BlockSpec(shape, idx, pipeline_mode=pl.Buffered(1))
    return pl.BlockSpec(shape, idx)


def _pick_tile_m(B, tile_m):
    """Choose / validate the batch tile (rows per grid step)."""
    b_aligned = _round_up(B, 8)
    if tile_m is None:
        # Large enough that per-step MXU work (>~1.6 GFLOP at 512) comfortably
        # exceeds the ~0.35 us fixed per-step pipeline overhead, while the f32
        # intermediates still fit even v5e's 16 MiB default scoped VMEM.
        tile_m = 512
    tile_m = max(8, _round_up(int(tile_m), 8))   # (8, 128) sublane constraint
    tile_m = min(tile_m, b_aligned)
    # Keep >= 2 grid steps when the batch allows it so the "parallel" batch
    # axis actually spans both TensorCores on v7x.
    if b_aligned // tile_m < 2 and b_aligned >= 16:
        tile_m = _round_up(pl.cdiv(b_aligned, 2), 8)
    return tile_m


def _build_forward_call(Bp, K, n1, n2, n3, n_out, tile_m, weight_bytes,
                        single_buffer_weights):
    grid = (Bp // tile_m,)

    in_specs = [
        # activations: one batch tile per grid step (pipeline double-buffered)
        pl.BlockSpec((tile_m, K), lambda i: (i, 0)),
        # weights / biases: constant block index -> loaded once, resident
        _weight_spec((K, n1), single_buffer_weights),
        _weight_spec((1, n1), single_buffer_weights),
        _weight_spec((n1, n2), single_buffer_weights),
        _weight_spec((1, n2), single_buffer_weights),
        _weight_spec((n2, n3), single_buffer_weights),
        _weight_spec((1, n3), single_buffer_weights),
        _weight_spec((n3, n_out), single_buffer_weights),
        _weight_spec((1, n_out), single_buffer_weights),
    ]
    out_specs = pl.BlockSpec((tile_m, n_out), lambda i: (i, 0))

    # Advisory cost estimate for XLA's scheduler.
    flops = 2 * Bp * (K * n1 + n1 * n2 + n2 * n3 + n3 * n_out)
    bytes_accessed = (Bp * K * 4 + Bp * n_out * 4 + weight_bytes
                      + (n1 + n2 + n3 + n_out) * 4)
    cost = pl.CostEstimate(flops=flops, transcendentals=0,
                           bytes_accessed=bytes_accessed)

    # Rough VMEM budget: in/out tiles (double-buffered) + weights (worst case
    # double-buffered) + f32 accumulators and bf16 copies of the hidden layers.
    vmem_est = (2 * tile_m * K * 4 + 2 * tile_m * n_out * 4
                + 2 * weight_bytes
                + tile_m * (n1 + n2 + n3) * (4 + 2))
    compiler_kwargs = dict(dimension_semantics=("parallel",))
    if vmem_est > (16 << 20):  # above v5e's default scoped VMEM limit
        compiler_kwargs["vmem_limit_bytes"] = int(min(vmem_est + (4 << 20),
                                                      100 << 20))

    return pl.pallas_call(
        _fused_mlp_kernel,
        out_shape=jax.ShapeDtypeStruct((Bp, n_out), jnp.float32),
        grid_spec=pl.GridSpec(grid=grid, in_specs=in_specs, out_specs=out_specs),
        compiler_params=pltpu.CompilerParams(**compiler_kwargs),
        cost_estimate=cost,
    )


def fully_connected_forward(params, x, *, tile_m=None):
    """Fused forward pass: x (B, input_size) -> (B, output_size), f32 output."""
    B, K = x.shape
    w1, b1 = params["fc1"]
    w2, b2 = params["fc2"]
    w3, b3 = params["fc3"]
    w4, b4 = params["fc4"]
    assert w1.shape[0] == K
    n1, n2, n3, n_out = w1.shape[1], w2.shape[1], w3.shape[1], w4.shape[1]

    # Biases as (1, N) f32 rows so they broadcast onto the f32 accumulator.
    b1r = b1.reshape(1, n1).astype(jnp.float32)
    b2r = b2.reshape(1, n2).astype(jnp.float32)
    b3r = b3.reshape(1, n3).astype(jnp.float32)
    b4r = b4.reshape(1, n_out).astype(jnp.float32)

    tile_m = _pick_tile_m(B, tile_m)
    Bp = _round_up(B, tile_m)
    if Bp != B:
        # Padded rows run through the MLP and are sliced off at the end.
        x = jnp.pad(x, ((0, Bp - B), (0, 0)))

    weight_bytes = sum(int(w.size) * w.dtype.itemsize for w in (w1, w2, w3, w4))
    args = (x, w1, b1r, w2, b2r, w3, b3r, w4, b4r)

    try:
        out = _build_forward_call(Bp, K, n1, n2, n3, n_out, tile_m, weight_bytes,
                                  single_buffer_weights=True)(*args)
    except Exception:
        # Fallback for JAX versions without BlockSpec(pipeline_mode=Buffered(1)).
        out = _build_forward_call(Bp, K, n1, n2, n3, n_out, tile_m, weight_bytes,
                                  single_buffer_weights=False)(*args)

    return out[:B]


# -----------------------------------------------------------------------------
# Parameter init (PyTorch nn.Linear default) and pure-JAX reference.
# -----------------------------------------------------------------------------
def init_linear_params(key, fan_in, fan_out, w_dtype=jnp.bfloat16):
    # PyTorch nn.Linear default init: U(-1/sqrt(fan_in), +1/sqrt(fan_in)).
    kw, kb = jax.random.split(key)
    bound = 1.0 / jnp.sqrt(jnp.asarray(fan_in, jnp.float32))
    w = jax.random.uniform(kw, (fan_in, fan_out), jnp.float32, -bound, bound)
    b = jax.random.uniform(kb, (fan_out,), jnp.float32, -bound, bound)
    return w.astype(w_dtype), b  # weights stored (in, out), bf16; bias f32


def fully_connected_init(key, input_size, output_size):
    k1, k2, k3, k4 = jax.random.split(key, 4)
    return {
        "fc1": init_linear_params(k1, input_size, 256),
        "fc2": init_linear_params(k2, 256, 512),
        "fc3": init_linear_params(k3, 512, 1024),
        "fc4": init_linear_params(k4, 1024, output_size),
    }


def reference_forward(params, x):
    """Pure-JAX reference using the same bf16-weight / f32-accumulate recipe.

    NOTE: this shares the bf16-weight recipe with the kernel, so it checks the
    kernel, not bf16-vs-f32 model drift (compare against an f32-weight model
    separately with a looser tolerance if strict PyTorch parity is required).
    """
    def lin(h, w, b):
        acc = jnp.dot(h.astype(w.dtype), w, preferred_element_type=jnp.float32)
        return acc + b.reshape(1, -1).astype(jnp.float32)
    h = jax.nn.relu(lin(x, *params["fc1"]))
    h = jax.nn.relu(lin(h, *params["fc2"]))
    h = jax.nn.relu(lin(h, *params["fc3"]))
    return lin(h, *params["fc4"])


if __name__ == "__main__":
    key = jax.random.PRNGKey(0)
    k_params, k_x = jax.random.split(key)

    batch = 128
    input_size = 128
    output_size = 128

    params = fully_connected_init(k_params, input_size, output_size)
    x = jax.random.normal(k_x, (batch, input_size), jnp.float32)

    # Default tiling: batch split into >=2 sublane-aligned tiles (grid=(2,) here
    # so the "parallel" axis covers both TensorCores on v7x).
    out = fully_connected_forward(params, x)
    out = jax.block_until_ready(out)

    ref = reference_forward(params, x)
    assert out.shape == (batch, output_size)
    max_err = float(jnp.max(jnp.abs(out - ref)))
    assert jnp.allclose(out, ref, atol=1e-2, rtol=1e-2), max_err

    print("KERNEL_OK")
</pallas_src>

<mosaic_0001>
module attributes {stable_mosaic.version = 11 : i64} {
  func.func @_fused_mlp_kernel(%arg0: i32, %arg1: memref<64x128xf32, #tpu.memory_space<vmem>>, %arg2: memref<128x256xbf16, #tpu.memory_space<vmem>>, %arg3: memref<1x256xf32, #tpu.memory_space<vmem>>, %arg4: memref<256x512xbf16, #tpu.memory_space<vmem>>, %arg5: memref<1x512xf32, #tpu.memory_space<vmem>>, %arg6: memref<512x1024xbf16, #tpu.memory_space<vmem>>, %arg7: memref<1x1024xf32, #tpu.memory_space<vmem>>, %arg8: memref<1024x128xbf16, #tpu.memory_space<vmem>>, %arg9: memref<1x128xf32, #tpu.memory_space<vmem>>, %arg10: memref<64x128xf32, #tpu.memory_space<vmem>>) attributes {dimension_semantics = [#tpu.dimension_semantics<parallel>], iteration_bounds = array<i64: 2>, scalar_prefetch = 0 : i64, scratch_operands = 0 : i64, tpu.core_type = #tpu.core_type<tc>, window_params = [{transform_indices = @transform_0, window_bounds = array<i64: 64, 128>}, {pipeline_mode = #tpu.pipeline_mode<synchronous>, transform_indices = @transform_1, window_bounds = array<i64: 128, 256>}, {pipeline_mode = #tpu.pipeline_mode<synchronous>, transform_indices = @transform_2, window_bounds = array<i64: 1, 256>}, {pipeline_mode = #tpu.pipeline_mode<synchronous>, transform_indices = @transform_3, window_bounds = array<i64: 256, 512>}, {pipeline_mode = #tpu.pipeline_mode<synchronous>, transform_indices = @transform_4, window_bounds = array<i64: 1, 512>}, {pipeline_mode = #tpu.pipeline_mode<synchronous>, transform_indices = @transform_5, window_bounds = array<i64: 512, 1024>}, {pipeline_mode = #tpu.pipeline_mode<synchronous>, transform_indices = @transform_6, window_bounds = array<i64: 1, 1024>}, {pipeline_mode = #tpu.pipeline_mode<synchronous>, transform_indices = @transform_7, window_bounds = array<i64: 1024, 128>}, {pipeline_mode = #tpu.pipeline_mode<synchronous>, transform_indices = @transform_8, window_bounds = array<i64: 1, 128>}, {transform_indices = @transform_9, window_bounds = array<i64: 64, 128>}]} {
    %c0 = arith.constant 0 : index
    %c0_0 = arith.constant 0 : index
    %0 = vector.load %arg1[%c0, %c0_0] : memref<64x128xf32, #tpu.memory_space<vmem>>, vector<64x128xf32>
    %1 = arith.truncf %0 : vector<64x128xf32> to vector<64x128xbf16>
    %c0_1 = arith.constant 0 : index
    %c0_2 = arith.constant 0 : index
    %2 = vector.load %arg2[%c0_1, %c0_2] : memref<128x256xbf16, #tpu.memory_space<vmem>>, vector<128x256xbf16>
    %cst = arith.constant dense<0.000000e+00> : vector<64x256xf32>
    %3 = tpu.matmul %1, %2, %cst {dimension_numbers = #tpu.dot_dimension_numbers<[1], [0], [0], [1], [0, 0, 1, 1], [], []>} : vector<64x128xbf16>, vector<128x256xbf16>, vector<64x256xf32> -> vector<64x256xf32>
    %c0_3 = arith.constant 0 : index
    %c0_4 = arith.constant 0 : index
    %4 = vector.load %arg3[%c0_3, %c0_4] : memref<1x256xf32, #tpu.memory_space<vmem>>, vector<1x256xf32>
    %5 = vector.broadcast %4 : vector<1x256xf32> to vector<64x256xf32>
    %6 = arith.addf %3, %5 : vector<64x256xf32>
    %cst_5 = arith.constant 0.000000e+00 : f32
    %7 = vector.broadcast %cst_5 : f32 to vector<64x256xf32>
    %8 = arith.maximumf %6, %7 : vector<64x256xf32>
    %9 = arith.truncf %8 : vector<64x256xf32> to vector<64x256xbf16>
    %c0_6 = arith.constant 0 : index
    %c0_7 = arith.constant 0 : index
    %10 = vector.load %arg4[%c0_6, %c0_7] : memref<256x512xbf16, #tpu.memory_space<vmem>>, vector<256x512xbf16>
    %cst_8 = arith.constant dense<0.000000e+00> : vector<64x512xf32>
    %11 = tpu.matmul %9, %10, %cst_8 {dimension_numbers = #tpu.dot_dimension_numbers<[1], [0], [0], [1], [0, 0, 1, 1], [], []>} : vector<64x256xbf16>, vector<256x512xbf16>, vector<64x512xf32> -> vector<64x512xf32>
    %c0_9 = arith.constant 0 : index
    %c0_10 = arith.constant 0 : index
    %12 = vector.load %arg5[%c0_9, %c0_10] : memref<1x512xf32, #tpu.memory_space<vmem>>, vector<1x512xf32>
    %13 = vector.broadcast %12 : vector<1x512xf32> to vector<64x512xf32>
    %14 = arith.addf %11, %13 : vector<64x512xf32>
    %cst_11 = arith.constant 0.000000e+00 : f32
    %15 = vector.broadcast %cst_11 : f32 to vector<64x512xf32>
    %16 = arith.maximumf %14, %15 : vector<64x512xf32>
    %17 = arith.truncf %16 : vector<64x512xf32> to vector<64x512xbf16>
    %c0_12 = arith.constant 0 : index
    %c0_13 = arith.constant 0 : index
    %18 = vector.load %arg6[%c0_12, %c0_13] : memref<512x1024xbf16, #tpu.memory_space<vmem>>, vector<512x1024xbf16>
    %cst_14 = arith.constant dense<0.000000e+00> : vector<64x1024xf32>
    %19 = tpu.matmul %17, %18, %cst_14 {dimension_numbers = #tpu.dot_dimension_numbers<[1], [0], [0], [1], [0, 0, 1, 1], [], []>} : vector<64x512xbf16>, vector<512x1024xbf16>, vector<64x1024xf32> -> vector<64x1024xf32>
    %c0_15 = arith.constant 0 : index
    %c0_16 = arith.constant 0 : index
    %20 = vector.load %arg7[%c0_15, %c0_16] : memref<1x1024xf32, #tpu.memory_space<vmem>>, vector<1x1024xf32>
    %21 = vector.broadcast %20 : vector<1x1024xf32> to vector<64x1024xf32>
    %22 = arith.addf %19, %21 : vector<64x1024xf32>
    %cst_17 = arith.constant 0.000000e+00 : f32
    %23 = vector.broadcast %cst_17 : f32 to vector<64x1024xf32>
    %24 = arith.maximumf %22, %23 : vector<64x1024xf32>
    %25 = arith.truncf %24 : vector<64x1024xf32> to vector<64x1024xbf16>
    %c0_18 = arith.constant 0 : index
    %c0_19 = arith.constant 0 : index
    %26 = vector.load %arg8[%c0_18, %c0_19] : memref<1024x128xbf16, #tpu.memory_space<vmem>>, vector<1024x128xbf16>
    %cst_20 = arith.constant dense<0.000000e+00> : vector<64x128xf32>
    %27 = tpu.matmul %25, %26, %cst_20 {dimension_numbers = #tpu.dot_dimension_numbers<[1], [0], [0], [1], [0, 0, 1, 1], [], []>} : vector<64x1024xbf16>, vector<1024x128xbf16>, vector<64x128xf32> -> vector<64x128xf32>
    %c0_21 = arith.constant 0 : index
    %c0_22 = arith.constant 0 : index
    %28 = vector.load %arg9[%c0_21, %c0_22] : memref<1x128xf32, #tpu.memory_space<vmem>>, vector<1x128xf32>
    %29 = vector.broadcast %28 : vector<1x128xf32> to vector<64x128xf32>
    %30 = arith.addf %27, %29 : vector<64x128xf32>
    %c0_23 = arith.constant 0 : index
    %c0_24 = arith.constant 0 : index
    %31 = vector.load %arg10[%c0_23, %c0_24] : memref<64x128xf32, #tpu.memory_space<vmem>>, vector<64x128xf32>
    tpu.vector_store %arg10[%c0_23, %c0_24], %30 {strides = array<i32>} : memref<64x128xf32, #tpu.memory_space<vmem>>, vector<64x128xf32>,
    return
  }
  func.func @transform_0(%arg0: i32) -> (i32, i32) {
    %c0_i32 = arith.constant 0 : i32
    %c0_i32_0 = arith.constant 0 : i32
    return %arg0, %c0_i32 : i32, i32
  }
  func.func @transform_1(%arg0: i32) -> (i32, i32) {
    %c0_i32 = arith.constant 0 : i32
    %c0_i32_0 = arith.constant 0 : i32
    %c0_i32_1 = arith.constant 0 : i32
    return %c0_i32, %c0_i32_0 : i32, i32
  }
  func.func @transform_2(%arg0: i32) -> (i32, i32) {
    %c0_i32 = arith.constant 0 : i32
    %c0_i32_0 = arith.constant 0 : i32
    %c0_i32_1 = arith.constant 0 : i32
    return %c0_i32, %c0_i32_0 : i32, i32
  }
  func.func @transform_3(%arg0: i32) -> (i32, i32) {
    %c0_i32 = arith.constant 0 : i32
    %c0_i32_0 = arith.constant 0 : i32
    %c0_i32_1 = arith.constant 0 : i32
    return %c0_i32, %c0_i32_0 : i32, i32
  }
  func.func @transform_4(%arg0: i32) -> (i32, i32) {
    %c0_i32 = arith.constant 0 : i32
    %c0_i32_0 = arith.constant 0 : i32
    %c0_i32_1 = arith.constant 0 : i32
    return %c0_i32, %c0_i32_0 : i32, i32
  }
  func.func @transform_5(%arg0: i32) -> (i32, i32) {
    %c0_i32 = arith.constant 0 : i32
    %c0_i32_0 = arith.constant 0 : i32
    %c0_i32_1 = arith.constant 0 : i32
    return %c0_i32, %c0_i32_0 : i32, i32
  }
  func.func @transform_6(%arg0: i32) -> (i32, i32) {
    %c0_i32 = arith.constant 0 : i32
    %c0_i32_0 = arith.constant 0 : i32
    %c0_i32_1 = arith.constant 0 : i32
    return %c0_i32, %c0_i32_0 : i32, i32
  }
  func.func @transform_7(%arg0: i32) -> (i32, i32) {
    %c0_i32 = arith.constant 0 : i32
    %c0_i32_0 = arith.constant 0 : i32
    %c0_i32_1 = arith.constant 0 : i32
    return %c0_i32, %c0_i32_0 : i32, i32
  }
  func.func @transform_8(%arg0: i32) -> (i32, i32) {
    %c0_i32 = arith.constant 0 : i32
    %c0_i32_0 = arith.constant 0 : i32
    %c0_i32_1 = arith.constant 0 : i32
    return %c0_i32, %c0_i32_0 : i32, i32
  }
  func.func @transform_9(%arg0: i32) -> (i32, i32) {
    %c0_i32 = arith.constant 0 : i32
    %c0_i32_0 = arith.constant 0 : i32
    return %arg0, %c0_i32 : i32, i32
  }
}

module attributes {stable_mosaic.version = 11 : i64} {
  func.func @_fused_mlp_kernel(%arg0: i32, %arg1: memref<64x128xf32, #tpu.memory_space<vmem>>, %arg2: memref<128x256xbf16, #tpu.memory_space<vmem>>, %arg3: memref<1x256xf32, #tpu.memory_space<vmem>>, %arg4: memref<256x512xbf16, #tpu.memory_space<vmem>>, %arg5: memref<1x512xf32, #tpu.memory_space<vmem>>, %arg6: memref<512x1024xbf16, #tpu.memory_space<vmem>>, %arg7: memref<1x1024xf32, #tpu.memory_space<vmem>>, %arg8: memref<1024x128xbf16, #tpu.memory_space<vmem>>, %arg9: memref<1x128xf32, #tpu.memory_space<vmem>>, %arg10: memref<64x128xf32, #tpu.memory_space<vmem>>) attributes {dimension_semantics = [#tpu.dimension_semantics<parallel>], iteration_bounds = array<i64: 2>, scalar_prefetch = 0 : i64, scratch_operands = 0 : i64, tpu.core_type = #tpu.core_type<tc>, window_params = [{transform_indices = @transform_0, window_bounds = array<i64: 64, 128>}, {pipeline_mode = #tpu.pipeline_mode<synchronous>, transform_indices = @transform_1, window_bounds = array<i64: 128, 256>}, {pipeline_mode = #tpu.pipeline_mode<synchronous>, transform_indices = @transform_2, window_bounds = array<i64: 1, 256>}, {pipeline_mode = #tpu.pipeline_mode<synchronous>, transform_indices = @transform_3, window_bounds = array<i64: 256, 512>}, {pipeline_mode = #tpu.pipeline_mode<synchronous>, transform_indices = @transform_4, window_bounds = array<i64: 1, 512>}, {pipeline_mode = #tpu.pipeline_mode<synchronous>, transform_indices = @transform_5, window_bounds = array<i64: 512, 1024>}, {pipeline_mode = #tpu.pipeline_mode<synchronous>, transform_indices = @transform_6, window_bounds = array<i64: 1, 1024>}, {pipeline_mode = #tpu.pipeline_mode<synchronous>, transform_indices = @transform_7, window_bounds = array<i64: 1024, 128>}, {pipeline_mode = #tpu.pipeline_mode<synchronous>, transform_indices = @transform_8, window_bounds = array<i64: 1, 128>}, {transform_indices = @transform_9, window_bounds = array<i64: 64, 128>}]} {
    %c0 = arith.constant 0 : index
    %c0_0 = arith.constant 0 : index
    %0 = vector.load %arg1[%c0, %c0_0] : memref<64x128xf32, #tpu.memory_space<vmem>>, vector<64x128xf32>
    %1 = arith.truncf %0 : vector<64x128xf32> to vector<64x128xbf16>
    %c0_1 = arith.constant 0 : index
    %c0_2 = arith.constant 0 : index
    %2 = vector.load %arg2[%c0_1, %c0_2] : memref<128x256xbf16, #tpu.memory_space<vmem>>, vector<128x256xbf16>
    %cst = arith.constant dense<0.000000e+00> : vector<64x256xf32>
    %3 = tpu.matmul %1, %2, %cst {dimension_numbers = #tpu.dot_dimension_numbers<[1], [0], [0], [1], [0, 0, 1, 1], [], []>} : vector<64x128xbf16>, vector<128x256xbf16>, vector<64x256xf32> -> vector<64x256xf32>
    %c0_3 = arith.constant 0 : index
    %c0_4 = arith.constant 0 : index
    %4 = vector.load %arg3[%c0_3, %c0_4] : memref<1x256xf32, #tpu.memory_space<vmem>>, vector<1x256xf32>
    %5 = vector.broadcast %4 : vector<1x256xf32> to vector<64x256xf32>
    %6 = arith.addf %3, %5 : vector<64x256xf32>
    %cst_5 = arith.constant 0.000000e+00 : f32
    %7 = vector.broadcast %cst_5 : f32 to vector<64x256xf32>
    %8 = arith.maximumf %6, %7 : vector<64x256xf32>
    %9 = arith.truncf %8 : vector<64x256xf32> to vector<64x256xbf16>
    %c0_6 = arith.constant 0 : index
    %c0_7 = arith.constant 0 : index
    %10 = vector.load %arg4[%c0_6, %c0_7] : memref<256x512xbf16, #tpu.memory_space<vmem>>, vector<256x512xbf16>
    %cst_8 = arith.constant dense<0.000000e+00> : vector<64x512xf32>
    %11 = tpu.matmul %9, %10, %cst_8 {dimension_numbers = #tpu.dot_dimension_numbers<[1], [0], [0], [1], [0, 0, 1, 1], [], []>} : vector<64x256xbf16>, vector<256x512xbf16>, vector<64x512xf32> -> vector<64x512xf32>
    %c0_9 = arith.constant 0 : index
    %c0_10 = arith.constant 0 : index
    %12 = vector.load %arg5[%c0_9, %c0_10] : memref<1x512xf32, #tpu.memory_space<vmem>>, vector<1x512xf32>
    %13 = vector.broadcast %12 : vector<1x512xf32> to vector<64x512xf32>
    %14 = arith.addf %11, %13 : vector<64x512xf32>
    %cst_11 = arith.constant 0.000000e+00 : f32
    %15 = vector.broadcast %cst_11 : f32 to vector<64x512xf32>
    %16 = arith.maximumf %14, %15 : vector<64x512xf32>
    %17 = arith.truncf %16 : vector<64x512xf32> to vector<64x512xbf16>
    %c0_12 = arith.constant 0 : index
    %c0_13 = arith.constant 0 : index
    %18 = vector.load %arg6[%c0_12, %c0_13] : memref<512x1024xbf16, #tpu.memory_space<vmem>>, vector<512x1024xbf16>
    %cst_14 = arith.constant dense<0.000000e+00> : vector<64x1024xf32>
    %19 = tpu.matmul %17, %18, %cst_14 {dimension_numbers = #tpu.dot_dimension_numbers<[1], [0], [0], [1], [0, 0, 1, 1], [], []>} : vector<64x512xbf16>, vector<512x1024xbf16>, vector<64x1024xf32> -> vector<64x1024xf32>
    %c0_15 = arith.constant 0 : index
    %c0_16 = arith.constant 0 : index
    %20 = vector.load %arg7[%c0_15, %c0_16] : memref<1x1024xf32, #tpu.memory_space<vmem>>, vector<1x1024xf32>
    %21 = vector.broadcast %20 : vector<1x1024xf32> to vector<64x1024xf32>
    %22 = arith.addf %19, %21 : vector<64x1024xf32>
    %cst_17 = arith.constant 0.000000e+00 : f32
    %23 = vector.broadcast %cst_17 : f32 to vector<64x1024xf32>
    %24 = arith.maximumf %22, %23 : vector<64x1024xf32>
    %25 = arith.truncf %24 : vector<64x1024xf32> to vector<64x1024xbf16>
    %c0_18 = arith.constant 0 : index
    %c0_19 = arith.constant 0 : index
    %26 = vector.load %arg8[%c0_18, %c0_19] : memref<1024x128xbf16, #tpu.memory_space<vmem>>, vector<1024x128xbf16>
    %cst_20 = arith.constant dense<0.000000e+00> : vector<64x128xf32>
    %27 = tpu.matmul %25, %26, %cst_20 {dimension_numbers = #tpu.dot_dimension_numbers<[1], [0], [0], [1], [0, 0, 1, 1], [], []>} : vector<64x1024xbf16>, vector<1024x128xbf16>, vector<64x128xf32> -> vector<64x128xf32>
    %c0_21 = arith.constant 0 : index
    %c0_22 = arith.constant 0 : index
    %28 = vector.load %arg9[%c0_21, %c0_22] : memref<1x128xf32, #tpu.memory_space<vmem>>, vector<1x128xf32>
    %29 = vector.broadcast %28 : vector<1x128xf32> to vector<64x128xf32>
    %30 = arith.addf %27, %29 : vector<64x128xf32>
    %c0_23 = arith.constant 0 : index
    %c0_24 = arith.constant 0 : index
    %31 = vector.load %arg10[%c0_23, %c0_24] : memref<64x128xf32, #tpu.memory_space<vmem>>, vector<64x128xf32>
    tpu.vector_store %arg10[%c0_23, %c0_24], %30 {strides = array<i32>} : memref<64x128xf32, #tpu.memory_space<vmem>>, vector<64x128xf32>,
    return
  }
  func.func @transform_0(%arg0: i32) -> (i32, i32) {
    %c0_i32 = arith.constant 0 : i32
    %c0_i32_0 = arith.constant 0 : i32
    return %arg0, %c0_i32 : i32, i32
  }
  func.func @transform_1(%arg0: i32) -> (i32, i32) {
    %c0_i32 = arith.constant 0 : i32
    %c0_i32_0 = arith.constant 0 : i32
    %c0_i32_1 = arith.constant 0 : i32
    return %c0_i32, %c0_i32_0 : i32, i32
  }
  func.func @transform_2(%arg0: i32) -> (i32, i32) {
    %c0_i32 = arith.constant 0 : i32
    %c0_i32_0 = arith.constant 0 : i32
    %c0_i32_1 = arith.constant 0 : i32
    return %c0_i32, %c0_i32_0 : i32, i32
  }
  func.func @transform_3(%arg0: i32) -> (i32, i32) {
    %c0_i32 = arith.constant 0 : i32
    %c0_i32_0 = arith.constant 0 : i32
    %c0_i32_1 = arith.constant 0 : i32
    return %c0_i32, %c0_i32_0 : i32, i32
  }
  func.func @transform_4(%arg0: i32) -> (i32, i32) {
    %c0_i32 = arith.constant 0 : i32
    %c0_i32_0 = arith.constant 0 : i32
    %c0_i32_1 = arith.constant 0 : i32
    return %c0_i32, %c0_i32_0 : i32, i32
  }
  func.func @transform_5(%arg0: i32) -> (i32, i32) {
    %c0_i32 = arith.constant 0 : i32
    %c0_i32_0 = arith.constant 0 : i32
    %c0_i32_1 = arith.constant 0 : i32
    return %c0_i32, %c0_i32_0 : i32, i32
  }
  func.func @transform_6(%arg0: i32) -> (i32, i32) {
    %c0_i32 = arith.constant 0 : i32
    %c0_i32_0 = arith.constant 0 : i32
    %c0_i32_1 = arith.constant 0 : i32
    return %c0_i32, %c0_i32_0 : i32, i32
  }
  func.func @transform_7(%arg0: i32) -> (i32, i32) {
    %c0_i32 = arith.constant 0 : i32
    %c0_i32_0 = arith.constant 0 : i32
    %c0_i32_1 = arith.constant 0 : i32
    return %c0_i32, %c0_i32_0 : i32, i32
  }
  func.func @transform_8(%arg0: i32) -> (i32, i32) {
    %c0_i32 = arith.constant 0 : i32
    %c0_i32_0 = arith.constant 0 : i32
    %c0_i32_1 = arith.constant 0 : i32
    return %c0_i32, %c0_i32_0 : i32, i32
  }
  func.func @transform_9(%arg0: i32) -> (i32, i32) {
    %c0_i32 = arith.constant 0 : i32
    %c0_i32_0 = arith.constant 0 : i32
    return %arg0, %c0_i32 : i32, i32
  }
}

</mosaic_0001>

<bundles_post_ra>
// kernel: tpu_custom_call.1
= control target key start
LH: loop header
LB: loop body
LE: loop exit
PB: predicated region body
PF: predicated region fallthrough
CT: control target
= control target key end

     0   :  { %s8420_s0 = inlined_call_operand.hbm [shape: f32[128,128], index: 0, kind: input, shape index: {}]   ;;  %s8421_s1 = inlined_call_operand.hbm [shape: bf16[128,256], index: 1, kind: input, shape index: {}]   ;;  %s8422_s2 = inlined_call_operand.hbm [shape: f32[1,256], index: 2, kind: input, shape index: {}]   ;;  %s8423_s3 = inlined_call_operand.hbm [shape: bf16[256,512], index: 3, kind: input, shape index: {}]   ;;  %s8424_s4 = inlined_call_operand.hbm [shape: f32[1,512], index: 4, kind: input, shape index: {}]   ;;  %s8425_s5 = inlined_call_operand.hbm [shape: bf16[512,1024], index: 5, kind: input, shape index: {}]   ;;  %s8426_s6 = inlined_call_operand.hbm [shape: f32[1,1024], index: 6, kind: input, shape index: {}]   ;;  %s8427_s7 = inlined_call_operand.hbm [shape: bf16[1024,128], index: 7, kind: input, shape index: {}]   ;;  %s8428_s8 = inlined_call_operand.vmem [shape: f32[1,128], index: 8, kind: input, shape index: {}]   ;;  %s8429_s9 = inlined_call_operand.hbm [shape: f32[128,128], index: 9, kind: output, shape index: {}]  }
   0x1   :  { %8432 = sst [smem:[#allocation23_spill]] %s8421_s1 }
   0x2   :  { %8433 = sst [smem:[#allocation24_spill]] %s8422_s2 }
   0x3   :  { %8434 = sst [smem:[#allocation25_spill]] %s8423_s3 }
   0x4   :  { %14 = vsyncpa [#allocation3], 0 }
   0x5   :  { %16 = vsyncpa [#allocation3 + $0x1], 0 }
   0x6   :  { %17 = vsyncpa [#allocation6], 0 }
   0x7   :  { %18 = vsyncpa [#allocation9], 0 }
   0x8   :  { %19 = vsyncpa [#allocation12], 0 }
   0x9   :  { %20 = vsyncpa [#allocation15], 0 }
   0xa   :  { %21 = vsyncpa [#allocation4], 0 }
   0xb   :  { %23 = vsyncpa [#allocation4 + $0x1], 0  ;;  %s7392_s30 = smov 0   ;;  %s7394_s10 = smov 0  }
   0xc   :  { %s7396_s11 = smov 0   ;;  %s7398_s12 = smov 0  }
   0xd LB: > { %s8435_s1 = sld [smem:[#allocation23_spill]]  ;;  %s7416_s16 = sadd.s32 4294967295, %s7323_s12   ;;  %s7323_s12 = sphi %s7398_s12, %s8450_s12   ;;  %s7319_s11 = sphi %s7396_s11, %s8449_s11   ;;  %s7315_s10 = sphi %s7394_s10, %s8448_s10   ;;  %s7311_s30 = sphi %s7392_s30, %s8447_s30  }
   0xe   : > { %p4826_p0 = scmp.ge.s32.totalorder %s7323_s12, 1  ;;  %p50_p1 = scmp.eq.s32.totalorder %s7416_s16, 0 }
   0xf   : > { %p254_p2 = scmp.lt.s32.totalorder %s7323_s12, 3  ;;  %s7325_s18 = smov [#allocation5]  }
  0x10   : > { %s267_s19 = sshll.u32 %s7325_s18, 4  ;;  %s8437_s3 = sld [smem:[#allocation25_spill]]  ;;  %s268_s19 = int_to_ptr.vmem [resolvable:$true] %s267_s19 }
  0x11   : > { %p7421_p3 = pnand %p4826_p0, %p254_p2  ;;  %s7326_s24 = smov [#allocation8]  }
  0x12   : > { %s293_s25 = sshll.u32 %s7326_s24, 4  ;;  %s8430_s26 = smov 128   ;;  %s294_s25 = int_to_ptr.vmem [resolvable:$true] %s293_s25 }
  0x13   : > { %s265_s15 = sshll.u32 %s8435_s1, 4  ;;  %p6903_p4 = pneg %p7421_p3  ;;  %s266_s15 = int_to_ptr.hbm [resolvable:$true] %s265_s15 }
  0x14   : > { %s8431_s27 = smov 8   ;;  %s7329_s28 = smov 256  }
  0x15   : > { %p7433_p6 = pnand %p6903_p4, %p50_p1  ;;  %s7330_s29 = smov 16  }
  0x16   : > { %s291_s22 = sshll.u32 %s8437_s3, 4  ;;  %s317_s18 = sshll.u32 %s8425_s5, 4  ;;  %s292_s22 = int_to_ptr.hbm [resolvable:$true] %s291_s22  ;;  %s318_s18 = int_to_ptr.hbm [resolvable:$true] %s317_s18 }
  0x17   : > { %6906 = dma.hbm_to_vmem [thread:$0]  (!%p7433_p6), %s266_s15, 2048, %s268_s19, [#allocation6], %s8430_s26, %s8430_s26, %s8431_s27  }
  0x18   : > { %6912 = dma.hbm_to_vmem [thread:$0]  (!%p7433_p6), %s292_s22, 8192, %s294_s25, [#allocation9], %s7329_s28, %s7329_s28, %s7330_s29  }
  0x19   : > { %s7331_s20 = smov [#allocation11]   ;;  %s8439_s2 = sld [smem:[#allocation24_spill]] }
  0x1a   : > { %s319_s21 = sshll.u32 %s7331_s20, 4  ;;  %s7332_s15 = smov 512   ;;  %s320_s21 = int_to_ptr.vmem [resolvable:$true] %s319_s21 }
  0x1b   : > { %s7333_s19 = smov 32   ;;  %s7334_s22 = smov [#allocation7]  }
  0x1c   : > { %6918 = dma.hbm_to_vmem [thread:$0]  (!%p7433_p6), %s318_s18, 32768, %s320_s21, [#allocation12], %s7332_s15, %s7332_s15, %s7333_s19  }
  0x1d   : > { %s282_s25 = sshll.u32 %s7334_s22, 4  ;;  %s306_s13 = sshll.u32 %s8424_s4, 4  ;;  %s283_s25 = int_to_ptr.vmem [resolvable:$true] %s282_s25  ;;  %s307_s13 = int_to_ptr.hbm [resolvable:$true] %s306_s13 }
  0x1e   : > { %s332_s20 = sshll.u32 %s8426_s6, 4  ;;  %s7335_s24 = smov [#allocation10]   ;;  %s333_s20 = int_to_ptr.hbm [resolvable:$true] %s332_s20 }
  0x1f   : > { %s280_s3 = sshll.u32 %s8439_s2, 4  ;;  %s308_s26 = sshll.u32 %s7335_s24, 4  ;;  %s281_s3 = int_to_ptr.hbm [resolvable:$true] %s280_s3  ;;  %s309_s26 = int_to_ptr.vmem [resolvable:$true] %s308_s26 }
  0x20   : > { %6909 = dma.hbm_to_vmem [thread:$0]  (!%p7433_p6), %s281_s3, 32, %s283_s25, [#allocation6]  }
  0x21   : > { %6915 = dma.hbm_to_vmem [thread:$0]  (!%p7433_p6), %s307_s13, 64, %s309_s26, [#allocation9]  }
  0x22   : > { %s7336_s18 = smov [#allocation13]   ;;  %s343_s19 = sshll.u32 %s8427_s7, 4  ;;  %s344_s19 = int_to_ptr.hbm [resolvable:$true] %s343_s19 }
  0x23   : > { %s334_s21 = sshll.u32 %s7336_s18, 4  ;;  %s7337_s22 = smov [#allocation14]   ;;  %s335_s21 = int_to_ptr.vmem [resolvable:$true] %s334_s21 }
  0x24   : > { %6921 = dma.hbm_to_vmem [thread:$0]  (!%p7433_p6), %s333_s20, 128, %s335_s21, [#allocation12]  }
  0x25   : > { %s345_s26 = sshll.u32 %s7337_s22, 4  ;;  %s7338_s25 = smov 64   ;;  %s346_s26 = int_to_ptr.vmem [resolvable:$true] %s345_s26 }
  0x26   : > { %s7339_s28 = smov 4   ;;  %s4825_s29 = sadd.s32 4294967294, %s7323_s12  }
  0x27   : > { %6924 = dma.hbm_to_vmem [thread:$0]  (!%p7433_p6), %s344_s19, 8192, %s346_s26, [#allocation15], %s7338_s25, %s7338_s25, %s7339_s28  }
  0x28   : > { %s7471_s13 = sadd.s32 1, %s7323_s12   ;;  %s36_s14 = sadd.s32 1, %s7319_s11 }
  0x29   : > { %s33_s1 = ssub.s32 %s7323_s12, %s7471_s13  ;;  %p43_p7 = scmp.ne.s32.totalorder %s7319_s11, %s7315_s10 }
  0x2a   : > { %p34_p8 = scmp.eq.s32.totalorder %s33_s1, 0  ;;  %p44_p9 = scmp.eq.s32.totalorder %s7323_s12, 0 }
  0x2b   : > { %p49_p10 = scmp.ne.s32.totalorder %s7315_s10, %s7311_s30  ;;  %p241_p11 = scmp.eq.s32.totalorder %s7416_s16, 1 }
  0x2c   : > { %s7483_s20 = scalar_select %p34_p8, %s7319_s11, %s36_s14  }
  0x2d   : > { %p7487_p12 = por %p50_p1, %p49_p10  ;;  %p7491_p13 = por %p241_p11, %p43_p7 }
  0x2e   : > { %p247_p0 = scmp.eq.s32.totalorder %s4825_s29, 1  ;;  %p45_p2 = por %p44_p9, %p43_p7 }
  0x2f   : > { %s362_s18 = sand.u32 1, %s7319_s11   ;;  %p6940_p6 = scmp.lt.s32.totalorder %s7323_s12, 2 }
  0x30   : > { %p7496_p4 = por %p247_p0, %p49_p10  ;;  %s4835_s3 = sshll.u32 %s362_s18, 6 }
  0x31   : > { %s6453_s15 = sshll.u32 %s7323_s12, 6  ;;  %s366_s28 = scalar_lea.vmem [#allocation2], %s4835_s3 }
  0x32   : > { %s371_s26 = scalar_lea.hbm %s8420_s0, %s6453_s15  ;;  %s374_s14 = sshll.u32 %s366_s28, 4  ;;  %s375_s14 = int_to_ptr.vmem [resolvable:$true] %s374_s14 }
  0x33   : > { %s372_s25 = sshll.u32 %s371_s26, 4  ;;  %p7505_p8 = pnand %p6940_p6, %p45_p2  ;;  %s373_s25 = int_to_ptr.hbm [resolvable:$true] %s372_s25 }
  0x34   : > { %s363_s1 = scalar_lea.sflag [#allocation3], %s362_s18  ;;  %s7211_s27 = sshra.s32 %s373_s25, 4  ;;  %s7212_s27 = int_to_ptr.hbm [resolvable:$true] %s7211_s27 }
  0x35   : > { %s7213_s2 = scalar_lea.hbm %s7212_s27, 64  ;;  %p7215_p9 = pneg %p7505_p8 }
  0x36   : > { %p7214_p7 = scmp.ne.s32.totalorder %s7212_s27, %s7213_s2  ;;  %s7218_s3 = scalar_lea.hbm %s8420_s0, 128 }
  0x37   : > { %p7219_p0 = scmp.lt.s32.totalorder %s7212_s27, %s8420_s0  ;;  %p7220_p2 = scmp.lt.s32.totalorder %s7218_s3, %s7213_s2 }
  0x38   : > { %p7216_p10 = pnand %p7215_p9, %p7214_p7 }
  0x39   : > { %p7221_p6 = por %p7220_p2, %p7219_p0 }
  0x3a   : > { %p7217_p11 = pneg %p7216_p10 }
  0x3c   : > { %p7222_p5 = pnand %p7221_p6, %p7217_p11 }
  0x3e   : > { %7225 = shalt.err (!%p7222_p5)
}
  0x3f   : > { %s8444_s18 = smov 8   ;;  %s8445_s28 = smov 128  }
  0x40   : > { %6928 = dma.hbm_to_vmem [thread:$0]  (!%p7505_p8), %s373_s25, 1024, %s375_s14, %s363_s1, %s8445_s28, %s8445_s28, %s8444_s18  }
  0x41   : > { %386 = sbr.rel (%p7421_p3) target bundleno = 1243 (0x4db), region = 56  ;;  %s7525_s15 = sand.u32 (!%p7421_p3), 1, %s7315_s10  }
  0x42   : > { %s4839_s2 = sshll.u32 (!%p7421_p3), %s7525_s15, 6  ;;  %s389_s27 = scalar_lea.sflag (!%p7421_p3), [#allocation3], %s7525_s15 }
  0x43   : > { %s7531_s19 = scalar_lea.vmem (!%p7421_p3), [#allocation2], %s4839_s2 }
  0x46   : > { %7286 = dma.done.wait (%p7487_p12), %s389_s27, 1024  }
  0x47   : > { %7288 = vsyncadd (%p7487_p12), %s389_s27, 4294966272 }
  0x48   : > { %7290 = dma.done.wait (%p50_p1), [#allocation6], 2080  }
  0x49   : > { %7292 = vsyncadd (%p50_p1), [#allocation6], 4294965216 }
  0x4a   : > { %7294 = dma.done.wait (%p50_p1), [#allocation9], 8256  }
  0x4b   : > { %7296 = vsyncadd (%p50_p1), [#allocation9], 4294959040 }
  0x4c   : > { %7298 = dma.done.wait (%p50_p1), [#allocation12], 32896  }
  0x4d   : > { %7300 = vsyncadd (%p50_p1), [#allocation12], 4294934400 }
  0x4e   : > { %7302 = dma.done.wait (%p50_p1), [#allocation15], 8192  }
  0x4f   : > { %7304 = vsyncadd (%p50_p1), [#allocation15], 4294959104  ;;  %v4906_v0 = vld [vmem:[#allocation5 + $0x70] sm:$0xf]  ;;  %v6469_v1 = vld [vmem:[#allocation5 + $0x74] sm:$0xf0] }
  0x50   : > { %v6468_v2 = vld [vmem:[#allocation5 + $0x74] sm:$0xf]  ;;  %v4907_v3 = vor.u32 %v6469_v1, %v4906_v0  ;;  %v4908_v4 = vld [vmem:[#allocation5 + $0x78] sm:$0xf0]  ;;  %v4898_v5 = vld [vmem:[#allocation5 + $0x60] sm:$0xf] }
  0x51   : > { %v6467_v6 = vld [vmem:[#allocation5 + $0x64] sm:$0xf0]  ;;  %v4911_v7 = vor.u32 %v6468_v2, %v4908_v4  ;;  %v6466_v8 = vld [vmem:[#allocation5 + $0x64] sm:$0xf]  ;;  %v4900_v9 = vld [vmem:[#allocation5 + $0x68] sm:$0xf0] }
  0x52   : > { %579 = vmatpush.bf16.msra.mxu0 %v4907_v3  ;;  %v4899_v10 = vor.u32 %v6467_v6, %v4898_v5  ;;  %6855 = vmatpush.bf16.msra.mxu2 %v4907_v3  ;;  %v4903_v11 = vor.u32 %v6466_v8, %v4900_v9  ;;  %v4890_v12 = vld [vmem:[#allocation5 + $0x50] sm:$0xf]  ;;  %v6465_v13 = vld [vmem:[#allocation5 + $0x54] sm:$0xf0]  ;;  %v6464_v14 = vld [vmem:[#allocation5 + $0x54] sm:$0xf] }
  0x53   : > { %608 = vmatpush.bf16.msra.mxu1 %v4911_v7  ;;  %6863 = vmatpush.bf16.msra.mxu3 %v4911_v7  ;;  %v4892_v15 = vld [vmem:[#allocation5 + $0x58] sm:$0xf0]  ;;  %v4891_v16 = vor.u32 %v6465_v13, %v4890_v12  ;;  %v4882_v18 = vld [vmem:[#allocation5 + $0x40] sm:$0xf]  ;;  %v6463_v19 = vld [vmem:[#allocation5 + $0x44] sm:$0xf0] }
  0x54   : > { %v4895_v17 = vor.u32 %v6464_v14, %v4892_v15  ;;  %v6462_v20 = vld [vmem:[#allocation5 + $0x44] sm:$0xf]  ;;  %v4884_v21 = vld [vmem:[#allocation5 + $0x48] sm:$0xf0]  ;;  %v4883_v22 = vor.u32 %v6463_v19, %v4882_v18  ;;  %v4874_v24 = vld [vmem:[#allocation5 + $0x30] sm:$0xf] }
  0x55   : > { %v4887_v23 = vor.u32 %v6462_v20, %v4884_v21  ;;  %v6461_v25 = vld [vmem:[#allocation5 + $0x34] sm:$0xf0]  ;;  %v6460_v26 = vld [vmem:[#allocation5 + $0x34] sm:$0xf]  ;;  %v4876_v27 = vld [vmem:[#allocation5 + $0x38] sm:$0xf0] }
  0x56   : > { %580 = vmatpush.bf16.msra.mxu0 %v4899_v10  ;;  %6856 = vmatpush.bf16.msra.mxu2 %v4899_v10  ;;  %v4875_v28 = vor.u32 %v6461_v25, %v4874_v24  ;;  %v4879_v29 = vor.u32 %v6460_v26, %v4876_v27  ;;  %v4866_v30 = vld [vmem:[#allocation5 + $0x20] sm:$0xf]  ;;  %v6459_v31 = vld [vmem:[#allocation5 + $0x24] sm:$0xf0]  ;;  %v6458_v32 = vld [vmem:[#allocation5 + $0x24] sm:$0xf] }
  0x57   : > { %609 = vmatpush.bf16.msra.mxu1 %v4903_v11  ;;  %6864 = vmatpush.bf16.msra.mxu3 %v4903_v11  ;;  %v4868_v33 = vld [vmem:[#allocation5 + $0x28] sm:$0xf0]  ;;  %v4867_v34 = vor.u32 %v6459_v31, %v4866_v30  ;;  %v4858_v36 = vld [vmem:[#allocation5 + $0x10] sm:$0xf]  ;;  %v6457_v37 = vld [vmem:[#allocation5 + $0x14] sm:$0xf0] }
  0x58   : > { %v4871_v35 = vor.u32 %v6458_v32, %v4868_v33  ;;  %v6456_v38 = vld [vmem:[#allocation5 + $0x14] sm:$0xf]  ;;  %v4860_v39 = vld [vmem:[#allocation5 + $0x18] sm:$0xf0]  ;;  %v4859_v40 = vor.u32 %v6457_v37, %v4858_v36  ;;  %v4850_v42 = vld [vmem:[#allocation5] sm:$0xf] }
  0x59   : > { %v4863_v41 = vor.u32 %v6456_v38, %v4860_v39  ;;  %v6455_v43 = vld [vmem:[#allocation5 + $0x4] sm:$0xf0]  ;;  %v6454_v44 = vld [vmem:[#allocation5 + $0x4] sm:$0xf]  ;;  %v4852_v45 = vld [vmem:[#allocation5 + $0x8] sm:$0xf0] }
  0x5a   : > { %581 = vmatpush.bf16.msra.mxu0 %v4891_v16  ;;  %6857 = vmatpush.bf16.msra.mxu2 %v4891_v16  ;;  %v465_v46 = vld [vmem:[%s7531_s19] sm:$0xff]  ;;  %v6500_v48 = vld [vmem:[#allocation8 + $0xec] sm:$0xf0]  ;;  %v4851_v51 = vor.u32 %v6455_v43, %v4850_v42  ;;  %v466_v52 = vld [vmem:[%s7531_s19 + $0x8] sm:$0xff]  ;;  %v4855_v55 = vor.u32 %v6454_v44, %v4852_v45  ;;  %s8356_s25 = scalar_lea.vmem [#allocation16], %s4839_s2  ;;  %s6854_s14 = sshll.u32 %s7416_s16, 6 }
  0x5b   : > { %610 = vmatpush.bf16.msra.mxu1 %v4895_v17  ;;  %6865 = vmatpush.bf16.msra.mxu3 %v4895_v17  ;;  %v5026_v47 = vld [vmem:[#allocation8 + $0xe0] sm:$0xf]  ;;  %v6532_v50 = vld [vmem:[#allocation8 + $0x1ec] sm:$0xf0]  ;;  %v470_v54 = vld [vmem:[%s7531_s19 + $0x28] sm:$0xff]  ;;  %v473_v63 = vpack.c.bf16 %v466_v52, %v465_v46  ;;  %s4681_s3 = scalar_lea.hbm %s8429_s9, %s6854_s14  ;;  %s4682_s22 = sshll.u32 %s8356_s25, 4  ;;  %s4683_s22 = int_to_ptr.vmem [resolvable:$true] %s4682_s22 }
  0x5c   : > { %v5154_v49 = vld [vmem:[#allocation8 + $0x1e0] sm:$0xf]  ;;  %v6498_v56 = vld [vmem:[#allocation8 + $0xe4] sm:$0xf]  ;;  %v5028_v57 = vld [vmem:[#allocation8 + $0xf0] sm:$0xf0]  ;;  %v5027_v58 = vor.u32 %v6500_v48, %v5026_v47 }
  0x5d   : > { %v469_v53 = vld [vmem:[%s7531_s19 + $0x20] sm:$0xff]  ;;  %v5155_v59 = vor.u32 %v6532_v50, %v5154_v49  ;;  %v5156_v61 = vld [vmem:[#allocation8 + $0x1f0] sm:$0xf0]  ;;  %v6496_v1 = vld [vmem:[#allocation8 + $0xcc] sm:$0xf0]  ;;  %v5031_v4 = vor.u32 %v6498_v56, %v5028_v57  ;;  %s4684_s26 = sshll.u32 %s4681_s3, 4  ;;  %s4685_s26 = int_to_ptr.hbm [resolvable:$true] %s4684_s26 }
  0x5e   : > { %582 = vmatpush.bf16.msra.mxu0 %v4883_v22  ;;  %6858 = vmatpush.bf16.msra.mxu2 %v4883_v22  ;;  %v6530_v60 = vld [vmem:[#allocation8 + $0x1e4] sm:$0xf]  ;;  %v5010_v62 = vld [vmem:[#allocation8 + $0xc0] sm:$0xf]  ;;  %v475_v0 = vpack.c.bf16 %v470_v54, %v469_v53  ;;  %v6528_v3 = vld [vmem:[#allocation8 + $0x1cc] sm:$0xf0] }
  0x5f   : > { %611 = vmatpush.bf16.msra.mxu1 %v4887_v23  ;;  %6866 = vmatpush.bf16.msra.mxu3 %v4887_v23  ;;  %v5138_v2 = vld [vmem:[#allocation8 + $0x1c0] sm:$0xf]  ;;  %v5159_v5 = vor.u32 %v6530_v60, %v5156_v61  ;;  %v6494_v6 = vld [vmem:[#allocation8 + $0xc4] sm:$0xf]  ;;  %v5012_v7 = vld [vmem:[#allocation8 + $0xd0] sm:$0xf0]  ;;  %v5011_v8 = vor.u32 %v6496_v1, %v5010_v62 }
  0x60   : > { %v5139_v9 = vor.u32 %v6528_v3, %v5138_v2  ;;  %v6526_v10 = vld [vmem:[#allocation8 + $0x1c4] sm:$0xf]  ;;  %v5140_v11 = vld [vmem:[#allocation8 + $0x1d0] sm:$0xf0]  ;;  %v4994_v12 = vld [vmem:[#allocation8 + $0xa0] sm:$0xf]  ;;  %v5015_v16 = vor.u32 %v6494_v6, %v5012_v7 }
  0x61   : > { %v6492_v13 = vld [vmem:[#allocation8 + $0xac] sm:$0xf0]  ;;  %v5122_v14 = vld [vmem:[#allocation8 + $0x1a0] sm:$0xf]  ;;  %v5143_v17 = vor.u32 %v6526_v10, %v5140_v11  ;;  %v6490_v18 = vld [vmem:[#allocation8 + $0xa4] sm:$0xf] }
  0x62   : > { %583 = vmatpush.bf16.msra.mxu0 %v4875_v28  ;;  %6859 = vmatpush.bf16.msra.mxu2 %v4875_v28  ;;  %v6524_v15 = vld [vmem:[#allocation8 + $0x1ac] sm:$0xf0]  ;;  %v4996_v19 = vld [vmem:[#allocation8 + $0xb0] sm:$0xf0]  ;;  %v4995_v20 = vor.u32 %v6492_v13, %v4994_v12  ;;  %v6522_v22 = vld [vmem:[#allocation8 + $0x1a4] sm:$0xf] }
  0x63   : > { %612 = vmatpush.bf16.msra.mxu1 %v4879_v29  ;;  %6867 = vmatpush.bf16.msra.mxu3 %v4879_v29  ;;  %v5123_v21 = vor.u32 %v6524_v15, %v5122_v14  ;;  %v5124_v23 = vld [vmem:[#allocation8 + $0x1b0] sm:$0xf0]  ;;  %v4978_v24 = vld [vmem:[#allocation8 + $0x80] sm:$0xf]  ;;  %v6488_v25 = vld [vmem:[#allocation8 + $0x8c] sm:$0xf0]  ;;  %v4999_v28 = vor.u32 %v6490_v18, %v4996_v19 }
  0x64   : > { %v5106_v26 = vld [vmem:[#allocation8 + $0x180] sm:$0xf]  ;;  %v6520_v27 = vld [vmem:[#allocation8 + $0x18c] sm:$0xf0]  ;;  %v5127_v29 = vor.u32 %v6522_v22, %v5124_v23  ;;  %v6486_v30 = vld [vmem:[#allocation8 + $0x84] sm:$0xf]  ;;  %v4979_v31 = vor.u32 %v6488_v25, %v4978_v24 }
  0x65   : > { %v5107_v32 = vor.u32 %v6520_v27, %v5106_v26  ;;  %v4980_v33 = vld [vmem:[#allocation8 + $0x90] sm:$0xf0]  ;;  %v4962_v37 = vld [vmem:[#allocation8 + $0x60] sm:$0xf]  ;;  %v6484_v38 = vld [vmem:[#allocation8 + $0x6c] sm:$0xf0] }
  0x66   : > { %584 = vmatpush.bf16.msra.mxu0 %v4867_v34  ;;  %6860 = vmatpush.bf16.msra.mxu2 %v4867_v34  ;;  %v6518_v34 = vld [vmem:[#allocation8 + $0x184] sm:$0xf]  ;;  %v467_v36 = vld [vmem:[%s7531_s19 + $0x10] sm:$0xff]  ;;  %v468_v39 = vld [vmem:[%s7531_s19 + $0x18] sm:$0xff]  ;;  %v4983_v42 = vor.u32 %v6486_v30, %v4980_v33  ;;  %v4963_v44 = vor.u32 %v6484_v38, %v4962_v37  ;;  %s4670_s16 = scalar_lea.sflag [#allocation4], %s7525_s15  ;;  %s7255_s18 = sshra.s32 %s4685_s26, 4  ;;  %s7256_s18 = int_to_ptr.hbm [resolvable:$true] %s7255_s18 }
  0x67   : > { %613 = vmatpush.bf16.msra.mxu1 %v4871_v35  ;;  %6868 = vmatpush.bf16.msra.mxu3 %v4871_v35  ;;  %v5108_v35 = vld [vmem:[#allocation8 + $0x190] sm:$0xf0]  ;;  %v474_v45 = vpack.c.bf16 %v468_v39, %v467_v36  ;;  %v5090_v47 = vld [vmem:[#allocation8 + $0x160] sm:$0xf]  ;;  %v6516_v48 = vld [vmem:[#allocation8 + $0x16c] sm:$0xf0]  ;;  %p7262_p12 = scmp.lt.s32.totalorder %s7256_s18, %s8429_s9 }
  0x68   : > { %v5111_v43 = vor.u32 %v6518_v34, %v5108_v35  ;;  %v6482_v49 = vld [vmem:[#allocation8 + $0x64] sm:$0xf]  ;;  %v5091_v50 = vor.u32 %v6516_v48, %v5090_v47  ;;  %v5092_v53 = vld [vmem:[#allocation8 + $0x170] sm:$0xf0]  ;;  %v4946_v56 = vld [vmem:[#allocation8 + $0x40] sm:$0xf] }
  0x69   : > { %v6514_v52 = vld [vmem:[#allocation8 + $0x164] sm:$0xf]  ;;  %v6480_v57 = vld [vmem:[#allocation8 + $0x4c] sm:$0xf0]  ;;  %v5076_v1 = vld [vmem:[#allocation8 + $0x150] sm:$0xf0] }
  0x6a   : > { %585 = vmatpush.bf16.msra.mxu0 %v4859_v40  ;;  %6861 = vmatpush.bf16.msra.mxu2 %v4859_v40  ;;  %v471_v40 = vld [vmem:[%s7531_s19 + $0x30] sm:$0xff]  ;;  %v6478_v61 = vld [vmem:[#allocation8 + $0x44] sm:$0xf]  ;;  %v5058_v7 = vld [vmem:[#allocation8 + $0x120] sm:$0xf]  ;;  %s7257_s28 = scalar_lea.hbm %s7256_s18, 64 }
  0x6b   : > { %614 = vmatpush.bf16.msra.mxu1 %v4863_v41  ;;  %6869 = vmatpush.bf16.msra.mxu3 %v4863_v41  ;;  %v472_v41 = vld [vmem:[%s7531_s19 + $0x38] sm:$0xff]  ;;  %v6512_v60 = vld [vmem:[#allocation8 + $0x14c] sm:$0xf0]  ;;  %v6506_v12 = vld [vmem:[#allocation8 + $0x124] sm:$0xf]  ;;  %p7258_p1 = scmp.ne.s32.totalorder %s7256_s18, %s7257_s28  ;;  %s7261_s19 = scalar_lea.hbm %s8429_s9, 128 }
  0x6c   : > { %v476_v46 = vpack.c.bf16 %v472_v41, %v471_v40  ;;  %v4932_v11 = vld [vmem:[#allocation8 + $0x30] sm:$0xf0]  ;;  %v5042_v18 = vld [vmem:[#allocation8 + $0x100] sm:$0xf]  ;;  %v6502_v25 = vld [vmem:[#allocation8 + $0x104] sm:$0xf]  ;;  %p7263_p8 = scmp.lt.s32.totalorder %s7261_s19, %s7257_s28 }
  0x6d   : > { %v5060_v13 = vld [vmem:[#allocation8 + $0x130] sm:$0xf0]  ;;  %v5018_v33 = vld [vmem:[#allocation8 + $0xc8] sm:$0xf]  ;;  %v6497_v35 = vld [vmem:[#allocation8 + $0xd4] sm:$0xf0]  ;;  %p7259_p3 = pnand %p7258_p1, %p7491_p13 }
  0x6e   : > { %586 = vmatpush.bf16.msra.mxu0 %v4851_v51  ;;  %6862 = vmatpush.bf16.msra.mxu2 %v4851_v51  ;;  %v4964_v51 = vld [vmem:[#allocation8 + $0x70] sm:$0xf0]  ;;  %v5063_v15 = vor.u32 %v6506_v12, %v5060_v13  ;;  %v6499_v36 = vld [vmem:[#allocation8 + $0xec] sm:$0xf]  ;;  %v5036_v37 = vld [vmem:[#allocation8 + $0xf8] sm:$0xf0]  ;;  %v5019_v38 = vor.u32 %v6497_v35, %v5018_v33  ;;  %p7264_p7 = por %p7263_p8, %p7262_p12 }
  0x6f   : > { %615 = vmatpush.bf16.msra.mxu1 %v4855_v55  ;;  %6870 = vmatpush.bf16.msra.mxu3 %v4855_v55  ;;  %v4967_v54 = vor.u32 %v6482_v49, %v4964_v51  ;;  %v5095_v55 = vor.u32 %v6514_v52, %v5092_v53  ;;  %v4916_v22 = vld [vmem:[#allocation8 + $0x10] sm:$0xf0]  ;;  %v5039_v39 = vor.u32 %v6499_v36, %v5036_v37  ;;  %v5146_v40 = vld [vmem:[#allocation8 + $0x1c8] sm:$0xf]  ;;  %v6529_v41 = vld [vmem:[#allocation8 + $0x1d4] sm:$0xf0]  ;;  %p7260_p5 = pneg %p7259_p3 }
  0x70   : > { %v5044_v26 = vld [vmem:[#allocation8 + $0x110] sm:$0xf0]  ;;  %v5002_v48 = vld [vmem:[#allocation8 + $0xa8] sm:$0xf]  ;;  %v6493_v49 = vld [vmem:[#allocation8 + $0xb4] sm:$0xf0] }
  0x71   : > { %587 = vmatmul.bf16.vlgmr.msra.gmra.mxu0 %v473_v63  ;;  %597 = vmatmul.bf16.vlgmr.msra.gmra.mxu2 %v475_v0  ;;  %v5047_v27 = vor.u32 %v6502_v25, %v5044_v26  ;;  %v5003_v52 = vor.u32 %v6493_v49, %v5002_v48  ;;  %v5020_v53 = vld [vmem:[#allocation8 + $0xd8] sm:$0xf0]  ;;  %v6485_v25 = vld [vmem:[#allocation8 + $0x74] sm:$0xf0]  ;;  %v6487_v26 = vld [vmem:[#allocation8 + $0x8c] sm:$0xf]  ;;  %p7265_p9 = pnand %p7264_p7, %p7260_p5 }
  0x72   : > { %1055 = vmatpush.bf16.msrb.mxu2 %v5027_v58  ;;  %616 = vmatmul.bf16.vlgmr.msra.gmra.mxu1 %v473_v63  ;;  %v4947_v58 = vor.u32 %v6480_v57, %v4946_v56  ;;  %v4948_v63 = vld [vmem:[#allocation8 + $0x50] sm:$0xf0]  ;;  %v6519_v33 = vld [vmem:[#allocation8 + $0x18c] sm:$0xf]  ;;  %v5116_v35 = vld [vmem:[#allocation8 + $0x198] sm:$0xf0] }
  0x73   : > { %1084 = vmatpush.bf16.msrb.mxu3 %v5155_v59  ;;  %1113 = vmatpush.bf16.msrb.mxu0 %v5031_v4  ;;  %v5074_v59 = vld [vmem:[#allocation8 + $0x140] sm:$0xf]  ;;  %v4951_v2 = vor.u32 %v6478_v61, %v4948_v63  ;;  %v6489_v63 = vld [vmem:[#allocation8 + $0x94] sm:$0xf0]  ;;  %v4954_v36 = vld [vmem:[#allocation8 + $0x48] sm:$0xf] }
  0x74   : > { %626 = vmatmul.bf16.vlgmr.msra.gmra.mxu3 %v475_v0  ;;  %1142 = vmatpush.bf16.msrb.mxu1 %v5159_v5  ;;  %v5075_v62 = vor.u32 %v6512_v60, %v5074_v59  ;;  %v6510_v0 = vld [vmem:[#allocation8 + $0x144] sm:$0xf]  ;;  %v4930_v4 = vld [vmem:[#allocation8 + $0x20] sm:$0xf]  ;;  %v6476_v5 = vld [vmem:[#allocation8 + $0x2c] sm:$0xf0] }
  0x75   : > { %v5079_v3 = vor.u32 %v6510_v0, %v5076_v1  ;;  %v4931_v6 = vor.u32 %v6476_v5, %v4930_v4  ;;  %v5148_v59 = vld [vmem:[#allocation8 + $0x1d8] sm:$0xf0]  ;;  %v4986_v60 = vld [vmem:[#allocation8 + $0x88] sm:$0xf]  ;;  %v6491_v0 = vld [vmem:[#allocation8 + $0xac] sm:$0xf] }
  0x76   : > { %1056 = vmatpush.bf16.msrb.mxu2 %v5011_v8  ;;  %v6508_v8 = vld [vmem:[#allocation8 + $0x12c] sm:$0xf0]  ;;  %v5114_v4 = vld [vmem:[#allocation8 + $0x188] sm:$0xf]  ;;  %v6515_v48 = vld [vmem:[#allocation8 + $0x16c] sm:$0xf] }
  0x77   : > { %1085 = vmatpush.bf16.msrb.mxu3 %v5139_v9  ;;  %1114 = vmatpush.bf16.msrb.mxu0 %v5015_v16  ;;  %v6474_v9 = vld [vmem:[#allocation8 + $0x24] sm:$0xf]  ;;  %v5059_v10 = vor.u32 %v6508_v8, %v5058_v7  ;;  %v4914_v16 = vld [vmem:[#allocation8] sm:$0xf]  ;;  %v6523_v7 = vld [vmem:[#allocation8 + $0x1ac] sm:$0xf] }
  0x78   : > { %1143 = vmatpush.bf16.msrb.mxu1 %v5143_v17  ;;  %v4935_v14 = vor.u32 %v6474_v9, %v4932_v11  ;;  %v6472_v17 = vld [vmem:[#allocation8 + $0xc] sm:$0xf0]  ;;  %v5132_v8 = vld [vmem:[#allocation8 + $0x1b8] sm:$0xf0] }
  0x79   : > { %v4915_v19 = vor.u32 %v6472_v17, %v4914_v16  ;;  %v5100_v49 = vld [vmem:[#allocation8 + $0x178] sm:$0xf0] }
  0x7a   : > { %1057 = vmatpush.bf16.msrb.mxu2 %v4995_v20  ;;  %v6504_v20 = vld [vmem:[#allocation8 + $0x10c] sm:$0xf0] }
  0x7b   : > { %1086 = vmatpush.bf16.msrb.mxu3 %v5123_v21  ;;  %1115 = vmatpush.bf16.msrb.mxu0 %v4999_v28  ;;  %v6470_v21 = vld [vmem:[#allocation8 + $0x4] sm:$0xf]  ;;  %v5043_v23 = vor.u32 %v6504_v20, %v5042_v18  ;;  %v5034_v28 = vld [vmem:[#allocation8 + $0xe8] sm:$0xf] }
  0x7c   : > { %1144 = vmatpush.bf16.msrb.mxu1 %v5127_v29  ;;  %v4919_v24 = vor.u32 %v6470_v21, %v4916_v22  ;;  %v6501_v29 = vld [vmem:[#allocation8 + $0xf4] sm:$0xf0] }
  0x7d   : > { %v5035_v30 = vor.u32 %v6501_v29, %v5034_v28  ;;  %v4988_v29 = vld [vmem:[#allocation8 + $0x98] sm:$0xf0] }
  0x7e   : > { %1058 = vmatpush.bf16.msrb.mxu2 %v4979_v31  ;;  %v5162_v31 = vld [vmem:[#allocation8 + $0x1e8] sm:$0xf] }
  0x7f   : > { %1087 = vmatpush.bf16.msrb.mxu3 %v5107_v32  ;;  %1116 = vmatpush.bf16.msrb.mxu0 %v4983_v42  ;;  %v6533_v32 = vld [vmem:[#allocation8 + $0x1f4] sm:$0xf0]  ;;  %v6531_v42 = vld [vmem:[#allocation8 + $0x1ec] sm:$0xf] }
  0x80   : > { %1145 = vmatpush.bf16.msrb.mxu1 %v5111_v43  ;;  %v5163_v34 = vor.u32 %v6533_v32, %v5162_v31  ;;  %v493_v43 = vld [vmem:[#allocation7] sm:$0x3]  ;;  %v4991_v31 = vor.u32 %v6487_v26, %v4988_v29  ;;  %v6517_v32 = vld [vmem:[#allocation8 + $0x174] sm:$0xf0] }
  0x81   : > { %592 = vmatmul.bf16.gmra.mxu0 %v474_v45  ;;  %602 = vmatmul.bf16.gmra.mxu2 %v476_v46  ;;  %v7561_v61 = vperm.slane %v493_v43, 0  ;;  %v7563_v1 = vperm.slane %v493_v43, 1  ;;  %v4972_v43 = vld [vmem:[#allocation8 + $0x78] sm:$0xf0] }
  0x82   : > { %1059 = vmatpush.bf16.msrb.mxu2 %v4963_v44  ;;  %621 = vmatmul.bf16.gmra.mxu1 %v474_v45  ;;  %v5147_v44 = vor.u32 %v6529_v41, %v5146_v40  ;;  %v5164_v45 = vld [vmem:[#allocation8 + $0x1f8] sm:$0xf0]  ;;  %v6483_v40 = vld [vmem:[#allocation8 + $0x6c] sm:$0xf] }
  0x83   : > { %1088 = vmatpush.bf16.msrb.mxu3 %v5091_v50  ;;  %1117 = vmatpush.bf16.msrb.mxu0 %v4967_v54  ;;  %v5167_v47 = vor.u32 %v6531_v42, %v5164_v45  ;;  %v6495_v50 = vld [vmem:[#allocation8 + $0xcc] sm:$0xf]  ;;  %v5130_v54 = vld [vmem:[#allocation8 + $0x1a8] sm:$0xf]  ;;  %v6513_v45 = vld [vmem:[#allocation8 + $0x154] sm:$0xf0] }
  0x84   : > { %631 = vmatmul.bf16.gmra.mxu3 %v476_v46  ;;  %1146 = vmatpush.bf16.msrb.mxu1 %v5095_v55  ;;  %v6525_v55 = vld [vmem:[#allocation8 + $0x1b4] sm:$0xf0]  ;;  %v5023_v56 = vor.u32 %v6495_v50, %v5020_v53  ;;  %v5068_v26 = vld [vmem:[#allocation8 + $0x138] sm:$0xf0] }
  0x85   : > { %v5131_v57 = vor.u32 %v6525_v55, %v5130_v54 }
  0x86   : > { %1060 = vmatpush.bf16.msrb.mxu2 %v4947_v58  ;;  %v6527_v58 = vld [vmem:[#allocation8 + $0x1cc] sm:$0xf] }
  0x87   : > { %1089 = vmatpush.bf16.msrb.mxu3 %v5075_v62  ;;  %1118 = vmatpush.bf16.msrb.mxu0 %v4951_v2  ;;  %v5151_v62 = vor.u32 %v6527_v58, %v5148_v59  ;;  %v4987_v2 = vor.u32 %v6489_v63, %v4986_v60 }
  0x88   : > { %1147 = vmatpush.bf16.msrb.mxu1 %v5079_v3  ;;  %v5004_v3 = vld [vmem:[#allocation8 + $0xb8] sm:$0xf0] }
  0x89   : > { %v5007_v5 = vor.u32 %v6491_v0, %v5004_v3  ;;  %v4938_v3 = vld [vmem:[#allocation8 + $0x28] sm:$0xf] }
  0x8a   : > { %1061 = vmatpush.bf16.msrb.mxu2 %v4931_v6  ;;  %v6521_v6 = vld [vmem:[#allocation8 + $0x194] sm:$0xf0] }
  0x8b   : > { %1090 = vmatpush.bf16.msrb.mxu3 %v5059_v10  ;;  %1119 = vmatpush.bf16.msrb.mxu0 %v4935_v14  ;;  %v5115_v9 = vor.u32 %v6521_v6, %v5114_v4  ;;  %v5135_v10 = vor.u32 %v6523_v7, %v5132_v8  ;;  %v6477_v4 = vld [vmem:[#allocation8 + $0x34] sm:$0xf0]  ;;  %v4956_v7 = vld [vmem:[#allocation8 + $0x58] sm:$0xf0]  ;;  %v5066_v8 = vld [vmem:[#allocation8 + $0x128] sm:$0xf] }
  0x8c   : > { %1148 = vmatpush.bf16.msrb.mxu1 %v5063_v15  ;;  %v4939_v6 = vor.u32 %v6477_v4, %v4938_v3  ;;  %v6594_v3 = vld [vmem:[#allocation11 + $0x1dc] sm:$0xf0] }
  0x8d   : > { %v5586_v4 = vld [vmem:[#allocation11 + $0x340] sm:$0xf] }
  0x8e   : > { %1062 = vmatpush.bf16.msrb.mxu2 %v4915_v19 }
  0x8f   : > { %1091 = vmatpush.bf16.msrb.mxu3 %v5043_v23  ;;  %1120 = vmatpush.bf16.msrb.mxu0 %v4919_v24  ;;  %v4970_v24 = vld [vmem:[#allocation8 + $0x68] sm:$0xf] }
  0x90   : > { %1149 = vmatpush.bf16.msrb.mxu1 %v5047_v27  ;;  %v4971_v28 = vor.u32 %v6485_v25, %v4970_v24 }
  0x92   : > { %1171 = vmatpush.bf16.msra.mxu2 %v5035_v30  ;;  %v5098_v30 = vld [vmem:[#allocation8 + $0x168] sm:$0xf] }
  0x93   : > { %1200 = vmatpush.bf16.msra.mxu3 %v5163_v34  ;;  %1229 = vmatpush.bf16.msra.mxu0 %v5039_v39  ;;  %v5099_v34 = vor.u32 %v6517_v32, %v5098_v30  ;;  %v6481_v39 = vld [vmem:[#allocation8 + $0x54] sm:$0xf0] }
  0x94   : > { %1258 = vmatpush.bf16.msra.mxu1 %v5167_v47  ;;  %v4955_v42 = vor.u32 %v6481_v39, %v4954_v36  ;;  %v5052_v36 = vld [vmem:[#allocation8 + $0x118] sm:$0xf0] }
  0x96   : > { %1172 = vmatpush.bf16.msra.mxu2 %v5019_v38  ;;  %v5119_v38 = vor.u32 %v6519_v33, %v5116_v35  ;;  %v6471_v33 = vld [vmem:[#allocation8 + $0xc] sm:$0xf] }
  0x97   : > { %1201 = vmatpush.bf16.msra.mxu3 %v5147_v44  ;;  %1230 = vmatpush.bf16.msra.mxu0 %v5023_v56  ;;  %v5082_v44 = vld [vmem:[#allocation8 + $0x148] sm:$0xf]  ;;  %v6503_v35 = vld [vmem:[#allocation8 + $0x10c] sm:$0xf] }
  0x98   : > { %1259 = vmatpush.bf16.msra.mxu1 %v5151_v62  ;;  %v5083_v47 = vor.u32 %v6513_v45, %v5082_v44 }
  0x9a   : > { %1173 = vmatpush.bf16.msra.mxu2 %v5003_v52 }
  0x9b   : > { %1202 = vmatpush.bf16.msra.mxu3 %v5131_v57  ;;  %1231 = vmatpush.bf16.msra.mxu0 %v5007_v5  ;;  %v6479_v5 = vld [vmem:[#allocation8 + $0x4c] sm:$0xf] }
  0x9c   : > { %1260 = vmatpush.bf16.msra.mxu1 %v5135_v10  ;;  %v6509_v10 = vld [vmem:[#allocation8 + $0x134] sm:$0xf0] }
  0x9e   : > { %1174 = vmatpush.bf16.msra.mxu2 %v4987_v2 }
  0x9f   : > { %1203 = vmatpush.bf16.msra.mxu3 %v5115_v9  ;;  %1232 = vmatpush.bf16.msra.mxu0 %v4991_v31  ;;  %v4959_v9 = vor.u32 %v6479_v5, %v4956_v7  ;;  %v6642_v5 = vld [vmem:[#allocation11 + $0x35c] sm:$0xf0] }
  0xa0   : > { %1261 = vmatpush.bf16.msra.mxu1 %v5119_v38  ;;  %v6586_v7 = vld [vmem:[#allocation11 + $0x19c] sm:$0xf0] }
  0xa2   : > { %1175 = vmatpush.bf16.msra.mxu2 %v4971_v28  ;;  %v6505_v28 = vld [vmem:[#allocation8 + $0x114] sm:$0xf0] }
  0xa3   : > { %1204 = vmatpush.bf16.msra.mxu3 %v5099_v34  ;;  %v4924_v34 = vld [vmem:[#allocation8 + $0x18] sm:$0xf0] }
  0xa4   : > { %v4927_v38 = vor.u32 %v6471_v33, %v4924_v34  ;;  %v5426_v34 = vld [vmem:[#allocation11 + $0x200] sm:$0xf] }
  0xa6   : > { %1176 = vmatpush.bf16.msra.mxu2 %v4955_v42 }
  0xa7   : > { %1205 = vmatpush.bf16.msra.mxu3 %v5083_v47 }
  0xaa   : > { %1177 = vmatpush.bf16.msra.mxu2 %v4939_v6  ;;  %v5362_v6 = vld [vmem:[#allocation11 + $0x180] sm:$0xf] }
  0xee   : > { %v588_v46 = vpop.f32.mrf.mxu0 }
  0xef   : > { %v617_v51 = vpop.f32.mrf.mxu1  ;;  %v589_v11 = vadd.f32 %v588_v46, %v7561_v61  ;;  %v4975_v46 = vor.u32 %v6483_v40, %v4972_v43 }
  0xf0   : > { %v618_v12 = vadd.f32 %v617_v51, %v7563_v1  ;;  %v5103_v51 = vor.u32 %v6515_v48, %v5100_v49 }
  0xf1   : > { %v637_v17 = vmax.f32 %v589_v11, 0.0  ;;  %1233 = vmatpush.bf16.msra.mxu0 %v4975_v46  ;;  %v6511_v11 = vld [vmem:[#allocation8 + $0x14c] sm:$0xf] }
  0xf2   : > { %v638_v19 = vmax.f32 %v618_v12, 0.0  ;;  %1262 = vmatpush.bf16.msra.mxu1 %v5103_v51  ;;  %v5067_v12 = vor.u32 %v6509_v10, %v5066_v8  ;;  %v5587_v8 = vor.u32 %v6642_v5, %v5586_v4  ;;  %v5554_v10 = vld [vmem:[#allocation11 + $0x300] sm:$0xf] }
  0xf4   : > { %v598_v37 = vpop.f32.mrf.mxu2  ;;  %1206 = vmatpush.bf16.msra.mxu3 %v5067_v12  ;;  %v6578_v12 = vld [vmem:[#allocation11 + $0x15c] sm:$0xf0] }
  0xf5   : > { %1234 = vmatpush.bf16.msra.mxu0 %v4959_v9  ;;  %v5363_v9 = vor.u32 %v6586_v7, %v5362_v6  ;;  %v6706_v6 = vld [vmem:[#allocation11 + $0x55c] sm:$0xf0] }
  0xf6   : > { %v590_v13 = vpop.f32.mrf.mxu0 }
  0xf7   : > { %v591_v14 = vadd.f32 %v590_v13, %v7561_v61  ;;  %v619_v15 = vpop.f32.mrf.mxu1  ;;  %v627_v41 = vpop.f32.mrf.mxu3  ;;  %v5084_v13 = vld [vmem:[#allocation8 + $0x158] sm:$0xf0] }
  0xf8   : > { %v620_v16 = vadd.f32 %v619_v15, %v7563_v1  ;;  %v6473_v15 = vld [vmem:[#allocation8 + $0x14] sm:$0xf0]  ;;  %v628_v29 = vadd.f32 %v627_v41, %v7563_v1  ;;  %v5055_v41 = vor.u32 %v6503_v35, %v5052_v36  ;;  %v6602_v35 = vld [vmem:[#allocation11 + $0x21c] sm:$0xf0] }
  0xf9   : > { %v639_v18 = vmax.f32 %v591_v14, 0.0  ;;  %v4922_v14 = vld [vmem:[#allocation8 + $0x8] sm:$0xf]  ;;  %v5427_v36 = vor.u32 %v6602_v35, %v5426_v34  ;;  %v6066_v35 = vld [vmem:[#allocation11 + $0x700] sm:$0xf] }
  0xfa   : > { %v640_v20 = vmax.f32 %v620_v16, 0.0  ;;  %v5087_v16 = vor.u32 %v6511_v11, %v5084_v13  ;;  %v646_v43 = vmax.f32 %v628_v29, 0.0  ;;  %v6610_v29 = vld [vmem:[#allocation11 + $0x25c] sm:$0xf0] }
  0xfb   : > { %v7569_v21 = vpack.c.bf16 %v639_v18, %v637_v17  ;;  %v4923_v17 = vor.u32 %v6473_v15, %v4922_v14  ;;  %v6475_v18 = vld [vmem:[#allocation8 + $0x2c] sm:$0xf]  ;;  %v5522_v14 = vld [vmem:[#allocation11 + $0x2c0] sm:$0xf] }
  0xfc   : > { %v7571_v22 = vpack.c.bf16 %v640_v20, %v638_v19  ;;  %v600_v0 = vpop.f32.mrf.mxu2  ;;  %v4940_v19 = vld [vmem:[#allocation8 + $0x38] sm:$0xf0]  ;;  %v6507_v20 = vld [vmem:[#allocation8 + $0x12c] sm:$0xf]  ;;  %1263 = vmatpush.bf16.msra.mxu1 %v5087_v16  ;;  %v6626_v15 = vld [vmem:[#allocation11 + $0x2dc] sm:$0xf0] }
  0xfd   : > { %1063 = vmatmul.bf16.vlgmr.msrb.gmra.mxu2 %v7569_v21  ;;  %1121 = vmatmul.bf16.vlgmr.msrb.gmra.mxu0 %v7569_v21  ;;  %v601_v24 = vadd.f32 %v600_v0, %v7561_v61  ;;  %v4943_v25 = vor.u32 %v6475_v18, %v4940_v19  ;;  %v5071_v31 = vor.u32 %v6507_v20, %v5068_v26  ;;  %v6650_v0 = vld [vmem:[#allocation11 + $0x39c] sm:$0xf0] }
  0xfe   : > { %1092 = vmatmul.bf16.vlgmr.msrb.gmra.mxu3 %v7571_v22  ;;  %1150 = vmatmul.bf16.vlgmr.msrb.gmra.mxu1 %v7571_v22  ;;  %v593_v23 = vpop.f32.mrf.mxu0  ;;  %v5523_v16 = vor.u32 %v6626_v15, %v5522_v14  ;;  %v6570_v18 = vld [vmem:[#allocation11 + $0x11c] sm:$0xf0] }
  0xff   : > { %v622_v27 = vpop.f32.mrf.mxu1  ;;  %v594_v50 = vadd.f32 %v593_v23, %v7561_v61  ;;  %v629_v2 = vpop.f32.mrf.mxu3  ;;  %v599_v23 = vadd.f32 %v598_v37, %v7561_v61  ;;  %1178 = vmatpush.bf16.msra.mxu2 %v4923_v17  ;;  %1235 = vmatpush.bf16.msra.mxu0 %v4943_v25  ;;  %v647_v40 = vmax.f32 %v601_v24, 0.0  ;;  %v5298_v17 = vld [vmem:[#allocation11 + $0x100] sm:$0xf] }
 0x100   : > { %v623_v52 = vadd.f32 %v622_v27, %v7563_v1  ;;  %v5050_v27 = vld [vmem:[#allocation8 + $0x108] sm:$0xf]  ;;  %v630_v30 = vadd.f32 %v629_v2, %v7563_v1  ;;  %1264 = vmatpush.bf16.msra.mxu1 %v5071_v31  ;;  %v5394_v2 = vld [vmem:[#allocation11 + $0x1c0] sm:$0xf]  ;;  %v5299_v19 = vor.u32 %v6570_v18, %v5298_v17 }
 0x101   : > { %v641_v57 = vmax.f32 %v594_v50, 0.0  ;;  %v5051_v32 = vor.u32 %v6505_v28, %v5050_v27  ;;  %v645_v39 = vmax.f32 %v599_v23, 0.0  ;;  %v5490_v20 = vld [vmem:[#allocation11 + $0x280] sm:$0xf]  ;;  %v6654_v17 = vld [vmem:[#allocation11 + $0x3c4] sm:$0xf] }
 0x102   : > { %v642_v59 = vmax.f32 %v623_v52, 0.0  ;;  %v648_v44 = vmax.f32 %v630_v30, 0.0  ;;  %v6618_v23 = vld [vmem:[#allocation11 + $0x29c] sm:$0xf0]  ;;  %v5652_v18 = vld [vmem:[#allocation11 + $0x3e0] sm:$0xf0] }
 0x103   : > { %1207 = vmatpush.bf16.msra.mxu3 %v5051_v32  ;;  %1236 = vmatpush.bf16.msra.mxu0 %v4927_v38  ;;  %v7593_v45 = vpack.c.bf16 %v647_v40, %v645_v39  ;;  %v5491_v24 = vor.u32 %v6618_v23, %v5490_v20  ;;  %v5266_v25 = vld [vmem:[#allocation11 + $0xc0] sm:$0xf]  ;;  %v5655_v23 = vor.u32 %v6654_v17, %v5652_v18  ;;  %v6566_v17 = vld [vmem:[#allocation11 + $0x104] sm:$0xf] }
 0x104   : > { %v603_v37 = vpop.f32.mrf.mxu2  ;;  %v7595_v46 = vpack.c.bf16 %v648_v44, %v646_v43  ;;  %1265 = vmatpush.bf16.msra.mxu1 %v5055_v41  ;;  %v6562_v26 = vld [vmem:[#allocation11 + $0xdc] sm:$0xf0]  ;;  %v5300_v18 = vld [vmem:[#allocation11 + $0x120] sm:$0xf0] }
 0x105   : > { %v604_v49 = vadd.f32 %v603_v37, %v7561_v61  ;;  %v5267_v27 = vor.u32 %v6562_v26, %v5266_v25  ;;  %v5458_v28 = vld [vmem:[#allocation11 + $0x240] sm:$0xf]  ;;  %v6646_v26 = vld [vmem:[#allocation11 + $0x384] sm:$0xf] }
 0x106   : > { %v595_v53 = vpop.f32.mrf.mxu0  ;;  %v5459_v30 = vor.u32 %v6610_v29, %v5458_v28  ;;  %v5234_v31 = vld [vmem:[#allocation11 + $0x80] sm:$0xf] }
 0x107   : > { %v596_v54 = vadd.f32 %v595_v53, %v7561_v61  ;;  %v624_v55 = vpop.f32.mrf.mxu1  ;;  %v632_v42 = vpop.f32.mrf.mxu3  ;;  %v649_v53 = vmax.f32 %v604_v49, 0.0  ;;  %v6554_v32 = vld [vmem:[#allocation11 + $0x9c] sm:$0xf0] }
 0x108   : > { %v625_v56 = vadd.f32 %v624_v55, %v7563_v1  ;;  %v633_v51 = vadd.f32 %v632_v42, %v7563_v1  ;;  %v5235_v33 = vor.u32 %v6554_v32, %v5234_v31  ;;  %v5202_v37 = vld [vmem:[#allocation11 + $0x40] sm:$0xf] }
 0x109   : > { %v643_v58 = vmax.f32 %v596_v54, 0.0  ;;  %v6546_v38 = vld [vmem:[#allocation11 + $0x5c] sm:$0xf0] }
 0x10a   : > { %v644_v60 = vmax.f32 %v625_v56, 0.0  ;;  %v650_v55 = vmax.f32 %v633_v51, 0.0  ;;  %v5203_v39 = vor.u32 %v6546_v38, %v5202_v37  ;;  %v5170_v40 = vld [vmem:[#allocation11] sm:$0xf]  ;;  %v6590_v37 = vld [vmem:[#allocation11 + $0x1c4] sm:$0xf] }
 0x10b   : > { %v7581_v62 = vpack.c.bf16 %v643_v58, %v641_v57  ;;  %v6538_v42 = vld [vmem:[#allocation11 + $0x1c] sm:$0xf0] }
 0x10c   : > { %v7583_v63 = vpack.c.bf16 %v644_v60, %v642_v59  ;;  %v605_v47 = vpop.f32.mrf.mxu2  ;;  %v5618_v60 = vld [vmem:[#allocation11 + $0x380] sm:$0xf]  ;;  %v5171_v43 = vor.u32 %v6538_v42, %v5170_v40  ;;  %v5396_v40 = vld [vmem:[#allocation11 + $0x1e0] sm:$0xf0] }
 0x10d   : > { %1068 = vmatmul.bf16.gmra.mxu2 %v7581_v62  ;;  %1126 = vmatmul.bf16.gmra.mxu0 %v7581_v62  ;;  %v606_v50 = vadd.f32 %v605_v47, %v7561_v61  ;;  %v5650_v61 = vld [vmem:[#allocation11 + $0x3c0] sm:$0xf] }
 0x10e   : > { %1097 = vmatmul.bf16.gmra.mxu3 %v7583_v63  ;;  %1155 = vmatmul.bf16.gmra.mxu1 %v7583_v63  ;;  %v5906_v44 = vld [vmem:[#allocation11 + $0x5c0] sm:$0xf] }
 0x10f   : > { %v634_v48 = vpop.f32.mrf.mxu3  ;;  %v651_v54 = vmax.f32 %v606_v50, 0.0  ;;  %v6722_v41 = vld [vmem:[#allocation11 + $0x5dc] sm:$0xf0] }
 0x110   : > { %v635_v52 = vadd.f32 %v634_v48, %v7563_v1  ;;  %v6658_v1 = vld [vmem:[#allocation11 + $0x3dc] sm:$0xf0] }
 0x111   : > { %v7605_v57 = vpack.c.bf16 %v651_v54, %v649_v53  ;;  %v5651_v59 = vor.u32 %v6658_v1, %v5650_v61  ;;  %v6162_v47 = vld [vmem:[#allocation11 + $0x7c0] sm:$0xf] }
 0x112   : > { %v652_v56 = vmax.f32 %v635_v52, 0.0  ;;  %v6786_v48 = vld [vmem:[#allocation11 + $0x7dc] sm:$0xf0] }
 0x113   : > { %2918 = vmatpush.bf16.msrb.mxu3 %v5651_v59  ;;  %v6163_v50 = vor.u32 %v6786_v48, %v6162_v47  ;;  %v5874_v54 = vld [vmem:[#allocation11 + $0x580] sm:$0xf] }
 0x114   : > { %v7607_v58 = vpack.c.bf16 %v652_v56, %v650_v55  ;;  %v6714_v55 = vld [vmem:[#allocation11 + $0x59c] sm:$0xf0] }
 0x115   : > { %2976 = vmatpush.bf16.msrb.mxu1 %v6163_v50  ;;  %v6778_v61 = vld [vmem:[#allocation11 + $0x79c] sm:$0xf0]  ;;  %v6582_v50 = vld [vmem:[#allocation11 + $0x184] sm:$0xf] }
 0x116   : > { %v6770_v14 = vld [vmem:[#allocation11 + $0x75c] sm:$0xf0] }
 0x117   : > { %v6698_v31 = vld [vmem:[#allocation11 + $0x51c] sm:$0xf0] }
 0x11d   : > { %1073 = vmatmul.bf16.gmra.mxu2 %v7593_v45  ;;  %1131 = vmatmul.bf16.gmra.mxu0 %v7593_v45 }
 0x11e   : > { %1102 = vmatmul.bf16.gmra.mxu3 %v7595_v46  ;;  %1160 = vmatmul.bf16.gmra.mxu1 %v7595_v46 }
 0x12d   : > { %1078 = vmatmul.bf16.gmra.mxu2 %v7605_v57  ;;  %1136 = vmatmul.bf16.gmra.mxu0 %v7605_v57 }
 0x12e   : > { %1107 = vmatmul.bf16.gmra.mxu3 %v7607_v58  ;;  %1165 = vmatmul.bf16.gmra.mxu1 %v7607_v58 }
 0x13d   : > { %1179 = vmatmul.bf16.vlgmr.msra.gmra.mxu2 %v7569_v21  ;;  %1237 = vmatmul.bf16.vlgmr.msra.gmra.mxu0 %v7569_v21  ;;  %v5619_v21 = vor.u32 %v6650_v0, %v5618_v60 }
 0x13e   : > { %1208 = vmatmul.bf16.vlgmr.msra.gmra.mxu3 %v7571_v22  ;;  %1266 = vmatmul.bf16.vlgmr.msra.gmra.mxu1 %v7571_v22  ;;  %v5395_v22 = vor.u32 %v6594_v3, %v5394_v2 }
 0x13f   : > { %2919 = vmatpush.bf16.msrb.mxu3 %v5619_v21 }
 0x140   : > { %2889 = vmatpush.bf16.msrb.mxu2 %v5395_v22  ;;  %v5842_v22 = vld [vmem:[#allocation11 + $0x540] sm:$0xf] }
 0x141   : > { %v5843_v7 = vor.u32 %v6706_v6, %v5842_v22 }
 0x143   : > { %2920 = vmatpush.bf16.msrb.mxu3 %v5587_v8 }
 0x144   : > { %2890 = vmatpush.bf16.msrb.mxu2 %v5363_v9 }
 0x14d   : > { %1184 = vmatmul.bf16.gmra.mxu2 %v7581_v62  ;;  %1242 = vmatmul.bf16.gmra.mxu0 %v7581_v62  ;;  %v6634_v62 = vld [vmem:[#allocation11 + $0x31c] sm:$0xf0] }
 0x14e   : > { %1213 = vmatmul.bf16.gmra.mxu3 %v7583_v63  ;;  %1271 = vmatmul.bf16.gmra.mxu1 %v7583_v63  ;;  %v5555_v11 = vor.u32 %v6634_v62, %v5554_v10  ;;  %v5330_v63 = vld [vmem:[#allocation11 + $0x140] sm:$0xf] }
 0x14f   : > { %v5331_v13 = vor.u32 %v6578_v12, %v5330_v63 }
 0x150   : > { %2921 = vmatpush.bf16.msrb.mxu3 %v5555_v11 }
 0x151   : > { %2891 = vmatpush.bf16.msrb.mxu2 %v5331_v13  ;;  %v6098_v13 = vld [vmem:[#allocation11 + $0x740] sm:$0xf] }
 0x154   : > { %2922 = vmatpush.bf16.msrb.mxu3 %v5523_v16  ;;  %v6099_v16 = vor.u32 %v6770_v14, %v6098_v13  ;;  %v5524_v13 = vld [vmem:[#allocation11 + $0x2e0] sm:$0xf0] }
 0x155   : > { %2892 = vmatpush.bf16.msrb.mxu2 %v5299_v19 }
 0x158   : > { %2923 = vmatpush.bf16.msrb.mxu3 %v5491_v24 }
 0x159   : > { %2893 = vmatpush.bf16.msrb.mxu2 %v5267_v27  ;;  %v5620_v27 = vld [vmem:[#allocation11 + $0x3a0] sm:$0xf0] }
 0x15a   : > { %v5623_v32 = vor.u32 %v6646_v26, %v5620_v27  ;;  %v6614_v26 = vld [vmem:[#allocation11 + $0x284] sm:$0xf] }
 0x15c   : > { %2924 = vmatpush.bf16.msrb.mxu3 %v5459_v30  ;;  %v5810_v30 = vld [vmem:[#allocation11 + $0x500] sm:$0xf] }
 0x15d   : > { %1189 = vmatmul.bf16.gmra.mxu2 %v7593_v45  ;;  %1247 = vmatmul.bf16.gmra.mxu0 %v7593_v45  ;;  %v5907_v45 = vor.u32 %v6722_v41, %v5906_v44  ;;  %v5811_v34 = vor.u32 %v6698_v31, %v5810_v30  ;;  %v6638_v44 = vld [vmem:[#allocation11 + $0x344] sm:$0xf]  ;;  %v5746_v30 = vld [vmem:[#allocation11 + $0x480] sm:$0xf] }
 0x15e   : > { %1218 = vmatmul.bf16.gmra.mxu3 %v7595_v46  ;;  %1276 = vmatmul.bf16.gmra.mxu1 %v7595_v46  ;;  %v7629_v46 = vld [vmem:[#allocation10] sm:$0xf]  ;;  %v5588_v41 = vld [vmem:[#allocation11 + $0x360] sm:$0xf0]  ;;  %v6682_v31 = vld [vmem:[#allocation11 + $0x49c] sm:$0xf0] }
 0x15f   : > { %2894 = vmatpush.bf16.msrb.mxu2 %v5235_v33  ;;  %2947 = vmatpush.bf16.msrb.mxu0 %v5907_v45  ;;  %v7632_v51 = vperm.slane %v7629_v46, 1  ;;  %v7636_v1 = vperm.slane %v7629_v46, 0 }
 0x160   : > { %2925 = vmatpush.bf16.msrb.mxu3 %v5427_v36  ;;  %v6762_v36 = vld [vmem:[#allocation11 + $0x71c] sm:$0xf0] }
 0x163   : > { %2895 = vmatpush.bf16.msrb.mxu2 %v5203_v39  ;;  %v6067_v39 = vor.u32 %v6762_v36, %v6066_v35  ;;  %v5492_v35 = vld [vmem:[#allocation11 + $0x2a0] sm:$0xf0] }
 0x164   : > { %3034 = vmatpush.bf16.msra.mxu3 %v5655_v23  ;;  %v5303_v23 = vor.u32 %v6566_v17, %v5300_v18  ;;  %v6558_v36 = vld [vmem:[#allocation11 + $0xc4] sm:$0xf]  ;;  %v5682_v17 = vld [vmem:[#allocation11 + $0x400] sm:$0xf] }
 0x165   : > { %v6666_v18 = vld [vmem:[#allocation11 + $0x41c] sm:$0xf0] }
 0x167   : > { %2896 = vmatpush.bf16.msrb.mxu2 %v5171_v43  ;;  %v5399_v43 = vor.u32 %v6590_v37, %v5396_v40  ;;  %v5268_v37 = vld [vmem:[#allocation11 + $0xe0] sm:$0xf0] }
 0x168   : > { %3035 = vmatpush.bf16.msra.mxu3 %v5623_v32  ;;  %v5271_v40 = vor.u32 %v6558_v36, %v5268_v37 }
 0x16b   : > { %3005 = vmatpush.bf16.msra.mxu2 %v5399_v43  ;;  %v5970_v43 = vld [vmem:[#allocation11 + $0x640] sm:$0xf] }
 0x16d   : > { %1194 = vmatmul.bf16.gmra.mxu2 %v7605_v57  ;;  %1252 = vmatmul.bf16.gmra.mxu0 %v7605_v57  ;;  %v5875_v57 = vor.u32 %v6714_v55, %v5874_v54  ;;  %v5778_v55 = vld [vmem:[#allocation11 + $0x4c0] sm:$0xf] }
 0x16e   : > { %1223 = vmatmul.bf16.gmra.mxu3 %v7607_v58  ;;  %1281 = vmatmul.bf16.gmra.mxu1 %v7607_v58  ;;  %v6130_v58 = vld [vmem:[#allocation11 + $0x780] sm:$0xf] }
 0x16f   : > { %v6131_v60 = vor.u32 %v6778_v61, %v6130_v58  ;;  %2948 = vmatpush.bf16.msrb.mxu0 %v5875_v57  ;;  %v6630_v61 = vld [vmem:[#allocation11 + $0x304] sm:$0xf] }
 0x171   : > { %2977 = vmatpush.bf16.msrb.mxu1 %v6131_v60 }
 0x173   : > { %2949 = vmatpush.bf16.msrb.mxu0 %v5843_v7 }
 0x175   : > { %2978 = vmatpush.bf16.msrb.mxu1 %v6099_v16 }
 0x177   : > { %2950 = vmatpush.bf16.msrb.mxu0 %v5811_v34  ;;  %v5747_v34 = vor.u32 %v6682_v31, %v5746_v30 }
 0x179   : > { %2979 = vmatpush.bf16.msrb.mxu1 %v6067_v39  ;;  %v5495_v39 = vor.u32 %v6614_v26, %v5492_v35 }
 0x17a   : > { %v1122_v49 = vpop.f32.mrf.mxu0 }
 0x17b   : > { %v1151_v52 = vpop.f32.mrf.mxu1  ;;  %v1123_v53 = vadd.f32 %v1122_v49, %v7632_v51  ;;  %v5591_v49 = vor.u32 %v6638_v44, %v5588_v41  ;;  %v6738_v44 = vld [vmem:[#allocation11 + $0x65c] sm:$0xf0]  ;;  %v6606_v41 = vld [vmem:[#allocation11 + $0x244] sm:$0xf] }
 0x17d   : > { %v1152_v2 = vadd.f32 %v1151_v52, %v1123_v53  ;;  %v5364_v52 = vld [vmem:[#allocation11 + $0x1a0] sm:$0xf0]  ;;  %3036 = vmatpush.bf16.msra.mxu3 %v5591_v49  ;;  %v5971_v49 = vor.u32 %v6738_v44, %v5970_v43 }
 0x17e   : > { %v5367_v57 = vor.u32 %v6582_v50, %v5364_v52  ;;  %v5460_v50 = vld [vmem:[#allocation11 + $0x260] sm:$0xf0] }
 0x17f   : > { %v1288_v8 = vmax.f32 %v1152_v2, 0.0  ;;  %v5463_v52 = vor.u32 %v6606_v41, %v5460_v50  ;;  %v6782_v50 = vld [vmem:[#allocation11 + $0x7c4] sm:$0xf] }
 0x180   : > { %v1064_v56 = vpop.f32.mrf.mxu2  ;;  %3006 = vmatpush.bf16.msra.mxu2 %v5367_v57  ;;  %v5714_v57 = vld [vmem:[#allocation11 + $0x440] sm:$0xf] }
 0x181   : > { %v1093_v59 = vpop.f32.mrf.mxu3  ;;  %v1065_v4 = vadd.f32 %v1064_v56, %v7636_v1  ;;  %v6690_v56 = vld [vmem:[#allocation11 + $0x4dc] sm:$0xf0] }
 0x182   : > { %v1124_v0 = vpop.f32.mrf.mxu0  ;;  %v5779_v58 = vor.u32 %v6690_v56, %v5778_v55 }
 0x183   : > { %v1125_v21 = vadd.f32 %v1124_v0, %v7632_v51  ;;  %v1153_v3 = vpop.f32.mrf.mxu1  ;;  %v1094_v62 = vadd.f32 %v1093_v59, %v1065_v4  ;;  %v5556_v59 = vld [vmem:[#allocation11 + $0x320] sm:$0xf0] }
 0x184   : > { %v5559_v2 = vor.u32 %v6630_v61, %v5556_v59  ;;  %2951 = vmatpush.bf16.msrb.mxu0 %v5779_v58  ;;  %v5332_v4 = vld [vmem:[#allocation11 + $0x160] sm:$0xf0]  ;;  %v6674_v58 = vld [vmem:[#allocation11 + $0x45c] sm:$0xf0] }
 0x185   : > { %v1154_v5 = vadd.f32 %v1153_v3, %v1125_v21  ;;  %v1287_v24 = vmax.f32 %v1094_v62, 0.0  ;;  %v6574_v3 = vld [vmem:[#allocation11 + $0x144] sm:$0xf]  ;;  %v5715_v59 = vor.u32 %v6674_v58, %v5714_v57 }
 0x186   : > { %3037 = vmatpush.bf16.msra.mxu3 %v5559_v2  ;;  %v6598_v2 = vld [vmem:[#allocation11 + $0x204] sm:$0xf] }
 0x187   : > { %v1292_v9 = vmax.f32 %v1154_v5, 0.0 }
 0x188   : > { %v1066_v10 = vpop.f32.mrf.mxu2  ;;  %2952 = vmatpush.bf16.msrb.mxu0 %v5747_v34 }
 0x189   : > { %v7640_v11 = vpack.c.bf16 %v1292_v9, %v1288_v8  ;;  %v1067_v63 = vadd.f32 %v1066_v10, %v7636_v1  ;;  %v1095_v12 = vpop.f32.mrf.mxu3  ;;  %v6034_v8 = vld [vmem:[#allocation11 + $0x6c0] sm:$0xf]  ;;  %v5335_v10 = vor.u32 %v6574_v3, %v5332_v4 }
 0x18a   : > { %v1127_v15 = vpop.f32.mrf.mxu0  ;;  %v6754_v9 = vld [vmem:[#allocation11 + $0x6dc] sm:$0xf0] }
 0x18b   : > { %v1096_v19 = vadd.f32 %v1095_v12, %v1067_v63  ;;  %v1156_v20 = vpop.f32.mrf.mxu1  ;;  %2926 = vmatmul.bf16.vlgmr.msrb.gmra.mxu3 %v7640_v11  ;;  %v1128_v29 = vadd.f32 %v1127_v15, %v7632_v51  ;;  %v6035_v63 = vor.u32 %v6754_v9, %v6034_v8  ;;  %v6622_v12 = vld [vmem:[#allocation11 + $0x2c4] sm:$0xf]  ;;  %3007 = vmatpush.bf16.msra.mxu2 %v5335_v10 }
 0x18c   : > { %v5527_v16 = vor.u32 %v6622_v12, %v5524_v13  ;;  %2953 = vmatpush.bf16.msrb.mxu0 %v5715_v59  ;;  %v6542_v8 = vld [vmem:[#allocation11 + $0x44] sm:$0xf] }
 0x18d   : > { %v1291_v25 = vmax.f32 %v1096_v19, 0.0  ;;  %v1157_v45 = vadd.f32 %v1156_v20, %v1128_v29  ;;  %2980 = vmatpush.bf16.msrb.mxu1 %v6035_v63  ;;  %v5204_v9 = vld [vmem:[#allocation11 + $0x60] sm:$0xf0] }
 0x18e   : > { %3038 = vmatpush.bf16.msra.mxu3 %v5527_v16  ;;  %v5207_v13 = vor.u32 %v6542_v8, %v5204_v9 }
 0x18f   : > { %v7644_v28 = vpack.c.bf16 %v1291_v25, %v1287_v24  ;;  %v1296_v60 = vmax.f32 %v1157_v45, 0.0  ;;  %v6002_v24 = vld [vmem:[#allocation11 + $0x680] sm:$0xf]  ;;  %3008 = vmatpush.bf16.msra.mxu2 %v5303_v23 }
 0x190   : > { %v1069_v33 = vpop.f32.mrf.mxu2  ;;  %v6746_v25 = vld [vmem:[#allocation11 + $0x69c] sm:$0xf0] }
 0x191   : > { %v1098_v38 = vpop.f32.mrf.mxu3  ;;  %2897 = vmatmul.bf16.vlgmr.msrb.gmra.mxu2 %v7644_v28  ;;  %v1070_v53 = vadd.f32 %v1069_v33, %v7636_v1  ;;  %v6003_v32 = vor.u32 %v6746_v25, %v6002_v24  ;;  %v5683_v24 = vor.u32 %v6666_v18, %v5682_v17  ;;  %v5172_v25 = vld [vmem:[#allocation11 + $0x20] sm:$0xf0] }
 0x192   : > { %v1129_v42 = vpop.f32.mrf.mxu0  ;;  %3039 = vmatpush.bf16.msra.mxu3 %v5495_v39  ;;  %v6718_v39 = vld [vmem:[#allocation11 + $0x5c4] sm:$0xf] }
 0x193   : > { %v1130_v47 = vadd.f32 %v1129_v42, %v7632_v51  ;;  %v1158_v48 = vpop.f32.mrf.mxu1  ;;  %v1099_v5 = vadd.f32 %v1098_v38, %v1070_v53  ;;  %2981 = vmatpush.bf16.msrb.mxu1 %v6003_v32  ;;  %3009 = vmatpush.bf16.msra.mxu2 %v5271_v40  ;;  %v6550_v53 = vld [vmem:[#allocation11 + $0x84] sm:$0xf] }
 0x194   : > { %2954 = vmatpush.bf16.msrb.mxu0 %v5683_v24  ;;  %v5908_v40 = vld [vmem:[#allocation11 + $0x5e0] sm:$0xf0] }
 0x195   : > { %v1159_v54 = vadd.f32 %v1158_v48, %v1130_v47  ;;  %v1295_v19 = vmax.f32 %v1099_v5, 0.0  ;;  %v5428_v5 = vld [vmem:[#allocation11 + $0x220] sm:$0xf0] }
 0x196   : > { %3040 = vmatpush.bf16.msra.mxu3 %v5463_v52  ;;  %v6164_v52 = vld [vmem:[#allocation11 + $0x7e0] sm:$0xf0] }
 0x197   : > { %v1300_v0 = vmax.f32 %v1159_v54, 0.0  ;;  %v5236_v54 = vld [vmem:[#allocation11 + $0xa0] sm:$0xf0]  ;;  %2982 = vmatpush.bf16.msrb.mxu1 %v5971_v49 }
 0x198   : > { %v1071_v21 = vpop.f32.mrf.mxu2  ;;  %v5239_v61 = vor.u32 %v6550_v53, %v5236_v54  ;;  %v6167_v53 = vor.u32 %v6782_v50, %v6164_v52  ;;  %v6766_v24 = vld [vmem:[#allocation11 + $0x744] sm:$0xf]  ;;  %v5402_v52 = vld [vmem:[#allocation11 + $0x1c8] sm:$0xf] }
 0x199   : > { %v7650_v22 = vpack.c.bf16 %v1300_v0, %v1296_v60  ;;  %v1072_v6 = vadd.f32 %v1071_v21, %v7636_v1  ;;  %v1100_v7 = vpop.f32.mrf.mxu3  ;;  %v5938_v60 = vld [vmem:[#allocation11 + $0x600] sm:$0xf]  ;;  %v6068_v50 = vld [vmem:[#allocation11 + $0x720] sm:$0xf0] }
 0x19a   : > { %v1132_v62 = vpop.f32.mrf.mxu0  ;;  %v6730_v0 = vld [vmem:[#allocation11 + $0x61c] sm:$0xf0]  ;;  %3010 = vmatpush.bf16.msra.mxu2 %v5239_v61 }
 0x19b   : > { %v1101_v14 = vadd.f32 %v1100_v7, %v1072_v6  ;;  %v1161_v15 = vpop.f32.mrf.mxu1  ;;  %2931 = vmatmul.bf16.gmra.mxu3 %v7650_v22  ;;  %v1133_v29 = vadd.f32 %v1132_v62, %v7632_v51  ;;  %v5939_v4 = vor.u32 %v6730_v0, %v5938_v60  ;;  %v5431_v7 = vor.u32 %v6598_v2, %v5428_v5  ;;  %v5876_v60 = vld [vmem:[#allocation11 + $0x5a0] sm:$0xf0] }
 0x19d   : > { %v1299_v20 = vmax.f32 %v1101_v14, 0.0  ;;  %v1162_v45 = vadd.f32 %v1161_v15, %v1133_v29  ;;  %2983 = vmatpush.bf16.msrb.mxu1 %v5939_v4  ;;  %3041 = vmatpush.bf16.msra.mxu3 %v5431_v7  ;;  %v7681_v4 = vperm.slane %v7629_v46, 2 }
 0x19e   : > { %3011 = vmatpush.bf16.msra.mxu2 %v5207_v13  ;;  %v6702_v13 = vld [vmem:[#allocation11 + $0x544] sm:$0xf] }
 0x19f   : > { %v7654_v27 = vpack.c.bf16 %v1299_v20, %v1295_v19  ;;  %v1304_v21 = vmax.f32 %v1162_v45, 0.0  ;;  %v6534_v19 = vld [vmem:[#allocation11 + $0x4] sm:$0xf] }
 0x1a0   : > { %v1074_v33 = vpop.f32.mrf.mxu2  ;;  %v5175_v26 = vor.u32 %v6534_v19, %v5172_v25  ;;  %v6100_v25 = vld [vmem:[#allocation11 + $0x760] sm:$0xf0] }
 0x1a1   : > { %v1103_v38 = vpop.f32.mrf.mxu3  ;;  %2902 = vmatmul.bf16.gmra.mxu2 %v7654_v27  ;;  %v1075_v55 = vadd.f32 %v1074_v33, %v7636_v1  ;;  %3092 = vmatpush.bf16.msra.mxu1 %v6167_v53 }
 0x1a2   : > { %v1134_v42 = vpop.f32.mrf.mxu0  ;;  %3012 = vmatpush.bf16.msra.mxu2 %v5175_v26 }
 0x1a3   : > { %v1135_v47 = vadd.f32 %v1134_v42, %v7632_v51  ;;  %v1163_v48 = vpop.f32.mrf.mxu1  ;;  %v1104_v10 = vadd.f32 %v1103_v38, %v1075_v55  ;;  %v5911_v42 = vor.u32 %v6718_v39, %v5908_v40  ;;  %v7674_v55 = vperm.slane %v7629_v46, 3  ;;  %v6651_v39 = vld [vmem:[#allocation11 + $0x3a4] sm:$0xf0] }
 0x1a5   : > { %v1164_v56 = vadd.f32 %v1163_v48, %v1135_v47  ;;  %v1303_v20 = vmax.f32 %v1104_v10, 0.0  ;;  %3063 = vmatpush.bf16.msra.mxu0 %v5911_v42 }
 0x1a7   : > { %v1308_v3 = vmax.f32 %v1164_v56, 0.0 }
 0x1a8   : > { %v1076_v6 = vpop.f32.mrf.mxu2 }
 0x1a9   : > { %v7660_v62 = vpack.c.bf16 %v1308_v3, %v1304_v21  ;;  %v1077_v63 = vadd.f32 %v1076_v6, %v7636_v1  ;;  %v1105_v12 = vpop.f32.mrf.mxu3  ;;  %v6774_v21 = vld [vmem:[#allocation11 + $0x784] sm:$0xf] }
 0x1aa   : > { %v1137_v14 = vpop.f32.mrf.mxu0  ;;  %v6132_v3 = vld [vmem:[#allocation11 + $0x7a0] sm:$0xf0] }
 0x1ab   : > { %v1106_v15 = vadd.f32 %v1105_v12, %v1077_v63  ;;  %v1166_v16 = vpop.f32.mrf.mxu1  ;;  %2936 = vmatmul.bf16.gmra.mxu3 %v7660_v62  ;;  %v1138_v30 = vadd.f32 %v1137_v14, %v7632_v51  ;;  %v6135_v6 = vor.u32 %v6774_v21, %v6132_v3  ;;  %v5844_v14 = vld [vmem:[#allocation11 + $0x560] sm:$0xf0]  ;;  %v5370_v21 = vld [vmem:[#allocation11 + $0x188] sm:$0xf] }
 0x1ac   : > { %v6587_v3 = vld [vmem:[#allocation11 + $0x1a4] sm:$0xf0] }
 0x1ad   : > { %v1307_v23 = vmax.f32 %v1106_v15, 0.0  ;;  %v1167_v34 = vadd.f32 %v1166_v16, %v1138_v30  ;;  %3093 = vmatpush.bf16.msra.mxu1 %v6135_v6  ;;  %v5847_v15 = vor.u32 %v6702_v13, %v5844_v14  ;;  %v6103_v30 = vor.u32 %v6766_v24, %v6100_v25  ;;  %v6750_v25 = vld [vmem:[#allocation11 + $0x6c4] sm:$0xf] }
 0x1af   : > { %v7664_v29 = vpack.c.bf16 %v1307_v23, %v1303_v20  ;;  %v1312_v43 = vmax.f32 %v1167_v34, 0.0 }
 0x1b0   : > { %v1079_v31 = vpop.f32.mrf.mxu2 }
 0x1b1   : > { %v1108_v32 = vpop.f32.mrf.mxu3  ;;  %2907 = vmatmul.bf16.gmra.mxu2 %v7664_v29  ;;  %v1080_v37 = vadd.f32 %v1079_v31, %v7636_v1  ;;  %v5658_v31 = vld [vmem:[#allocation11 + $0x3c8] sm:$0xf]  ;;  %3094 = vmatpush.bf16.msra.mxu1 %v6103_v30 }
 0x1b2   : > { %v1139_v33 = vpop.f32.mrf.mxu0 }
 0x1b3   : > { %v1140_v35 = vadd.f32 %v1139_v33, %v7632_v51  ;;  %v1168_v36 = vpop.f32.mrf.mxu1  ;;  %v1109_v45 = vadd.f32 %v1108_v32, %v1080_v37  ;;  %v6659_v32 = vld [vmem:[#allocation11 + $0x3e4] sm:$0xf0] }
 0x1b5   : > { %v1169_v38 = vadd.f32 %v1168_v36, %v1140_v35  ;;  %v1311_v57 = vmax.f32 %v1109_v45, 0.0  ;;  %v5659_v35 = vor.u32 %v6659_v32, %v5658_v31 }
 0x1b7   : > { %v1316_v44 = vmax.f32 %v1169_v38, 0.0  ;;  %3150 = vmatpush.bf16.msrb.mxu3 %v5659_v35  ;;  %v5626_v38 = vld [vmem:[#allocation11 + $0x388] sm:$0xf] }
 0x1b8   : > { %v1081_v41 = vpop.f32.mrf.mxu2 }
 0x1b9   : > { %v7670_v47 = vpack.c.bf16 %v1316_v44, %v1312_v43  ;;  %v1082_v48 = vadd.f32 %v1081_v41, %v7636_v1  ;;  %v1110_v49 = vpop.f32.mrf.mxu3  ;;  %v6710_v1 = vld [vmem:[#allocation11 + $0x584] sm:$0xf]  ;;  %v5627_v41 = vor.u32 %v6651_v39, %v5626_v38  ;;  %v5306_v38 = vld [vmem:[#allocation11 + $0x108] sm:$0xf] }
 0x1ba   : > { %v1238_v51 = vpop.f32.mrf.mxu0  ;;  %v5879_v2 = vor.u32 %v6710_v1, %v5876_v60  ;;  %v6694_v43 = vld [vmem:[#allocation11 + $0x504] sm:$0xf]  ;;  %v6571_v39 = vld [vmem:[#allocation11 + $0x124] sm:$0xf0] }
 0x1bb   : > { %v1111_v54 = vadd.f32 %v1110_v49, %v1082_v48  ;;  %v1267_v56 = vpop.f32.mrf.mxu1  ;;  %2941 = vmatmul.bf16.gmra.mxu3 %v7670_v47  ;;  %v1239_v59 = vadd.f32 %v1238_v51, %v7674_v55  ;;  %v5812_v44 = vld [vmem:[#allocation11 + $0x520] sm:$0xf0] }
 0x1bc   : > { %3064 = vmatpush.bf16.msra.mxu0 %v5879_v2  ;;  %v5815_v48 = vor.u32 %v6694_v43, %v5812_v44  ;;  %v6758_v49 = vld [vmem:[#allocation11 + $0x704] sm:$0xf]  ;;  %3151 = vmatpush.bf16.msrb.mxu3 %v5627_v41  ;;  %v5307_v44 = vor.u32 %v6571_v39, %v5306_v38 }
 0x1bd   : > { %v1315_v58 = vmax.f32 %v1111_v54, 0.0  ;;  %v1268_v8 = vadd.f32 %v1267_v56, %v1239_v59  ;;  %v6071_v53 = vor.u32 %v6758_v49, %v6068_v50  ;;  %v6595_v54 = vld [vmem:[#allocation11 + $0x1e4] sm:$0xf0]  ;;  %v6742_v41 = vld [vmem:[#allocation11 + $0x684] sm:$0xf] }
 0x1be   : > { %v6643_v59 = vld [vmem:[#allocation11 + $0x364] sm:$0xf0] }
 0x1bf   : > { %v7677_v61 = vpack.c.bf16 %v1315_v58, %v1311_v57  ;;  %v1290_v16 = vmax.f32 %v1268_v8, 0.0  ;;  %v5403_v57 = vor.u32 %v6595_v54, %v5402_v52  ;;  %v5594_v58 = vld [vmem:[#allocation11 + $0x348] sm:$0xf]  ;;  %3095 = vmatpush.bf16.msra.mxu1 %v6071_v53  ;;  %v5780_v8 = vld [vmem:[#allocation11 + $0x4e0] sm:$0xf0] }
 0x1c0   : > { %v1180_v0 = vpop.f32.mrf.mxu2  ;;  %3065 = vmatpush.bf16.msra.mxu0 %v5847_v15  ;;  %v5595_v2 = vor.u32 %v6643_v59, %v5594_v58  ;;  %v6678_v52 = vld [vmem:[#allocation11 + $0x484] sm:$0xf]  ;;  %v5274_v58 = vld [vmem:[#allocation11 + $0xc8] sm:$0xf] }
 0x1c1   : > { %v1209_v5 = vpop.f32.mrf.mxu3  ;;  %2912 = vmatmul.bf16.gmra.mxu2 %v7677_v61  ;;  %v1181_v63 = vadd.f32 %v1180_v0, %v7681_v4  ;;  %v6563_v59 = vld [vmem:[#allocation11 + $0xe4] sm:$0xf0] }
 0x1c2   : > { %v1240_v7 = vpop.f32.mrf.mxu0  ;;  %3121 = vmatpush.bf16.msrb.mxu2 %v5403_v57  ;;  %3152 = vmatpush.bf16.msrb.mxu3 %v5595_v2  ;;  %v6619_v57 = vld [vmem:[#allocation11 + $0x2a4] sm:$0xf0]  ;;  %v5716_v2 = vld [vmem:[#allocation11 + $0x460] sm:$0xf0] }
 0x1c3   : > { %v1241_v9 = vadd.f32 %v1240_v7, %v7674_v55  ;;  %v1269_v10 = vpop.f32.mrf.mxu1  ;;  %v1210_v18 = vadd.f32 %v1209_v5, %v1181_v63  ;;  %v6686_v7 = vld [vmem:[#allocation11 + $0x4c4] sm:$0xf]  ;;  %v5562_v63 = vld [vmem:[#allocation11 + $0x308] sm:$0xf] }
 0x1c4   : > { %3066 = vmatpush.bf16.msra.mxu0 %v5815_v48  ;;  %v5498_v48 = vld [vmem:[#allocation11 + $0x288] sm:$0xf] }
 0x1c5   : > { %v1270_v12 = vadd.f32 %v1269_v10, %v1241_v9  ;;  %v1289_v36 = vmax.f32 %v1210_v18, 0.0  ;;  %v5371_v9 = vor.u32 %v6587_v3, %v5370_v21  ;;  %v5783_v10 = vor.u32 %v6686_v7, %v5780_v8  ;;  %v6734_v3 = vld [vmem:[#allocation11 + $0x644] sm:$0xf]  ;;  %v5466_v8 = vld [vmem:[#allocation11 + $0x248] sm:$0xf] }
 0x1c6   : > { %v5275_v21 = vor.u32 %v6563_v59, %v5274_v58  ;;  %v5972_v7 = vld [vmem:[#allocation11 + $0x660] sm:$0xf0] }
 0x1c7   : > { %v1294_v46 = vmax.f32 %v1270_v12, 0.0  ;;  %v6635_v12 = vld [vmem:[#allocation11 + $0x324] sm:$0xf0]  ;;  %3122 = vmatpush.bf16.msrb.mxu2 %v5371_v9 }
 0x1c8   : > { %v1182_v17 = vpop.f32.mrf.mxu2  ;;  %v5563_v15 = vor.u32 %v6635_v12, %v5562_v63  ;;  %3067 = vmatpush.bf16.msra.mxu0 %v5783_v10  ;;  %v6611_v9 = vld [vmem:[#allocation11 + $0x264] sm:$0xf0] }
 0x1c9   : > { %v7686_v19 = vpack.c.bf16 %v1294_v46, %v1290_v16  ;;  %v1183_v20 = vadd.f32 %v1182_v17, %v7681_v4  ;;  %v1211_v23 = vpop.f32.mrf.mxu3  ;;  %v5338_v46 = vld [vmem:[#allocation11 + $0x148] sm:$0xf] }
 0x1ca   : > { %v1243_v26 = vpop.f32.mrf.mxu0  ;;  %v6579_v17 = vld [vmem:[#allocation11 + $0x164] sm:$0xf0]  ;;  %3153 = vmatpush.bf16.msrb.mxu3 %v5563_v15 }
 0x1cb   : > { %v1212_v33 = vadd.f32 %v1211_v23, %v1183_v20  ;;  %v1272_v34 = vpop.f32.mrf.mxu1  ;;  %2984 = vmatmul.bf16.vlgmr.msrb.gmra.mxu1 %v7686_v19  ;;  %3042 = vmatmul.bf16.vlgmr.msra.gmra.mxu3 %v7640_v11  ;;  %v1244_v42 = vadd.f32 %v1243_v26, %v7674_v55  ;;  %v6036_v26 = vld [vmem:[#allocation11 + $0x6e0] sm:$0xf0]  ;;  %v5339_v30 = vor.u32 %v6579_v17, %v5338_v46  ;;  %v5242_v15 = vld [vmem:[#allocation11 + $0x88] sm:$0xf] }
 0x1cc   : > { %v6039_v32 = vor.u32 %v6750_v25, %v6036_v26  ;;  %v6726_v46 = vld [vmem:[#allocation11 + $0x604] sm:$0xf]  ;;  %v6603_v26 = vld [vmem:[#allocation11 + $0x224] sm:$0xf0] }
 0x1cd   : > { %v1293_v37 = vmax.f32 %v1212_v33, 0.0  ;;  %v1273_v1 = vadd.f32 %v1272_v34, %v1244_v42  ;;  %v5530_v33 = vld [vmem:[#allocation11 + $0x2c8] sm:$0xf]  ;;  %3123 = vmatpush.bf16.msrb.mxu2 %v5339_v30  ;;  %v6662_v30 = vld [vmem:[#allocation11 + $0x404] sm:$0xf] }
 0x1ce   : > { %v6627_v34 = vld [vmem:[#allocation11 + $0x2e4] sm:$0xf0]  ;;  %3096 = vmatpush.bf16.msra.mxu1 %v6039_v32 }
 0x1cf   : > { %v7691_v40 = vpack.c.bf16 %v1293_v37, %v1289_v36  ;;  %v1298_v13 = vmax.f32 %v1273_v1, 0.0  ;;  %v5531_v37 = vor.u32 %v6627_v34, %v5530_v33  ;;  %v5210_v34 = vld [vmem:[#allocation11 + $0x48] sm:$0xf] }
 0x1d0   : > { %v1185_v45 = vpop.f32.mrf.mxu2 }
 0x1d1   : > { %v1214_v51 = vpop.f32.mrf.mxu3  ;;  %2955 = vmatmul.bf16.vlgmr.msrb.gmra.mxu0 %v7691_v40  ;;  %3013 = vmatmul.bf16.vlgmr.msra.gmra.mxu2 %v7644_v28  ;;  %v1186_v5 = vadd.f32 %v1185_v45, %v7681_v4  ;;  %v6004_v45 = vld [vmem:[#allocation11 + $0x6a0] sm:$0xf0] }
 0x1d2   : > { %v1245_v56 = vpop.f32.mrf.mxu0  ;;  %3154 = vmatpush.bf16.msrb.mxu3 %v5531_v37  ;;  %v6007_v53 = vor.u32 %v6742_v41, %v6004_v45  ;;  %3124 = vmatpush.bf16.msrb.mxu2 %v5307_v44 }
 0x1d3   : > { %v1246_v60 = vadd.f32 %v1245_v56, %v7674_v55  ;;  %v1274_v0 = vpop.f32.mrf.mxu1  ;;  %v1215_v18 = vadd.f32 %v1214_v51, %v1186_v5  ;;  %v5748_v51 = vld [vmem:[#allocation11 + $0x4a0] sm:$0xf0] }
 0x1d4   : > { %v5751_v56 = vor.u32 %v6678_v52, %v5748_v51  ;;  %3097 = vmatpush.bf16.msra.mxu1 %v6007_v53  ;;  %v5178_v51 = vld [vmem:[#allocation11 + $0x8] sm:$0xf] }
 0x1d5   : > { %v1275_v6 = vadd.f32 %v1274_v0, %v1246_v60  ;;  %v1297_v42 = vmax.f32 %v1215_v18, 0.0  ;;  %v5499_v60 = vor.u32 %v6619_v57, %v5498_v48  ;;  %v6670_v0 = vld [vmem:[#allocation11 + $0x444] sm:$0xf]  ;;  %v6539_v53 = vld [vmem:[#allocation11 + $0x24] sm:$0xf0] }
 0x1d6   : > { %3068 = vmatpush.bf16.msra.mxu0 %v5751_v56  ;;  %3125 = vmatpush.bf16.msrb.mxu2 %v5275_v21  ;;  %v5940_v18 = vld [vmem:[#allocation11 + $0x620] sm:$0xf0]  ;;  %v5179_v57 = vor.u32 %v6539_v53, %v5178_v51  ;;  %v6170_v21 = vld [vmem:[#allocation11 + $0x7c8] sm:$0xf] }
 0x1d7   : > { %v1302_v14 = vmax.f32 %v1275_v6, 0.0  ;;  %v5719_v6 = vor.u32 %v6670_v0, %v5716_v2  ;;  %3155 = vmatpush.bf16.msrb.mxu3 %v5499_v60  ;;  %v5943_v32 = vor.u32 %v6726_v46, %v5940_v18  ;;  %v5914_v0 = vld [vmem:[#allocation11 + $0x5c8] sm:$0xf] }
 0x1d8   : > { %v1187_v16 = vpop.f32.mrf.mxu2  ;;  %v6723_v2 = vld [vmem:[#allocation11 + $0x5e4] sm:$0xf0] }
 0x1d9   : > { %v7698_v20 = vpack.c.bf16 %v1302_v14, %v1298_v13  ;;  %v1188_v23 = vadd.f32 %v1187_v16, %v7681_v4  ;;  %v1216_v24 = vpop.f32.mrf.mxu3  ;;  %v5975_v13 = vor.u32 %v6734_v3, %v5972_v7  ;;  %v5467_v14 = vor.u32 %v6611_v9, %v5466_v8  ;;  %v6555_v16 = vld [vmem:[#allocation11 + $0xa4] sm:$0xf0] }
 0x1da   : > { %v1248_v31 = vpop.f32.mrf.mxu0  ;;  %v5243_v17 = vor.u32 %v6555_v16, %v5242_v15  ;;  %3069 = vmatpush.bf16.msra.mxu0 %v5719_v6  ;;  %v6787_v6 = vld [vmem:[#allocation11 + $0x7e4] sm:$0xf0] }
 0x1db   : > { %v1217_v35 = vadd.f32 %v1216_v24, %v1188_v23  ;;  %v1277_v36 = vpop.f32.mrf.mxu1  ;;  %2989 = vmatmul.bf16.gmra.mxu1 %v7698_v20  ;;  %3047 = vmatmul.bf16.gmra.mxu3 %v7650_v22  ;;  %v1249_v50 = vadd.f32 %v1248_v31, %v7674_v55  ;;  %v5434_v23 = vld [vmem:[#allocation11 + $0x208] sm:$0xf]  ;;  %v5684_v31 = vld [vmem:[#allocation11 + $0x420] sm:$0xf0]  ;;  %v6171_v9 = vor.u32 %v6787_v6, %v6170_v21 }
 0x1dc   : > { %3098 = vmatpush.bf16.msra.mxu1 %v5975_v13  ;;  %v5687_v33 = vor.u32 %v6662_v30, %v5684_v31  ;;  %3156 = vmatpush.bf16.msrb.mxu3 %v5467_v14  ;;  %v5435_v39 = vor.u32 %v6603_v26, %v5434_v23  ;;  %v5882_v13 = vld [vmem:[#allocation11 + $0x588] sm:$0xf] }
 0x1dd   : > { %v1301_v43 = vmax.f32 %v1217_v35, 0.0  ;;  %v1278_v10 = vadd.f32 %v1277_v36, %v1249_v50  ;;  %v6547_v35 = vld [vmem:[#allocation11 + $0x64] sm:$0xf0]  ;;  %3126 = vmatpush.bf16.msrb.mxu2 %v5243_v17 }
 0x1de   : > { %3070 = vmatpush.bf16.msra.mxu0 %v5687_v33  ;;  %v6715_v14 = vld [vmem:[#allocation11 + $0x5a4] sm:$0xf0] }
 0x1df   : > { %v7703_v49 = vpack.c.bf16 %v1301_v43, %v1297_v42  ;;  %v1306_v36 = vmax.f32 %v1278_v10, 0.0  ;;  %v5211_v42 = vor.u32 %v6547_v35, %v5210_v34  ;;  %v5883_v46 = vor.u32 %v6715_v14, %v5882_v13  ;;  %v6138_v26 = vld [vmem:[#allocation11 + $0x788] sm:$0xf]  ;;  %v6583_v14 = vld [vmem:[#allocation11 + $0x18c] sm:$0xf] }
 0x1e0   : > { %v1190_v54 = vpop.f32.mrf.mxu2  ;;  %3099 = vmatpush.bf16.msra.mxu1 %v5943_v32  ;;  %3157 = vmatpush.bf16.msrb.mxu3 %v5435_v39  ;;  %v6779_v30 = vld [vmem:[#allocation11 + $0x7a4] sm:$0xf0] }
 0x1e1   : > { %v1219_v1 = vpop.f32.mrf.mxu3  ;;  %2960 = vmatmul.bf16.gmra.mxu0 %v7703_v49  ;;  %3018 = vmatmul.bf16.gmra.mxu2 %v7654_v27  ;;  %v1191_v24 = vadd.f32 %v1190_v54, %v7681_v4  ;;  %v6139_v31 = vor.u32 %v6779_v30, %v6138_v26  ;;  %v6707_v35 = vld [vmem:[#allocation11 + $0x564] sm:$0xf0]  ;;  %v6575_v30 = vld [vmem:[#allocation11 + $0x14c] sm:$0xf] }
 0x1e2   : > { %v1250_v5 = vpop.f32.mrf.mxu0  ;;  %3127 = vmatpush.bf16.msrb.mxu2 %v5211_v42  ;;  %v5818_v42 = vld [vmem:[#allocation11 + $0x508] sm:$0xf] }
 0x1e3   : > { %v1251_v63 = vadd.f32 %v1250_v5, %v7674_v55  ;;  %v1279_v12 = vpop.f32.mrf.mxu1  ;;  %v1220_v43 = vadd.f32 %v1219_v1, %v1191_v24  ;;  %v5915_v5 = vor.u32 %v6723_v2, %v5914_v0  ;;  %v6591_v0 = vld [vmem:[#allocation11 + $0x1cc] sm:$0xf]  ;;  %v5786_v21 = vld [vmem:[#allocation11 + $0x4c8] sm:$0xf] }
 0x1e4   : > { %3208 = vmatpush.bf16.msrb.mxu1 %v6171_v9  ;;  %v5404_v2 = vld [vmem:[#allocation11 + $0x1e8] sm:$0xf0]  ;;  %v6042_v6 = vld [vmem:[#allocation11 + $0x6c8] sm:$0xf] }
 0x1e5   : > { %v1280_v25 = vadd.f32 %v1279_v12, %v1251_v63  ;;  %v1305_v54 = vmax.f32 %v1220_v43, 0.0  ;;  %3179 = vmatpush.bf16.msrb.mxu0 %v5915_v5  ;;  %v6699_v43 = vld [vmem:[#allocation11 + $0x524] sm:$0xf0]  ;;  %v5407_v5 = vor.u32 %v6591_v0, %v5404_v2  ;;  %v6639_v9 = vld [vmem:[#allocation11 + $0x34c] sm:$0xf] }
 0x1e6   : > { %3128 = vmatpush.bf16.msrb.mxu2 %v5179_v57  ;;  %v6647_v57 = vld [vmem:[#allocation11 + $0x38c] sm:$0xf]  ;;  %v6683_v26 = vld [vmem:[#allocation11 + $0x4a4] sm:$0xf0] }
 0x1e7   : > { %v1310_v37 = vmax.f32 %v1280_v25, 0.0  ;;  %v5722_v0 = vld [vmem:[#allocation11 + $0x448] sm:$0xf] }
 0x1e8   : > { %v1192_v38 = vpop.f32.mrf.mxu2  ;;  %3209 = vmatpush.bf16.msrb.mxu1 %v6139_v31  ;;  %v5340_v31 = vld [vmem:[#allocation11 + $0x168] sm:$0xf0]  ;;  %v6675_v2 = vld [vmem:[#allocation11 + $0x464] sm:$0xf0] }
 0x1e9   : > { %v7710_v44 = vpack.c.bf16 %v1310_v37, %v1306_v36  ;;  %v1193_v41 = vadd.f32 %v1192_v38, %v7681_v4  ;;  %v1221_v45 = vpop.f32.mrf.mxu3  ;;  %3180 = vmatpush.bf16.msrb.mxu0 %v5883_v46  ;;  %v6106_v36 = vld [vmem:[#allocation11 + $0x748] sm:$0xf] }
 0x1ea   : > { %v1253_v48 = vpop.f32.mrf.mxu0  ;;  %v6771_v38 = vld [vmem:[#allocation11 + $0x764] sm:$0xf0]  ;;  %3237 = vmatpush.bf16.msra.mxu2 %v5407_v5  ;;  %v5723_v5 = vor.u32 %v6675_v2, %v5722_v0 }
 0x1eb   : > { %v1222_v50 = vadd.f32 %v1221_v45, %v1193_v41  ;;  %v1282_v52 = vpop.f32.mrf.mxu1  ;;  %2994 = vmatmul.bf16.gmra.mxu1 %v7710_v44  ;;  %3052 = vmatmul.bf16.gmra.mxu3 %v7660_v62  ;;  %v1254_v59 = vadd.f32 %v1253_v48, %v7674_v55  ;;  %v6107_v39 = vor.u32 %v6771_v38, %v6106_v36  ;;  %v6655_v45 = vld [vmem:[#allocation11 + $0x3cc] sm:$0xf]  ;;  %v6747_v38 = vld [vmem:[#allocation11 + $0x6a4] sm:$0xf0] }
 0x1ec   : > { %v5819_v41 = vor.u32 %v6699_v43, %v5818_v42  ;;  %v5660_v48 = vld [vmem:[#allocation11 + $0x3e8] sm:$0xf0] }
 0x1ed   : > { %v1309_v56 = vmax.f32 %v1222_v50, 0.0  ;;  %v1283_v7 = vadd.f32 %v1282_v52, %v1254_v59  ;;  %3210 = vmatpush.bf16.msrb.mxu1 %v6107_v39  ;;  %v6074_v50 = vld [vmem:[#allocation11 + $0x708] sm:$0xf]  ;;  %v5663_v51 = vor.u32 %v6655_v45, %v5660_v48  ;;  %v5628_v59 = vld [vmem:[#allocation11 + $0x3a8] sm:$0xf0] }
 0x1ee   : > { %v6763_v52 = vld [vmem:[#allocation11 + $0x724] sm:$0xf0]  ;;  %v5532_v36 = vld [vmem:[#allocation11 + $0x2e8] sm:$0xf0] }
 0x1ef   : > { %v7715_v58 = vpack.c.bf16 %v1309_v56, %v1305_v54  ;;  %v1314_v15 = vmax.f32 %v1283_v7, 0.0  ;;  %v6075_v53 = vor.u32 %v6763_v52, %v6074_v50  ;;  %v7733_v54 = vld [vmem:[#allocation13] sm:$0xff]  ;;  %3266 = vmatpush.bf16.msra.mxu3 %v5663_v51  ;;  %v5308_v45 = vld [vmem:[#allocation11 + $0x128] sm:$0xf0] }
 0x1f0   : > { %v1195_v1 = vpop.f32.mrf.mxu2  ;;  %v6615_v51 = vld [vmem:[#allocation11 + $0x28c] sm:$0xf] }
 0x1f1   : > { %v1224_v60 = vpop.f32.mrf.mxu3  ;;  %2965 = vmatmul.bf16.gmra.mxu0 %v7715_v58  ;;  %3023 = vmatmul.bf16.gmra.mxu2 %v7664_v29  ;;  %v1196_v63 = vadd.f32 %v1195_v1, %v7681_v4  ;;  %v5631_v1 = vor.u32 %v6647_v57, %v5628_v59  ;;  %v6559_v59 = vld [vmem:[#allocation11 + $0xcc] sm:$0xf] }
 0x1f2   : > { %v1255_v3 = vpop.f32.mrf.mxu0  ;;  %3211 = vmatpush.bf16.msrb.mxu1 %v6075_v53  ;;  %v5500_v53 = vld [vmem:[#allocation11 + $0x2a8] sm:$0xf0] }
 0x1f3   : > { %v1256_v8 = vadd.f32 %v1255_v3, %v7674_v55  ;;  %v1284_v10 = vpop.f32.mrf.mxu1  ;;  %v1225_v18 = vadd.f32 %v1224_v60, %v1196_v63  ;;  %v7736_v60 = vperm.slane %v7733_v54, 0  ;;  %v6691_v3 = vld [vmem:[#allocation11 + $0x4e4] sm:$0xf0]  ;;  %3267 = vmatpush.bf16.msra.mxu3 %v5631_v1  ;;  %v5276_v1 = vld [vmem:[#allocation11 + $0xe8] sm:$0xf0] }
 0x1f4   : > { %v5787_v7 = vor.u32 %v6691_v3, %v5786_v21  ;;  %v5279_v21 = vor.u32 %v6559_v59, %v5276_v1  ;;  %v5978_v3 = vld [vmem:[#allocation11 + $0x648] sm:$0xf] }
 0x1f5   : > { %v1285_v12 = vadd.f32 %v1284_v10, %v1256_v8  ;;  %v1313_v32 = vmax.f32 %v1225_v18, 0.0  ;;  %v6755_v8 = vld [vmem:[#allocation11 + $0x6e4] sm:$0xf0]  ;;  %v5596_v10 = vld [vmem:[#allocation11 + $0x368] sm:$0xf0] }
 0x1f6   : > { %v6043_v63 = vor.u32 %v6755_v8, %v6042_v6  ;;  %v6631_v18 = vld [vmem:[#allocation11 + $0x30c] sm:$0xf]  ;;  %v6739_v6 = vld [vmem:[#allocation11 + $0x664] sm:$0xf0] }
 0x1f7   : > { %v1318_v16 = vmax.f32 %v1285_v12, 0.0  ;;  %v5599_v12 = vor.u32 %v6639_v9, %v5596_v10  ;;  %v5468_v8 = vld [vmem:[#allocation11 + $0x268] sm:$0xf0]  ;;  %v5979_v9 = vor.u32 %v6739_v6, %v5978_v3 }
 0x1f8   : > { %v1197_v17 = vpop.f32.mrf.mxu2  ;;  %3212 = vmatpush.bf16.msrb.mxu1 %v6043_v63  ;;  %v5884_v6 = vld [vmem:[#allocation11 + $0x5a8] sm:$0xf0] }
 0x1f9   : > { %v7722_v23 = vpack.c.bf16 %v1318_v16, %v1314_v15  ;;  %v1198_v24 = vadd.f32 %v1197_v17, %v7681_v4  ;;  %v1226_v55 = vpop.f32.mrf.mxu3  ;;  %v5850_v4 = vld [vmem:[#allocation11 + $0x548] sm:$0xf]  ;;  %v5372_v15 = vld [vmem:[#allocation11 + $0x1a8] sm:$0xf0]  ;;  %3268 = vmatpush.bf16.msra.mxu3 %v5599_v12 }
 0x1fa   : > { %v5851_v37 = vor.u32 %v6707_v35, %v5850_v4  ;;  %v5375_v46 = vor.u32 %v6583_v14, %v5372_v15  ;;  %v5343_v4 = vor.u32 %v6575_v30, %v5340_v31  ;;  %v6623_v35 = vld [vmem:[#allocation11 + $0x2cc] sm:$0xf]  ;;  %v5690_v30 = vld [vmem:[#allocation11 + $0x408] sm:$0xf] }
 0x1fb   : > { %v1227_v25 = vadd.f32 %v1226_v55, %v1198_v24  ;;  %2999 = vmatmul.bf16.gmra.mxu1 %v7722_v23  ;;  %3057 = vmatmul.bf16.gmra.mxu3 %v7670_v47  ;;  %v5564_v24 = vld [vmem:[#allocation11 + $0x328] sm:$0xf0]  ;;  %v5754_v55 = vld [vmem:[#allocation11 + $0x488] sm:$0xf]  ;;  %v5535_v39 = vor.u32 %v6623_v35, %v5532_v36 }
 0x1fc   : > { %3181 = vmatpush.bf16.msrb.mxu0 %v5851_v37  ;;  %3238 = vmatpush.bf16.msra.mxu2 %v5375_v46  ;;  %v6010_v37 = vld [vmem:[#allocation11 + $0x688] sm:$0xf]  ;;  %v6551_v12 = vld [vmem:[#allocation11 + $0x8c] sm:$0xf] }
 0x1fd   : > { %v1317_v33 = vmax.f32 %v1227_v25, 0.0  ;;  %v5567_v25 = vor.u32 %v6631_v18, %v5564_v24  ;;  %v6011_v43 = vor.u32 %v6747_v38, %v6010_v37  ;;  %v5946_v46 = vld [vmem:[#allocation11 + $0x608] sm:$0xf]  ;;  %v6599_v18 = vld [vmem:[#allocation11 + $0x20c] sm:$0xf] }
 0x1fe   : > { %v6667_v31 = vld [vmem:[#allocation11 + $0x424] sm:$0xf0]  ;;  %v5212_v35 = vld [vmem:[#allocation11 + $0x68] sm:$0xf0] }
 0x1ff   : > { %v7727_v34 = vpack.c.bf16 %v1317_v33, %v1313_v32  ;;  %v5755_v33 = vor.u32 %v6683_v26, %v5754_v55  ;;  %3269 = vmatpush.bf16.msra.mxu3 %v5567_v25  ;;  %3213 = vmatpush.bf16.msrb.mxu1 %v6011_v43  ;;  %v5436_v55 = vld [vmem:[#allocation11 + $0x228] sm:$0xf0] }
 0x200   : > { %3182 = vmatpush.bf16.msrb.mxu0 %v5819_v41  ;;  %3239 = vmatpush.bf16.msra.mxu2 %v5343_v4  ;;  %v6567_v41 = vld [vmem:[#allocation11 + $0x10c] sm:$0xf]  ;;  %v5439_v26 = vor.u32 %v6599_v18, %v5436_v55  ;;  %v5691_v4 = vor.u32 %v6667_v31, %v5690_v30  ;;  %v5666_v31 = vld [vmem:[#allocation11 + $0x3d0] sm:$0xf] }
 0x201   : > { %2970 = vmatmul.bf16.gmra.mxu0 %v7727_v34  ;;  %3028 = vmatmul.bf16.gmra.mxu2 %v7677_v61  ;;  %v5311_v50 = vor.u32 %v6567_v41, %v5308_v45  ;;  %v6535_v38 = vld [vmem:[#allocation11 + $0xc] sm:$0xf] }
 0x203   : > { %3270 = vmatpush.bf16.msra.mxu3 %v5535_v39  ;;  %3214 = vmatpush.bf16.msrb.mxu1 %v5979_v9  ;;  %v5180_v39 = vld [vmem:[#allocation11 + $0x28] sm:$0xf0] }
 0x204   : > { %3183 = vmatpush.bf16.msrb.mxu0 %v5787_v7  ;;  %3240 = vmatpush.bf16.msra.mxu2 %v5311_v50  ;;  %v6607_v7 = vld [vmem:[#allocation11 + $0x24c] sm:$0xf]  ;;  %v5183_v43 = vor.u32 %v6535_v38, %v5180_v39 }
 0x205   : > { %v5471_v10 = vor.u32 %v6607_v7, %v5468_v8  ;;  %v5916_v50 = vld [vmem:[#allocation11 + $0x5e8] sm:$0xf0] }
 0x206   : > { %v6775_v7 = vld [vmem:[#allocation11 + $0x78c] sm:$0xf] }
 0x208   : > { %3184 = vmatpush.bf16.msrb.mxu0 %v5755_v33  ;;  %3241 = vmatpush.bf16.msra.mxu2 %v5279_v21  ;;  %v6543_v33 = vld [vmem:[#allocation11 + $0x4c] sm:$0xf] }
 0x209   : > { %v5215_v36 = vor.u32 %v6543_v33, %v5212_v35  ;;  %v6660_v33 = vld [vmem:[#allocation11 + $0x3ec] sm:$0xf0]  ;;  %v5820_v35 = vld [vmem:[#allocation11 + $0x528] sm:$0xf0] }
 0x20b   : > { %3100 = vmatmul.bf16.vlgmr.msra.gmra.mxu1 %v7686_v19  ;;  %3158 = vmatmul.bf16.vlgmr.msrb.gmra.mxu3 %v7640_v11 }
 0x20c   : > { %3185 = vmatpush.bf16.msrb.mxu0 %v5723_v5  ;;  %v6711_v5 = vld [vmem:[#allocation11 + $0x58c] sm:$0xf] }
 0x20d   : > { %v5887_v9 = vor.u32 %v6711_v5, %v5884_v6  ;;  %v5602_v6 = vld [vmem:[#allocation11 + $0x350] sm:$0xf] }
 0x20e   : > { %v2927_v56 = vpop.f32.mrf.mxu3 }
 0x210   : > { %3186 = vmatpush.bf16.msrb.mxu0 %v5691_v4  ;;  %v6695_v4 = vld [vmem:[#allocation11 + $0x50c] sm:$0xf] }
 0x211   : > { %3071 = vmatmul.bf16.vlgmr.msra.gmra.mxu0 %v7691_v40  ;;  %3129 = vmatmul.bf16.vlgmr.msrb.gmra.mxu2 %v7644_v28  ;;  %v5823_v39 = vor.u32 %v6695_v4, %v5820_v35 }
 0x214   : > { %v2898_v13 = vpop.f32.mrf.mxu2 }
 0x215   : > { %v2899_v16 = vadd.f32 %v2898_v13, %v7736_v60  ;;  %v5244_v13 = vld [vmem:[#allocation11 + $0xa8] sm:$0xf0] }
 0x216   : > { %v2929_v17 = vpop.f32.mrf.mxu3  ;;  %v5247_v15 = vor.u32 %v6551_v12, %v5244_v13  ;;  %v6703_v13 = vld [vmem:[#allocation11 + $0x54c] sm:$0xf] }
 0x217   : > { %v7741_v32 = vadd.f32 %v2927_v56, %v2899_v16  ;;  %v5503_v56 = vor.u32 %v6615_v51, %v5500_v53 }
 0x218   : > { %3242 = vmatpush.bf16.msra.mxu2 %v5247_v15  ;;  %v6767_v15 = vld [vmem:[#allocation11 + $0x74c] sm:$0xf] }
 0x219   : > { %3271 = vmatpush.bf16.msra.mxu3 %v5503_v56  ;;  %v6172_v56 = vld [vmem:[#allocation11 + $0x7e8] sm:$0xf0] }
 0x21b   : > { %3105 = vmatmul.bf16.gmra.mxu1 %v7698_v20  ;;  %3163 = vmatmul.bf16.gmra.mxu3 %v7650_v22 }
 0x21c   : > { %v2900_v42 = vpop.f32.mrf.mxu2  ;;  %3243 = vmatpush.bf16.msra.mxu2 %v5215_v36  ;;  %v6759_v36 = vld [vmem:[#allocation11 + $0x70c] sm:$0xf] }
 0x21d   : > { %v2901_v48 = vadd.f32 %v2900_v42, %v7736_v60  ;;  %3272 = vmatpush.bf16.msra.mxu3 %v5471_v10  ;;  %v6140_v10 = vld [vmem:[#allocation11 + $0x7a8] sm:$0xf0] }
 0x21e   : > { %v2932_v52 = vpop.f32.mrf.mxu3 }
 0x21f   : > { %v7746_v57 = vadd.f32 %v2929_v17, %v2901_v48  ;;  %v6731_v17 = vld [vmem:[#allocation11 + $0x624] sm:$0xf0]  ;;  %v6719_v48 = vld [vmem:[#allocation11 + $0x5cc] sm:$0xf] }
 0x220   : > { %v5947_v24 = vor.u32 %v6731_v17, %v5946_v46  ;;  %3244 = vmatpush.bf16.msra.mxu2 %v5183_v43  ;;  %v5919_v53 = vor.u32 %v6719_v48, %v5916_v50  ;;  %v6108_v17 = vld [vmem:[#allocation11 + $0x768] sm:$0xf0] }
 0x221   : > { %3076 = vmatmul.bf16.gmra.mxu0 %v7703_v49  ;;  %3134 = vmatmul.bf16.gmra.mxu2 %v7654_v27 }
 0x222   : > { %3215 = vmatpush.bf16.msrb.mxu1 %v5947_v24  ;;  %3273 = vmatpush.bf16.msra.mxu3 %v5439_v26  ;;  %v6111_v24 = vor.u32 %v6767_v15, %v6108_v17  ;;  %v5378_v15 = vld [vmem:[#allocation11 + $0x190] sm:$0xf] }
 0x223   : > { %3295 = vmatpush.bf16.msra.mxu0 %v5919_v53  ;;  %v6588_v17 = vld [vmem:[#allocation11 + $0x1ac] sm:$0xf0] }
 0x224   : > { %v2903_v63 = vpop.f32.mrf.mxu2 }
 0x225   : > { %v2904_v14 = vadd.f32 %v2903_v63, %v7736_v60  ;;  %v6143_v63 = vor.u32 %v6775_v7, %v6140_v10  ;;  %v6644_v7 = vld [vmem:[#allocation11 + $0x36c] sm:$0xf0] }
 0x226   : > { %v2934_v16 = vpop.f32.mrf.mxu3 }
 0x227   : > { %v7751_v25 = vadd.f32 %v2932_v52, %v2904_v14  ;;  %v6783_v52 = vld [vmem:[#allocation11 + $0x7cc] sm:$0xf]  ;;  %3296 = vmatpush.bf16.msra.mxu0 %v5887_v9  ;;  %v5603_v9 = vor.u32 %v6644_v7, %v5602_v6 }
 0x228   : > { %v6175_v1 = vor.u32 %v6783_v52, %v6172_v56  ;;  %v5852_v14 = vld [vmem:[#allocation11 + $0x568] sm:$0xf0]  ;;  %v5634_v52 = vld [vmem:[#allocation11 + $0x390] sm:$0xf] }
 0x229   : > { %v5855_v46 = vor.u32 %v6703_v13, %v5852_v14  ;;  %v6751_v13 = vld [vmem:[#allocation11 + $0x6cc] sm:$0xf] }
 0x22a   : > { %3324 = vmatpush.bf16.msra.mxu1 %v6175_v1  ;;  %v6044_v14 = vld [vmem:[#allocation11 + $0x6e8] sm:$0xf0] }
 0x22b   : > { %3110 = vmatmul.bf16.gmra.mxu1 %v7710_v44  ;;  %3168 = vmatmul.bf16.gmra.mxu3 %v7660_v62 }
 0x22c   : > { %v2905_v37 = vpop.f32.mrf.mxu2  ;;  %3297 = vmatpush.bf16.msra.mxu0 %v5855_v46  ;;  %v6047_v46 = vor.u32 %v6751_v13, %v6044_v14 }
 0x22d   : > { %v2906_v42 = vadd.f32 %v2905_v37, %v7736_v60  ;;  %v5667_v37 = vor.u32 %v6660_v33, %v5666_v31  ;;  %v6636_v31 = vld [vmem:[#allocation11 + $0x32c] sm:$0xf0] }
 0x22e   : > { %v2937_v41 = vpop.f32.mrf.mxu3  ;;  %3325 = vmatpush.bf16.msra.mxu1 %v6143_v63 }
 0x22f   : > { %v7756_v45 = vadd.f32 %v2934_v16, %v2906_v42  ;;  %v6076_v42 = vld [vmem:[#allocation11 + $0x728] sm:$0xf0]  ;;  %3382 = vmatpush.bf16.msrb.mxu3 %v5667_v37  ;;  %v5346_v37 = vld [vmem:[#allocation11 + $0x150] sm:$0xf] }
 0x230   : > { %3298 = vmatpush.bf16.msra.mxu0 %v5823_v39 }
 0x231   : > { %3081 = vmatmul.bf16.gmra.mxu0 %v7715_v58  ;;  %3139 = vmatmul.bf16.gmra.mxu2 %v7664_v29 }
 0x232   : > { %3326 = vmatpush.bf16.msra.mxu1 %v6111_v24 }
 0x234   : > { %v2908_v51 = vpop.f32.mrf.mxu2 }
 0x235   : > { %v2909_v59 = vadd.f32 %v2908_v51, %v7736_v60  ;;  %v6652_v51 = vld [vmem:[#allocation11 + $0x3ac] sm:$0xf0] }
 0x236   : > { %v2939_v0 = vpop.f32.mrf.mxu3  ;;  %v5635_v56 = vor.u32 %v6652_v51, %v5634_v52  ;;  %v5756_v51 = vld [vmem:[#allocation11 + $0x4a8] sm:$0xf0] }
 0x237   : > { %v7761_v2 = vadd.f32 %v2937_v41, %v2909_v59  ;;  %v6079_v41 = vor.u32 %v6759_v36, %v6076_v42 }
 0x238   : > { %3383 = vmatpush.bf16.msrb.mxu3 %v5635_v56 }
 0x239   : > { %3327 = vmatpush.bf16.msra.mxu1 %v6079_v41  ;;  %v6628_v41 = vld [vmem:[#allocation11 + $0x2ec] sm:$0xf0] }
 0x23b   : > { %3115 = vmatmul.bf16.gmra.mxu1 %v7722_v23  ;;  %3173 = vmatmul.bf16.gmra.mxu3 %v7670_v47 }
 0x23c   : > { %v2910_v21 = vpop.f32.mrf.mxu2  ;;  %3384 = vmatpush.bf16.msrb.mxu3 %v5603_v9 }
 0x23d   : > { %v2911_v3 = vadd.f32 %v2910_v21, %v7736_v60  ;;  %v6596_v21 = vld [vmem:[#allocation11 + $0x1ec] sm:$0xf0]  ;;  %3328 = vmatpush.bf16.msra.mxu1 %v6047_v46 }
 0x23e   : > { %v2942_v8 = vpop.f32.mrf.mxu3  ;;  %v5282_v46 = vld [vmem:[#allocation11 + $0xd0] sm:$0xf] }
 0x23f   : > { %v7766_v12 = vadd.f32 %v2939_v0, %v2911_v3  ;;  %v5410_v0 = vld [vmem:[#allocation11 + $0x1d0] sm:$0xf] }
 0x240   : > { %v5411_v5 = vor.u32 %v6596_v21, %v5410_v0  ;;  %v6743_v0 = vld [vmem:[#allocation11 + $0x68c] sm:$0xf] }
 0x241   : > { %3086 = vmatmul.bf16.gmra.mxu0 %v7727_v34  ;;  %3144 = vmatmul.bf16.gmra.mxu2 %v7677_v61  ;;  %v6012_v21 = vld [vmem:[#allocation11 + $0x6a8] sm:$0xf0] }
 0x242   : > { %3353 = vmatpush.bf16.msrb.mxu2 %v5411_v5  ;;  %v5314_v5 = vld [vmem:[#allocation11 + $0x110] sm:$0xf]  ;;  %v6015_v7 = vor.u32 %v6743_v0, %v6012_v21 }
 0x243   : > { %v6604_v21 = vld [vmem:[#allocation11 + $0x22c] sm:$0xf0] }
 0x244   : > { %v2913_v16 = vpop.f32.mrf.mxu2  ;;  %3329 = vmatpush.bf16.msra.mxu1 %v6015_v7 }
 0x245   : > { %v2914_v18 = vadd.f32 %v2913_v16, %v7736_v60 }
 0x246   : > { %v2944_v55 = vpop.f32.mrf.mxu3 }
 0x247   : > { %v7771_v26 = vadd.f32 %v2942_v8, %v2914_v18  ;;  %v5788_v8 = vld [vmem:[#allocation11 + $0x4e8] sm:$0xf0] }
 0x248   : > { %v2985_v30 = vpop.f32.mrf.mxu1 }
 0x24b   : > { %3216 = vmatmul.bf16.vlgmr.msrb.gmra.mxu1 %v7686_v19  ;;  %3274 = vmatmul.bf16.vlgmr.msra.gmra.mxu3 %v7640_v11 }
 0x24c   : > { %v2915_v38 = vpop.f32.mrf.mxu2 }
 0x24d   : > { %v2916_v43 = vadd.f32 %v2915_v38, %v7736_v60  ;;  %v7782_v60 = vperm.slane %v7733_v54, 1  ;;  %v6580_v38 = vld [vmem:[#allocation11 + $0x16c] sm:$0xf0] }
 0x24e   : > { %v2956_v48 = vpop.f32.mrf.mxu0  ;;  %v3043_v50 = vpop.f32.mrf.mxu3  ;;  %v5347_v42 = vor.u32 %v6580_v38, %v5346_v37 }
 0x24f   : > { %v2957_v53 = vadd.f32 %v2956_v48, %v7741_v32  ;;  %v7777_v59 = vadd.f32 %v2944_v55, %v2916_v43  ;;  %v6687_v32 = vld [vmem:[#allocation11 + $0x4cc] sm:$0xf]  ;;  %v5379_v55 = vor.u32 %v6588_v17, %v5378_v15  ;;  %v5538_v43 = vld [vmem:[#allocation11 + $0x2d0] sm:$0xf] }
 0x250   : > { %v2987_v1 = vpop.f32.mrf.mxu1  ;;  %v5791_v63 = vor.u32 %v6687_v32, %v5788_v8  ;;  %v6564_v17 = vld [vmem:[#allocation11 + $0xec] sm:$0xf0] }
 0x251   : > { %v2986_v3 = vadd.f32 %v2985_v30, %v2957_v53  ;;  %3187 = vmatmul.bf16.vlgmr.msrb.gmra.mxu0 %v7691_v40  ;;  %3245 = vmatmul.bf16.vlgmr.msra.gmra.mxu2 %v7644_v28  ;;  %v5570_v30 = vld [vmem:[#allocation11 + $0x310] sm:$0xf]  ;;  %v5539_v53 = vor.u32 %v6628_v41, %v5538_v43 }
 0x252   : > { %3299 = vmatpush.bf16.msra.mxu0 %v5791_v63  ;;  %v5571_v4 = vor.u32 %v6636_v31, %v5570_v30  ;;  %3354 = vmatpush.bf16.msrb.mxu2 %v5379_v55  ;;  %v6620_v63 = vld [vmem:[#allocation11 + $0x2ac] sm:$0xf0]  ;;  %v5283_v55 = vor.u32 %v6564_v17, %v5282_v46  ;;  %v6735_v30 = vld [vmem:[#allocation11 + $0x64c] sm:$0xf] }
 0x253   : > { %v3817_v48 = vmax.f32 %v2986_v3, 0.0  ;;  %v6572_v3 = vld [vmem:[#allocation11 + $0x12c] sm:$0xf0]  ;;  %v5980_v31 = vld [vmem:[#allocation11 + $0x668] sm:$0xf0] }
 0x254   : > { %v3014_v10 = vpop.f32.mrf.mxu2  ;;  %3385 = vmatpush.bf16.msrb.mxu3 %v5571_v4  ;;  %v5315_v9 = vor.u32 %v6572_v3, %v5314_v5  ;;  %v6671_v4 = vld [vmem:[#allocation11 + $0x44c] sm:$0xf]  ;;  %v5983_v37 = vor.u32 %v6735_v30, %v5980_v31  ;;  %v6556_v43 = vld [vmem:[#allocation11 + $0xac] sm:$0xf0] }
 0x255   : > { %v3015_v16 = vadd.f32 %v3014_v10, %v7782_v60  ;;  %v5506_v10 = vld [vmem:[#allocation11 + $0x290] sm:$0xf] }
 0x256   : > { %v2958_v18 = vpop.f32.mrf.mxu0  ;;  %v3045_v24 = vpop.f32.mrf.mxu3  ;;  %3355 = vmatpush.bf16.msrb.mxu2 %v5347_v42  ;;  %v5507_v14 = vor.u32 %v6620_v63, %v5506_v10  ;;  %v5250_v42 = vld [vmem:[#allocation11 + $0x90] sm:$0xf]  ;;  %3330 = vmatpush.bf16.msra.mxu1 %v5983_v37 }
 0x257   : > { %v2959_v33 = vadd.f32 %v2958_v18, %v7746_v57  ;;  %v7786_v35 = vadd.f32 %v3043_v50, %v3015_v16  ;;  %v6679_v57 = vld [vmem:[#allocation11 + $0x48c] sm:$0xf]  ;;  %v5218_v3 = vld [vmem:[#allocation11 + $0x50] sm:$0xf] }
 0x258   : > { %v2990_v36 = vpop.f32.mrf.mxu1  ;;  %v5759_v56 = vor.u32 %v6679_v57, %v5756_v51  ;;  %3386 = vmatpush.bf16.msrb.mxu3 %v5539_v53  ;;  %v6727_v51 = vld [vmem:[#allocation11 + $0x60c] sm:$0xf]  ;;  %v5186_v17 = vld [vmem:[#allocation11 + $0x10] sm:$0xf] }
 0x259   : > { %v2988_v39 = vadd.f32 %v2987_v1, %v2959_v33  ;;  %v5474_v33 = vld [vmem:[#allocation11 + $0x250] sm:$0xf]  ;;  %v5948_v53 = vld [vmem:[#allocation11 + $0x628] sm:$0xf0] }
 0x25a   : > { %3300 = vmatpush.bf16.msra.mxu0 %v5759_v56  ;;  %3356 = vmatpush.bf16.msrb.mxu2 %v5315_v9  ;;  %v5951_v0 = vor.u32 %v6727_v51, %v5948_v53 }
 0x25b   : > { %v3825_v52 = vmax.f32 %v2988_v39, 0.0  ;;  %3221 = vmatmul.bf16.gmra.mxu1 %v7698_v20  ;;  %3279 = vmatmul.bf16.gmra.mxu3 %v7650_v22  ;;  %v6612_v39 = vld [vmem:[#allocation11 + $0x26c] sm:$0xf0] }
 0x25c   : > { %v3016_v50 = vpop.f32.mrf.mxu2  ;;  %3387 = vmatpush.bf16.msrb.mxu3 %v5507_v14  ;;  %v5475_v41 = vor.u32 %v6612_v39, %v5474_v33  ;;  %3331 = vmatpush.bf16.msra.mxu1 %v5951_v0  ;;  %v5692_v14 = vld [vmem:[#allocation11 + $0x428] sm:$0xf0]  ;;  %v6724_v39 = vld [vmem:[#allocation11 + $0x5ec] sm:$0xf0] }
 0x25d   : > { %v7790_v1 = vpack.c.bf16 %v3825_v52, %v3817_v48  ;;  %v3017_v6 = vadd.f32 %v3016_v50, %v7782_v60  ;;  %v5251_v48 = vor.u32 %v6556_v43, %v5250_v42  ;;  %v5442_v50 = vld [vmem:[#allocation11 + $0x210] sm:$0xf] }
 0x25e   : > { %v2961_v32 = vpop.f32.mrf.mxu0  ;;  %v3048_v8 = vpop.f32.mrf.mxu3  ;;  %3357 = vmatpush.bf16.msrb.mxu2 %v5283_v55  ;;  %v5443_v7 = vor.u32 %v6604_v21, %v5442_v50  ;;  %v6540_v55 = vld [vmem:[#allocation11 + $0x2c] sm:$0xf0] }
 0x25f   : > { %v2962_v13 = vadd.f32 %v2961_v32, %v7751_v25  ;;  %v7794_v15 = vadd.f32 %v3045_v24, %v3017_v6  ;;  %v5724_v25 = vld [vmem:[#allocation11 + $0x468] sm:$0xf0]  ;;  %v6548_v32 = vld [vmem:[#allocation11 + $0x6c] sm:$0xf0]  ;;  %v5187_v31 = vor.u32 %v6540_v55, %v5186_v17 }
 0x260   : > { %v2992_v16 = vpop.f32.mrf.mxu1  ;;  %v5727_v24 = vor.u32 %v6671_v4, %v5724_v25  ;;  %3388 = vmatpush.bf16.msrb.mxu3 %v5475_v41  ;;  %v5219_v10 = vor.u32 %v6548_v32, %v5218_v3  ;;  %v6788_v41 = vld [vmem:[#allocation11 + $0x7ec] sm:$0xf0] }
 0x261   : > { %v2991_v18 = vadd.f32 %v2990_v36, %v2962_v13  ;;  %3192 = vmatmul.bf16.gmra.mxu0 %v7703_v49  ;;  %3250 = vmatmul.bf16.gmra.mxu2 %v7654_v27  ;;  %v5890_v3 = vld [vmem:[#allocation11 + $0x590] sm:$0xf] }
 0x262   : > { %3301 = vmatpush.bf16.msra.mxu0 %v5727_v24  ;;  %3358 = vmatpush.bf16.msrb.mxu2 %v5251_v48  ;;  %v5922_v24 = vld [vmem:[#allocation11 + $0x5d0] sm:$0xf] }
 0x263   : > { %v3833_v63 = vmax.f32 %v2991_v18, 0.0  ;;  %v5923_v43 = vor.u32 %v6724_v39, %v5922_v24  ;;  %v6716_v32 = vld [vmem:[#allocation11 + $0x5ac] sm:$0xf0] }
 0x264   : > { %v3019_v38 = vpop.f32.mrf.mxu2  ;;  %3389 = vmatpush.bf16.msrb.mxu3 %v5443_v7 }
 0x265   : > { %v3020_v36 = vadd.f32 %v3019_v38, %v7782_v60 }
 0x266   : > { %v2963_v52 = vpop.f32.mrf.mxu0  ;;  %v3050_v57 = vpop.f32.mrf.mxu3  ;;  %3359 = vmatpush.bf16.msrb.mxu2 %v5219_v10 }
 0x267   : > { %v2964_v56 = vadd.f32 %v2963_v52, %v7756_v45  ;;  %v7800_v5 = vadd.f32 %v3048_v8, %v3020_v36  ;;  %v6663_v45 = vld [vmem:[#allocation11 + $0x40c] sm:$0xf]  ;;  %v6178_v36 = vld [vmem:[#allocation11 + $0x7d0] sm:$0xf] }
 0x268   : > { %v2995_v6 = vpop.f32.mrf.mxu1  ;;  %v5695_v8 = vor.u32 %v6663_v45, %v5692_v14  ;;  %v6179_v52 = vor.u32 %v6788_v41, %v6178_v36  ;;  %v6780_v45 = vld [vmem:[#allocation11 + $0x7ac] sm:$0xf0] }
 0x269   : > { %v2993_v9 = vadd.f32 %v2992_v16, %v2964_v56 }
 0x26a   : > { %3302 = vmatpush.bf16.msra.mxu0 %v5695_v8  ;;  %3360 = vmatpush.bf16.msrb.mxu2 %v5187_v31  ;;  %v6708_v31 = vld [vmem:[#allocation11 + $0x56c] sm:$0xf0] }
 0x26b   : > { %v3841_v13 = vmax.f32 %v2993_v9, 0.0  ;;  %3226 = vmatmul.bf16.gmra.mxu1 %v7710_v44  ;;  %3284 = vmatmul.bf16.gmra.mxu3 %v7660_v62  ;;  %v6146_v9 = vld [vmem:[#allocation11 + $0x790] sm:$0xf] }
 0x26c   : > { %v3021_v46 = vpop.f32.mrf.mxu2  ;;  %3440 = vmatpush.bf16.msrb.mxu1 %v6179_v52  ;;  %v5668_v52 = vld [vmem:[#allocation11 + $0x3f0] sm:$0xf0] }
 0x26d   : > { %v3022_v30 = vadd.f32 %v3021_v46, %v7782_v60  ;;  %v7805_v16 = vpack.c.bf16 %v3841_v13, %v3833_v63  ;;  %v5891_v13 = vor.u32 %v6716_v32, %v5890_v3  ;;  %v6147_v46 = vor.u32 %v6780_v45, %v6146_v9 }
 0x26e   : > { %v2966_v33 = vpop.f32.mrf.mxu0  ;;  %v3053_v18 = vpop.f32.mrf.mxu3  ;;  %3411 = vmatpush.bf16.msrb.mxu0 %v5923_v43 }
 0x26f   : > { %v2967_v4 = vadd.f32 %v2966_v33, %v7761_v2  ;;  %v7808_v25 = vadd.f32 %v3050_v57, %v3022_v30  ;;  %v5858_v30 = vld [vmem:[#allocation11 + $0x550] sm:$0xf] }
 0x270   : > { %v2997_v37 = vpop.f32.mrf.mxu1  ;;  %3441 = vmatpush.bf16.msrb.mxu1 %v6147_v46 }
 0x271   : > { %v2996_v38 = vadd.f32 %v2995_v6, %v2967_v4  ;;  %3197 = vmatmul.bf16.gmra.mxu0 %v7715_v58  ;;  %3255 = vmatmul.bf16.gmra.mxu2 %v7664_v29  ;;  %v6114_v4 = vld [vmem:[#allocation11 + $0x750] sm:$0xf] }
 0x272   : > { %3412 = vmatpush.bf16.msrb.mxu0 %v5891_v13  ;;  %v5636_v13 = vld [vmem:[#allocation11 + $0x3b0] sm:$0xf0] }
 0x273   : > { %v3849_v0 = vmax.f32 %v2996_v38, 0.0 }
 0x274   : > { %v3024_v42 = vpop.f32.mrf.mxu2 }
 0x275   : > { %v3025_v48 = vadd.f32 %v3024_v42, %v7782_v60 }
 0x276   : > { %v2968_v51 = vpop.f32.mrf.mxu0  ;;  %v3055_v2 = vpop.f32.mrf.mxu3 }
 0x277   : > { %v2969_v57 = vadd.f32 %v2968_v51, %v7766_v12  ;;  %v7814_v53 = vadd.f32 %v3053_v18, %v3025_v48  ;;  %v5859_v18 = vor.u32 %v6708_v31, %v5858_v30  ;;  %v6656_v48 = vld [vmem:[#allocation11 + $0x3d4] sm:$0xf] }
 0x278   : > { %v3000_v50 = vpop.f32.mrf.mxu1  ;;  %v5412_v30 = vld [vmem:[#allocation11 + $0x1f0] sm:$0xf0] }
 0x279   : > { %v2998_v56 = vadd.f32 %v2997_v37, %v2969_v57  ;;  %v6772_v37 = vld [vmem:[#allocation11 + $0x76c] sm:$0xf0]  ;;  %3413 = vmatpush.bf16.msrb.mxu0 %v5859_v18  ;;  %v6640_v18 = vld [vmem:[#allocation11 + $0x354] sm:$0xf] }
 0x27a   : > { %v5826_v57 = vld [vmem:[#allocation11 + $0x510] sm:$0xf] }
 0x27b   : > { %v3857_v21 = vmax.f32 %v2998_v56, 0.0  ;;  %3231 = vmatmul.bf16.gmra.mxu1 %v7722_v23  ;;  %3289 = vmatmul.bf16.gmra.mxu3 %v7670_v47  ;;  %v5671_v56 = vor.u32 %v6656_v48, %v5668_v52  ;;  %v5380_v52 = vld [vmem:[#allocation11 + $0x1b0] sm:$0xf0] }
 0x27c   : > { %v3026_v6 = vpop.f32.mrf.mxu2 }
 0x27d   : > { %v3027_v7 = vadd.f32 %v3026_v6, %v7782_v60  ;;  %v7819_v10 = vpack.c.bf16 %v3857_v21, %v3849_v0  ;;  %v6082_v6 = vld [vmem:[#allocation11 + $0x710] sm:$0xf]  ;;  %3498 = vmatpush.bf16.msra.mxu3 %v5671_v56 }
 0x27e   : > { %v2971_v12 = vpop.f32.mrf.mxu0  ;;  %v3058_v63 = vpop.f32.mrf.mxu3 }
 0x27f   : > { %v2972_v14 = vadd.f32 %v2971_v12, %v7771_v26  ;;  %v7822_v8 = vadd.f32 %v3055_v2, %v3027_v7  ;;  %v6115_v26 = vor.u32 %v6772_v37, %v6114_v4  ;;  %v5604_v4 = vld [vmem:[#allocation11 + $0x370] sm:$0xf0]  ;;  %v6692_v37 = vld [vmem:[#allocation11 + $0x4ec] sm:$0xf0] }
 0x280   : > { %v3002_v17 = vpop.f32.mrf.mxu1 }
 0x281   : > { %v3001_v55 = vadd.f32 %v3000_v50, %v2972_v14  ;;  %3202 = vmatmul.bf16.gmra.mxu0 %v7727_v34  ;;  %3260 = vmatmul.bf16.gmra.mxu2 %v7677_v61  ;;  %v6700_v50 = vld [vmem:[#allocation11 + $0x52c] sm:$0xf0] }
 0x282   : > { %3442 = vmatpush.bf16.msrb.mxu1 %v6115_v26  ;;  %v5827_v21 = vor.u32 %v6700_v50, %v5826_v57  ;;  %v6632_v57 = vld [vmem:[#allocation11 + $0x314] sm:$0xf] }
 0x283   : > { %v3865_v51 = vmax.f32 %v3001_v55, 0.0  ;;  %v6592_v55 = vld [vmem:[#allocation11 + $0x1d4] sm:$0xf] }
 0x284   : > { %v3029_v33 = vpop.f32.mrf.mxu2  ;;  %3414 = vmatpush.bf16.msrb.mxu0 %v5827_v21  ;;  %v5572_v50 = vld [vmem:[#allocation11 + $0x330] sm:$0xf0] }
 0x285   : > { %v3030_v38 = vadd.f32 %v3029_v33, %v7782_v60  ;;  %v5415_v33 = vor.u32 %v6592_v55, %v5412_v30  ;;  %v6684_v55 = vld [vmem:[#allocation11 + $0x4ac] sm:$0xf0] }
 0x286   : > { %v2973_v24 = vpop.f32.mrf.mxu0  ;;  %v3060_v39 = vpop.f32.mrf.mxu3 }
 0x287   : > { %v2974_v42 = vadd.f32 %v2973_v24, %v7777_v59  ;;  %v7828_v43 = vadd.f32 %v3058_v63, %v3030_v38  ;;  %v6764_v59 = vld [vmem:[#allocation11 + $0x72c] sm:$0xf0]  ;;  %v6648_v63 = vld [vmem:[#allocation11 + $0x394] sm:$0xf]  ;;  %3469 = vmatpush.bf16.msra.mxu2 %v5415_v33  ;;  %v5607_v38 = vor.u32 %v6640_v18, %v5604_v4 }
 0x288   : > { %v3101_v36 = vpop.f32.mrf.mxu1  ;;  %v6083_v3 = vor.u32 %v6764_v59, %v6082_v6  ;;  %v5639_v14 = vor.u32 %v6648_v63, %v5636_v13  ;;  %v6576_v59 = vld [vmem:[#allocation11 + $0x154] sm:$0xf]  ;;  %v6018_v18 = vld [vmem:[#allocation11 + $0x690] sm:$0xf] }
 0x289   : > { %v3003_v41 = vadd.f32 %v3002_v17, %v2974_v42  ;;  %v6756_v42 = vld [vmem:[#allocation11 + $0x6ec] sm:$0xf0]  ;;  %v6624_v63 = vld [vmem:[#allocation11 + $0x2d4] sm:$0xf] }
 0x28a   : > { %3443 = vmatpush.bf16.msrb.mxu1 %v6083_v3  ;;  %3499 = vmatpush.bf16.msra.mxu3 %v5639_v14  ;;  %v5540_v13 = vld [vmem:[#allocation11 + $0x2f0] sm:$0xf0]  ;;  %v6748_v4 = vld [vmem:[#allocation11 + $0x6ac] sm:$0xf0] }
 0x28b   : > { %v3873_v2 = vmax.f32 %v3003_v41, 0.0  ;;  %3332 = vmatmul.bf16.vlgmr.msra.gmra.mxu1 %v7686_v19  ;;  %3390 = vmatmul.bf16.vlgmr.msrb.gmra.mxu3 %v7640_v11  ;;  %v5543_v30 = vor.u32 %v6624_v63, %v5540_v13  ;;  %v5476_v13 = vld [vmem:[#allocation11 + $0x270] sm:$0xf0] }
 0x28c   : > { %v3031_v0 = vpop.f32.mrf.mxu2 }
 0x28d   : > { %v3032_v7 = vadd.f32 %v3031_v0, %v7782_v60  ;;  %v7833_v32 = vpack.c.bf16 %v3873_v2, %v3865_v51  ;;  %v7841_v60 = vperm.slane %v7733_v54, 2  ;;  %v5575_v0 = vor.u32 %v6632_v57, %v5572_v50  ;;  %v5284_v57 = vld [vmem:[#allocation11 + $0xf0] sm:$0xf0] }
 0x28e   : > { %v3072_v9 = vpop.f32.mrf.mxu0  ;;  %v3159_v12 = vpop.f32.mrf.mxu3  ;;  %3500 = vmatpush.bf16.msra.mxu3 %v5607_v38  ;;  %v6019_v38 = vor.u32 %v6748_v4, %v6018_v18  ;;  %v6732_v18 = vld [vmem:[#allocation11 + $0x62c] sm:$0xf0]  ;;  %v6600_v4 = vld [vmem:[#allocation11 + $0x214] sm:$0xf] }
 0x28f   : > { %v3073_v45 = vadd.f32 %v3072_v9, %v7786_v35  ;;  %v7836_v46 = vadd.f32 %v3060_v39, %v3032_v7  ;;  %v5794_v35 = vld [vmem:[#allocation11 + $0x4d0] sm:$0xf]  ;;  %v5348_v7 = vld [vmem:[#allocation11 + $0x170] sm:$0xf0] }
 0x290   : > { %v3103_v17 = vpop.f32.mrf.mxu1  ;;  %v5795_v24 = vor.u32 %v6692_v37, %v5794_v35  ;;  %v6050_v39 = vld [vmem:[#allocation11 + $0x6d0] sm:$0xf]  ;;  %v5351_v9 = vor.u32 %v6576_v59, %v5348_v7  ;;  %v6568_v35 = vld [vmem:[#allocation11 + $0x114] sm:$0xf] }
 0x291   : > { %v3102_v31 = vadd.f32 %v3101_v36, %v3073_v45  ;;  %3303 = vmatmul.bf16.vlgmr.msra.gmra.mxu0 %v7691_v40  ;;  %3361 = vmatmul.bf16.vlgmr.msrb.gmra.mxu2 %v7644_v28  ;;  %v6584_v36 = vld [vmem:[#allocation11 + $0x194] sm:$0xf]  ;;  %v6051_v48 = vor.u32 %v6756_v42, %v6050_v39  ;;  %v6740_v59 = vld [vmem:[#allocation11 + $0x66c] sm:$0xf0] }
 0x292   : > { %3415 = vmatpush.bf16.msrb.mxu0 %v5795_v24  ;;  %v5383_v2 = vor.u32 %v6584_v36, %v5380_v52  ;;  %3501 = vmatpush.bf16.msra.mxu3 %v5575_v0  ;;  %v6616_v42 = vld [vmem:[#allocation11 + $0x294] sm:$0xf]  ;;  %v5986_v0 = vld [vmem:[#allocation11 + $0x650] sm:$0xf] }
 0x293   : > { %3444 = vmatpush.bf16.msrb.mxu1 %v6051_v48  ;;  %v3818_v45 = vmax.f32 %v3102_v31, 0.0  ;;  %v5316_v31 = vld [vmem:[#allocation11 + $0x130] sm:$0xf0] }
 0x294   : > { %v3130_v26 = vpop.f32.mrf.mxu2  ;;  %3470 = vmatpush.bf16.msra.mxu2 %v5383_v2  ;;  %v5319_v39 = vor.u32 %v6568_v35, %v5316_v31  ;;  %v5508_v36 = vld [vmem:[#allocation11 + $0x2b0] sm:$0xf0] }
 0x295   : > { %v3131_v41 = vadd.f32 %v3130_v26, %v7841_v60  ;;  %v5511_v48 = vor.u32 %v6616_v42, %v5508_v36  ;;  %v6560_v2 = vld [vmem:[#allocation11 + $0xd4] sm:$0xf] }
 0x296   : > { %v3074_v51 = vpop.f32.mrf.mxu0  ;;  %v3161_v54 = vpop.f32.mrf.mxu3  ;;  %3502 = vmatpush.bf16.msra.mxu3 %v5543_v30  ;;  %v6608_v7 = vld [vmem:[#allocation11 + $0x254] sm:$0xf] }
 0x297   : > { %v3075_v56 = vadd.f32 %v3074_v51, %v7794_v15  ;;  %v7845_v21 = vadd.f32 %v3159_v12, %v3131_v41  ;;  %v5762_v15 = vld [vmem:[#allocation11 + $0x490] sm:$0xf]  ;;  %3445 = vmatpush.bf16.msrb.mxu1 %v6019_v38  ;;  %v5444_v38 = vld [vmem:[#allocation11 + $0x230] sm:$0xf0] }
 0x298   : > { %v3106_v6 = vpop.f32.mrf.mxu1  ;;  %v5763_v33 = vor.u32 %v6684_v55, %v5762_v15  ;;  %3471 = vmatpush.bf16.msra.mxu2 %v5351_v9  ;;  %v5987_v9 = vor.u32 %v6740_v59, %v5986_v0  ;;  %v5479_v15 = vor.u32 %v6608_v7, %v5476_v13  ;;  %v6544_v42 = vld [vmem:[#allocation11 + $0x54] sm:$0xf] }
 0x299   : > { %v3104_v3 = vadd.f32 %v3103_v17, %v3075_v56  ;;  %v5287_v56 = vor.u32 %v6560_v2, %v5284_v57  ;;  %v5220_v36 = vld [vmem:[#allocation11 + $0x70] sm:$0xf0] }
 0x29a   : > { %3416 = vmatpush.bf16.msrb.mxu0 %v5763_v33  ;;  %3503 = vmatpush.bf16.msra.mxu3 %v5511_v48  ;;  %v5954_v33 = vld [vmem:[#allocation11 + $0x610] sm:$0xf]  ;;  %v5223_v48 = vor.u32 %v6544_v42, %v5220_v36  ;;  %v6536_v59 = vld [vmem:[#allocation11 + $0x14] sm:$0xf] }
 0x29b   : > { %v3826_v14 = vmax.f32 %v3104_v3, 0.0  ;;  %3337 = vmatmul.bf16.gmra.mxu1 %v7698_v20  ;;  %3395 = vmatmul.bf16.gmra.mxu3 %v7650_v22  ;;  %v5730_v3 = vld [vmem:[#allocation11 + $0x450] sm:$0xf]  ;;  %v5188_v7 = vld [vmem:[#allocation11 + $0x30] sm:$0xf0] }
 0x29c   : > { %v3132_v12 = vpop.f32.mrf.mxu2  ;;  %3472 = vmatpush.bf16.msra.mxu2 %v5319_v39  ;;  %3446 = vmatpush.bf16.msrb.mxu1 %v5987_v9  ;;  %v5447_v39 = vor.u32 %v6600_v4, %v5444_v38 }
 0x29d   : > { %v7849_v17 = vpack.c.bf16 %v3826_v14, %v3818_v45  ;;  %v3133_v37 = vadd.f32 %v3132_v12, %v7841_v60  ;;  %v6552_v45 = vld [vmem:[#allocation11 + $0x94] sm:$0xf] }
 0x29e   : > { %v3077_v26 = vpop.f32.mrf.mxu0  ;;  %v3164_v24 = vpop.f32.mrf.mxu3  ;;  %v5252_v14 = vld [vmem:[#allocation11 + $0xb0] sm:$0xf0]  ;;  %3504 = vmatpush.bf16.msra.mxu3 %v5479_v15 }
 0x29f   : > { %v3078_v41 = vadd.f32 %v3077_v26, %v7800_v5  ;;  %v7853_v52 = vadd.f32 %v3161_v54, %v3133_v37  ;;  %v6676_v5 = vld [vmem:[#allocation11 + $0x46c] sm:$0xf0]  ;;  %v5255_v55 = vor.u32 %v6552_v45, %v5252_v14  ;;  %v5955_v37 = vor.u32 %v6732_v18, %v5954_v33  ;;  %v6720_v14 = vld [vmem:[#allocation11 + $0x5d4] sm:$0xf] }
 0x2a0   : > { %v3108_v51 = vpop.f32.mrf.mxu1  ;;  %v5731_v54 = vor.u32 %v6676_v5, %v5730_v3  ;;  %3473 = vmatpush.bf16.msra.mxu2 %v5287_v56  ;;  %v6668_v56 = vld [vmem:[#allocation11 + $0x42c] sm:$0xf0]  ;;  %v5191_v5 = vor.u32 %v6536_v59, %v5188_v7  ;;  %v6180_v33 = vld [vmem:[#allocation11 + $0x7f0] sm:$0xf0] }
 0x2a1   : > { %v3107_v50 = vadd.f32 %v3106_v6, %v3078_v41  ;;  %3308 = vmatmul.bf16.gmra.mxu0 %v7703_v49  ;;  %3366 = vmatmul.bf16.gmra.mxu2 %v7654_v27 }
 0x2a2   : > { %3417 = vmatpush.bf16.msrb.mxu0 %v5731_v54  ;;  %3447 = vmatpush.bf16.msrb.mxu1 %v5955_v37 }
 0x2a3   : > { %v3834_v2 = vmax.f32 %v3107_v50, 0.0  ;;  %3505 = vmatpush.bf16.msra.mxu3 %v5447_v39 }
 0x2a4   : > { %v3135_v63 = vpop.f32.mrf.mxu2  ;;  %3474 = vmatpush.bf16.msra.mxu2 %v5255_v55 }
 0x2a5   : > { %v3136_v6 = vadd.f32 %v3135_v63, %v7841_v60 }
 0x2a6   : > { %v3079_v30 = vpop.f32.mrf.mxu0  ;;  %v3166_v12 = vpop.f32.mrf.mxu3 }
 0x2a7   : > { %v3080_v35 = vadd.f32 %v3079_v30, %v7808_v25  ;;  %v7859_v31 = vadd.f32 %v3164_v24, %v3136_v6  ;;  %v5698_v25 = vld [vmem:[#allocation11 + $0x410] sm:$0xf]  ;;  %v5924_v6 = vld [vmem:[#allocation11 + $0x5f0] sm:$0xf0] }
 0x2a8   : > { %v3111_v26 = vpop.f32.mrf.mxu1  ;;  %v5699_v24 = vor.u32 %v6668_v56, %v5698_v25  ;;  %3475 = vmatpush.bf16.msra.mxu2 %v5223_v48  ;;  %v5927_v55 = vor.u32 %v6720_v14, %v5924_v6  ;;  %v6784_v30 = vld [vmem:[#allocation11 + $0x7d4] sm:$0xf] }
 0x2a9   : > { %v3109_v41 = vadd.f32 %v3108_v51, %v3080_v35  ;;  %v6183_v4 = vor.u32 %v6784_v30, %v6180_v33  ;;  %v6712_v48 = vld [vmem:[#allocation11 + $0x594] sm:$0xf] }
 0x2aa   : > { %3418 = vmatpush.bf16.msrb.mxu0 %v5699_v24  ;;  %v6148_v24 = vld [vmem:[#allocation11 + $0x7b0] sm:$0xf0] }
 0x2ab   : > { %v3842_v57 = vmax.f32 %v3109_v41, 0.0  ;;  %3342 = vmatmul.bf16.gmra.mxu1 %v7710_v44  ;;  %3400 = vmatmul.bf16.gmra.mxu3 %v7660_v62  ;;  %v6768_v14 = vld [vmem:[#allocation11 + $0x754] sm:$0xf] }
 0x2ac   : > { %v3137_v0 = vpop.f32.mrf.mxu2  ;;  %3476 = vmatpush.bf16.msra.mxu2 %v5191_v5  ;;  %3556 = vmatpush.bf16.msra.mxu1 %v6183_v4  ;;  %v6116_v6 = vld [vmem:[#allocation11 + $0x770] sm:$0xf0] }
 0x2ad   : > { %v3138_v3 = vadd.f32 %v3137_v0, %v7841_v60  ;;  %v7864_v51 = vpack.c.bf16 %v3842_v57, %v3834_v2  ;;  %v5892_v2 = vld [vmem:[#allocation11 + $0x5b0] sm:$0xf0] }
 0x2ae   : > { %v3082_v9 = vpop.f32.mrf.mxu0  ;;  %v3169_v50 = vpop.f32.mrf.mxu3  ;;  %3527 = vmatpush.bf16.msra.mxu0 %v5927_v55  ;;  %v6776_v57 = vld [vmem:[#allocation11 + $0x794] sm:$0xf]  ;;  %v5895_v0 = vor.u32 %v6712_v48, %v5892_v2 }
 0x2af   : > { %v3083_v63 = vadd.f32 %v3082_v9, %v7814_v53  ;;  %v7867_v54 = vadd.f32 %v3166_v12, %v3138_v3  ;;  %v6151_v7 = vor.u32 %v6776_v57, %v6148_v24  ;;  %v6760_v2 = vld [vmem:[#allocation11 + $0x714] sm:$0xf] }
 0x2b0   : > { %v3113_v13 = vpop.f32.mrf.mxu1 }
 0x2b1   : > { %v3112_v45 = vadd.f32 %v3111_v26, %v3083_v63  ;;  %3313 = vmatmul.bf16.gmra.mxu0 %v7715_v58  ;;  %3371 = vmatmul.bf16.gmra.mxu2 %v7664_v29  ;;  %v5860_v63 = vld [vmem:[#allocation11 + $0x570] sm:$0xf0] }
 0x2b2   : > { %3528 = vmatpush.bf16.msra.mxu0 %v5895_v0  ;;  %3557 = vmatpush.bf16.msra.mxu1 %v6151_v7  ;;  %v6653_v7 = vld [vmem:[#allocation11 + $0x3b4] sm:$0xf0] }
 0x2b3   : > { %v3850_v39 = vmax.f32 %v3112_v45, 0.0 }
 0x2b4   : > { %v3140_v15 = vpop.f32.mrf.mxu2 }
 0x2b5   : > { %v3141_v18 = vadd.f32 %v3140_v15, %v7841_v60 }
 0x2b6   : > { %v3084_v35 = vpop.f32.mrf.mxu0  ;;  %v3171_v53 = vpop.f32.mrf.mxu3 }
 0x2b7   : > { %v3085_v12 = vadd.f32 %v3084_v35, %v7822_v8  ;;  %v7873_v37 = vadd.f32 %v3169_v50, %v3141_v18  ;;  %v6704_v50 = vld [vmem:[#allocation11 + $0x554] sm:$0xf] }
 0x2b8   : > { %v3116_v38 = vpop.f32.mrf.mxu1  ;;  %v5863_v45 = vor.u32 %v6704_v50, %v5860_v63 }
 0x2b9   : > { %v3114_v26 = vadd.f32 %v3113_v13, %v3085_v12  ;;  %v6661_v12 = vld [vmem:[#allocation11 + $0x3f4] sm:$0xf0] }
 0x2ba   : > { %3529 = vmatpush.bf16.msra.mxu0 %v5863_v45  ;;  %v6597_v45 = vld [vmem:[#allocation11 + $0x1f4] sm:$0xf0] }
 0x2bb   : > { %v3858_v42 = vmax.f32 %v3114_v26, 0.0  ;;  %3347 = vmatmul.bf16.gmra.mxu1 %v7722_v23  ;;  %3405 = vmatmul.bf16.gmra.mxu3 %v7670_v47 }
 0x2bc   : > { %v3142_v36 = vpop.f32.mrf.mxu2 }
 0x2bd   : > { %v3143_v41 = vadd.f32 %v3142_v36, %v7841_v60  ;;  %v7878_v25 = vpack.c.bf16 %v3858_v42, %v3850_v39  ;;  %v6696_v39 = vld [vmem:[#allocation11 + $0x514] sm:$0xf] }
 0x2be   : > { %v3087_v8 = vpop.f32.mrf.mxu0  ;;  %v3174_v56 = vpop.f32.mrf.mxu3  ;;  %v5828_v42 = vld [vmem:[#allocation11 + $0x530] sm:$0xf0] }
 0x2bf   : > { %v3088_v59 = vadd.f32 %v3087_v8, %v7828_v43  ;;  %v7881_v3 = vadd.f32 %v3171_v53, %v3143_v41  ;;  %v6119_v43 = vor.u32 %v6768_v14, %v6116_v6  ;;  %v5674_v53 = vld [vmem:[#allocation11 + $0x3d8] sm:$0xf]  ;;  %v5831_v48 = vor.u32 %v6696_v39, %v5828_v42 }
 0x2c0   : > { %v3118_v5 = vpop.f32.mrf.mxu1  ;;  %v5675_v36 = vor.u32 %v6661_v12, %v5674_v53  ;;  %v6052_v12 = vld [vmem:[#allocation11 + $0x6f0] sm:$0xf0]  ;;  %v6589_v42 = vld [vmem:[#allocation11 + $0x1b4] sm:$0xf0] }
 0x2c1   : > { %v3117_v9 = vadd.f32 %v3116_v38, %v3088_v59  ;;  %3318 = vmatmul.bf16.gmra.mxu0 %v7727_v34  ;;  %3376 = vmatmul.bf16.gmra.mxu2 %v7677_v61  ;;  %v5642_v59 = vld [vmem:[#allocation11 + $0x398] sm:$0xf] }
 0x2c2   : > { %3558 = vmatpush.bf16.msra.mxu1 %v6119_v43  ;;  %3614 = vmatpush.bf16.msrb.mxu3 %v5675_v36  ;;  %v6645_v43 = vld [vmem:[#allocation11 + $0x374] sm:$0xf0] }
 0x2c3   : > { %v3866_v38 = vmax.f32 %v3117_v9, 0.0  ;;  %3530 = vmatpush.bf16.msra.mxu0 %v5831_v48  ;;  %v5643_v9 = vor.u32 %v6653_v7, %v5642_v59  ;;  %v5354_v7 = vld [vmem:[#allocation11 + $0x158] sm:$0xf] }
 0x2c4   : > { %v3145_v13 = vpop.f32.mrf.mxu2 }
 0x2c5   : > { %v3146_v15 = vadd.f32 %v3145_v13, %v7841_v60  ;;  %v5418_v13 = vld [vmem:[#allocation11 + $0x1d8] sm:$0xf] }
 0x2c6   : > { %v3089_v55 = vpop.f32.mrf.mxu0  ;;  %v3176_v30 = vpop.f32.mrf.mxu3  ;;  %3615 = vmatpush.bf16.msrb.mxu3 %v5643_v9 }
 0x2c7   : > { %v3090_v33 = vadd.f32 %v3089_v55, %v7836_v46  ;;  %v7887_v18 = vadd.f32 %v3174_v56, %v3146_v15  ;;  %v6084_v46 = vld [vmem:[#allocation11 + $0x730] sm:$0xf0]  ;;  %v5419_v15 = vor.u32 %v6597_v45, %v5418_v13  ;;  %v5546_v45 = vld [vmem:[#allocation11 + $0x2d8] sm:$0xf] }
 0x2c8   : > { %v3217_v4 = vpop.f32.mrf.mxu1  ;;  %v6087_v8 = vor.u32 %v6760_v2, %v6084_v46  ;;  %v6688_v55 = vld [vmem:[#allocation11 + $0x4d4] sm:$0xf]  ;;  %v5578_v2 = vld [vmem:[#allocation11 + $0x318] sm:$0xf] }
 0x2c9   : > { %v3119_v35 = vadd.f32 %v3118_v5, %v3090_v33  ;;  %3585 = vmatpush.bf16.msrb.mxu2 %v5419_v15  ;;  %v6637_v46 = vld [vmem:[#allocation11 + $0x334] sm:$0xf0] }
 0x2ca   : > { %3559 = vmatpush.bf16.msra.mxu1 %v6087_v8  ;;  %v5579_v8 = vor.u32 %v6637_v46, %v5578_v2  ;;  %v6629_v15 = vld [vmem:[#allocation11 + $0x2f4] sm:$0xf0] }
 0x2cb   : > { %v3874_v26 = vmax.f32 %v3119_v35, 0.0  ;;  %3448 = vmatmul.bf16.vlgmr.msrb.gmra.mxu1 %v7686_v19  ;;  %3506 = vmatmul.bf16.vlgmr.msra.gmra.mxu3 %v7640_v11 }
 0x2cc   : > { %v3147_v41 = vpop.f32.mrf.mxu2 }
 0x2cd   : > { %v3148_v57 = vadd.f32 %v3147_v41, %v7841_v60  ;;  %v7892_v56 = vpack.c.bf16 %v3874_v26, %v3866_v38  ;;  %v7899_v60 = vld [vmem:[#allocation13] sm:$0xff]  ;;  %v5386_v38 = vld [vmem:[#allocation11 + $0x198] sm:$0xf] }
 0x2ce   : > { %v3188_v0 = vpop.f32.mrf.mxu0  ;;  %v3275_v24 = vpop.f32.mrf.mxu3  ;;  %v7902_v6 = vperm.slane %v7899_v60, 3  ;;  %v5387_v48 = vor.u32 %v6589_v42, %v5386_v38 }
 0x2cf   : > { %v3189_v5 = vadd.f32 %v3188_v0, %v7845_v21  ;;  %v7895_v50 = vadd.f32 %v3176_v30, %v3148_v57  ;;  %v5610_v21 = vld [vmem:[#allocation11 + $0x358] sm:$0xf]  ;;  %v5796_v30 = vld [vmem:[#allocation11 + $0x4f0] sm:$0xf0] }
 0x2d0   : > { %v3219_v63 = vpop.f32.mrf.mxu1  ;;  %v5611_v33 = vor.u32 %v6645_v43, %v5610_v21  ;;  %v5799_v53 = vor.u32 %v6688_v55, %v5796_v30  ;;  %3586 = vmatpush.bf16.msrb.mxu2 %v5387_v48  ;;  %v5764_v55 = vld [vmem:[#allocation11 + $0x4b0] sm:$0xf0]  ;;  %v5547_v30 = vor.u32 %v6629_v15, %v5546_v45  ;;  %v6621_v48 = vld [vmem:[#allocation11 + $0x2b4] sm:$0xf0] }
 0x2d1   : > { %v3218_v14 = vadd.f32 %v3217_v4, %v3189_v5  ;;  %3419 = vmatmul.bf16.vlgmr.msrb.gmra.mxu0 %v7691_v40  ;;  %3477 = vmatmul.bf16.vlgmr.msra.gmra.mxu2 %v7644_v28  ;;  %v6752_v4 = vld [vmem:[#allocation11 + $0x6d4] sm:$0xf]  ;;  %v6581_v5 = vld [vmem:[#allocation11 + $0x174] sm:$0xf0] }
 0x2d2   : > { %v6055_v39 = vor.u32 %v6752_v4, %v6052_v12  ;;  %3531 = vmatpush.bf16.msra.mxu0 %v5799_v53  ;;  %3616 = vmatpush.bf16.msrb.mxu3 %v5611_v33  ;;  %v5355_v13 = vor.u32 %v6581_v5, %v5354_v7  ;;  %v6020_v53 = vld [vmem:[#allocation11 + $0x6b0] sm:$0xf0]  ;;  %v5322_v4 = vld [vmem:[#allocation11 + $0x118] sm:$0xf] }
 0x2d3   : > { %v3819_v21 = vmax.f32 %v3218_v14, 0.0  ;;  %v6573_v14 = vld [vmem:[#allocation11 + $0x134] sm:$0xf0]  ;;  %v6736_v45 = vld [vmem:[#allocation11 + $0x654] sm:$0xf] }
 0x2d4   : > { %v3246_v35 = vpop.f32.mrf.mxu2  ;;  %3560 = vmatpush.bf16.msra.mxu1 %v6055_v39  ;;  %3587 = vmatpush.bf16.msrb.mxu2 %v5355_v13  ;;  %v5323_v42 = vor.u32 %v6573_v14, %v5322_v4  ;;  %v5290_v7 = vld [vmem:[#allocation11 + $0xd8] sm:$0xf]  ;;  %v5988_v15 = vld [vmem:[#allocation11 + $0x670] sm:$0xf0] }
 0x2d5   : > { %v3247_v26 = vadd.f32 %v3246_v35, %v7902_v6  ;;  %v6744_v35 = vld [vmem:[#allocation11 + $0x694] sm:$0xf]  ;;  %v6565_v5 = vld [vmem:[#allocation11 + $0xf4] sm:$0xf0] }
 0x2d6   : > { %v3190_v36 = vpop.f32.mrf.mxu0  ;;  %v3277_v41 = vpop.f32.mrf.mxu3  ;;  %3617 = vmatpush.bf16.msrb.mxu3 %v5579_v8  ;;  %v6023_v38 = vor.u32 %v6744_v35, %v6020_v53  ;;  %v5291_v13 = vor.u32 %v6565_v5, %v5290_v7  ;;  %v5956_v14 = vld [vmem:[#allocation11 + $0x630] sm:$0xf0]  ;;  %v5226_v5 = vld [vmem:[#allocation11 + $0x58] sm:$0xf] }
 0x2d7   : > { %v3191_v57 = vadd.f32 %v3190_v36, %v7853_v52  ;;  %v7906_v0 = vadd.f32 %v3275_v24, %v3247_v26  ;;  %v6680_v52 = vld [vmem:[#allocation11 + $0x494] sm:$0xf]  ;;  %v5514_v36 = vld [vmem:[#allocation11 + $0x298] sm:$0xf] }
 0x2d8   : > { %v3222_v59 = vpop.f32.mrf.mxu1  ;;  %v5767_v33 = vor.u32 %v6680_v52, %v5764_v55  ;;  %3561 = vmatpush.bf16.msra.mxu1 %v6023_v38  ;;  %v5515_v46 = vor.u32 %v6621_v48, %v5514_v36  ;;  %3588 = vmatpush.bf16.msrb.mxu2 %v5323_v42  ;;  %v5991_v52 = vor.u32 %v6736_v45, %v5988_v15  ;;  %v6728_v38 = vld [vmem:[#allocation11 + $0x614] sm:$0xf]  ;;  %v6605_v48 = vld [vmem:[#allocation11 + $0x234] sm:$0xf0] }
 0x2d9   : > { %v3220_v9 = vadd.f32 %v3219_v63, %v3191_v57  ;;  %v5959_v36 = vor.u32 %v6728_v38, %v5956_v14  ;;  %v5930_v38 = vld [vmem:[#allocation11 + $0x5d8] sm:$0xf] }
 0x2da   : > { %3532 = vmatpush.bf16.msra.mxu0 %v5767_v33  ;;  %3618 = vmatpush.bf16.msrb.mxu3 %v5547_v30  ;;  %v6613_v30 = vld [vmem:[#allocation11 + $0x274] sm:$0xf0] }
 0x2db   : > { %v3827_v43 = vmax.f32 %v3220_v9, 0.0  ;;  %3453 = vmatmul.bf16.gmra.mxu1 %v7698_v20  ;;  %3511 = vmatmul.bf16.gmra.mxu3 %v7650_v22  ;;  %v6557_v33 = vld [vmem:[#allocation11 + $0xb4] sm:$0xf0] }
 0x2dc   : > { %v3248_v24 = vpop.f32.mrf.mxu2  ;;  %3589 = vmatpush.bf16.msrb.mxu2 %v5291_v13  ;;  %3562 = vmatpush.bf16.msra.mxu1 %v5991_v52  ;;  %v6549_v13 = vld [vmem:[#allocation11 + $0x74] sm:$0xf0] }
 0x2dd   : > { %v7910_v63 = vpack.c.bf16 %v3827_v43, %v3819_v21  ;;  %v3249_v12 = vadd.f32 %v3248_v24, %v7902_v6  ;;  %v5482_v21 = vld [vmem:[#allocation11 + $0x258] sm:$0xf]  ;;  %v6672_v43 = vld [vmem:[#allocation11 + $0x454] sm:$0xf]  ;;  %v5227_v15 = vor.u32 %v6549_v13, %v5226_v5 }
 0x2de   : > { %v3193_v26 = vpop.f32.mrf.mxu0  ;;  %v3280_v39 = vpop.f32.mrf.mxu3  ;;  %3619 = vmatpush.bf16.msrb.mxu3 %v5515_v46  ;;  %v5258_v24 = vld [vmem:[#allocation11 + $0x98] sm:$0xf]  ;;  %v5483_v35 = vor.u32 %v6613_v30, %v5482_v21 }
 0x2df   : > { %v3194_v2 = vadd.f32 %v3193_v26, %v7859_v31  ;;  %v7914_v57 = vadd.f32 %v3277_v41, %v3249_v12  ;;  %v5732_v31 = vld [vmem:[#allocation11 + $0x470] sm:$0xf0]  ;;  %v5259_v53 = vor.u32 %v6557_v33, %v5258_v24  ;;  %v5450_v26 = vld [vmem:[#allocation11 + $0x218] sm:$0xf] }
 0x2e0   : > { %v3224_v8 = vpop.f32.mrf.mxu1  ;;  %v5735_v41 = vor.u32 %v6672_v43, %v5732_v31  ;;  %v5451_v7 = vor.u32 %v6605_v48, %v5450_v26  ;;  %3563 = vmatpush.bf16.msra.mxu1 %v5959_v36  ;;  %v5700_v31 = vld [vmem:[#allocation11 + $0x430] sm:$0xf0]  ;;  %v6725_v14 = vld [vmem:[#allocation11 + $0x5f4] sm:$0xf0] }
 0x2e1   : > { %v3223_v9 = vadd.f32 %v3222_v59, %v3194_v2  ;;  %3424 = vmatmul.bf16.gmra.mxu0 %v7703_v49  ;;  %3482 = vmatmul.bf16.gmra.mxu2 %v7654_v27  ;;  %v6186_v36 = vld [vmem:[#allocation11 + $0x7d8] sm:$0xf] }
 0x2e2   : > { %3533 = vmatpush.bf16.msra.mxu0 %v5735_v41  ;;  %3620 = vmatpush.bf16.msrb.mxu3 %v5483_v35  ;;  %v6541_v41 = vld [vmem:[#allocation11 + $0x34] sm:$0xf0] }
 0x2e3   : > { %3590 = vmatpush.bf16.msrb.mxu2 %v5259_v53  ;;  %v3835_v21 = vmax.f32 %v3223_v9, 0.0  ;;  %v6789_v48 = vld [vmem:[#allocation11 + $0x7f4] sm:$0xf0] }
 0x2e4   : > { %v3251_v55 = vpop.f32.mrf.mxu2  ;;  %v6187_v5 = vor.u32 %v6789_v48, %v6186_v36  ;;  %v6122_v48 = vld [vmem:[#allocation11 + $0x758] sm:$0xf] }
 0x2e5   : > { %v3252_v59 = vadd.f32 %v3251_v55, %v7902_v6  ;;  %v5194_v55 = vld [vmem:[#allocation11 + $0x18] sm:$0xf] }
 0x2e6   : > { %v3195_v4 = vpop.f32.mrf.mxu0  ;;  %v3282_v12 = vpop.f32.mrf.mxu3  ;;  %3621 = vmatpush.bf16.msrb.mxu3 %v5451_v7  ;;  %v5195_v24 = vor.u32 %v6541_v41, %v5194_v55  ;;  %3672 = vmatpush.bf16.msrb.mxu1 %v6187_v5  ;;  %v6154_v55 = vld [vmem:[#allocation11 + $0x798] sm:$0xf] }
 0x2e7   : > { %v3196_v42 = vadd.f32 %v3195_v4, %v7867_v54  ;;  %v7920_v2 = vadd.f32 %v3280_v39, %v3252_v59  ;;  %v6664_v54 = vld [vmem:[#allocation11 + $0x414] sm:$0xf]  ;;  %3591 = vmatpush.bf16.msrb.mxu2 %v5227_v15 }
 0x2e8   : > { %v3227_v46 = vpop.f32.mrf.mxu1  ;;  %v5703_v39 = vor.u32 %v6664_v54, %v5700_v31 }
 0x2e9   : > { %v3225_v45 = vadd.f32 %v3224_v8, %v3196_v42  ;;  %v5931_v42 = vor.u32 %v6725_v14, %v5930_v38  ;;  %v5866_v14 = vld [vmem:[#allocation11 + $0x558] sm:$0xf] }
 0x2ea   : > { %3534 = vmatpush.bf16.msra.mxu0 %v5703_v39  ;;  %v6717_v39 = vld [vmem:[#allocation11 + $0x5b4] sm:$0xf0] }
 0x2eb   : > { %v3843_v43 = vmax.f32 %v3225_v45, 0.0  ;;  %3458 = vmatmul.bf16.gmra.mxu1 %v7710_v44  ;;  %3516 = vmatmul.bf16.gmra.mxu3 %v7660_v62 }
 0x2ec   : > { %v3253_v52 = vpop.f32.mrf.mxu2  ;;  %3592 = vmatpush.bf16.msrb.mxu2 %v5195_v24 }
 0x2ed   : > { %v3254_v30 = vadd.f32 %v3253_v52, %v7902_v6  ;;  %v7925_v8 = vpack.c.bf16 %v3843_v43, %v3835_v21  ;;  %v5898_v52 = vld [vmem:[#allocation11 + $0x598] sm:$0xf] }
 0x2ee   : > { %v3198_v33 = vpop.f32.mrf.mxu0  ;;  %v3285_v9 = vpop.f32.mrf.mxu3  ;;  %3643 = vmatpush.bf16.msrb.mxu0 %v5931_v42  ;;  %v5899_v24 = vor.u32 %v6717_v39, %v5898_v52  ;;  %v5834_v39 = vld [vmem:[#allocation11 + $0x518] sm:$0xf] }
 0x2ef   : > { %v3199_v59 = vadd.f32 %v3198_v33, %v7873_v37  ;;  %v7928_v35 = vadd.f32 %v3282_v12, %v3254_v30  ;;  %v6781_v33 = vld [vmem:[#allocation11 + $0x7b4] sm:$0xf0] }
 0x2f0   : > { %v3229_v53 = vpop.f32.mrf.mxu1 }
 0x2f1   : > { %v3228_v4 = vadd.f32 %v3227_v46, %v3199_v59  ;;  %3429 = vmatmul.bf16.gmra.mxu0 %v7715_v58  ;;  %3487 = vmatmul.bf16.gmra.mxu2 %v7664_v29  ;;  %v6155_v59 = vor.u32 %v6781_v33, %v6154_v55  ;;  %v6701_v55 = vld [vmem:[#allocation11 + $0x534] sm:$0xf0] }
 0x2f2   : > { %3644 = vmatpush.bf16.msrb.mxu0 %v5899_v24  ;;  %v5835_v33 = vor.u32 %v6701_v55, %v5834_v39  ;;  %v6058_v55 = vld [vmem:[#allocation11 + $0x6d8] sm:$0xf] }
 0x2f3   : > { %v3851_v21 = vmax.f32 %v3228_v4, 0.0  ;;  %3673 = vmatpush.bf16.msrb.mxu1 %v6155_v59 }
 0x2f4   : > { %v3256_v26 = vpop.f32.mrf.mxu2 }
 0x2f5   : > { %v3257_v7 = vadd.f32 %v3256_v26, %v7902_v6  ;;  %v6709_v26 = vld [vmem:[#allocation11 + $0x574] sm:$0xf0] }
 0x2f6   : > { %v3200_v13 = vpop.f32.mrf.mxu0  ;;  %v3287_v37 = vpop.f32.mrf.mxu3  ;;  %v5867_v36 = vor.u32 %v6709_v26, %v5866_v14  ;;  %v6649_v26 = vld [vmem:[#allocation11 + $0x39c] sm:$0xf] }
 0x2f7   : > { %v3201_v12 = vadd.f32 %v3200_v13, %v7881_v3  ;;  %v7934_v46 = vadd.f32 %v3285_v9, %v3257_v7  ;;  %v6773_v7 = vld [vmem:[#allocation11 + $0x774] sm:$0xf0] }
 0x2f8   : > { %v3232_v45 = vpop.f32.mrf.mxu1  ;;  %3645 = vmatpush.bf16.msrb.mxu0 %v5867_v36 }
 0x2f9   : > { %v3230_v15 = vadd.f32 %v3229_v53, %v3201_v12 }
 0x2fb   : > { %v3859_v43 = vmax.f32 %v3230_v15, 0.0  ;;  %3463 = vmatmul.bf16.gmra.mxu1 %v7722_v23  ;;  %3521 = vmatmul.bf16.gmra.mxu3 %v7670_v47 }
 0x2fc   : > { %v3258_v54 = vpop.f32.mrf.mxu2  ;;  %3646 = vmatpush.bf16.msrb.mxu0 %v5835_v33 }
 0x2fd   : > { %v3259_v31 = vadd.f32 %v3258_v54, %v7902_v6  ;;  %v7939_v41 = vpack.c.bf16 %v3859_v43, %v3851_v21  ;;  %v6657_v43 = vld [vmem:[#allocation11 + $0x3dc] sm:$0xf] }
 0x2fe   : > { %v3203_v3 = vpop.f32.mrf.mxu0  ;;  %v3290_v30 = vpop.f32.mrf.mxu3  ;;  %v5676_v54 = vld [vmem:[#allocation11 + $0x3f8] sm:$0xf0] }
 0x2ff   : > { %v3204_v9 = vadd.f32 %v3203_v3, %v7887_v18  ;;  %v7942_v53 = vadd.f32 %v3287_v37, %v3259_v31  ;;  %v6123_v18 = vor.u32 %v6773_v7, %v6122_v48  ;;  %v5679_v3 = vor.u32 %v6657_v43, %v5676_v54  ;;  %v6641_v43 = vld [vmem:[#allocation11 + $0x35c] sm:$0xf] }
 0x300   : > { %v3234_v4 = vpop.f32.mrf.mxu1  ;;  %v5612_v54 = vld [vmem:[#allocation11 + $0x378] sm:$0xf0] }
 0x301   : > { %v3233_v38 = vadd.f32 %v3232_v45, %v3204_v9  ;;  %3434 = vmatmul.bf16.gmra.mxu0 %v7727_v34  ;;  %3492 = vmatmul.bf16.gmra.mxu2 %v7677_v61  ;;  %v6090_v9 = vld [vmem:[#allocation11 + $0x718] sm:$0xf] }
 0x302   : > { %3674 = vmatpush.bf16.msrb.mxu1 %v6123_v18  ;;  %3730 = vmatpush.bf16.msra.mxu3 %v5679_v3  ;;  %v6593_v18 = vld [vmem:[#allocation11 + $0x1dc] sm:$0xf]  ;;  %v6757_v3 = vld [vmem:[#allocation11 + $0x6f4] sm:$0xf0] }
 0x303   : > { %v3867_v31 = vmax.f32 %v3233_v38, 0.0  ;;  %v6059_v33 = vor.u32 %v6757_v3, %v6058_v55  ;;  %v6026_v3 = vld [vmem:[#allocation11 + $0x698] sm:$0xf] }
 0x304   : > { %v3261_v42 = vpop.f32.mrf.mxu2 }
 0x305   : > { %v3262_v5 = vadd.f32 %v3261_v42, %v7902_v6  ;;  %v5644_v42 = vld [vmem:[#allocation11 + $0x3b8] sm:$0xf0] }
 0x306   : > { %v3205_v13 = vpop.f32.mrf.mxu0  ;;  %v3292_v37 = vpop.f32.mrf.mxu3  ;;  %v5647_v48 = vor.u32 %v6649_v26, %v5644_v42 }
 0x307   : > { %v3206_v12 = vadd.f32 %v3205_v13, %v7895_v50  ;;  %v7948_v45 = vadd.f32 %v3290_v30, %v3262_v5  ;;  %v6765_v50 = vld [vmem:[#allocation11 + $0x734] sm:$0xf0]  ;;  %v5420_v13 = vld [vmem:[#allocation11 + $0x1f8] sm:$0xf0] }
 0x308   : > { %v3333_v15 = vpop.f32.mrf.mxu1  ;;  %v6091_v59 = vor.u32 %v6765_v50, %v6090_v9  ;;  %3731 = vmatpush.bf16.msra.mxu3 %v5647_v48  ;;  %v5388_v9 = vld [vmem:[#allocation11 + $0x1b8] sm:$0xf0] }
 0x309   : > { %v3235_v21 = vadd.f32 %v3234_v4, %v3206_v12 }
 0x30a   : > { %3675 = vmatpush.bf16.msrb.mxu1 %v6091_v59  ;;  %v6633_v59 = vld [vmem:[#allocation11 + $0x31c] sm:$0xf] }
 0x30b   : > { %v3875_v52 = vmax.f32 %v3235_v21, 0.0  ;;  %3564 = vmatmul.bf16.vlgmr.msra.gmra.mxu1 %v7686_v19  ;;  %3622 = vmatmul.bf16.vlgmr.msrb.gmra.mxu3 %v7640_v11  ;;  %v5423_v21 = vor.u32 %v6593_v18, %v5420_v13  ;;  %v6577_v18 = vld [vmem:[#allocation11 + $0x15c] sm:$0xf] }
 0x30c   : > { %v3263_v24 = vpop.f32.mrf.mxu2  ;;  %v5356_v13 = vld [vmem:[#allocation11 + $0x178] sm:$0xf0] }
 0x30d   : > { %v3264_v30 = vadd.f32 %v3263_v24, %v7902_v6  ;;  %v7953_v4 = vpack.c.bf16 %v3875_v52, %v3867_v31  ;;  %v7961_v6 = vperm.slane %v7899_v60, 4  ;;  %v6693_v31 = vld [vmem:[#allocation11 + $0x4f4] sm:$0xf0]  ;;  %3701 = vmatpush.bf16.msra.mxu2 %v5423_v21 }
 0x30e   : > { %v3304_v14 = vpop.f32.mrf.mxu0  ;;  %v3391_v38 = vpop.f32.mrf.mxu3  ;;  %3676 = vmatpush.bf16.msrb.mxu1 %v6059_v33 }
 0x30f   : > { %v3305_v36 = vadd.f32 %v3304_v14, %v7906_v0  ;;  %v7956_v7 = vadd.f32 %v3292_v37, %v3264_v30  ;;  %v5802_v0 = vld [vmem:[#allocation11 + $0x4d8] sm:$0xf]  ;;  %v5615_v37 = vor.u32 %v6641_v43, %v5612_v54  ;;  %v5580_v14 = vld [vmem:[#allocation11 + $0x338] sm:$0xf0]  ;;  %v5359_v43 = vor.u32 %v6577_v18, %v5356_v13 }
 0x310   : > { %v3335_v5 = vpop.f32.mrf.mxu1  ;;  %v5803_v39 = vor.u32 %v6693_v31, %v5802_v0  ;;  %v5583_v42 = vor.u32 %v6633_v59, %v5580_v14  ;;  %v6625_v54 = vld [vmem:[#allocation11 + $0x2dc] sm:$0xf] }
 0x311   : > { %v3334_v12 = vadd.f32 %v3333_v15, %v3305_v36  ;;  %3535 = vmatmul.bf16.vlgmr.msra.gmra.mxu0 %v7691_v40  ;;  %3593 = vmatmul.bf16.vlgmr.msrb.gmra.mxu2 %v7644_v28  ;;  %v6585_v15 = vld [vmem:[#allocation11 + $0x19c] sm:$0xf] }
 0x312   : > { %3647 = vmatpush.bf16.msrb.mxu0 %v5803_v39  ;;  %3732 = vmatpush.bf16.msra.mxu3 %v5615_v37  ;;  %v5391_v30 = vor.u32 %v6585_v15, %v5388_v9  ;;  %v5548_v0 = vld [vmem:[#allocation11 + $0x2f8] sm:$0xf0]  ;;  %v6749_v15 = vld [vmem:[#allocation11 + $0x6b4] sm:$0xf0] }
 0x313   : > { %v3820_v31 = vmax.f32 %v3334_v12, 0.0  ;;  %v5551_v39 = vor.u32 %v6625_v54, %v5548_v0  ;;  %v6027_v9 = vor.u32 %v6749_v15, %v6026_v3  ;;  %v5324_v12 = vld [vmem:[#allocation11 + $0x138] sm:$0xf0] }
 0x314   : > { %v3362_v52 = vpop.f32.mrf.mxu2  ;;  %3702 = vmatpush.bf16.msra.mxu2 %v5391_v30  ;;  %v6617_v14 = vld [vmem:[#allocation11 + $0x29c] sm:$0xf] }
 0x315   : > { %v3363_v24 = vadd.f32 %v3362_v52, %v7961_v6  ;;  %v6685_v52 = vld [vmem:[#allocation11 + $0x4b4] sm:$0xf0]  ;;  %3677 = vmatpush.bf16.msrb.mxu1 %v6027_v9  ;;  %v5292_v54 = vld [vmem:[#allocation11 + $0xf8] sm:$0xf0] }
 0x316   : > { %v3306_v50 = vpop.f32.mrf.mxu0  ;;  %v3393_v60 = vpop.f32.mrf.mxu3  ;;  %3733 = vmatpush.bf16.msra.mxu3 %v5583_v42  ;;  %v5484_v3 = vld [vmem:[#allocation11 + $0x278] sm:$0xf0] }
 0x317   : > { %v3307_v26 = vadd.f32 %v3306_v50, %v7914_v57  ;;  %v7965_v36 = vadd.f32 %v3391_v38, %v3363_v24  ;;  %v5770_v57 = vld [vmem:[#allocation11 + $0x498] sm:$0xf]  ;;  %v6569_v24 = vld [vmem:[#allocation11 + $0x11c] sm:$0xf] }
 0x318   : > { %v3338_v48 = vpop.f32.mrf.mxu1  ;;  %v5771_v55 = vor.u32 %v6685_v52, %v5770_v57  ;;  %3703 = vmatpush.bf16.msra.mxu2 %v5359_v43  ;;  %v5327_v59 = vor.u32 %v6569_v24, %v5324_v12  ;;  %v6561_v43 = vld [vmem:[#allocation11 + $0xdc] sm:$0xf]  ;;  %v6741_v57 = vld [vmem:[#allocation11 + $0x674] sm:$0xf0] }
 0x319   : > { %v3336_v21 = vadd.f32 %v3335_v5, %v3307_v26  ;;  %v5516_v26 = vld [vmem:[#allocation11 + $0x2b8] sm:$0xf0] }
 0x31a   : > { %3648 = vmatpush.bf16.msrb.mxu0 %v5771_v55  ;;  %3734 = vmatpush.bf16.msra.mxu3 %v5551_v39  ;;  %v5519_v18 = vor.u32 %v6617_v14, %v5516_v26  ;;  %v6609_v52 = vld [vmem:[#allocation11 + $0x25c] sm:$0xf]  ;;  %v5738_v39 = vld [vmem:[#allocation11 + $0x458] sm:$0xf] }
 0x31b   : > { %v3828_v37 = vmax.f32 %v3336_v21, 0.0  ;;  %3569 = vmatmul.bf16.gmra.mxu1 %v7698_v20  ;;  %3627 = vmatmul.bf16.gmra.mxu3 %v7650_v22  ;;  %v6553_v15 = vld [vmem:[#allocation11 + $0x9c] sm:$0xf]  ;;  %v6733_v14 = vld [vmem:[#allocation11 + $0x634] sm:$0xf0] }
 0x31c   : > { %v3364_v38 = vpop.f32.mrf.mxu2  ;;  %3704 = vmatpush.bf16.msra.mxu2 %v5327_v59  ;;  %v5260_v24 = vld [vmem:[#allocation11 + $0xb8] sm:$0xf0]  ;;  %v5962_v59 = vld [vmem:[#allocation11 + $0x618] sm:$0xf] }
 0x31d   : > { %v7969_v5 = vpack.c.bf16 %v3828_v37, %v3820_v31  ;;  %v3365_v33 = vadd.f32 %v3364_v38, %v7961_v6  ;;  %v5295_v31 = vor.u32 %v6561_v43, %v5292_v54  ;;  %v5994_v37 = vld [vmem:[#allocation11 + $0x658] sm:$0xf]  ;;  %v5263_v9 = vor.u32 %v6553_v15, %v5260_v24  ;;  %v6601_v26 = vld [vmem:[#allocation11 + $0x21c] sm:$0xf] }
 0x31e   : > { %v3309_v50 = vpop.f32.mrf.mxu0  ;;  %v3396_v30 = vpop.f32.mrf.mxu3  ;;  %3735 = vmatpush.bf16.msra.mxu3 %v5519_v18  ;;  %v5995_v38 = vor.u32 %v6741_v57, %v5994_v37  ;;  %v5963_v18 = vor.u32 %v6733_v14, %v5962_v59  ;;  %v5452_v43 = vld [vmem:[#allocation11 + $0x238] sm:$0xf0] }
 0x31f   : > { %v3310_v42 = vadd.f32 %v3309_v50, %v7920_v2  ;;  %v7973_v13 = vadd.f32 %v3393_v60, %v3365_v33  ;;  %v6677_v2 = vld [vmem:[#allocation11 + $0x474] sm:$0xf0]  ;;  %v5487_v33 = vor.u32 %v6609_v52, %v5484_v3  ;;  %v5455_v37 = vor.u32 %v6601_v26, %v5452_v43  ;;  %v6545_v57 = vld [vmem:[#allocation11 + $0x5c] sm:$0xf] }
 0x320   : > { %v3340_v21 = vpop.f32.mrf.mxu1  ;;  %v5739_v60 = vor.u32 %v6677_v2, %v5738_v39  ;;  %3705 = vmatpush.bf16.msra.mxu2 %v5295_v31  ;;  %3678 = vmatpush.bf16.msrb.mxu1 %v5995_v38  ;;  %v5228_v39 = vld [vmem:[#allocation11 + $0x78] sm:$0xf0] }
 0x321   : > { %v3339_v0 = vadd.f32 %v3338_v48, %v3310_v42  ;;  %3540 = vmatmul.bf16.gmra.mxu0 %v7703_v49  ;;  %3598 = vmatmul.bf16.gmra.mxu2 %v7654_v27  ;;  %v5231_v2 = vor.u32 %v6545_v57, %v5228_v39  ;;  %v6537_v15 = vld [vmem:[#allocation11 + $0x1c] sm:$0xf] }
 0x322   : > { %3649 = vmatpush.bf16.msrb.mxu0 %v5739_v60  ;;  %3736 = vmatpush.bf16.msra.mxu3 %v5487_v33  ;;  %v6669_v60 = vld [vmem:[#allocation11 + $0x434] sm:$0xf0]  ;;  %v5196_v24 = vld [vmem:[#allocation11 + $0x38] sm:$0xf0] }
 0x323   : > { %v3836_v38 = vmax.f32 %v3339_v0, 0.0  ;;  %v5199_v33 = vor.u32 %v6537_v15, %v5196_v24  ;;  %v6785_v57 = vld [vmem:[#allocation11 + $0x7dc] sm:$0xf] }
 0x324   : > { %v3367_v55 = vpop.f32.mrf.mxu2  ;;  %3706 = vmatpush.bf16.msra.mxu2 %v5263_v9  ;;  %3679 = vmatpush.bf16.msrb.mxu1 %v5963_v18  ;;  %v5932_v18 = vld [vmem:[#allocation11 + $0x5f8] sm:$0xf0] }
 0x325   : > { %v3368_v48 = vadd.f32 %v3367_v55, %v7961_v6  ;;  %v6188_v39 = vld [vmem:[#allocation11 + $0x7f8] sm:$0xf0] }
 0x326   : > { %v3311_v12 = vpop.f32.mrf.mxu0  ;;  %v3398_v50 = vpop.f32.mrf.mxu3  ;;  %3737 = vmatpush.bf16.msra.mxu3 %v5455_v37  ;;  %v6713_v24 = vld [vmem:[#allocation11 + $0x59c] sm:$0xf] }
 0x327   : > { %v3312_v42 = vadd.f32 %v3311_v12, %v7928_v35  ;;  %v7979_v54 = vadd.f32 %v3396_v30, %v3368_v48  ;;  %v5706_v35 = vld [vmem:[#allocation11 + $0x418] sm:$0xf] }
 0x328   : > { %v3343_v31 = vpop.f32.mrf.mxu1  ;;  %v5707_v30 = vor.u32 %v6669_v60, %v5706_v35  ;;  %3707 = vmatpush.bf16.msra.mxu2 %v5231_v2  ;;  %v6191_v2 = vor.u32 %v6785_v57, %v6188_v39  ;;  %v6705_v57 = vld [vmem:[#allocation11 + $0x55c] sm:$0xf] }
 0x329   : > { %v3341_v52 = vadd.f32 %v3340_v21, %v3312_v42  ;;  %v6721_v42 = vld [vmem:[#allocation11 + $0x5dc] sm:$0xf] }
 0x32a   : > { %3650 = vmatpush.bf16.msrb.mxu0 %v5707_v30  ;;  %v5935_v37 = vor.u32 %v6721_v42, %v5932_v18  ;;  %3788 = vmatpush.bf16.msra.mxu1 %v6191_v2  ;;  %v6156_v42 = vld [vmem:[#allocation11 + $0x7b8] sm:$0xf0] }
 0x32b   : > { %v3844_v55 = vmax.f32 %v3341_v52, 0.0  ;;  %3574 = vmatmul.bf16.gmra.mxu1 %v7710_v44  ;;  %3632 = vmatmul.bf16.gmra.mxu3 %v7660_v62  ;;  %v5868_v39 = vld [vmem:[#allocation11 + $0x578] sm:$0xf0] }
 0x32c   : > { %v3369_v3 = vpop.f32.mrf.mxu2  ;;  %3708 = vmatpush.bf16.msra.mxu2 %v5199_v33  ;;  %v6777_v33 = vld [vmem:[#allocation11 + $0x79c] sm:$0xf]  ;;  %v5871_v2 = vor.u32 %v6705_v57, %v5868_v39 }
 0x32d   : > { %v3370_v48 = vadd.f32 %v3369_v3, %v7961_v6  ;;  %v7984_v21 = vpack.c.bf16 %v3844_v55, %v3836_v38  ;;  %v6092_v57 = vld [vmem:[#allocation11 + $0x738] sm:$0xf0] }
 0x32e   : > { %v3314_v9 = vpop.f32.mrf.mxu0  ;;  %v3401_v0 = vpop.f32.mrf.mxu3  ;;  %3759 = vmatpush.bf16.msra.mxu0 %v5935_v37 }
 0x32f   : > { %v3315_v12 = vadd.f32 %v3314_v9, %v7934_v46  ;;  %v7987_v59 = vadd.f32 %v3398_v50, %v3370_v48  ;;  %v5900_v48 = vld [vmem:[#allocation11 + $0x5b8] sm:$0xf0] }
 0x330   : > { %v3345_v14 = vpop.f32.mrf.mxu1 }
 0x331   : > { %v3344_v26 = vadd.f32 %v3343_v31, %v3315_v12  ;;  %3545 = vmatmul.bf16.gmra.mxu0 %v7715_v58  ;;  %3603 = vmatmul.bf16.gmra.mxu2 %v7664_v29 }
 0x333   : > { %v3852_v60 = vmax.f32 %v3344_v26, 0.0  ;;  %v6159_v26 = vor.u32 %v6777_v33, %v6156_v42  ;;  %v6697_v33 = vld [vmem:[#allocation11 + $0x51c] sm:$0xf] }
 0x334   : > { %v3372_v43 = vpop.f32.mrf.mxu2 }
 0x335   : > { %v3373_v52 = vadd.f32 %v3372_v43, %v7961_v6  ;;  %3789 = vmatpush.bf16.msra.mxu1 %v6159_v26  ;;  %v6761_v26 = vld [vmem:[#allocation11 + $0x71c] sm:$0xf] }
 0x336   : > { %v3316_v38 = vpop.f32.mrf.mxu0  ;;  %v3403_v46 = vpop.f32.mrf.mxu3  ;;  %v6095_v39 = vor.u32 %v6761_v26, %v6092_v57 }
 0x337   : > { %v3317_v50 = vadd.f32 %v3316_v38, %v7942_v53  ;;  %v7993_v31 = vadd.f32 %v3401_v0, %v3373_v52  ;;  %v5903_v0 = vor.u32 %v6713_v24, %v5900_v48  ;;  %v6769_v38 = vld [vmem:[#allocation11 + $0x75c] sm:$0xf] }
 0x338   : > { %v3348_v55 = vpop.f32.mrf.mxu1 }
 0x339   : > { %v3346_v35 = vadd.f32 %v3345_v14, %v3317_v50  ;;  %3760 = vmatpush.bf16.msra.mxu0 %v5903_v0  ;;  %v6124_v50 = vld [vmem:[#allocation11 + $0x778] sm:$0xf0]  ;;  %v6805_v0 = vld [vmem:[#allocation14 + $0x78] sm:$0xff] }
 0x33a   : > { %4458 = vmatpush.bf16.msrb.mxu3 %v6805_v0 }
 0x33b   : > { %v3860_v3 = vmax.f32 %v3346_v35, 0.0  ;;  %3579 = vmatmul.bf16.gmra.mxu1 %v7722_v23  ;;  %3637 = vmatmul.bf16.gmra.mxu3 %v7670_v47 }
 0x33c   : > { %v3374_v30 = vpop.f32.mrf.mxu2 }
 0x33d   : > { %v3375_v15 = vadd.f32 %v3374_v30, %v7961_v6  ;;  %v7998_v9 = vpack.c.bf16 %v3860_v3, %v3852_v60  ;;  %3761 = vmatpush.bf16.msra.mxu0 %v5871_v2 }
 0x33e   : > { %v3319_v53 = vpop.f32.mrf.mxu0  ;;  %v3406_v12 = vpop.f32.mrf.mxu3 }
 0x33f   : > { %v3320_v14 = vadd.f32 %v3319_v53, %v7948_v45  ;;  %v8001_v18 = vadd.f32 %v3403_v46, %v3375_v15  ;;  %v6127_v45 = vor.u32 %v6769_v38, %v6124_v50  ;;  %v5836_v53 = vld [vmem:[#allocation11 + $0x538] sm:$0xf0] }
 0x340   : > { %v3350_v43 = vpop.f32.mrf.mxu1 }
 0x341   : > { %v3349_v37 = vadd.f32 %v3348_v55, %v3320_v14  ;;  %3550 = vmatmul.bf16.gmra.mxu0 %v7727_v34  ;;  %3608 = vmatmul.bf16.gmra.mxu2 %v7677_v61  ;;  %v5839_v14 = vor.u32 %v6697_v33, %v5836_v53 }
 0x342   : > { %3790 = vmatpush.bf16.msra.mxu1 %v6127_v45  ;;  %v5804_v45 = vld [vmem:[#allocation11 + $0x4f8] sm:$0xf0] }
 0x343   : > { %v3868_v24 = vmax.f32 %v3349_v37, 0.0  ;;  %3762 = vmatpush.bf16.msra.mxu0 %v5839_v14  ;;  %v6795_v14 = vld [vmem:[#allocation14 + $0x28] sm:$0xff] }
 0x344   : > { %v3377_v52 = vpop.f32.mrf.mxu2 }
 0x345   : > { %v3378_v35 = vadd.f32 %v3377_v52, %v7961_v6 }
 0x346   : > { %v3321_v60 = vpop.f32.mrf.mxu0  ;;  %v3408_v46 = vpop.f32.mrf.mxu3  ;;  %3791 = vmatpush.bf16.msra.mxu1 %v6095_v39  ;;  %v5772_v39 = vld [vmem:[#allocation11 + $0x4b8] sm:$0xf0] }
 0x347   : > { %v3322_v3 = vadd.f32 %v3321_v60, %v7956_v7  ;;  %v8007_v55 = vadd.f32 %v3406_v12, %v3378_v35  ;;  %v6689_v35 = vld [vmem:[#allocation11 + $0x4dc] sm:$0xf]  ;;  %v6803_v60 = vld [vmem:[#allocation14 + $0x68] sm:$0xff] }
 0x348   : > { %v3449_v30 = vpop.f32.mrf.mxu1 }
 0x349   : > { %v3351_v15 = vadd.f32 %v3350_v43, %v3322_v3 }
 0x34b   : > { %v3876_v48 = vmax.f32 %v3351_v15, 0.0  ;;  %3680 = vmatmul.bf16.vlgmr.msrb.gmra.mxu1 %v7686_v19  ;;  %3738 = vmatmul.bf16.vlgmr.msra.gmra.mxu3 %v7640_v11  ;;  %v6804_v11 = vld [vmem:[#allocation14 + $0x70] sm:$0xff]  ;;  %v5807_v15 = vor.u32 %v6689_v35, %v5804_v45  ;;  %v6794_v45 = vld [vmem:[#allocation14 + $0x20] sm:$0xff] }
 0x34c   : > { %v3379_v42 = vpop.f32.mrf.mxu2  ;;  %4459 = vmatpush.bf16.msrb.mxu3 %v6804_v11 }
 0x34d   : > { %v3380_v7 = vadd.f32 %v3379_v42, %v7961_v6  ;;  %v8012_v12 = vpack.c.bf16 %v3876_v48, %v3868_v24  ;;  %v6797_v6 = vld [vmem:[#allocation14 + $0x38] sm:$0xff]  ;;  %v6060_v24 = vld [vmem:[#allocation11 + $0x6f8] sm:$0xf0]  ;;  %3763 = vmatpush.bf16.msra.mxu0 %v5807_v15 }
 0x34e   : > { %v3420_v43 = vpop.f32.mrf.mxu0  ;;  %v8014_v37 = vpop.f32.mrf.mxu3  ;;  %4429 = vmatpush.bf16.msrb.mxu2 %v6797_v6  ;;  %v6028_v6 = vld [vmem:[#allocation11 + $0x6b8] sm:$0xf0] }
 0x34f   : > { %v3421_v52 = vadd.f32 %v3420_v43, %v7965_v36  ;;  %v8017_v2 = vadd.f32 %v3408_v46, %v3380_v7  ;;  %v6753_v36 = vld [vmem:[#allocation11 + $0x6dc] sm:$0xf]  ;;  %v6801_v43 = vld [vmem:[#allocation14 + $0x58] sm:$0xff] }
 0x350   : > { %v3451_v38 = vpop.f32.mrf.mxu1  ;;  %v6063_v48 = vor.u32 %v6753_v36, %v6060_v24  ;;  %v6796_v46 = vld [vmem:[#allocation14 + $0x30] sm:$0xff]  ;;  %4460 = vmatpush.bf16.msrb.mxu3 %v6803_v60 }
 0x351   : > { %v3450_v50 = vadd.f32 %v3449_v30, %v3421_v52  ;;  %3651 = vmatmul.bf16.vlgmr.msrb.gmra.mxu0 %v7691_v40  ;;  %3709 = vmatmul.bf16.vlgmr.msra.gmra.mxu2 %v7644_v28  ;;  %v6802_v30 = vld [vmem:[#allocation14 + $0x60] sm:$0xff]  ;;  %v6681_v7 = vld [vmem:[#allocation11 + $0x49c] sm:$0xf] }
 0x352   : > { %3792 = vmatpush.bf16.msra.mxu1 %v6063_v48  ;;  %4430 = vmatpush.bf16.msrb.mxu2 %v6796_v46  ;;  %v5775_v11 = vor.u32 %v6681_v7, %v5772_v39  ;;  %v6800_v15 = vld [vmem:[#allocation14 + $0x50] sm:$0xff]  ;;  %v6793_v48 = vld [vmem:[#allocation14 + $0x18] sm:$0xff] }
 0x353   : > { %v3821_v26 = vmax.f32 %v3450_v50, 0.0  ;;  %v6737_v46 = vld [vmem:[#allocation11 + $0x65c] sm:$0xf] }
 0x354   : > { %v8021_v3 = vpop.f32.mrf.mxu2  ;;  %4461 = vmatpush.bf16.msrb.mxu3 %v6802_v30  ;;  %3764 = vmatpush.bf16.msra.mxu0 %v5775_v11  ;;  %v5740_v30 = vld [vmem:[#allocation11 + $0x478] sm:$0xf0] }
 0x355   : > { %v5964_v39 = vld [vmem:[#allocation11 + $0x638] sm:$0xf0] }
 0x356   : > { %v3422_v33 = vpop.f32.mrf.mxu0  ;;  %v8023_v53 = vpop.f32.mrf.mxu3  ;;  %4431 = vmatpush.bf16.msrb.mxu2 %v6795_v14  ;;  %v6799_v14 = vld [vmem:[#allocation14 + $0x48] sm:$0xff] }
 0x357   : > { %v3423_v28 = vadd.f32 %v3422_v33, %v7973_v13  ;;  %v6745_v13 = vld [vmem:[#allocation11 + $0x69c] sm:$0xf] }
 0x358   : > { %v3454_v0 = vpop.f32.mrf.mxu1  ;;  %4462 = vmatpush.bf16.msrb.mxu3 %v6801_v43  ;;  %v5996_v33 = vld [vmem:[#allocation11 + $0x678] sm:$0xf0] }
 0x359   : > { %v3452_v42 = vadd.f32 %v3451_v38, %v3423_v28  ;;  %v6031_v38 = vor.u32 %v6745_v13, %v6028_v6  ;;  %v6673_v28 = vld [vmem:[#allocation11 + $0x45c] sm:$0xf]  ;;  %v6798_v13 = vld [vmem:[#allocation14 + $0x40] sm:$0xff] }
 0x35a   : > { %4432 = vmatpush.bf16.msrb.mxu2 %v6794_v45  ;;  %v6791_v45 = vld [vmem:[#allocation14 + $0x8] sm:$0xff] }
 0x35b   : > { %v3829_v57 = vmax.f32 %v3452_v42, 0.0  ;;  %3685 = vmatmul.bf16.gmra.mxu1 %v7698_v20  ;;  %3743 = vmatmul.bf16.gmra.mxu3 %v7650_v22  ;;  %v5999_v42 = vor.u32 %v6737_v46, %v5996_v33  ;;  %v6790_v33 = vld [vmem:[#allocation14] sm:$0xff] }
 0x35c   : > { %v8028_v52 = vpop.f32.mrf.mxu2  ;;  %3793 = vmatpush.bf16.msra.mxu1 %v6031_v38  ;;  %4463 = vmatpush.bf16.msrb.mxu3 %v6800_v15  ;;  %v6665_v15 = vld [vmem:[#allocation11 + $0x41c] sm:$0xf] }
 0x35d   : > { %v8030_v35 = vpack.c.bf16 %v3829_v57, %v3821_v26  ;;  %v6792_v57 = vld [vmem:[#allocation14 + $0x10] sm:$0xff] }
 0x35e   : > { %v3425_v50 = vpop.f32.mrf.mxu0  ;;  %v8032_v60 = vpop.f32.mrf.mxu3  ;;  %4433 = vmatpush.bf16.msrb.mxu2 %v6793_v48  ;;  %v5708_v48 = vld [vmem:[#allocation11 + $0x438] sm:$0xf0] }
 0x35f   : > { %v3426_v22 = vadd.f32 %v3425_v50, %v7979_v54  ;;  %v5743_v54 = vor.u32 %v6673_v28, %v5740_v30 }
 0x360   : > { %v3456_v36 = vpop.f32.mrf.mxu1  ;;  %3794 = vmatpush.bf16.msra.mxu1 %v5999_v42  ;;  %4464 = vmatpush.bf16.msrb.mxu3 %v6799_v14 }
 0x361   : > { %v3455_v24 = vadd.f32 %v3454_v0, %v3426_v22  ;;  %3656 = vmatmul.bf16.gmra.mxu0 %v7703_v49  ;;  %3714 = vmatmul.bf16.gmra.mxu2 %v7654_v27  ;;  %v6729_v0 = vld [vmem:[#allocation11 + $0x61c] sm:$0xf] }
 0x362   : > { %3765 = vmatpush.bf16.msra.mxu0 %v5743_v54  ;;  %v5967_v11 = vor.u32 %v6729_v0, %v5964_v39  ;;  %4434 = vmatpush.bf16.msrb.mxu2 %v6792_v57 }
 0x363   : > { %v3837_v50 = vmax.f32 %v3455_v24, 0.0 }
 0x364   : > { %v8037_v26 = vpop.f32.mrf.mxu2  ;;  %3795 = vmatpush.bf16.msra.mxu1 %v5967_v11  ;;  %4465 = vmatpush.bf16.msrb.mxu3 %v6798_v13  ;;  %v6813_v13 = vld [vmem:[#allocation14 + $0xb8] sm:$0xff] }
 0x366   : > { %v3427_v7 = vpop.f32.mrf.mxu0  ;;  %v8040_v43 = vpop.f32.mrf.mxu3  ;;  %4435 = vmatpush.bf16.msrb.mxu2 %v6791_v45 }
 0x367   : > { %v3428_v27 = vadd.f32 %v3427_v7, %v7987_v59  ;;  %v5711_v59 = vor.u32 %v6665_v15, %v5708_v48 }
 0x368   : > { %v3459_v6 = vpop.f32.mrf.mxu1 }
 0x369   : > { %v3457_v38 = vadd.f32 %v3456_v36, %v3428_v27  ;;  %3766 = vmatpush.bf16.msra.mxu0 %v5711_v59 }
 0x36a   : > { %4436 = vmatpush.bf16.msrb.mxu2 %v6790_v33 }
 0x36b   : > { %v3845_v22 = vmax.f32 %v3457_v38, 0.0  ;;  %3690 = vmatmul.bf16.gmra.mxu1 %v7710_v44  ;;  %3748 = vmatmul.bf16.gmra.mxu3 %v7660_v62 }
 0x36c   : > { %v8044_v46 = vpop.f32.mrf.mxu2 }
 0x36d   : > { %v8046_v28 = vpack.c.bf16 %v3845_v22, %v3837_v50  ;;  %4487 = vmatpush.bf16.msrb.mxu0 %v6813_v13  ;;  %v6821_v50 = vld [vmem:[#allocation14 + $0xf8] sm:$0xff] }
 0x36e   : > { %v3430_v30 = vpop.f32.mrf.mxu0  ;;  %v8049_v14 = vpop.f32.mrf.mxu3  ;;  %4516 = vmatpush.bf16.msrb.mxu1 %v6821_v50  ;;  %v6834_v50 = vld [vmem:[#allocation14 + $0x160] sm:$0xff] }
 0x36f   : > { %v3431_v36 = vadd.f32 %v3430_v30, %v7993_v31 }
 0x370   : > { %v3461_v42 = vpop.f32.mrf.mxu1 }
 0x371   : > { %v3460_v24 = vadd.f32 %v3459_v6, %v3431_v36  ;;  %3661 = vmatmul.bf16.gmra.mxu0 %v7715_v58  ;;  %3719 = vmatmul.bf16.gmra.mxu2 %v7664_v29 }
 0x373   : > { %v3853_v39 = vmax.f32 %v3460_v24, 0.0 }
 0x374   : > { %v8053_v62 = vpop.f32.mrf.mxu2 }
 0x376   : > { %v3432_v54 = vpop.f32.mrf.mxu0  ;;  %v8056_v11 = vpop.f32.mrf.mxu3 }
 0x377   : > { %v3433_v57 = vadd.f32 %v3432_v54, %v8001_v18  ;;  %v6811_v54 = vld [vmem:[#allocation14 + $0xa8] sm:$0xff] }
 0x378   : > { %v3464_v7 = vpop.f32.mrf.mxu1 }
 0x379   : > { %v3462_v0 = vadd.f32 %v3461_v42, %v3433_v57  ;;  %v6837_v42 = vld [vmem:[#allocation14 + $0x178] sm:$0xff] }
 0x37a   : > { %4574 = vmatpush.bf16.msra.mxu3 %v6837_v42  ;;  %v6816_v42 = vld [vmem:[#allocation14 + $0xd0] sm:$0xff] }
 0x37b   : > { %v3861_v27 = vmax.f32 %v3462_v0, 0.0  ;;  %3695 = vmatmul.bf16.gmra.mxu1 %v7722_v23  ;;  %3753 = vmatmul.bf16.gmra.mxu3 %v7670_v47  ;;  %v6812_v47 = vld [vmem:[#allocation14 + $0xb0] sm:$0xff] }
 0x37c   : > { %v8060_v31 = vpop.f32.mrf.mxu2  ;;  %4488 = vmatpush.bf16.msrb.mxu0 %v6812_v47  ;;  %v6836_v0 = vld [vmem:[#allocation14 + $0x170] sm:$0xff]  ;;  %v6827_v47 = vld [vmem:[#allocation14 + $0x128] sm:$0xff] }
 0x37d   : > { %v8062_v6 = vpack.c.bf16 %v3861_v27, %v3853_v39  ;;  %v6835_v27 = vld [vmem:[#allocation14 + $0x168] sm:$0xff] }
 0x37e   : > { %v3435_v29 = vpop.f32.mrf.mxu0  ;;  %v8069_v15 = vpop.f32.mrf.mxu3  ;;  %4575 = vmatpush.bf16.msra.mxu3 %v6836_v0 }
 0x37f   : > { %v3436_v38 = vadd.f32 %v3435_v29, %v8007_v55  ;;  %v6810_v29 = vld [vmem:[#allocation14 + $0xa0] sm:$0xff] }
 0x380   : > { %v3466_v18 = vpop.f32.mrf.mxu1  ;;  %4489 = vmatpush.bf16.msrb.mxu0 %v6811_v54  ;;  %v6832_v54 = vld [vmem:[#allocation14 + $0x150] sm:$0xff] }
 0x381   : > { %v3465_v45 = vadd.f32 %v3464_v7, %v3436_v38  ;;  %3666 = vmatmul.bf16.gmra.mxu0 %v7727_v34  ;;  %3724 = vmatmul.bf16.gmra.mxu2 %v7677_v61  ;;  %v6820_v61 = vld [vmem:[#allocation14 + $0xf0] sm:$0xff] }
 0x382   : > { %4517 = vmatpush.bf16.msrb.mxu1 %v6820_v61  ;;  %v6828_v38 = vld [vmem:[#allocation14 + $0x130] sm:$0xff]  ;;  %4576 = vmatpush.bf16.msra.mxu3 %v6835_v27 }
 0x383   : > { %v3869_v30 = vmax.f32 %v3465_v45, 0.0  ;;  %v6818_v45 = vld [vmem:[#allocation14 + $0xe0] sm:$0xff]  ;;  %v6808_v27 = vld [vmem:[#allocation14 + $0x90] sm:$0xff] }
 0x384   : > { %v8067_v22 = vpop.f32.mrf.mxu2  ;;  %4490 = vmatpush.bf16.msrb.mxu0 %v6810_v29  ;;  %v6824_v29 = vld [vmem:[#allocation14 + $0x110] sm:$0xff] }
 0x386   : > { %v3437_v48 = vpop.f32.mrf.mxu0  ;;  %v8082_v7 = vpop.f32.mrf.mxu3  ;;  %4577 = vmatpush.bf16.msra.mxu3 %v6834_v50  ;;  %v6830_v50 = vld [vmem:[#allocation14 + $0x140] sm:$0xff] }
 0x387   : > { %v3438_v59 = vadd.f32 %v3437_v48, %v8017_v2  ;;  %v6817_v48 = vld [vmem:[#allocation14 + $0xd8] sm:$0xff] }
 0x388   : > { %v8072_v33 = vpop.f32.mrf.mxu1 }
 0x389   : > { %v3467_v55 = vadd.f32 %v3466_v18, %v3438_v59  ;;  %v6833_v59 = vld [vmem:[#allocation14 + $0x158] sm:$0xff] }
 0x38a   : > { %4578 = vmatpush.bf16.msra.mxu3 %v6833_v59 }
 0x38b   : > { %v3877_v36 = vmax.f32 %v3467_v55, 0.0  ;;  %3796 = vmatmul.bf16.vlgmr.msra.gmra.mxu1 %v7686_v19  ;;  %4466 = vmatmul.bf16.vlgmr.msrb.gmra.mxu3 %v7849_v17  ;;  %v6829_v19 = vld [vmem:[#allocation14 + $0x138] sm:$0xff]  ;;  %v6819_v17 = vld [vmem:[#allocation14 + $0xe8] sm:$0xff] }
 0x38c   : > { %v8076_v24 = vpop.f32.mrf.mxu2  ;;  %4545 = vmatpush.bf16.msra.mxu2 %v6829_v19  ;;  %4518 = vmatpush.bf16.msrb.mxu1 %v6819_v17  ;;  %v6809_v55 = vld [vmem:[#allocation14 + $0x98] sm:$0xff]  ;;  %v6815_v19 = vld [vmem:[#allocation14 + $0xc8] sm:$0xff] }
 0x38d   : > { %v8078_v57 = vpack.c.bf16 %v3877_v36, %v3869_v30  ;;  %v6826_v30 = vld [vmem:[#allocation14 + $0x120] sm:$0xff]  ;;  %4491 = vmatpush.bf16.msrb.mxu0 %v6809_v55  ;;  %v6831_v17 = vld [vmem:[#allocation14 + $0x148] sm:$0xff] }
 0x38e   : > { %v8080_v2 = vpop.f32.mrf.mxu0  ;;  %4579 = vmatpush.bf16.msra.mxu3 %v6832_v54  ;;  %v6806_v55 = vld [vmem:[#allocation14 + $0x80] sm:$0xff] }
 0x390   : > { %v8084_v39 = vpop.f32.mrf.mxu1  ;;  %4546 = vmatpush.bf16.msra.mxu2 %v6828_v38  ;;  %4519 = vmatpush.bf16.msrb.mxu1 %v6818_v45  ;;  %v6814_v45 = vld [vmem:[#allocation14 + $0xc0] sm:$0xff] }
 0x391   : > { %3767 = vmatmul.bf16.vlgmr.msra.gmra.mxu0 %v7691_v40  ;;  %4437 = vmatmul.bf16.vlgmr.msrb.gmra.mxu2 %v7790_v1  ;;  %v8094_v1 = vpop.f32.mrf.mxu3 }
 0x392   : > { %4580 = vmatpush.bf16.msra.mxu3 %v6831_v17  ;;  %4492 = vmatpush.bf16.msrb.mxu0 %v6808_v27 }
 0x394   : > { %v8088_v13 = vpop.f32.mrf.mxu2  ;;  %4547 = vmatpush.bf16.msra.mxu2 %v6827_v47  ;;  %4520 = vmatpush.bf16.msrb.mxu1 %v6817_v48  ;;  %v6807_v47 = vld [vmem:[#allocation14 + $0x88] sm:$0xff] }
 0x395   : > { %v6823_v48 = vld [vmem:[#allocation14 + $0x108] sm:$0xff] }
 0x396   : > { %v8090_v18 = vpop.f32.mrf.mxu0  ;;  %4581 = vmatpush.bf16.msra.mxu3 %v6830_v50  ;;  %4493 = vmatpush.bf16.msrb.mxu0 %v6807_v47 }
 0x398   : > { %v8092_v40 = vpop.f32.mrf.mxu1  ;;  %4548 = vmatpush.bf16.msra.mxu2 %v6826_v30  ;;  %4521 = vmatpush.bf16.msrb.mxu1 %v6816_v42  ;;  %v6822_v30 = vld [vmem:[#allocation14 + $0x100] sm:$0xff] }
 0x39a   : > { %4494 = vmatpush.bf16.msrb.mxu0 %v6806_v55 }
 0x39b   : > { %3801 = vmatmul.bf16.gmra.mxu1 %v7698_v20  ;;  %4471 = vmatmul.bf16.gmra.mxu3 %v7864_v51  ;;  %v6825_v20 = vld [vmem:[#allocation14 + $0x118] sm:$0xff]  ;;  %v8106_v51 = vpop.f32.mrf.mxu3 }
 0x39c   : > { %v8098_v36 = vpop.f32.mrf.mxu2  ;;  %4549 = vmatpush.bf16.msra.mxu2 %v6825_v20  ;;  %4522 = vmatpush.bf16.msrb.mxu1 %v6815_v19 }
 0x39e   : > { %v8100_v61 = vpop.f32.mrf.mxu0 }
 0x3a0   : > { %v8102_v0 = vpop.f32.mrf.mxu1  ;;  %4550 = vmatpush.bf16.msra.mxu2 %v6824_v29  ;;  %4523 = vmatpush.bf16.msrb.mxu1 %v6814_v45 }
 0x3a1   : > { %3772 = vmatmul.bf16.gmra.mxu0 %v7703_v49  ;;  %4442 = vmatmul.bf16.gmra.mxu2 %v7805_v16 }
 0x3a3   : > { %v8116_v59 = vpop.f32.mrf.mxu3 }
 0x3a4   : > { %v8110_v49 = vpop.f32.mrf.mxu2  ;;  %4551 = vmatpush.bf16.msra.mxu2 %v6823_v48 }
 0x3a6   : > { %v8108_v38 = vpop.f32.mrf.mxu0 }
 0x3a8   : > { %v8112_v16 = vpop.f32.mrf.mxu1  ;;  %4552 = vmatpush.bf16.msra.mxu2 %v6822_v30 }
 0x3ab   : > { %3806 = vmatmul.bf16.gmra.mxu1 %v7710_v44  ;;  %4476 = vmatmul.bf16.gmra.mxu3 %v7878_v25  ;;  %v8126_v44 = vld [vmem:[#allocation13] sm:$0xff]  ;;  %v8135_v27 = vpop.f32.mrf.mxu3 }
 0x3ac   : > { %v8124_v20 = vpop.f32.mrf.mxu2  ;;  %v8129_v25 = vperm.slane %v8126_v44, 5 }
 0x3ae   : > { %v8118_v42 = vpop.f32.mrf.mxu0  ;;  %v3481_v17 = vadd.f32 %v8028_v52, %v8129_v25  ;;  %v6845_v52 = vld [vmem:[#allocation14 + $0x1b8] sm:$0xff] }
 0x3af   : > { %4603 = vmatpush.bf16.msra.mxu0 %v6845_v52 }
 0x3b0   : > { %v8120_v54 = vpop.f32.mrf.mxu1 }
 0x3b1   : > { %3777 = vmatmul.bf16.gmra.mxu0 %v7715_v58  ;;  %4447 = vmatmul.bf16.gmra.mxu2 %v7819_v10  ;;  %v3479_v58 = vadd.f32 %v8021_v3, %v8129_v25  ;;  %v3510_v10 = vadd.f32 %v8023_v53, %v3481_v17 }
 0x3b3   : > { %v3508_v50 = vadd.f32 %v8014_v37, %v3479_v58  ;;  %v3539_v47 = vadd.f32 %v8090_v18, %v3510_v10  ;;  %v8154_v53 = vpop.f32.mrf.mxu3  ;;  %v6844_v18 = vld [vmem:[#allocation14 + $0x1b0] sm:$0xff]  ;;  %v3486_v58 = vadd.f32 %v8044_v46, %v8129_v25 }
 0x3b4   : > { %v8144_v45 = vpop.f32.mrf.mxu2  ;;  %4604 = vmatpush.bf16.msra.mxu0 %v6844_v18  ;;  %v6842_v18 = vld [vmem:[#allocation14 + $0x1a0] sm:$0xff] }
 0x3b5   : > { %v3537_v55 = vadd.f32 %v8080_v2, %v3508_v50  ;;  %v3568_v3 = vadd.f32 %v8084_v39, %v3539_v47  ;;  %v6852_v47 = vld [vmem:[#allocation14 + $0x1f0] sm:$0xff] }
 0x3b6   : > { %v8131_v19 = vpop.f32.mrf.mxu0 }
 0x3b7   : > { %v3830_v37 = vmax.f32 %v3568_v3, 0.0 }
 0x3b8   : > { %v8137_v29 = vpop.f32.mrf.mxu1 }
 0x3bb   : > { %3811 = vmatmul.bf16.gmra.mxu1 %v7722_v23  ;;  %4481 = vmatmul.bf16.gmra.mxu3 %v7892_v56  ;;  %v3566_v23 = vadd.f32 %v8072_v33, %v3537_v55  ;;  %v6853_v56 = vld [vmem:[#allocation14 + $0x1f8] sm:$0xff]  ;;  %v3515_v33 = vadd.f32 %v8040_v43, %v3486_v58  ;;  %v8170_v50 = vpop.f32.mrf.mxu3  ;;  %v6843_v55 = vld [vmem:[#allocation14 + $0x1a8] sm:$0xff]  ;;  %v3491_v58 = vadd.f32 %v8060_v31, %v8129_v25 }
 0x3bc   : > { %4632 = vmatpush.bf16.msra.mxu1 %v6853_v56  ;;  %v8159_v17 = vpop.f32.mrf.mxu2  ;;  %4605 = vmatpush.bf16.msra.mxu0 %v6843_v55 }
 0x3bd   : > { %v3822_v39 = vmax.f32 %v3566_v23, 0.0  ;;  %v3544_v46 = vadd.f32 %v8108_v38, %v3515_v33 }
 0x3be   : > { %v8148_v48 = vpop.f32.mrf.mxu0 }
 0x3bf   : > { %v3573_v56 = vadd.f32 %v8102_v0, %v3544_v46 }
 0x3c0   : > { %v8151_v30 = vpop.f32.mrf.mxu1  ;;  %4633 = vmatpush.bf16.msra.mxu1 %v6852_v47  ;;  %4606 = vmatpush.bf16.msra.mxu0 %v6842_v18  ;;  %v6841_v47 = vld [vmem:[#allocation14 + $0x198] sm:$0xff] }
 0x3c1   : > { %3782 = vmatmul.bf16.gmra.mxu0 %v7727_v34  ;;  %4452 = vmatmul.bf16.gmra.mxu2 %v7833_v32  ;;  %v3484_v34 = vadd.f32 %v8037_v26, %v8129_v25  ;;  %v3886_v32 = vpack.c.bf16 %v3830_v37, %v3822_v39  ;;  %v3846_v38 = vmax.f32 %v3573_v56, 0.0  ;;  %v6840_v56 = vld [vmem:[#allocation14 + $0x190] sm:$0xff] }
 0x3c3   : > { %v3513_v52 = vadd.f32 %v8032_v60, %v3484_v34  ;;  %v6851_v60 = vld [vmem:[#allocation14 + $0x1e8] sm:$0xff]  ;;  %v8186_v37 = vpop.f32.mrf.mxu3  ;;  %v3520_v34 = vadd.f32 %v8056_v11, %v3491_v58  ;;  %v6848_v58 = vld [vmem:[#allocation14 + $0x1d0] sm:$0xff] }
 0x3c4   : > { %v8178_v26 = vpop.f32.mrf.mxu2  ;;  %4634 = vmatpush.bf16.msra.mxu1 %v6851_v60  ;;  %4607 = vmatpush.bf16.msra.mxu0 %v6841_v47 }
 0x3c5   : > { %v3542_v23 = vadd.f32 %v8100_v61, %v3513_v52  ;;  %v3549_v31 = vadd.f32 %v8131_v19, %v3520_v34 }
 0x3c6   : > { %v8161_v2 = vpop.f32.mrf.mxu0 }
 0x3c7   : > { %v3578_v11 = vadd.f32 %v8120_v54, %v3549_v31 }
 0x3c8   : > { %v8165_v10 = vpop.f32.mrf.mxu1  ;;  %4608 = vmatpush.bf16.msra.mxu0 %v6840_v56 }
 0x3cb   : > { %4524 = vmatmul.bf16.vlgmr.msrb.gmra.mxu1 %v7969_v5  ;;  %4582 = vmatmul.bf16.vlgmr.msra.gmra.mxu3 %v3886_v32  ;;  %v3571_v5 = vadd.f32 %v8092_v40, %v3542_v23  ;;  %v6850_v32 = vld [vmem:[#allocation14 + $0x1e0] sm:$0xff]  ;;  %v3862_v23 = vmax.f32 %v3578_v11, 0.0  ;;  %v8243_v11 = vperm.slane %v8126_v44, 6 }
 0x3cc   : > { %v8196_v40 = vpop.f32.mrf.mxu2  ;;  %4635 = vmatpush.bf16.msra.mxu1 %v6850_v32 }
 0x3cd   : > { %v3838_v39 = vmax.f32 %v3571_v5, 0.0  ;;  %v3496_v5 = vadd.f32 %v8076_v24, %v8129_v25 }
 0x3ce   : > { %v8175_v3 = vpop.f32.mrf.mxu0 }
 0x3cf   : > { %v3525_v18 = vadd.f32 %v8082_v7, %v3496_v5 }
 0x3d0   : > { %v8180_v43 = vpop.f32.mrf.mxu1 }
 0x3d1   : > { %4495 = vmatmul.bf16.vlgmr.msrb.gmra.mxu0 %v7910_v63  ;;  %4553 = vmatmul.bf16.vlgmr.msra.gmra.mxu2 %v8030_v35  ;;  %v3489_v63 = vadd.f32 %v8053_v62, %v8129_v25  ;;  %v3894_v35 = vpack.c.bf16 %v3846_v38, %v3838_v39  ;;  %v8205_v62 = vpop.f32.mrf.mxu3  ;;  %v6839_v38 = vld [vmem:[#allocation14 + $0x188] sm:$0xff]  ;;  %v3554_v39 = vadd.f32 %v8161_v2, %v3525_v18 }
 0x3d2   : > { %4609 = vmatpush.bf16.msra.mxu0 %v6839_v38  ;;  %v6847_v2 = vld [vmem:[#allocation14 + $0x1c8] sm:$0xff] }
 0x3d3   : > { %v3518_v33 = vadd.f32 %v8049_v14, %v3489_v63  ;;  %v6849_v14 = vld [vmem:[#allocation14 + $0x1d8] sm:$0xff]  ;;  %v6838_v63 = vld [vmem:[#allocation14 + $0x180] sm:$0xff]  ;;  %v3583_v7 = vadd.f32 %v8151_v30, %v3554_v39 }
 0x3d4   : > { %v8213_v19 = vpop.f32.mrf.mxu2  ;;  %4636 = vmatpush.bf16.msra.mxu1 %v6849_v14 }
 0x3d5   : > { %v3547_v46 = vadd.f32 %v8118_v42, %v3518_v33  ;;  %v3878_v32 = vmax.f32 %v3583_v7, 0.0 }
 0x3d6   : > { %v8188_v61 = vpop.f32.mrf.mxu0  ;;  %4610 = vmatpush.bf16.msra.mxu0 %v6838_v63 }
 0x3d8   : > { %v8192_v0 = vpop.f32.mrf.mxu1  ;;  %4637 = vmatpush.bf16.msra.mxu1 %v6848_v58 }
 0x3db   : > { %4529 = vmatmul.bf16.gmra.mxu1 %v7984_v21  ;;  %4587 = vmatmul.bf16.gmra.mxu3 %v3894_v35  ;;  %v3576_v21 = vadd.f32 %v8112_v16, %v3547_v46 }
 0x3dc   : > { %v3712_v35 = vpop.f32.mrf.mxu2  ;;  %4638 = vmatpush.bf16.msra.mxu1 %v6847_v2 }
 0x3dd   : > { %v3854_v60 = vmax.f32 %v3576_v21, 0.0  ;;  %v3595_v21 = vadd.f32 %v8088_v13, %v8243_v11 }
 0x3de   : > { %v8202_v52 = vpop.f32.mrf.mxu0 }
 0x3df   : > { %v3902_v16 = vpack.c.bf16 %v3862_v23, %v3854_v60  ;;  %v3624_v56 = vadd.f32 %v8094_v1, %v3595_v21  ;;  %v3602_v1 = vadd.f32 %v8124_v20, %v8243_v11 }
 0x3e0   : > { %v8207_v55 = vpop.f32.mrf.mxu1 }
 0x3e1   : > { %4500 = vmatmul.bf16.gmra.mxu0 %v7925_v8  ;;  %4558 = vmatmul.bf16.gmra.mxu2 %v8046_v28  ;;  %v3494_v8 = vadd.f32 %v8067_v22, %v8129_v25  ;;  %v8223_v28 = vpop.f32.mrf.mxu3  ;;  %v3653_v5 = vadd.f32 %v8175_v3, %v3624_v56 }
 0x3e3   : > { %v3523_v24 = vadd.f32 %v8069_v15, %v3494_v8  ;;  %v3682_v38 = vadd.f32 %v8165_v10, %v3653_v5 }
 0x3e4   : > { %v3715_v47 = vpop.f32.mrf.mxu2 }
 0x3e5   : > { %v3552_v22 = vadd.f32 %v8148_v48, %v3523_v24 }
 0x3e6   : > { %v8215_v42 = vpop.f32.mrf.mxu0 }
 0x3e8   : > { %v8219_v54 = vpop.f32.mrf.mxu1 }
 0x3e9   : > { %v3741_v15 = vpop.f32.mrf.mxu3 }
 0x3eb   : > { %4534 = vmatmul.bf16.gmra.mxu1 %v7998_v9  ;;  %4592 = vmatmul.bf16.gmra.mxu3 %v3902_v16  ;;  %v3581_v9 = vadd.f32 %v8137_v29, %v3552_v22 }
 0x3ed   : > { %v3870_v31 = vmax.f32 %v3581_v9, 0.0 }
 0x3ee   : > { %v8229_v34 = vpop.f32.mrf.mxu0 }
 0x3ef   : > { %v3910_v46 = vpack.c.bf16 %v3878_v32, %v3870_v31 }
 0x3f0   : > { %v8232_v25 = vpop.f32.mrf.mxu1 }
 0x3f1   : > { %4505 = vmatmul.bf16.gmra.mxu0 %v7939_v41  ;;  %4563 = vmatmul.bf16.gmra.mxu2 %v8062_v6  ;;  %v6846_v41 = vld [vmem:[#allocation14 + $0x1c0] sm:$0xff]  ;;  %v3597_v6 = vadd.f32 %v8098_v36, %v8243_v11  ;;  %v3744_v29 = vpop.f32.mrf.mxu3 }
 0x3f2   : > { %4639 = vmatpush.bf16.msra.mxu1 %v6846_v41 }
 0x3f3   : > { %v3626_v23 = vadd.f32 %v8106_v51, %v3597_v6  ;;  %v8265_v51 = vperm.slane %v8126_v44, 7  ;;  %v3631_v44 = vadd.f32 %v8135_v27, %v3602_v1 }
 0x3f5   : > { %v3655_v36 = vadd.f32 %v8188_v61, %v3626_v23  ;;  %v3823_v61 = vmax.f32 %v3682_v38, 0.0  ;;  %v3711_v3 = vadd.f32 %v8213_v19, %v8265_v51  ;;  %v3713_v10 = vadd.f32 %v3712_v35, %v8265_v51 }
 0x3f6   : > { %v8238_v33 = vpop.f32.mrf.mxu0  ;;  %v3660_v22 = vadd.f32 %v8215_v42, %v3631_v44  ;;  %v3607_v42 = vadd.f32 %v8159_v17, %v8243_v11 }
 0x3f7   : > { %v3684_v8 = vadd.f32 %v8180_v43, %v3655_v36  ;;  %v3600_v43 = vadd.f32 %v8110_v49, %v8243_v11  ;;  %v3740_v63 = vadd.f32 %v8223_v28, %v3711_v3  ;;  %v3742_v9 = vadd.f32 %v3741_v15, %v3713_v10 }
 0x3f8   : > { %v8240_v48 = vpop.f32.mrf.mxu1  ;;  %v3689_v32 = vadd.f32 %v8207_v55, %v3660_v22  ;;  %v3605_v55 = vadd.f32 %v8144_v45, %v8243_v11 }
 0x3f9   : > { %v3746_v13 = vpop.f32.mrf.mxu3  ;;  %v3629_v20 = vadd.f32 %v8116_v59, %v3600_v43 }
 0x3fa   : > { %v3847_v28 = vmax.f32 %v3689_v32, 0.0  ;;  %v3634_v17 = vadd.f32 %v8154_v53, %v3605_v55 }
 0x3fb   : > { %4539 = vmatmul.bf16.gmra.mxu1 %v8012_v12  ;;  %4597 = vmatmul.bf16.gmra.mxu3 %v3910_v46  ;;  %v3717_v12 = vpop.f32.mrf.mxu2  ;;  %v3658_v7 = vadd.f32 %v8202_v52, %v3629_v20  ;;  %v3716_v52 = vadd.f32 %v3715_v47, %v8265_v51 }
 0x3fc   : > { %v3663_v1 = vadd.f32 %v8229_v34, %v3634_v17 }
 0x3fd   : > { %v3687_v46 = vadd.f32 %v8192_v0, %v3658_v7  ;;  %v3745_v38 = vadd.f32 %v3744_v29, %v3716_v52 }
 0x3fe   : > { %v8248_v30 = vpop.f32.mrf.mxu0 }
 0x3ff   : > { %v3839_v23 = vmax.f32 %v3687_v46, 0.0 }
 0x400   : > { %v8252_v14 = vpop.f32.mrf.mxu1 }
 0x401   : > { %4510 = vmatmul.bf16.gmra.mxu0 %v7953_v4  ;;  %4568 = vmatmul.bf16.gmra.mxu2 %v8078_v57  ;;  %v3831_v4 = vmax.f32 %v3684_v8, 0.0  ;;  %v8277_v39 = vpop.f32.mrf.mxu3  ;;  %v3895_v36 = vpack.c.bf16 %v3847_v28, %v3839_v23  ;;  %v3718_v8 = vadd.f32 %v3717_v12, %v8265_v51  ;;  %v3692_v12 = vadd.f32 %v8219_v54, %v3663_v1 }
 0x403   : > { %v8267_v57 = vpop.f32.mrf.mxu2  ;;  %v3887_v58 = vpack.c.bf16 %v3831_v4, %v3823_v61  ;;  %v3747_v3 = vadd.f32 %v3746_v13, %v3718_v8 }
 0x404   : > { %v3721_v34 = vadd.f32 %v8267_v57, %v8265_v51 }
 0x406   : > { %v8260_v60 = vpop.f32.mrf.mxu0 }
 0x408   : > { %v3797_v16 = vpop.f32.mrf.mxu1 }
 0x409   : > { %v3751_v6 = vpop.f32.mrf.mxu3 }
 0x40b   : > { %v3722_v49 = vpop.f32.mrf.mxu2 }
 0x40c   : > { %v3723_v7 = vadd.f32 %v3722_v49, %v8265_v51 }
 0x40e   : > { %v3768_v18 = vpop.f32.mrf.mxu0 }
 0x40f   : > { %v3769_v19 = vadd.f32 %v3768_v18, %v3740_v63  ;;  %v3855_v63 = vmax.f32 %v3692_v12, 0.0 }
 0x410   : > { %v3799_v24 = vpop.f32.mrf.mxu1 }
 0x411   : > { %4611 = vmatmul.bf16.vlgmr.msra.gmra.mxu0 %v3887_v58  ;;  %v3798_v35 = vadd.f32 %v3797_v16, %v3769_v19  ;;  %v3636_v16 = vadd.f32 %v8170_v50, %v3607_v42  ;;  %v3754_v61 = vpop.f32.mrf.mxu3 }
 0x413   : > { %v3824_v21 = vmax.f32 %v3798_v35, 0.0  ;;  %v3725_v5 = vpop.f32.mrf.mxu2  ;;  %v3665_v4 = vadd.f32 %v8238_v33, %v3636_v16  ;;  %v3612_v33 = vadd.f32 %v8196_v40, %v8243_v11 }
 0x414   : > { %v3726_v42 = vadd.f32 %v3725_v5, %v8265_v51 }
 0x415   : > { %v3694_v18 = vadd.f32 %v8232_v25, %v3665_v4  ;;  %v3610_v25 = vadd.f32 %v8178_v26, %v8243_v11  ;;  %v3752_v11 = vadd.f32 %v3751_v6, %v3723_v7 }
 0x416   : > { %v3770_v2 = vpop.f32.mrf.mxu0 }
 0x417   : > { %v3771_v31 = vadd.f32 %v3770_v2, %v3742_v9  ;;  %v3863_v10 = vmax.f32 %v3694_v18, 0.0  ;;  %v3641_v9 = vadd.f32 %v8205_v62, %v3612_v33  ;;  %v3750_v2 = vadd.f32 %v8277_v39, %v3721_v34 }
 0x418   : > { %v3802_v27 = vpop.f32.mrf.mxu1  ;;  %v3639_v40 = vadd.f32 %v8186_v37, %v3610_v25 }
 0x419   : > { %v3800_v41 = vadd.f32 %v3799_v24, %v3771_v31  ;;  %v3756_v22 = vpop.f32.mrf.mxu3  ;;  %v3903_v54 = vpack.c.bf16 %v3863_v10, %v3855_v63  ;;  %v3670_v57 = vadd.f32 %v8260_v60, %v3641_v9  ;;  %v8342_v9 = vld [vmem:[%s8428_s8] ss:$0 sm:$0xff] }
 0x41a   : > { %v3668_v26 = vadd.f32 %v8248_v30, %v3639_v40 }
 0x41b   : > { %v3832_v59 = vmax.f32 %v3800_v41, 0.0  ;;  %v3727_v29 = vpop.f32.mrf.mxu2 }
 0x41c   : > { %v3697_v62 = vadd.f32 %v8240_v48, %v3668_v26 }
 0x41d   : > { %v3888_v15 = vpack.c.bf16 %v3832_v59, %v3824_v21 }
 0x41e   : > { %v3773_v56 = vpop.f32.mrf.mxu0  ;;  %v3871_v60 = vmax.f32 %v3697_v62, 0.0 }
 0x41f   : > { %4640 = vmatmul.bf16.vlgmr.msra.gmra.mxu1 %v3888_v15  ;;  %v3774_v47 = vadd.f32 %v3773_v56, %v3745_v38  ;;  %v3755_v15 = vadd.f32 %v3754_v61, %v3726_v42 }
 0x420   : > { %v3804_v0 = vpop.f32.mrf.mxu1 }
 0x421   : > { %4616 = vmatmul.bf16.gmra.mxu0 %v3895_v36  ;;  %v3803_v43 = vadd.f32 %v3802_v27, %v3774_v47  ;;  %v3699_v27 = vadd.f32 %v8252_v14, %v3670_v57  ;;  %v4467_v41 = vpop.f32.mrf.mxu3  ;;  %v3728_v14 = vadd.f32 %v3727_v29, %v8265_v51 }
 0x423   : > { %v3840_v44 = vmax.f32 %v3803_v43, 0.0  ;;  %v8308_v35 = vpop.f32.mrf.mxu2  ;;  %v3879_v21 = vmax.f32 %v3699_v27, 0.0  ;;  %v3757_v36 = vadd.f32 %v3756_v22, %v3728_v14 }
 0x424   : > { %v4439_v40 = vadd.f32 %v8342_v9, %v8308_v35 }
 0x425   : > { %v3911_v6 = vpack.c.bf16 %v3879_v21, %v3871_v60 }
 0x426   : > { %v3775_v45 = vpop.f32.mrf.mxu0  ;;  %v4468_v26 = vadd.f32 %v4467_v41, %v4439_v40 }
 0x427   : > { %v3776_v58 = vadd.f32 %v3775_v45, %v3747_v3 }
 0x428   : > { %v3807_v24 = vpop.f32.mrf.mxu1 }
 0x429   : > { %v3805_v50 = vadd.f32 %v3804_v0, %v3776_v58  ;;  %v4469_v56 = vpop.f32.mrf.mxu3 }
 0x42b   : > { %v3848_v53 = vmax.f32 %v3805_v50, 0.0  ;;  %v4440_v52 = vpop.f32.mrf.mxu2 }
 0x42d   : > { %v3896_v13 = vpack.c.bf16 %v3848_v53, %v3840_v44 }
 0x42e   : > { %v3778_v20 = vpop.f32.mrf.mxu0 }
 0x42f   : > { %4645 = vmatmul.bf16.gmra.mxu1 %v3896_v13  ;;  %v3779_v32 = vadd.f32 %v3778_v20, %v3750_v2 }
 0x430   : > { %v3809_v19 = vpop.f32.mrf.mxu1 }
 0x431   : > { %4621 = vmatmul.bf16.gmra.mxu0 %v3903_v54  ;;  %v3808_v46 = vadd.f32 %v3807_v24, %v3779_v32  ;;  %v4472_v47 = vpop.f32.mrf.mxu3 }
 0x433   : > { %v3856_v37 = vmax.f32 %v3808_v46, 0.0  ;;  %v4443_v38 = vpop.f32.mrf.mxu2  ;;  %v4441_v46 = vadd.f32 %v8342_v9, %v4440_v52 }
 0x434   : > { %v4444_v35 = vadd.f32 %v8342_v9, %v4443_v38 }
 0x435   : > { %v4470_v21 = vadd.f32 %v4469_v56, %v4441_v46 }
 0x436   : > { %v3780_v31 = vpop.f32.mrf.mxu0  ;;  %v4473_v14 = vadd.f32 %v4472_v47, %v4444_v35 }
 0x437   : > { %v3781_v49 = vadd.f32 %v3780_v31, %v3752_v11 }
 0x438   : > { %v3812_v28 = vpop.f32.mrf.mxu1 }
 0x439   : > { %v3810_v39 = vadd.f32 %v3809_v19, %v3781_v49  ;;  %v4474_v61 = vpop.f32.mrf.mxu3 }
 0x43b   : > { %v3864_v59 = vmax.f32 %v3810_v39, 0.0  ;;  %v4445_v18 = vpop.f32.mrf.mxu2 }
 0x43c   : > { %v4446_v56 = vadd.f32 %v8342_v9, %v4445_v18 }
 0x43d   : > { %v3904_v23 = vpack.c.bf16 %v3864_v59, %v3856_v37 }
 0x43e   : > { %v3783_v30 = vpop.f32.mrf.mxu0 }
 0x43f   : > { %4650 = vmatmul.bf16.gmra.mxu1 %v3904_v23  ;;  %v3784_v48 = vadd.f32 %v3783_v30, %v3755_v15 }
 0x440   : > { %v3814_v55 = vpop.f32.mrf.mxu1 }
 0x441   : > { %4626 = vmatmul.bf16.gmra.mxu0 %v3911_v6  ;;  %v3813_v8 = vadd.f32 %v3812_v28, %v3784_v48  ;;  %v8315_v12 = vpop.f32.mrf.mxu3 }
 0x443   : > { %v3872_v4 = vmax.f32 %v3813_v8, 0.0  ;;  %v4448_v58 = vpop.f32.mrf.mxu2 }
 0x446   : > { %v3785_v0 = vpop.f32.mrf.mxu0 }
 0x447   : > { %v3786_v16 = vadd.f32 %v3785_v0, %v3757_v36 }
 0x448   : > { %v4525_v3 = vpop.f32.mrf.mxu1 }
 0x449   : > { %v3815_v17 = vadd.f32 %v3814_v55, %v3786_v16  ;;  %v8319_v44 = vpop.f32.mrf.mxu3 }
 0x44b   : > { %v3880_v5 = vmax.f32 %v3815_v17, 0.0  ;;  %v8317_v29 = vpop.f32.mrf.mxu2 }
 0x44d   : > { %v3912_v1 = vpack.c.bf16 %v3880_v5, %v3872_v4  ;;  %v4475_v4 = vadd.f32 %v4474_v61, %v4446_v56 }
 0x44e   : > { %v4496_v45 = vpop.f32.mrf.mxu0 }
 0x44f   : > { %4655 = vmatmul.bf16.gmra.mxu1 %v3912_v1  ;;  %v4497_v27 = vadd.f32 %v4496_v45, %v4468_v26  ;;  %v4449_v45 = vadd.f32 %v8342_v9, %v4448_v58 }
 0x450   : > { %v4527_v43 = vpop.f32.mrf.mxu1 }
 0x451   : > { %v8325_v34 = vpop.f32.mrf.mxu3  ;;  %v4526_v49 = vadd.f32 %v4525_v3, %v4497_v27 }
 0x453   : > { %v8323_v63 = vpop.f32.mrf.mxu2 }
 0x456   : > { %v4498_v51 = vpop.f32.mrf.mxu0 }
 0x457   : > { %v4499_v59 = vadd.f32 %v4498_v51, %v4470_v21 }
 0x458   : > { %v4530_v50 = vpop.f32.mrf.mxu1 }
 0x459   : > { %v8335_v54 = vpop.f32.mrf.mxu3  ;;  %v4528_v23 = vadd.f32 %v4527_v43, %v4499_v59 }
 0x45b   : > { %v8331_v25 = vpop.f32.mrf.mxu2 }
 0x45e   : > { %v4501_v24 = vpop.f32.mrf.mxu0 }
 0x45f   : > { %v4502_v55 = vadd.f32 %v4501_v24, %v4473_v14 }
 0x460   : > { %v4532_v53 = vpop.f32.mrf.mxu1 }
 0x461   : > { %v4583_v57 = vpop.f32.mrf.mxu3  ;;  %v4531_v8 = vadd.f32 %v4530_v50, %v4502_v55  ;;  %v4478_v50 = vadd.f32 %v8315_v12, %v4449_v45 }
 0x463   : > { %v4554_v7 = vpop.f32.mrf.mxu2 }
 0x464   : > { %v4555_v28 = vadd.f32 %v4554_v7, %v4526_v49 }
 0x466   : > { %v4503_v10 = vpop.f32.mrf.mxu0  ;;  %v4584_v42 = vadd.f32 %v4583_v57, %v4555_v28 }
 0x467   : > { %v4504_v47 = vadd.f32 %v4503_v10, %v4475_v4  ;;  %v4451_v10 = vadd.f32 %v8342_v9, %v8317_v29 }
 0x468   : > { %v8327_v13 = vpop.f32.mrf.mxu1 }
 0x469   : > { %v4585_v62 = vpop.f32.mrf.mxu3  ;;  %v4533_v43 = vadd.f32 %v4532_v53, %v4504_v47  ;;  %v4480_v49 = vadd.f32 %v8319_v44, %v4451_v10 }
 0x46b   : > { %v4556_v11 = vpop.f32.mrf.mxu2 }
 0x46c   : > { %v4557_v6 = vadd.f32 %v4556_v11, %v4528_v23 }
 0x46e   : > { %v8321_v33 = vpop.f32.mrf.mxu0  ;;  %v4586_v36 = vadd.f32 %v4585_v62, %v4557_v6 }
 0x46f   : > { %v4507_v61 = vadd.f32 %v8321_v33, %v4478_v50  ;;  %v4454_v33 = vadd.f32 %v8342_v9, %v8323_v63 }
 0x470   : > { %v8337_v19 = vpop.f32.mrf.mxu1 }
 0x471   : > { %v4588_v15 = vpop.f32.mrf.mxu3  ;;  %v4536_v58 = vadd.f32 %v8327_v13, %v4507_v61 }
 0x473   : > { %v4559_v60 = vpop.f32.mrf.mxu2 }
 0x474   : > { %v4560_v17 = vadd.f32 %v4559_v60, %v4531_v8 }
 0x476   : > { %v8329_v20 = vpop.f32.mrf.mxu0  ;;  %v4589_v51 = vadd.f32 %v4588_v15, %v4560_v17 }
 0x477   : > { %v4509_v28 = vadd.f32 %v8329_v20, %v4480_v49 }
 0x478   : > { %v8348_v32 = vpop.f32.mrf.mxu1 }
 0x479   : > { %v4590_v1 = vpop.f32.mrf.mxu3 }
 0x47b   : > { %v4561_v0 = vpop.f32.mrf.mxu2 }
 0x47c   : > { %v4562_v40 = vadd.f32 %v4561_v0, %v4533_v43 }
 0x47e   : > { %v8333_v22 = vpop.f32.mrf.mxu0  ;;  %v4591_v11 = vadd.f32 %v4590_v1, %v4562_v40 }
 0x480   : > { %v8351_v39 = vpop.f32.mrf.mxu1 }
 0x481   : > { %v4593_v26 = vpop.f32.mrf.mxu3 }
 0x483   : > { %v4564_v7 = vpop.f32.mrf.mxu2 }
 0x484   : > { %v4565_v46 = vadd.f32 %v4564_v7, %v4536_v58 }
 0x486   : > { %v8344_v2 = vpop.f32.mrf.mxu0  ;;  %v4594_v29 = vadd.f32 %v4593_v26, %v4565_v46 }
 0x489   : > { %v4595_v21 = vpop.f32.mrf.mxu3 }
 0x48b   : > { %v4566_v62 = vpop.f32.mrf.mxu2 }
 0x48e   : > { %v4612_v31 = vpop.f32.mrf.mxu0 }
 0x48f   : > { %v4613_v41 = vadd.f32 %v4612_v31, %v4584_v42  ;;  %v4483_v42 = vadd.f32 %v8325_v34, %v4454_v33 }
 0x491   : > { %v4512_v23 = vadd.f32 %v8333_v22, %v4483_v42 }
 0x493   : > { %v4569_v20 = vpop.f32.mrf.mxu2 }
 0x496   : > { %v4614_v37 = vpop.f32.mrf.mxu0 }
 0x497   : > { %v4615_v16 = vadd.f32 %v4614_v37, %v4586_v36  ;;  %v4538_v37 = vadd.f32 %v8337_v19, %v4509_v28 }
 0x499   : > { %v4567_v35 = vadd.f32 %v4566_v62, %v4538_v37 }
 0x49b   : > { %v4596_v63 = vadd.f32 %v4595_v21, %v4567_v35  ;;  %v4571_v56 = vpop.f32.mrf.mxu2 }
 0x49c   : > { %v4641_v30 = vpop.f32.mrf.mxu1 }
 0x49d   : > { %v4642_v52 = vadd.f32 %v4641_v30, %v4613_v41  ;;  %v4456_v41 = vadd.f32 %v8342_v9, %v8331_v25  ;;  %v4541_v30 = vadd.f32 %v8348_v32, %v4512_v23 }
 0x49e   : > { %v4617_v48 = vpop.f32.mrf.mxu0 }
 0x49f   : > { %4661 = vst [vmem:[%s8356_s25] sm:$0xff] %v4642_v52  ;;  %v4618_v24 = vadd.f32 %v4617_v48, %v4589_v51  ;;  %v4570_v14 = vadd.f32 %v4569_v20, %v4541_v30  ;;  %v4485_v15 = vadd.f32 %v8335_v54, %v4456_v41  ;;  %v4598_v52 = vpop.f32.mrf.mxu3 }
 0x4a1   : > { %v4514_v22 = vadd.f32 %v8344_v2, %v4485_v15  ;;  %v4599_v55 = vadd.f32 %v4598_v52, %v4570_v14 }
 0x4a3   : > { %v4543_v25 = vadd.f32 %v8351_v39, %v4514_v22 }
 0x4a4   : > { %v4643_v38 = vpop.f32.mrf.mxu1 }
 0x4a5   : > { %v4644_v5 = vadd.f32 %v4643_v38, %v4615_v16  ;;  %v4572_v36 = vadd.f32 %v4571_v56, %v4543_v25 }
 0x4a6   : > { %v4619_v3 = vpop.f32.mrf.mxu0 }
 0x4a7   : > { %4662 = vst [vmem:[%s8356_s25 + $0x8] sm:$0xff] %v4644_v5  ;;  %v4620_v53 = vadd.f32 %v4619_v3, %v4591_v11  ;;  %v4600_v54 = vpop.f32.mrf.mxu3 }
 0x4a8   : > { %v4601_v8 = vadd.f32 %v4600_v54, %v4572_v36 }
 0x4ac   : > { %v4646_v18 = vpop.f32.mrf.mxu1 }
 0x4ad   : > { %v4647_v57 = vadd.f32 %v4646_v18, %v4618_v24 }
 0x4ae   : > { %v4622_v31 = vpop.f32.mrf.mxu0 }
 0x4af   : > { %4663 = vst [vmem:[%s8356_s25 + $0x10] sm:$0xff] %v4647_v57  ;;  %v4623_v59 = vadd.f32 %v4622_v31, %v4594_v29 }
 0x4b4   : > { %v4648_v27 = vpop.f32.mrf.mxu1 }
 0x4b5   : > { %v4649_v12 = vadd.f32 %v4648_v27, %v4620_v53 }
 0x4b6   : > { %v4624_v13 = vpop.f32.mrf.mxu0 }
 0x4b7   : > { %4664 = vst [vmem:[%s8356_s25 + $0x18] sm:$0xff] %v4649_v12  ;;  %v4625_v19 = vadd.f32 %v4624_v13, %v4596_v63 }
 0x4bc   : > { %v4651_v60 = vpop.f32.mrf.mxu1 }
 0x4bd   : > { %v4652_v44 = vadd.f32 %v4651_v60, %v4623_v59 }
 0x4be   : > { %v4627_v48 = vpop.f32.mrf.mxu0 }
 0x4bf   : > { %4665 = vst [vmem:[%s8356_s25 + $0x20] sm:$0xff] %v4652_v44  ;;  %v4628_v9 = vadd.f32 %v4627_v48, %v4599_v55 }
 0x4c4   : > { %v4653_v6 = vpop.f32.mrf.mxu1 }
 0x4c5   : > { %v4654_v34 = vadd.f32 %v4653_v6, %v4625_v19 }
 0x4c6   : > { %v4629_v2 = vpop.f32.mrf.mxu0 }
 0x4c7   : > { %4666 = vst [vmem:[%s8356_s25 + $0x28] sm:$0xff] %v4654_v34  ;;  %v4630_v39 = vadd.f32 %v4629_v2, %v4601_v8 }
 0x4cc   : > { %v4656_v32 = vpop.f32.mrf.mxu1 }
 0x4cd   : > { %v4657_v0 = vadd.f32 %v4656_v32, %v4628_v9 }
 0x4cf   : > { %4667 = vst [vmem:[%s8356_s25 + $0x30] sm:$0xff] %v4657_v0 }
 0x4d4   : > { %v4658_v16 = vpop.f32.mrf.mxu1 }
 0x4d5   : > { %v4659_v38 = vadd.f32 %v4658_v16, %v4630_v39 }
 0x4d7   : > { %4668 = vst [vmem:[%s8356_s25 + $0x38] sm:$0xff] %v4659_v38 }
 0x4d8   : > { %7268 = shalt.err (!%p7265_p9)
}
 0x4d9   : > { %s7340_s15 = smov 128   ;;  %s7341_s25 = smov 8  }
 0x4da   : > { %6901 = dma.vmem_to_hbm [thread:$0]  (%p7491_p13), %s4683_s22, 1024, %s4685_s26, %s4670_s16, %s7340_s15, %s7340_s15, %s7341_s25  }
 0x4db PF: > { %s4699_s14 = sand.u32 1, %s7311_s30   ;;  %p8446_p10 = scmp.ge.s32.totalorder %s7323_s12, 2 }
 0x4dc   : > { %s4700_s29 = scalar_lea.sflag [#allocation4], %s4699_s14 }
 0x4dd   : > { %p6930_p11 = pnand %p8446_p10, %p7496_p4 }
 0x4df   : > { %p6931_p0 = pneg %p6930_p11 }
 0x4e1   : > { %7306 = dma.done.wait (%p6931_p0), %s4700_s29, 1024  }
 0x4e2   : > { %7308 = vsyncadd (%p6931_p0), %s4700_s29, 4294966272  ;;  %p26_p2 = scmp.ge.s32.totalorder %s7471_s13, 4   ;;  %s8447_s30 = smov %s7315_s10 }
 0x4e3   : > { %s8448_s10 = smov %s7319_s11  ;;  %s8449_s11 = smov %s7483_s20 }
 0x4e4   : > { %s8450_s12 = smov %s7471_s13  ;;  %28 = sbr.rel (!%p26_p2) target bundleno = 13 (0xd), region = 129 }
 0x4e9   :  { %4706 = vsyncpa [#allocation3], 1 }
 0x4ea   :  { %4708 = vsyncpa [#allocation3 + $0x1], 1 }
 0x4eb   :  { %4709 = vsyncpa [#allocation6], 1 }
 0x4ec   :  { %4710 = vsyncpa [#allocation9], 1 }
 0x4ed   :  { %4711 = vsyncpa [#allocation12], 1 }
 0x4ee   :  { %4712 = vsyncpa [#allocation15], 1 }
 0x4ef   :  { %4713 = vsyncpa [#allocation4], 1 }
 0x4f0   :  { %4715 = vsyncpa [#allocation4 + $0x1], 1 }

// kernel: tpu_custom_call.1
= control target key start
LH: loop header
LB: loop body
LE: loop exit
PB: predicated region body
PF: predicated region fallthrough
CT: control target
= control target key end

     0   :  { %s8420_s0 = inlined_call_operand.hbm [shape: f32[128,128], index: 0, kind: input, shape index: {}]   ;;  %s8421_s1 = inlined_call_operand.hbm [shape: bf16[128,256], index: 1, kind: input, shape index: {}]   ;;  %s8422_s2 = inlined_call_operand.hbm [shape: f32[1,256], index: 2, kind: input, shape index: {}]   ;;  %s8423_s3 = inlined_call_operand.hbm [shape: bf16[256,512], index: 3, kind: input, shape index: {}]   ;;  %s8424_s4 = inlined_call_operand.hbm [shape: f32[1,512], index: 4, kind: input, shape index: {}]   ;;  %s8425_s5 = inlined_call_operand.hbm [shape: bf16[512,1024], index: 5, kind: input, shape index: {}]   ;;  %s8426_s6 = inlined_call_operand.hbm [shape: f32[1,1024], index: 6, kind: input, shape index: {}]   ;;  %s8427_s7 = inlined_call_operand.hbm [shape: bf16[1024,128], index: 7, kind: input, shape index: {}]   ;;  %s8428_s8 = inlined_call_operand.vmem [shape: f32[1,128], index: 8, kind: input, shape index: {}]   ;;  %s8429_s9 = inlined_call_operand.hbm [shape: f32[128,128], index: 9, kind: output, shape index: {}]  }
   0x1   :  { %8432 = sst [smem:[#allocation23_spill]] %s8421_s1 }
   0x2   :  { %8433 = sst [smem:[#allocation24_spill]] %s8422_s2 }
   0x3   :  { %8434 = sst [smem:[#allocation25_spill]] %s8423_s3 }
   0x4   :  { %14 = vsyncpa [#allocation3], 0 }
   0x5   :  { %16 = vsyncpa [#allocation3 + $0x1], 0 }
   0x6   :  { %17 = vsyncpa [#allocation6], 0 }
   0x7   :  { %18 = vsyncpa [#allocation9], 0 }
   0x8   :  { %19 = vsyncpa [#allocation12], 0 }
   0x9   :  { %20 = vsyncpa [#allocation15], 0 }
   0xa   :  { %21 = vsyncpa [#allocation4], 0 }
   0xb   :  { %23 = vsyncpa [#allocation4 + $0x1], 0  ;;  %s7392_s30 = smov 0   ;;  %s7394_s10 = smov 0  }
   0xc   :  { %s7396_s11 = smov 0   ;;  %s7398_s12 = smov 0  }
   0xd LB: > { %s8435_s1 = sld [smem:[#allocation23_spill]]  ;;  %s7416_s16 = sadd.s32 4294967295, %s7323_s12   ;;  %s7323_s12 = sphi %s7398_s12, %s8450_s12   ;;  %s7319_s11 = sphi %s7396_s11, %s8449_s11   ;;  %s7315_s10 = sphi %s7394_s10, %s8448_s10   ;;  %s7311_s30 = sphi %s7392_s30, %s8447_s30  }
   0xe   : > { %p4826_p0 = scmp.ge.s32.totalorder %s7323_s12, 1  ;;  %p50_p1 = scmp.eq.s32.totalorder %s7416_s16, 0 }
   0xf   : > { %p254_p2 = scmp.lt.s32.totalorder %s7323_s12, 3  ;;  %s7325_s18 = smov [#allocation5]  }
  0x10   : > { %s267_s19 = sshll.u32 %s7325_s18, 4  ;;  %s8437_s3 = sld [smem:[#allocation25_spill]]  ;;  %s268_s19 = int_to_ptr.vmem [resolvable:$true] %s267_s19 }
  0x11   : > { %p7421_p3 = pnand %p4826_p0, %p254_p2  ;;  %s7326_s24 = smov [#allocation8]  }
  0x12   : > { %s293_s25 = sshll.u32 %s7326_s24, 4  ;;  %s8430_s26 = smov 128   ;;  %s294_s25 = int_to_ptr.vmem [resolvable:$true] %s293_s25 }
  0x13   : > { %s265_s15 = sshll.u32 %s8435_s1, 4  ;;  %p6903_p4 = pneg %p7421_p3  ;;  %s266_s15 = int_to_ptr.hbm [resolvable:$true] %s265_s15 }
  0x14   : > { %s8431_s27 = smov 8   ;;  %s7329_s28 = smov 256  }
  0x15   : > { %p7433_p6 = pnand %p6903_p4, %p50_p1  ;;  %s7330_s29 = smov 16  }
  0x16   : > { %s291_s22 = sshll.u32 %s8437_s3, 4  ;;  %s317_s18 = sshll.u32 %s8425_s5, 4  ;;  %s292_s22 = int_to_ptr.hbm [resolvable:$true] %s291_s22  ;;  %s318_s18 = int_to_ptr.hbm [resolvable:$true] %s317_s18 }
  0x17   : > { %6906 = dma.hbm_to_vmem [thread:$0]  (!%p7433_p6), %s266_s15, 2048, %s268_s19, [#allocation6], %s8430_s26, %s8430_s26, %s8431_s27  }
  0x18   : > { %6912 = dma.hbm_to_vmem [thread:$0]  (!%p7433_p6), %s292_s22, 8192, %s294_s25, [#allocation9], %s7329_s28, %s7329_s28, %s7330_s29  }
  0x19   : > { %s7331_s20 = smov [#allocation11]   ;;  %s8439_s2 = sld [smem:[#allocation24_spill]] }
  0x1a   : > { %s319_s21 = sshll.u32 %s7331_s20, 4  ;;  %s7332_s15 = smov 512   ;;  %s320_s21 = int_to_ptr.vmem [resolvable:$true] %s319_s21 }
  0x1b   : > { %s7333_s19 = smov 32   ;;  %s7334_s22 = smov [#allocation7]  }
  0x1c   : > { %6918 = dma.hbm_to_vmem [thread:$0]  (!%p7433_p6), %s318_s18, 32768, %s320_s21, [#allocation12], %s7332_s15, %s7332_s15, %s7333_s19  }
  0x1d   : > { %s282_s25 = sshll.u32 %s7334_s22, 4  ;;  %s306_s13 = sshll.u32 %s8424_s4, 4  ;;  %s283_s25 = int_to_ptr.vmem [resolvable:$true] %s282_s25  ;;  %s307_s13 = int_to_ptr.hbm [resolvable:$true] %s306_s13 }
  0x1e   : > { %s332_s20 = sshll.u32 %s8426_s6, 4  ;;  %s7335_s24 = smov [#allocation10]   ;;  %s333_s20 = int_to_ptr.hbm [resolvable:$true] %s332_s20 }
  0x1f   : > { %s280_s3 = sshll.u32 %s8439_s2, 4  ;;  %s308_s26 = sshll.u32 %s7335_s24, 4  ;;  %s281_s3 = int_to_ptr.hbm [resolvable:$true] %s280_s3  ;;  %s309_s26 = int_to_ptr.vmem [resolvable:$true] %s308_s26 }
  0x20   : > { %6909 = dma.hbm_to_vmem [thread:$0]  (!%p7433_p6), %s281_s3, 32, %s283_s25, [#allocation6]  }
  0x21   : > { %6915 = dma.hbm_to_vmem [thread:$0]  (!%p7433_p6), %s307_s13, 64, %s309_s26, [#allocation9]  }
  0x22   : > { %s7336_s18 = smov [#allocation13]   ;;  %s343_s19 = sshll.u32 %s8427_s7, 4  ;;  %s344_s19 = int_to_ptr.hbm [resolvable:$true] %s343_s19 }
  0x23   : > { %s334_s21 = sshll.u32 %s7336_s18, 4  ;;  %s7337_s22 = smov [#allocation14]   ;;  %s335_s21 = int_to_ptr.vmem [resolvable:$true] %s334_s21 }
  0x24   : > { %6921 = dma.hbm_to_vmem [thread:$0]  (!%p7433_p6), %s333_s20, 128, %s335_s21, [#allocation12]  }
  0x25   : > { %s345_s26 = sshll.u32 %s7337_s22, 4  ;;  %s7338_s25 = smov 64   ;;  %s346_s26 = int_to_ptr.vmem [resolvable:$true] %s345_s26 }
  0x26   : > { %s7339_s28 = smov 4   ;;  %s4825_s29 = sadd.s32 4294967294, %s7323_s12  }
  0x27   : > { %6924 = dma.hbm_to_vmem [thread:$0]  (!%p7433_p6), %s344_s19, 8192, %s346_s26, [#allocation15], %s7338_s25, %s7338_s25, %s7339_s28  }
  0x28   : > { %s7471_s13 = sadd.s32 1, %s7323_s12   ;;  %s36_s14 = sadd.s32 1, %s7319_s11 }
  0x29   : > { %s33_s1 = ssub.s32 %s7323_s12, %s7471_s13  ;;  %p43_p7 = scmp.ne.s32.totalorder %s7319_s11, %s7315_s10 }
  0x2a   : > { %p34_p8 = scmp.eq.s32.totalorder %s33_s1, 0  ;;  %p44_p9 = scmp.eq.s32.totalorder %s7323_s12, 0 }
  0x2b   : > { %p49_p10 = scmp.ne.s32.totalorder %s7315_s10, %s7311_s30  ;;  %p241_p11 = scmp.eq.s32.totalorder %s7416_s16, 1 }
  0x2c   : > { %s7483_s20 = scalar_select %p34_p8, %s7319_s11, %s36_s14  }
  0x2d   : > { %p7487_p12 = por %p50_p1, %p49_p10  ;;  %p7491_p13 = por %p241_p11, %p43_p7 }
  0x2e   : > { %p247_p0 = scmp.eq.s32.totalorder %s4825_s29, 1  ;;  %p45_p2 = por %p44_p9, %p43_p7 }
  0x2f   : > { %s362_s18 = sand.u32 1, %s7319_s11   ;;  %p6940_p6 = scmp.lt.s32.totalorder %s7323_s12, 2 }
  0x30   : > { %p7496_p4 = por %p247_p0, %p49_p10  ;;  %s4835_s3 = sshll.u32 %s362_s18, 6 }
  0x31   : > { %s6453_s15 = sshll.u32 %s7323_s12, 6  ;;  %s366_s28 = scalar_lea.vmem [#allocation2], %s4835_s3 }
  0x32   : > { %s371_s26 = scalar_lea.hbm %s8420_s0, %s6453_s15  ;;  %s374_s14 = sshll.u32 %s366_s28, 4  ;;  %s375_s14 = int_to_ptr.vmem [resolvable:$true] %s374_s14 }
  0x33   : > { %s372_s25 = sshll.u32 %s371_s26, 4  ;;  %p7505_p8 = pnand %p6940_p6, %p45_p2  ;;  %s373_s25 = int_to_ptr.hbm [resolvable:$true] %s372_s25 }
  0x34   : > { %s363_s1 = scalar_lea.sflag [#allocation3], %s362_s18  ;;  %s7211_s27 = sshra.s32 %s373_s25, 4  ;;  %s7212_s27 = int_to_ptr.hbm [resolvable:$true] %s7211_s27 }
  0x35   : > { %s7213_s2 = scalar_lea.hbm %s7212_s27, 64  ;;  %p7215_p9 = pneg %p7505_p8 }
  0x36   : > { %p7214_p7 = scmp.ne.s32.totalorder %s7212_s27, %s7213_s2  ;;  %s7218_s3 = scalar_lea.hbm %s8420_s0, 128 }
  0x37   : > { %p7219_p0 = scmp.lt.s32.totalorder %s7212_s27, %s8420_s0  ;;  %p7220_p2 = scmp.lt.s32.totalorder %s7218_s3, %s7213_s2 }
  0x38   : > { %p7216_p10 = pnand %p7215_p9, %p7214_p7 }
  0x39   : > { %p7221_p6 = por %p7220_p2, %p7219_p0 }
  0x3a   : > { %p7217_p11 = pneg %p7216_p10 }
  0x3c   : > { %p7222_p5 = pnand %p7221_p6, %p7217_p11 }
  0x3e   : > { %7225 = shalt.err (!%p7222_p5)
}
  0x3f   : > { %s8444_s18 = smov 8   ;;  %s8445_s28 = smov 128  }
  0x40   : > { %6928 = dma.hbm_to_vmem [thread:$0]  (!%p7505_p8), %s373_s25, 1024, %s375_s14, %s363_s1, %s8445_s28, %s8445_s28, %s8444_s18  }
  0x41   : > { %386 = sbr.rel (%p7421_p3) target bundleno = 1243 (0x4db), region = 56  ;;  %s7525_s15 = sand.u32 (!%p7421_p3), 1, %s7315_s10  }
  0x42   : > { %s4839_s2 = sshll.u32 (!%p7421_p3), %s7525_s15, 6  ;;  %s389_s27 = scalar_lea.sflag (!%p7421_p3), [#allocation3], %s7525_s15 }
  0x43   : > { %s7531_s19 = scalar_lea.vmem (!%p7421_p3), [#allocation2], %s4839_s2 }
  0x46   : > { %7286 = dma.done.wait (%p7487_p12), %s389_s27, 1024  }
  0x47   : > { %7288 = vsyncadd (%p7487_p12), %s389_s27, 4294966272 }
  0x48   : > { %7290 = dma.done.wait (%p50_p1), [#allocation6], 2080  }
  0x49   : > { %7292 = vsyncadd (%p50_p1), [#allocation6], 4294965216 }
  0x4a   : > { %7294 = dma.done.wait (%p50_p1), [#allocation9], 8256  }
  0x4b   : > { %7296 = vsyncadd (%p50_p1), [#allocation9], 4294959040 }
  0x4c   : > { %7298 = dma.done.wait (%p50_p1), [#allocation12], 32896  }
  0x4d   : > { %7300 = vsyncadd (%p50_p1), [#allocation12], 4294934400 }
  0x4e   : > { %7302 = dma.done.wait (%p50_p1), [#allocation15], 8192  }
  0x4f   : > { %7304 = vsyncadd (%p50_p1), [#allocation15], 4294959104  ;;  %v4906_v0 = vld [vmem:[#allocation5 + $0x70] sm:$0xf]  ;;  %v6469_v1 = vld [vmem:[#allocation5 + $0x74] sm:$0xf0] }
  0x50   : > { %v6468_v2 = vld [vmem:[#allocation5 + $0x74] sm:$0xf]  ;;  %v4907_v3 = vor.u32 %v6469_v1, %v4906_v0  ;;  %v4908_v4 = vld [vmem:[#allocation5 + $0x78] sm:$0xf0]  ;;  %v4898_v5 = vld [vmem:[#allocation5 + $0x60] sm:$0xf] }
  0x51   : > { %v6467_v6 = vld [vmem:[#allocation5 + $0x64] sm:$0xf0]  ;;  %v4911_v7 = vor.u32 %v6468_v2, %v4908_v4  ;;  %v6466_v8 = vld [vmem:[#allocation5 + $0x64] sm:$0xf]  ;;  %v4900_v9 = vld [vmem:[#allocation5 + $0x68] sm:$0xf0] }
  0x52   : > { %579 = vmatpush.bf16.msra.mxu0 %v4907_v3  ;;  %v4899_v10 = vor.u32 %v6467_v6, %v4898_v5  ;;  %6855 = vmatpush.bf16.msra.mxu2 %v4907_v3  ;;  %v4903_v11 = vor.u32 %v6466_v8, %v4900_v9  ;;  %v4890_v12 = vld [vmem:[#allocation5 + $0x50] sm:$0xf]  ;;  %v6465_v13 = vld [vmem:[#allocation5 + $0x54] sm:$0xf0]  ;;  %v6464_v14 = vld [vmem:[#allocation5 + $0x54] sm:$0xf] }
  0x53   : > { %608 = vmatpush.bf16.msra.mxu1 %v4911_v7  ;;  %6863 = vmatpush.bf16.msra.mxu3 %v4911_v7  ;;  %v4892_v15 = vld [vmem:[#allocation5 + $0x58] sm:$0xf0]  ;;  %v4891_v16 = vor.u32 %v6465_v13, %v4890_v12  ;;  %v4882_v18 = vld [vmem:[#allocation5 + $0x40] sm:$0xf]  ;;  %v6463_v19 = vld [vmem:[#allocation5 + $0x44] sm:$0xf0] }
  0x54   : > { %v4895_v17 = vor.u32 %v6464_v14, %v4892_v15  ;;  %v6462_v20 = vld [vmem:[#allocation5 + $0x44] sm:$0xf]  ;;  %v4884_v21 = vld [vmem:[#allocation5 + $0x48] sm:$0xf0]  ;;  %v4883_v22 = vor.u32 %v6463_v19, %v4882_v18  ;;  %v4874_v24 = vld [vmem:[#allocation5 + $0x30] sm:$0xf] }
  0x55   : > { %v4887_v23 = vor.u32 %v6462_v20, %v4884_v21  ;;  %v6461_v25 = vld [vmem:[#allocation5 + $0x34] sm:$0xf0]  ;;  %v6460_v26 = vld [vmem:[#allocation5 + $0x34] sm:$0xf]  ;;  %v4876_v27 = vld [vmem:[#allocation5 + $0x38] sm:$0xf0] }
  0x56   : > { %580 = vmatpush.bf16.msra.mxu0 %v4899_v10  ;;  %6856 = vmatpush.bf16.msra.mxu2 %v4899_v10  ;;  %v4875_v28 = vor.u32 %v6461_v25, %v4874_v24  ;;  %v4879_v29 = vor.u32 %v6460_v26, %v4876_v27  ;;  %v4866_v30 = vld [vmem:[#allocation5 + $0x20] sm:$0xf]  ;;  %v6459_v31 = vld [vmem:[#allocation5 + $0x24] sm:$0xf0]  ;;  %v6458_v32 = vld [vmem:[#allocation5 + $0x24] sm:$0xf] }
  0x57   : > { %609 = vmatpush.bf16.msra.mxu1 %v4903_v11  ;;  %6864 = vmatpush.bf16.msra.mxu3 %v4903_v11  ;;  %v4868_v33 = vld [vmem:[#allocation5 + $0x28] sm:$0xf0]  ;;  %v4867_v34 = vor.u32 %v6459_v31, %v4866_v30  ;;  %v4858_v36 = vld [vmem:[#allocation5 + $0x10] sm:$0xf]  ;;  %v6457_v37 = vld [vmem:[#allocation5 + $0x14] sm:$0xf0] }
  0x58   : > { %v4871_v35 = vor.u32 %v6458_v32, %v4868_v33  ;;  %v6456_v38 = vld [vmem:[#allocation5 + $0x14] sm:$0xf]  ;;  %v4860_v39 = vld [vmem:[#allocation5 + $0x18] sm:$0xf0]  ;;  %v4859_v40 = vor.u32 %v6457_v37, %v4858_v36  ;;  %v4850_v42 = vld [vmem:[#allocation5] sm:$0xf] }
  0x59   : > { %v4863_v41 = vor.u32 %v6456_v38, %v4860_v39  ;;  %v6455_v43 = vld [vmem:[#allocation5 + $0x4] sm:$0xf0]  ;;  %v6454_v44 = vld [vmem:[#allocation5 + $0x4] sm:$0xf]  ;;  %v4852_v45 = vld [vmem:[#allocation5 + $0x8] sm:$0xf0] }
  0x5a   : > { %581 = vmatpush.bf16.msra.mxu0 %v4891_v16  ;;  %6857 = vmatpush.bf16.msra.mxu2 %v4891_v16  ;;  %v465_v46 = vld [vmem:[%s7531_s19] sm:$0xff]  ;;  %v6500_v48 = vld [vmem:[#allocation8 + $0xec] sm:$0xf0]  ;;  %v4851_v51 = vor.u32 %v6455_v43, %v4850_v42  ;;  %v466_v52 = vld [vmem:[%s7531_s19 + $0x8] sm:$0xff]  ;;  %v4855_v55 = vor.u32 %v6454_v44, %v4852_v45  ;;  %s8356_s25 = scalar_lea.vmem [#allocation16], %s4839_s2  ;;  %s6854_s14 = sshll.u32 %s7416_s16, 6 }
  0x5b   : > { %610 = vmatpush.bf16.msra.mxu1 %v4895_v17  ;;  %6865 = vmatpush.bf16.msra.mxu3 %v4895_v17  ;;  %v5026_v47 = vld [vmem:[#allocation8 + $0xe0] sm:$0xf]  ;;  %v6532_v50 = vld [vmem:[#allocation8 + $0x1ec] sm:$0xf0]  ;;  %v470_v54 = vld [vmem:[%s7531_s19 + $0x28] sm:$0xff]  ;;  %v473_v63 = vpack.c.bf16 %v466_v52, %v465_v46  ;;  %s4681_s3 = scalar_lea.hbm %s8429_s9, %s6854_s14  ;;  %s4682_s22 = sshll.u32 %s8356_s25, 4  ;;  %s4683_s22 = int_to_ptr.vmem [resolvable:$true] %s4682_s22 }
  0x5c   : > { %v5154_v49 = vld [vmem:[#allocation8 + $0x1e0] sm:$0xf]  ;;  %v6498_v56 = vld [vmem:[#allocation8 + $0xe4] sm:$0xf]  ;;  %v5028_v57 = vld [vmem:[#allocation8 + $0xf0] sm:$0xf0]  ;;  %v5027_v58 = vor.u32 %v6500_v48, %v5026_v47 }
  0x5d   : > { %v469_v53 = vld [vmem:[%s7531_s19 + $0x20] sm:$0xff]  ;;  %v5155_v59 = vor.u32 %v6532_v50, %v5154_v49  ;;  %v5156_v61 = vld [vmem:[#allocation8 + $0x1f0] sm:$0xf0]  ;;  %v6496_v1 = vld [vmem:[#allocation8 + $0xcc] sm:$0xf0]  ;;  %v5031_v4 = vor.u32 %v6498_v56, %v5028_v57  ;;  %s4684_s26 = sshll.u32 %s4681_s3, 4  ;;  %s4685_s26 = int_to_ptr.hbm [resolvable:$true] %s4684_s26 }
  0x5e   : > { %582 = vmatpush.bf16.msra.mxu0 %v4883_v22  ;;  %6858 = vmatpush.bf16.msra.mxu2 %v4883_v22  ;;  %v6530_v60 = vld [vmem:[#allocation8 + $0x1e4] sm:$0xf]  ;;  %v5010_v62 = vld [vmem:[#allocation8 + $0xc0] sm:$0xf]  ;;  %v475_v0 = vpack.c.bf16 %v470_v54, %v469_v53  ;;  %v6528_v3 = vld [vmem:[#allocation8 + $0x1cc] sm:$0xf0] }
  0x5f   : > { %611 = vmatpush.bf16.msra.mxu1 %v4887_v23  ;;  %6866 = vmatpush.bf16.msra.mxu3 %v4887_v23  ;;  %v5138_v2 = vld [vmem:[#allocation8 + $0x1c0] sm:$0xf]  ;;  %v5159_v5 = vor.u32 %v6530_v60, %v5156_v61  ;;  %v6494_v6 = vld [vmem:[#allocation8 + $0xc4] sm:$0xf]  ;;  %v5012_v7 = vld [vmem:[#allocation8 + $0xd0] sm:$0xf0]  ;;  %v5011_v8 = vor.u32 %v6496_v1, %v5010_v62 }
  0x60   : > { %v5139_v9 = vor.u32 %v6528_v3, %v5138_v2  ;;  %v6526_v10 = vld [vmem:[#allocation8 + $0x1c4] sm:$0xf]  ;;  %v5140_v11 = vld [vmem:[#allocation8 + $0x1d0] sm:$0xf0]  ;;  %v4994_v12 = vld [vmem:[#allocation8 + $0xa0] sm:$0xf]  ;;  %v5015_v16 = vor.u32 %v6494_v6, %v5012_v7 }
  0x61   : > { %v6492_v13 = vld [vmem:[#allocation8 + $0xac] sm:$0xf0]  ;;  %v5122_v14 = vld [vmem:[#allocation8 + $0x1a0] sm:$0xf]  ;;  %v5143_v17 = vor.u32 %v6526_v10, %v5140_v11  ;;  %v6490_v18 = vld [vmem:[#allocation8 + $0xa4] sm:$0xf] }
  0x62   : > { %583 = vmatpush.bf16.msra.mxu0 %v4875_v28  ;;  %6859 = vmatpush.bf16.msra.mxu2 %v4875_v28  ;;  %v6524_v15 = vld [vmem:[#allocation8 + $0x1ac] sm:$0xf0]  ;;  %v4996_v19 = vld [vmem:[#allocation8 + $0xb0] sm:$0xf0]  ;;  %v4995_v20 = vor.u32 %v6492_v13, %v4994_v12  ;;  %v6522_v22 = vld [vmem:[#allocation8 + $0x1a4] sm:$0xf] }
  0x63   : > { %612 = vmatpush.bf16.msra.mxu1 %v4879_v29  ;;  %6867 = vmatpush.bf16.msra.mxu3 %v4879_v29  ;;  %v5123_v21 = vor.u32 %v6524_v15, %v5122_v14  ;;  %v5124_v23 = vld [vmem:[#allocation8 + $0x1b0] sm:$0xf0]  ;;  %v4978_v24 = vld [vmem:[#allocation8 + $0x80] sm:$0xf]  ;;  %v6488_v25 = vld [vmem:[#allocation8 + $0x8c] sm:$0xf0]  ;;  %v4999_v28 = vor.u32 %v6490_v18, %v4996_v19 }
  0x64   : > { %v5106_v26 = vld [vmem:[#allocation8 + $0x180] sm:$0xf]  ;;  %v6520_v27 = vld [vmem:[#allocation8 + $0x18c] sm:$0xf0]  ;;  %v5127_v29 = vor.u32 %v6522_v22, %v5124_v23  ;;  %v6486_v30 = vld [vmem:[#allocation8 + $0x84] sm:$0xf]  ;;  %v4979_v31 = vor.u32 %v6488_v25, %v4978_v24 }
  0x65   : > { %v5107_v32 = vor.u32 %v6520_v27, %v5106_v26  ;;  %v4980_v33 = vld [vmem:[#allocation8 + $0x90] sm:$0xf0]  ;;  %v4962_v37 = vld [vmem:[#allocation8 + $0x60] sm:$0xf]  ;;  %v6484_v38 = vld [vmem:[#allocation8 + $0x6c] sm:$0xf0] }
  0x66   : > { %584 = vmatpush.bf16.msra.mxu0 %v4867_v34  ;;  %6860 = vmatpush.bf16.msra.mxu2 %v4867_v34  ;;  %v6518_v34 = vld [vmem:[#allocation8 + $0x184] sm:$0xf]  ;;  %v467_v36 = vld [vmem:[%s7531_s19 + $0x10] sm:$0xff]  ;;  %v468_v39 = vld [vmem:[%s7531_s19 + $0x18] sm:$0xff]  ;;  %v4983_v42 = vor.u32 %v6486_v30, %v4980_v33  ;;  %v4963_v44 = vor.u32 %v6484_v38, %v4962_v37  ;;  %s4670_s16 = scalar_lea.sflag [#allocation4], %s7525_s15  ;;  %s7255_s18 = sshra.s32 %s4685_s26, 4  ;;  %s7256_s18 = int_to_ptr.hbm [resolvable:$true] %s7255_s18 }
  0x67   : > { %613 = vmatpush.bf16.msra.mxu1 %v4871_v35  ;;  %6868 = vmatpush.bf16.msra.mxu3 %v4871_v35  ;;  %v5108_v35 = vld [vmem:[#allocation8 + $0x190] sm:$0xf0]  ;;  %v474_v45 = vpack.c.bf16 %v468_v39, %v467_v36  ;;  %v5090_v47 = vld [vmem:[#allocation8 + $0x160] sm:$0xf]  ;;  %v6516_v48 = vld [vmem:[#allocation8 + $0x16c] sm:$0xf0]  ;;  %p7262_p12 = scmp.lt.s32.totalorder %s7256_s18, %s8429_s9 }
  0x68   : > { %v5111_v43 = vor.u32 %v6518_v34, %v5108_v35  ;;  %v6482_v49 = vld [vmem:[#allocation8 + $0x64] sm:$0xf]  ;;  %v5091_v50 = vor.u32 %v6516_v48, %v5090_v47  ;;  %v5092_v53 = vld [vmem:[#allocation8 + $0x170] sm:$0xf0]  ;;  %v4946_v56 = vld [vmem:[#allocation8 + $0x40] sm:$0xf] }
  0x69   : > { %v6514_v52 = vld [vmem:[#allocation8 + $0x164] sm:$0xf]  ;;  %v6480_v57 = vld [vmem:[#allocation8 + $0x4c] sm:$0xf0]  ;;  %v5076_v1 = vld [vmem:[#allocation8 + $0x150] sm:$0xf0] }
  0x6a   : > { %585 = vmatpush.bf16.msra.mxu0 %v4859_v40  ;;  %6861 = vmatpush.bf16.msra.mxu2 %v4859_v40  ;;  %v471_v40 = vld [vmem:[%s7531_s19 + $0x30] sm:$0xff]  ;;  %v6478_v61 = vld [vmem:[#allocation8 + $0x44] sm:$0xf]  ;;  %v5058_v7 = vld [vmem:[#allocation8 + $0x120] sm:$0xf]  ;;  %s7257_s28 = scalar_lea.hbm %s7256_s18, 64 }
  0x6b   : > { %614 = vmatpush.bf16.msra.mxu1 %v4863_v41  ;;  %6869 = vmatpush.bf16.msra.mxu3 %v4863_v41  ;;  %v472_v41 = vld [vmem:[%s7531_s19 + $0x38] sm:$0xff]  ;;  %v6512_v60 = vld [vmem:[#allocation8 + $0x14c] sm:$0xf0]  ;;  %v6506_v12 = vld [vmem:[#allocation8 + $0x124] sm:$0xf]  ;;  %p7258_p1 = scmp.ne.s32.totalorder %s7256_s18, %s7257_s28  ;;  %s7261_s19 = scalar_lea.hbm %s8429_s9, 128 }
  0x6c   : > { %v476_v46 = vpack.c.bf16 %v472_v41, %v471_v40  ;;  %v4932_v11 = vld [vmem:[#allocation8 + $0x30] sm:$0xf0]  ;;  %v5042_v18 = vld [vmem:[#allocation8 + $0x100] sm:$0xf]  ;;  %v6502_v25 = vld [vmem:[#allocation8 + $0x104] sm:$0xf]  ;;  %p7263_p8 = scmp.lt.s32.totalorder %s7261_s19, %s7257_s28 }
  0x6d   : > { %v5060_v13 = vld [vmem:[#allocation8 + $0x130] sm:$0xf0]  ;;  %v5018_v33 = vld [vmem:[#allocation8 + $0xc8] sm:$0xf]  ;;  %v6497_v35 = vld [vmem:[#allocation8 + $0xd4] sm:$0xf0]  ;;  %p7259_p3 = pnand %p7258_p1, %p7491_p13 }
  0x6e   : > { %586 = vmatpush.bf16.msra.mxu0 %v4851_v51  ;;  %6862 = vmatpush.bf16.msra.mxu2 %v4851_v51  ;;  %v4964_v51 = vld [vmem:[#allocation8 + $0x70] sm:$0xf0]  ;;  %v5063_v15 = vor.u32 %v6506_v12, %v5060_v13  ;;  %v6499_v36 = vld [vmem:[#allocation8 + $0xec] sm:$0xf]  ;;  %v5036_v37 = vld [vmem:[#allocation8 + $0xf8] sm:$0xf0]  ;;  %v5019_v38 = vor.u32 %v6497_v35, %v5018_v33  ;;  %p7264_p7 = por %p7263_p8, %p7262_p12 }
  0x6f   : > { %615 = vmatpush.bf16.msra.mxu1 %v4855_v55  ;;  %6870 = vmatpush.bf16.msra.mxu3 %v4855_v55  ;;  %v4967_v54 = vor.u32 %v6482_v49, %v4964_v51  ;;  %v5095_v55 = vor.u32 %v6514_v52, %v5092_v53  ;;  %v4916_v22 = vld [vmem:[#allocation8 + $0x10] sm:$0xf0]  ;;  %v5039_v39 = vor.u32 %v6499_v36, %v5036_v37  ;;  %v5146_v40 = vld [vmem:[#allocation8 + $0x1c8] sm:$0xf]  ;;  %v6529_v41 = vld [vmem:[#allocation8 + $0x1d4] sm:$0xf0]  ;;  %p7260_p5 = pneg %p7259_p3 }
  0x70   : > { %v5044_v26 = vld [vmem:[#allocation8 + $0x110] sm:$0xf0]  ;;  %v5002_v48 = vld [vmem:[#allocation8 + $0xa8] sm:$0xf]  ;;  %v6493_v49 = vld [vmem:[#allocation8 + $0xb4] sm:$0xf0] }
  0x71   : > { %587 = vmatmul.bf16.vlgmr.msra.gmra.mxu0 %v473_v63  ;;  %597 = vmatmul.bf16.vlgmr.msra.gmra.mxu2 %v475_v0  ;;  %v5047_v27 = vor.u32 %v6502_v25, %v5044_v26  ;;  %v5003_v52 = vor.u32 %v6493_v49, %v5002_v48  ;;  %v5020_v53 = vld [vmem:[#allocation8 + $0xd8] sm:$0xf0]  ;;  %v6485_v25 = vld [vmem:[#allocation8 + $0x74] sm:$0xf0]  ;;  %v6487_v26 = vld [vmem:[#allocation8 + $0x8c] sm:$0xf]  ;;  %p7265_p9 = pnand %p7264_p7, %p7260_p5 }
  0x72   : > { %1055 = vmatpush.bf16.msrb.mxu2 %v5027_v58  ;;  %616 = vmatmul.bf16.vlgmr.msra.gmra.mxu1 %v473_v63  ;;  %v4947_v58 = vor.u32 %v6480_v57, %v4946_v56  ;;  %v4948_v63 = vld [vmem:[#allocation8 + $0x50] sm:$0xf0]  ;;  %v6519_v33 = vld [vmem:[#allocation8 + $0x18c] sm:$0xf]  ;;  %v5116_v35 = vld [vmem:[#allocation8 + $0x198] sm:$0xf0] }
  0x73   : > { %1084 = vmatpush.bf16.msrb.mxu3 %v5155_v59  ;;  %1113 = vmatpush.bf16.msrb.mxu0 %v5031_v4  ;;  %v5074_v59 = vld [vmem:[#allocation8 + $0x140] sm:$0xf]  ;;  %v4951_v2 = vor.u32 %v6478_v61, %v4948_v63  ;;  %v6489_v63 = vld [vmem:[#allocation8 + $0x94] sm:$0xf0]  ;;  %v4954_v36 = vld [vmem:[#allocation8 + $0x48] sm:$0xf] }
  0x74   : > { %626 = vmatmul.bf16.vlgmr.msra.gmra.mxu3 %v475_v0  ;;  %1142 = vmatpush.bf16.msrb.mxu1 %v5159_v5  ;;  %v5075_v62 = vor.u32 %v6512_v60, %v5074_v59  ;;  %v6510_v0 = vld [vmem:[#allocation8 + $0x144] sm:$0xf]  ;;  %v4930_v4 = vld [vmem:[#allocation8 + $0x20] sm:$0xf]  ;;  %v6476_v5 = vld [vmem:[#allocation8 + $0x2c] sm:$0xf0] }
  0x75   : > { %v5079_v3 = vor.u32 %v6510_v0, %v5076_v1  ;;  %v4931_v6 = vor.u32 %v6476_v5, %v4930_v4  ;;  %v5148_v59 = vld [vmem:[#allocation8 + $0x1d8] sm:$0xf0]  ;;  %v4986_v60 = vld [vmem:[#allocation8 + $0x88] sm:$0xf]  ;;  %v6491_v0 = vld [vmem:[#allocation8 + $0xac] sm:$0xf] }
  0x76   : > { %1056 = vmatpush.bf16.msrb.mxu2 %v5011_v8  ;;  %v6508_v8 = vld [vmem:[#allocation8 + $0x12c] sm:$0xf0]  ;;  %v5114_v4 = vld [vmem:[#allocation8 + $0x188] sm:$0xf]  ;;  %v6515_v48 = vld [vmem:[#allocation8 + $0x16c] sm:$0xf] }
  0x77   : > { %1085 = vmatpush.bf16.msrb.mxu3 %v5139_v9  ;;  %1114 = vmatpush.bf16.msrb.mxu0 %v5015_v16  ;;  %v6474_v9 = vld [vmem:[#allocation8 + $0x24] sm:$0xf]  ;;  %v5059_v10 = vor.u32 %v6508_v8, %v5058_v7  ;;  %v4914_v16 = vld [vmem:[#allocation8] sm:$0xf]  ;;  %v6523_v7 = vld [vmem:[#allocation8 + $0x1ac] sm:$0xf] }
  0x78   : > { %1143 = vmatpush.bf16.msrb.mxu1 %v5143_v17  ;;  %v4935_v14 = vor.u32 %v6474_v9, %v4932_v11  ;;  %v6472_v17 = vld [vmem:[#allocation8 + $0xc] sm:$0xf0]  ;;  %v5132_v8 = vld [vmem:[#allocation8 + $0x1b8] sm:$0xf0] }
  0x79   : > { %v4915_v19 = vor.u32 %v6472_v17, %v4914_v16  ;;  %v5100_v49 = vld [vmem:[#allocation8 + $0x178] sm:$0xf0] }
  0x7a   : > { %1057 = vmatpush.bf16.msrb.mxu2 %v4995_v20  ;;  %v6504_v20 = vld [vmem:[#allocation8 + $0x10c] sm:$0xf0] }
  0x7b   : > { %1086 = vmatpush.bf16.msrb.mxu3 %v5123_v21  ;;  %1115 = vmatpush.bf16.msrb.mxu0 %v4999_v28  ;;  %v6470_v21 = vld [vmem:[#allocation8 + $0x4] sm:$0xf]  ;;  %v5043_v23 = vor.u32 %v6504_v20, %v5042_v18  ;;  %v5034_v28 = vld [vmem:[#allocation8 + $0xe8] sm:$0xf] }
  0x7c   : > { %1144 = vmatpush.bf16.msrb.mxu1 %v5127_v29  ;;  %v4919_v24 = vor.u32 %v6470_v21, %v4916_v22  ;;  %v6501_v29 = vld [vmem:[#allocation8 + $0xf4] sm:$0xf0] }
  0x7d   : > { %v5035_v30 = vor.u32 %v6501_v29, %v5034_v28  ;;  %v4988_v29 = vld [vmem:[#allocation8 + $0x98] sm:$0xf0] }
  0x7e   : > { %1058 = vmatpush.bf16.msrb.mxu2 %v4979_v31  ;;  %v5162_v31 = vld [vmem:[#allocation8 + $0x1e8] sm:$0xf] }
  0x7f   : > { %1087 = vmatpush.bf16.msrb.mxu3 %v5107_v32  ;;  %1116 = vmatpush.bf16.msrb.mxu0 %v4983_v42  ;;  %v6533_v32 = vld [vmem:[#allocation8 + $0x1f4] sm:$0xf0]  ;;  %v6531_v42 = vld [vmem:[#allocation8 + $0x1ec] sm:$0xf] }
  0x80   : > { %1145 = vmatpush.bf16.msrb.mxu1 %v5111_v43  ;;  %v5163_v34 = vor.u32 %v6533_v32, %v5162_v31  ;;  %v493_v43 = vld [vmem:[#allocation7] sm:$0x3]  ;;  %v4991_v31 = vor.u32 %v6487_v26, %v4988_v29  ;;  %v6517_v32 = vld [vmem:[#allocation8 + $0x174] sm:$0xf0] }
  0x81   : > { %592 = vmatmul.bf16.gmra.mxu0 %v474_v45  ;;  %602 = vmatmul.bf16.gmra.mxu2 %v476_v46  ;;  %v7561_v61 = vperm.slane %v493_v43, 0  ;;  %v7563_v1 = vperm.slane %v493_v43, 1  ;;  %v4972_v43 = vld [vmem:[#allocation8 + $0x78] sm:$0xf0] }
  0x82   : > { %1059 = vmatpush.bf16.msrb.mxu2 %v4963_v44  ;;  %621 = vmatmul.bf16.gmra.mxu1 %v474_v45  ;;  %v5147_v44 = vor.u32 %v6529_v41, %v5146_v40  ;;  %v5164_v45 = vld [vmem:[#allocation8 + $0x1f8] sm:$0xf0]  ;;  %v6483_v40 = vld [vmem:[#allocation8 + $0x6c] sm:$0xf] }
  0x83   : > { %1088 = vmatpush.bf16.msrb.mxu3 %v5091_v50  ;;  %1117 = vmatpush.bf16.msrb.mxu0 %v4967_v54  ;;  %v5167_v47 = vor.u32 %v6531_v42, %v5164_v45  ;;  %v6495_v50 = vld [vmem:[#allocation8 + $0xcc] sm:$0xf]  ;;  %v5130_v54 = vld [vmem:[#allocation8 + $0x1a8] sm:$0xf]  ;;  %v6513_v45 = vld [vmem:[#allocation8 + $0x154] sm:$0xf0] }
  0x84   : > { %631 = vmatmul.bf16.gmra.mxu3 %v476_v46  ;;  %1146 = vmatpush.bf16.msrb.mxu1 %v5095_v55  ;;  %v6525_v55 = vld [vmem:[#allocation8 + $0x1b4] sm:$0xf0]  ;;  %v5023_v56 = vor.u32 %v6495_v50, %v5020_v53  ;;  %v5068_v26 = vld [vmem:[#allocation8 + $0x138] sm:$0xf0] }
  0x85   : > { %v5131_v57 = vor.u32 %v6525_v55, %v5130_v54 }
  0x86   : > { %1060 = vmatpush.bf16.msrb.mxu2 %v4947_v58  ;;  %v6527_v58 = vld [vmem:[#allocation8 + $0x1cc] sm:$0xf] }
  0x87   : > { %1089 = vmatpush.bf16.msrb.mxu3 %v5075_v62  ;;  %1118 = vmatpush.bf16.msrb.mxu0 %v4951_v2  ;;  %v5151_v62 = vor.u32 %v6527_v58, %v5148_v59  ;;  %v4987_v2 = vor.u32 %v6489_v63, %v4986_v60 }
  0x88   : > { %1147 = vmatpush.bf16.msrb.mxu1 %v5079_v3  ;;  %v5004_v3 = vld [vmem:[#allocation8 + $0xb8] sm:$0xf0] }
  0x89   : > { %v5007_v5 = vor.u32 %v6491_v0, %v5004_v3  ;;  %v4938_v3 = vld [vmem:[#allocation8 + $0x28] sm:$0xf] }
  0x8a   : > { %1061 = vmatpush.bf16.msrb.mxu2 %v4931_v6  ;;  %v6521_v6 = vld [vmem:[#allocation8 + $0x194] sm:$0xf0] }
  0x8b   : > { %1090 = vmatpush.bf16.msrb.mxu3 %v5059_v10  ;;  %1119 = vmatpush.bf16.msrb.mxu0 %v4935_v14  ;;  %v5115_v9 = vor.u32 %v6521_v6, %v5114_v4  ;;  %v5135_v10 = vor.u32 %v6523_v7, %v5132_v8  ;;  %v6477_v4 = vld [vmem:[#allocation8 + $0x34] sm:$0xf0]  ;;  %v4956_v7 = vld [vmem:[#allocation8 + $0x58] sm:$0xf0]  ;;  %v5066_v8 = vld [vmem:[#allocation8 + $0x128] sm:$0xf] }
  0x8c   : > { %1148 = vmatpush.bf16.msrb.mxu1 %v5063_v15  ;;  %v4939_v6 = vor.u32 %v6477_v4, %v4938_v3  ;;  %v6594_v3 = vld [vmem:[#allocation11 + $0x1dc] sm:$0xf0] }
  0x8d   : > { %v5586_v4 = vld [vmem:[#allocation11 + $0x340] sm:$0xf] }
  0x8e   : > { %1062 = vmatpush.bf16.msrb.mxu2 %v4915_v19 }
  0x8f   : > { %1091 = vmatpush.bf16.msrb.mxu3 %v5043_v23  ;;  %1120 = vmatpush.bf16.msrb.mxu0 %v4919_v24  ;;  %v4970_v24 = vld [vmem:[#allocation8 + $0x68] sm:$0xf] }
  0x90   : > { %1149 = vmatpush.bf16.msrb.mxu1 %v5047_v27  ;;  %v4971_v28 = vor.u32 %v6485_v25, %v4970_v24 }
  0x92   : > { %1171 = vmatpush.bf16.msra.mxu2 %v5035_v30  ;;  %v5098_v30 = vld [vmem:[#allocation8 + $0x168] sm:$0xf] }
  0x93   : > { %1200 = vmatpush.bf16.msra.mxu3 %v5163_v34  ;;  %1229 = vmatpush.bf16.msra.mxu0 %v5039_v39  ;;  %v5099_v34 = vor.u32 %v6517_v32, %v5098_v30  ;;  %v6481_v39 = vld [vmem:[#allocation8 + $0x54] sm:$0xf0] }
  0x94   : > { %1258 = vmatpush.bf16.msra.mxu1 %v5167_v47  ;;  %v4955_v42 = vor.u32 %v6481_v39, %v4954_v36  ;;  %v5052_v36 = vld [vmem:[#allocation8 + $0x118] sm:$0xf0] }
  0x96   : > { %1172 = vmatpush.bf16.msra.mxu2 %v5019_v38  ;;  %v5119_v38 = vor.u32 %v6519_v33, %v5116_v35  ;;  %v6471_v33 = vld [vmem:[#allocation8 + $0xc] sm:$0xf] }
  0x97   : > { %1201 = vmatpush.bf16.msra.mxu3 %v5147_v44  ;;  %1230 = vmatpush.bf16.msra.mxu0 %v5023_v56  ;;  %v5082_v44 = vld [vmem:[#allocation8 + $0x148] sm:$0xf]  ;;  %v6503_v35 = vld [vmem:[#allocation8 + $0x10c] sm:$0xf] }
  0x98   : > { %1259 = vmatpush.bf16.msra.mxu1 %v5151_v62  ;;  %v5083_v47 = vor.u32 %v6513_v45, %v5082_v44 }
  0x9a   : > { %1173 = vmatpush.bf16.msra.mxu2 %v5003_v52 }
  0x9b   : > { %1202 = vmatpush.bf16.msra.mxu3 %v5131_v57  ;;  %1231 = vmatpush.bf16.msra.mxu0 %v5007_v5  ;;  %v6479_v5 = vld [vmem:[#allocation8 + $0x4c] sm:$0xf] }
  0x9c   : > { %1260 = vmatpush.bf16.msra.mxu1 %v5135_v10  ;;  %v6509_v10 = vld [vmem:[#allocation8 + $0x134] sm:$0xf0] }
  0x9e   : > { %1174 = vmatpush.bf16.msra.mxu2 %v4987_v2 }
  0x9f   : > { %1203 = vmatpush.bf16.msra.mxu3 %v5115_v9  ;;  %1232 = vmatpush.bf16.msra.mxu0 %v4991_v31  ;;  %v4959_v9 = vor.u32 %v6479_v5, %v4956_v7  ;;  %v6642_v5 = vld [vmem:[#allocation11 + $0x35c] sm:$0xf0] }
  0xa0   : > { %1261 = vmatpush.bf16.msra.mxu1 %v5119_v38  ;;  %v6586_v7 = vld [vmem:[#allocation11 + $0x19c] sm:$0xf0] }
  0xa2   : > { %1175 = vmatpush.bf16.msra.mxu2 %v4971_v28  ;;  %v6505_v28 = vld [vmem:[#allocation8 + $0x114] sm:$0xf0] }
  0xa3   : > { %1204 = vmatpush.bf16.msra.mxu3 %v5099_v34  ;;  %v4924_v34 = vld [vmem:[#allocation8 + $0x18] sm:$0xf0] }
  0xa4   : > { %v4927_v38 = vor.u32 %v6471_v33, %v4924_v34  ;;  %v5426_v34 = vld [vmem:[#allocation11 + $0x200] sm:$0xf] }
  0xa6   : > { %1176 = vmatpush.bf16.msra.mxu2 %v4955_v42 }
  0xa7   : > { %1205 = vmatpush.bf16.msra.mxu3 %v5083_v47 }
  0xaa   : > { %1177 = vmatpush.bf16.msra.mxu2 %v4939_v6  ;;  %v5362_v6 = vld [vmem:[#allocation11 + $0x180] sm:$0xf] }
  0xee   : > { %v588_v46 = vpop.f32.mrf.mxu0 }
  0xef   : > { %v617_v51 = vpop.f32.mrf.mxu1  ;;  %v589_v11 = vadd.f32 %v588_v46, %v7561_v61  ;;  %v4975_v46 = vor.u32 %v6483_v40, %v4972_v43 }
  0xf0   : > { %v618_v12 = vadd.f32 %v617_v51, %v7563_v1  ;;  %v5103_v51 = vor.u32 %v6515_v48, %v5100_v49 }
  0xf1   : > { %v637_v17 = vmax.f32 %v589_v11, 0.0  ;;  %1233 = vmatpush.bf16.msra.mxu0 %v4975_v46  ;;  %v6511_v11 = vld [vmem:[#allocation8 + $0x14c] sm:$0xf] }
  0xf2   : > { %v638_v19 = vmax.f32 %v618_v12, 0.0  ;;  %1262 = vmatpush.bf16.msra.mxu1 %v5103_v51  ;;  %v5067_v12 = vor.u32 %v6509_v10, %v5066_v8  ;;  %v5587_v8 = vor.u32 %v6642_v5, %v5586_v4  ;;  %v5554_v10 = vld [vmem:[#allocation11 + $0x300] sm:$0xf] }
  0xf4   : > { %v598_v37 = vpop.f32.mrf.mxu2  ;;  %1206 = vmatpush.bf16.msra.mxu3 %v5067_v12  ;;  %v6578_v12 = vld [vmem:[#allocation11 + $0x15c] sm:$0xf0] }
  0xf5   : > { %1234 = vmatpush.bf16.msra.mxu0 %v4959_v9  ;;  %v5363_v9 = vor.u32 %v6586_v7, %v5362_v6  ;;  %v6706_v6 = vld [vmem:[#allocation11 + $0x55c] sm:$0xf0] }
  0xf6   : > { %v590_v13 = vpop.f32.mrf.mxu0 }
  0xf7   : > { %v591_v14 = vadd.f32 %v590_v13, %v7561_v61  ;;  %v619_v15 = vpop.f32.mrf.mxu1  ;;  %v627_v41 = vpop.f32.mrf.mxu3  ;;  %v5084_v13 = vld [vmem:[#allocation8 + $0x158] sm:$0xf0] }
  0xf8   : > { %v620_v16 = vadd.f32 %v619_v15, %v7563_v1  ;;  %v6473_v15 = vld [vmem:[#allocation8 + $0x14] sm:$0xf0]  ;;  %v628_v29 = vadd.f32 %v627_v41, %v7563_v1  ;;  %v5055_v41 = vor.u32 %v6503_v35, %v5052_v36  ;;  %v6602_v35 = vld [vmem:[#allocation11 + $0x21c] sm:$0xf0] }
  0xf9   : > { %v639_v18 = vmax.f32 %v591_v14, 0.0  ;;  %v4922_v14 = vld [vmem:[#allocation8 + $0x8] sm:$0xf]  ;;  %v5427_v36 = vor.u32 %v6602_v35, %v5426_v34  ;;  %v6066_v35 = vld [vmem:[#allocation11 + $0x700] sm:$0xf] }
  0xfa   : > { %v640_v20 = vmax.f32 %v620_v16, 0.0  ;;  %v5087_v16 = vor.u32 %v6511_v11, %v5084_v13  ;;  %v646_v43 = vmax.f32 %v628_v29, 0.0  ;;  %v6610_v29 = vld [vmem:[#allocation11 + $0x25c] sm:$0xf0] }
  0xfb   : > { %v7569_v21 = vpack.c.bf16 %v639_v18, %v637_v17  ;;  %v4923_v17 = vor.u32 %v6473_v15, %v4922_v14  ;;  %v6475_v18 = vld [vmem:[#allocation8 + $0x2c] sm:$0xf]  ;;  %v5522_v14 = vld [vmem:[#allocation11 + $0x2c0] sm:$0xf] }
  0xfc   : > { %v7571_v22 = vpack.c.bf16 %v640_v20, %v638_v19  ;;  %v600_v0 = vpop.f32.mrf.mxu2  ;;  %v4940_v19 = vld [vmem:[#allocation8 + $0x38] sm:$0xf0]  ;;  %v6507_v20 = vld [vmem:[#allocation8 + $0x12c] sm:$0xf]  ;;  %1263 = vmatpush.bf16.msra.mxu1 %v5087_v16  ;;  %v6626_v15 = vld [vmem:[#allocation11 + $0x2dc] sm:$0xf0] }
  0xfd   : > { %1063 = vmatmul.bf16.vlgmr.msrb.gmra.mxu2 %v7569_v21  ;;  %1121 = vmatmul.bf16.vlgmr.msrb.gmra.mxu0 %v7569_v21  ;;  %v601_v24 = vadd.f32 %v600_v0, %v7561_v61  ;;  %v4943_v25 = vor.u32 %v6475_v18, %v4940_v19  ;;  %v5071_v31 = vor.u32 %v6507_v20, %v5068_v26  ;;  %v6650_v0 = vld [vmem:[#allocation11 + $0x39c] sm:$0xf0] }
  0xfe   : > { %1092 = vmatmul.bf16.vlgmr.msrb.gmra.mxu3 %v7571_v22  ;;  %1150 = vmatmul.bf16.vlgmr.msrb.gmra.mxu1 %v7571_v22  ;;  %v593_v23 = vpop.f32.mrf.mxu0  ;;  %v5523_v16 = vor.u32 %v6626_v15, %v5522_v14  ;;  %v6570_v18 = vld [vmem:[#allocation11 + $0x11c] sm:$0xf0] }
  0xff   : > { %v622_v27 = vpop.f32.mrf.mxu1  ;;  %v594_v50 = vadd.f32 %v593_v23, %v7561_v61  ;;  %v629_v2 = vpop.f32.mrf.mxu3  ;;  %v599_v23 = vadd.f32 %v598_v37, %v7561_v61  ;;  %1178 = vmatpush.bf16.msra.mxu2 %v4923_v17  ;;  %1235 = vmatpush.bf16.msra.mxu0 %v4943_v25  ;;  %v647_v40 = vmax.f32 %v601_v24, 0.0  ;;  %v5298_v17 = vld [vmem:[#allocation11 + $0x100] sm:$0xf] }
 0x100   : > { %v623_v52 = vadd.f32 %v622_v27, %v7563_v1  ;;  %v5050_v27 = vld [vmem:[#allocation8 + $0x108] sm:$0xf]  ;;  %v630_v30 = vadd.f32 %v629_v2, %v7563_v1  ;;  %1264 = vmatpush.bf16.msra.mxu1 %v5071_v31  ;;  %v5394_v2 = vld [vmem:[#allocation11 + $0x1c0] sm:$0xf]  ;;  %v5299_v19 = vor.u32 %v6570_v18, %v5298_v17 }
 0x101   : > { %v641_v57 = vmax.f32 %v594_v50, 0.0  ;;  %v5051_v32 = vor.u32 %v6505_v28, %v5050_v27  ;;  %v645_v39 = vmax.f32 %v599_v23, 0.0  ;;  %v5490_v20 = vld [vmem:[#allocation11 + $0x280] sm:$0xf]  ;;  %v6654_v17 = vld [vmem:[#allocation11 + $0x3c4] sm:$0xf] }
 0x102   : > { %v642_v59 = vmax.f32 %v623_v52, 0.0  ;;  %v648_v44 = vmax.f32 %v630_v30, 0.0  ;;  %v6618_v23 = vld [vmem:[#allocation11 + $0x29c] sm:$0xf0]  ;;  %v5652_v18 = vld [vmem:[#allocation11 + $0x3e0] sm:$0xf0] }
 0x103   : > { %1207 = vmatpush.bf16.msra.mxu3 %v5051_v32  ;;  %1236 = vmatpush.bf16.msra.mxu0 %v4927_v38  ;;  %v7593_v45 = vpack.c.bf16 %v647_v40, %v645_v39  ;;  %v5491_v24 = vor.u32 %v6618_v23, %v5490_v20  ;;  %v5266_v25 = vld [vmem:[#allocation11 + $0xc0] sm:$0xf]  ;;  %v5655_v23 = vor.u32 %v6654_v17, %v5652_v18  ;;  %v6566_v17 = vld [vmem:[#allocation11 + $0x104] sm:$0xf] }
 0x104   : > { %v603_v37 = vpop.f32.mrf.mxu2  ;;  %v7595_v46 = vpack.c.bf16 %v648_v44, %v646_v43  ;;  %1265 = vmatpush.bf16.msra.mxu1 %v5055_v41  ;;  %v6562_v26 = vld [vmem:[#allocation11 + $0xdc] sm:$0xf0]  ;;  %v5300_v18 = vld [vmem:[#allocation11 + $0x120] sm:$0xf0] }
 0x105   : > { %v604_v49 = vadd.f32 %v603_v37, %v7561_v61  ;;  %v5267_v27 = vor.u32 %v6562_v26, %v5266_v25  ;;  %v5458_v28 = vld [vmem:[#allocation11 + $0x240] sm:$0xf]  ;;  %v6646_v26 = vld [vmem:[#allocation11 + $0x384] sm:$0xf] }
 0x106   : > { %v595_v53 = vpop.f32.mrf.mxu0  ;;  %v5459_v30 = vor.u32 %v6610_v29, %v5458_v28  ;;  %v5234_v31 = vld [vmem:[#allocation11 + $0x80] sm:$0xf] }
 0x107   : > { %v596_v54 = vadd.f32 %v595_v53, %v7561_v61  ;;  %v624_v55 = vpop.f32.mrf.mxu1  ;;  %v632_v42 = vpop.f32.mrf.mxu3  ;;  %v649_v53 = vmax.f32 %v604_v49, 0.0  ;;  %v6554_v32 = vld [vmem:[#allocation11 + $0x9c] sm:$0xf0] }
 0x108   : > { %v625_v56 = vadd.f32 %v624_v55, %v7563_v1  ;;  %v633_v51 = vadd.f32 %v632_v42, %v7563_v1  ;;  %v5235_v33 = vor.u32 %v6554_v32, %v5234_v31  ;;  %v5202_v37 = vld [vmem:[#allocation11 + $0x40] sm:$0xf] }
 0x109   : > { %v643_v58 = vmax.f32 %v596_v54, 0.0  ;;  %v6546_v38 = vld [vmem:[#allocation11 + $0x5c] sm:$0xf0] }
 0x10a   : > { %v644_v60 = vmax.f32 %v625_v56, 0.0  ;;  %v650_v55 = vmax.f32 %v633_v51, 0.0  ;;  %v5203_v39 = vor.u32 %v6546_v38, %v5202_v37  ;;  %v5170_v40 = vld [vmem:[#allocation11] sm:$0xf]  ;;  %v6590_v37 = vld [vmem:[#allocation11 + $0x1c4] sm:$0xf] }
 0x10b   : > { %v7581_v62 = vpack.c.bf16 %v643_v58, %v641_v57  ;;  %v6538_v42 = vld [vmem:[#allocation11 + $0x1c] sm:$0xf0] }
 0x10c   : > { %v7583_v63 = vpack.c.bf16 %v644_v60, %v642_v59  ;;  %v605_v47 = vpop.f32.mrf.mxu2  ;;  %v5618_v60 = vld [vmem:[#allocation11 + $0x380] sm:$0xf]  ;;  %v5171_v43 = vor.u32 %v6538_v42, %v5170_v40  ;;  %v5396_v40 = vld [vmem:[#allocation11 + $0x1e0] sm:$0xf0] }
 0x10d   : > { %1068 = vmatmul.bf16.gmra.mxu2 %v7581_v62  ;;  %1126 = vmatmul.bf16.gmra.mxu0 %v7581_v62  ;;  %v606_v50 = vadd.f32 %v605_v47, %v7561_v61  ;;  %v5650_v61 = vld [vmem:[#allocation11 + $0x3c0] sm:$0xf] }
 0x10e   : > { %1097 = vmatmul.bf16.gmra.mxu3 %v7583_v63  ;;  %1155 = vmatmul.bf16.gmra.mxu1 %v7583_v63  ;;  %v5906_v44 = vld [vmem:[#allocation11 + $0x5c0] sm:$0xf] }
 0x10f   : > { %v634_v48 = vpop.f32.mrf.mxu3  ;;  %v651_v54 = vmax.f32 %v606_v50, 0.0  ;;  %v6722_v41 = vld [vmem:[#allocation11 + $0x5dc] sm:$0xf0] }
 0x110   : > { %v635_v52 = vadd.f32 %v634_v48, %v7563_v1  ;;  %v6658_v1 = vld [vmem:[#allocation11 + $0x3dc] sm:$0xf0] }
 0x111   : > { %v7605_v57 = vpack.c.bf16 %v651_v54, %v649_v53  ;;  %v5651_v59 = vor.u32 %v6658_v1, %v5650_v61  ;;  %v6162_v47 = vld [vmem:[#allocation11 + $0x7c0] sm:$0xf] }
 0x112   : > { %v652_v56 = vmax.f32 %v635_v52, 0.0  ;;  %v6786_v48 = vld [vmem:[#allocation11 + $0x7dc] sm:$0xf0] }
 0x113   : > { %2918 = vmatpush.bf16.msrb.mxu3 %v5651_v59  ;;  %v6163_v50 = vor.u32 %v6786_v48, %v6162_v47  ;;  %v5874_v54 = vld [vmem:[#allocation11 + $0x580] sm:$0xf] }
 0x114   : > { %v7607_v58 = vpack.c.bf16 %v652_v56, %v650_v55  ;;  %v6714_v55 = vld [vmem:[#allocation11 + $0x59c] sm:$0xf0] }
 0x115   : > { %2976 = vmatpush.bf16.msrb.mxu1 %v6163_v50  ;;  %v6778_v61 = vld [vmem:[#allocation11 + $0x79c] sm:$0xf0]  ;;  %v6582_v50 = vld [vmem:[#allocation11 + $0x184] sm:$0xf] }
 0x116   : > { %v6770_v14 = vld [vmem:[#allocation11 + $0x75c] sm:$0xf0] }
 0x117   : > { %v6698_v31 = vld [vmem:[#allocation11 + $0x51c] sm:$0xf0] }
 0x11d   : > { %1073 = vmatmul.bf16.gmra.mxu2 %v7593_v45  ;;  %1131 = vmatmul.bf16.gmra.mxu0 %v7593_v45 }
 0x11e   : > { %1102 = vmatmul.bf16.gmra.mxu3 %v7595_v46  ;;  %1160 = vmatmul.bf16.gmra.mxu1 %v7595_v46 }
 0x12d   : > { %1078 = vmatmul.bf16.gmra.mxu2 %v7605_v57  ;;  %1136 = vmatmul.bf16.gmra.mxu0 %v7605_v57 }
 0x12e   : > { %1107 = vmatmul.bf16.gmra.mxu3 %v7607_v58  ;;  %1165 = vmatmul.bf16.gmra.mxu1 %v7607_v58 }
 0x13d   : > { %1179 = vmatmul.bf16.vlgmr.msra.gmra.mxu2 %v7569_v21  ;;  %1237 = vmatmul.bf16.vlgmr.msra.gmra.mxu0 %v7569_v21  ;;  %v5619_v21 = vor.u32 %v6650_v0, %v5618_v60 }
 0x13e   : > { %1208 = vmatmul.bf16.vlgmr.msra.gmra.mxu3 %v7571_v22  ;;  %1266 = vmatmul.bf16.vlgmr.msra.gmra.mxu1 %v7571_v22  ;;  %v5395_v22 = vor.u32 %v6594_v3, %v5394_v2 }
 0x13f   : > { %2919 = vmatpush.bf16.msrb.mxu3 %v5619_v21 }
 0x140   : > { %2889 = vmatpush.bf16.msrb.mxu2 %v5395_v22  ;;  %v5842_v22 = vld [vmem:[#allocation11 + $0x540] sm:$0xf] }
 0x141   : > { %v5843_v7 = vor.u32 %v6706_v6, %v5842_v22 }
 0x143   : > { %2920 = vmatpush.bf16.msrb.mxu3 %v5587_v8 }
 0x144   : > { %2890 = vmatpush.bf16.msrb.mxu2 %v5363_v9 }
 0x14d   : > { %1184 = vmatmul.bf16.gmra.mxu2 %v7581_v62  ;;  %1242 = vmatmul.bf16.gmra.mxu0 %v7581_v62  ;;  %v6634_v62 = vld [vmem:[#allocation11 + $0x31c] sm:$0xf0] }
 0x14e   : > { %1213 = vmatmul.bf16.gmra.mxu3 %v7583_v63  ;;  %1271 = vmatmul.bf16.gmra.mxu1 %v7583_v63  ;;  %v5555_v11 = vor.u32 %v6634_v62, %v5554_v10  ;;  %v5330_v63 = vld [vmem:[#allocation11 + $0x140] sm:$0xf] }
 0x14f   : > { %v5331_v13 = vor.u32 %v6578_v12, %v5330_v63 }
 0x150   : > { %2921 = vmatpush.bf16.msrb.mxu3 %v5555_v11 }
 0x151   : > { %2891 = vmatpush.bf16.msrb.mxu2 %v5331_v13  ;;  %v6098_v13 = vld [vmem:[#allocation11 + $0x740] sm:$0xf] }
 0x154   : > { %2922 = vmatpush.bf16.msrb.mxu3 %v5523_v16  ;;  %v6099_v16 = vor.u32 %v6770_v14, %v6098_v13  ;;  %v5524_v13 = vld [vmem:[#allocation11 + $0x2e0] sm:$0xf0] }
 0x155   : > { %2892 = vmatpush.bf16.msrb.mxu2 %v5299_v19 }
 0x158   : > { %2923 = vmatpush.bf16.msrb.mxu3 %v5491_v24 }
 0x159   : > { %2893 = vmatpush.bf16.msrb.mxu2 %v5267_v27  ;;  %v5620_v27 = vld [vmem:[#allocation11 + $0x3a0] sm:$0xf0] }
 0x15a   : > { %v5623_v32 = vor.u32 %v6646_v26, %v5620_v27  ;;  %v6614_v26 = vld [vmem:[#allocation11 + $0x284] sm:$0xf] }
 0x15c   : > { %2924 = vmatpush.bf16.msrb.mxu3 %v5459_v30  ;;  %v5810_v30 = vld [vmem:[#allocation11 + $0x500] sm:$0xf] }
 0x15d   : > { %1189 = vmatmul.bf16.gmra.mxu2 %v7593_v45  ;;  %1247 = vmatmul.bf16.gmra.mxu0 %v7593_v45  ;;  %v5907_v45 = vor.u32 %v6722_v41, %v5906_v44  ;;  %v5811_v34 = vor.u32 %v6698_v31, %v5810_v30  ;;  %v6638_v44 = vld [vmem:[#allocation11 + $0x344] sm:$0xf]  ;;  %v5746_v30 = vld [vmem:[#allocation11 + $0x480] sm:$0xf] }
 0x15e   : > { %1218 = vmatmul.bf16.gmra.mxu3 %v7595_v46  ;;  %1276 = vmatmul.bf16.gmra.mxu1 %v7595_v46  ;;  %v7629_v46 = vld [vmem:[#allocation10] sm:$0xf]  ;;  %v5588_v41 = vld [vmem:[#allocation11 + $0x360] sm:$0xf0]  ;;  %v6682_v31 = vld [vmem:[#allocation11 + $0x49c] sm:$0xf0] }
 0x15f   : > { %2894 = vmatpush.bf16.msrb.mxu2 %v5235_v33  ;;  %2947 = vmatpush.bf16.msrb.mxu0 %v5907_v45  ;;  %v7632_v51 = vperm.slane %v7629_v46, 1  ;;  %v7636_v1 = vperm.slane %v7629_v46, 0 }
 0x160   : > { %2925 = vmatpush.bf16.msrb.mxu3 %v5427_v36  ;;  %v6762_v36 = vld [vmem:[#allocation11 + $0x71c] sm:$0xf0] }
 0x163   : > { %2895 = vmatpush.bf16.msrb.mxu2 %v5203_v39  ;;  %v6067_v39 = vor.u32 %v6762_v36, %v6066_v35  ;;  %v5492_v35 = vld [vmem:[#allocation11 + $0x2a0] sm:$0xf0] }
 0x164   : > { %3034 = vmatpush.bf16.msra.mxu3 %v5655_v23  ;;  %v5303_v23 = vor.u32 %v6566_v17, %v5300_v18  ;;  %v6558_v36 = vld [vmem:[#allocation11 + $0xc4] sm:$0xf]  ;;  %v5682_v17 = vld [vmem:[#allocation11 + $0x400] sm:$0xf] }
 0x165   : > { %v6666_v18 = vld [vmem:[#allocation11 + $0x41c] sm:$0xf0] }
 0x167   : > { %2896 = vmatpush.bf16.msrb.mxu2 %v5171_v43  ;;  %v5399_v43 = vor.u32 %v6590_v37, %v5396_v40  ;;  %v5268_v37 = vld [vmem:[#allocation11 + $0xe0] sm:$0xf0] }
 0x168   : > { %3035 = vmatpush.bf16.msra.mxu3 %v5623_v32  ;;  %v5271_v40 = vor.u32 %v6558_v36, %v5268_v37 }
 0x16b   : > { %3005 = vmatpush.bf16.msra.mxu2 %v5399_v43  ;;  %v5970_v43 = vld [vmem:[#allocation11 + $0x640] sm:$0xf] }
 0x16d   : > { %1194 = vmatmul.bf16.gmra.mxu2 %v7605_v57  ;;  %1252 = vmatmul.bf16.gmra.mxu0 %v7605_v57  ;;  %v5875_v57 = vor.u32 %v6714_v55, %v5874_v54  ;;  %v5778_v55 = vld [vmem:[#allocation11 + $0x4c0] sm:$0xf] }
 0x16e   : > { %1223 = vmatmul.bf16.gmra.mxu3 %v7607_v58  ;;  %1281 = vmatmul.bf16.gmra.mxu1 %v7607_v58  ;;  %v6130_v58 = vld [vmem:[#allocation11 + $0x780] sm:$0xf] }
 0x16f   : > { %v6131_v60 = vor.u32 %v6778_v61, %v6130_v58  ;;  %2948 = vmatpush.bf16.msrb.mxu0 %v5875_v57  ;;  %v6630_v61 = vld [vmem:[#allocation11 + $0x304] sm:$0xf] }
 0x171   : > { %2977 = vmatpush.bf16.msrb.mxu1 %v6131_v60 }
 0x173   : > { %2949 = vmatpush.bf16.msrb.mxu0 %v5843_v7 }
 0x175   : > { %2978 = vmatpush.bf16.msrb.mxu1 %v6099_v16 }
 0x177   : > { %2950 = vmatpush.bf16.msrb.mxu0 %v5811_v34  ;;  %v5747_v34 = vor.u32 %v6682_v31, %v5746_v30 }
 0x179   : > { %2979 = vmatpush.bf16.msrb.mxu1 %v6067_v39  ;;  %v5495_v39 = vor.u32 %v6614_v26, %v5492_v35 }
 0x17a   : > { %v1122_v49 = vpop.f32.mrf.mxu0 }
 0x17b   : > { %v1151_v52 = vpop.f32.mrf.mxu1  ;;  %v1123_v53 = vadd.f32 %v1122_v49, %v7632_v51  ;;  %v5591_v49 = vor.u32 %v6638_v44, %v5588_v41  ;;  %v6738_v44 = vld [vmem:[#allocation11 + $0x65c] sm:$0xf0]  ;;  %v6606_v41 = vld [vmem:[#allocation11 + $0x244] sm:$0xf] }
 0x17d   : > { %v1152_v2 = vadd.f32 %v1151_v52, %v1123_v53  ;;  %v5364_v52 = vld [vmem:[#allocation11 + $0x1a0] sm:$0xf0]  ;;  %3036 = vmatpush.bf16.msra.mxu3 %v5591_v49  ;;  %v5971_v49 = vor.u32 %v6738_v44, %v5970_v43 }
 0x17e   : > { %v5367_v57 = vor.u32 %v6582_v50, %v5364_v52  ;;  %v5460_v50 = vld [vmem:[#allocation11 + $0x260] sm:$0xf0] }
 0x17f   : > { %v1288_v8 = vmax.f32 %v1152_v2, 0.0  ;;  %v5463_v52 = vor.u32 %v6606_v41, %v5460_v50  ;;  %v6782_v50 = vld [vmem:[#allocation11 + $0x7c4] sm:$0xf] }
 0x180   : > { %v1064_v56 = vpop.f32.mrf.mxu2  ;;  %3006 = vmatpush.bf16.msra.mxu2 %v5367_v57  ;;  %v5714_v57 = vld [vmem:[#allocation11 + $0x440] sm:$0xf] }
 0x181   : > { %v1093_v59 = vpop.f32.mrf.mxu3  ;;  %v1065_v4 = vadd.f32 %v1064_v56, %v7636_v1  ;;  %v6690_v56 = vld [vmem:[#allocation11 + $0x4dc] sm:$0xf0] }
 0x182   : > { %v1124_v0 = vpop.f32.mrf.mxu0  ;;  %v5779_v58 = vor.u32 %v6690_v56, %v5778_v55 }
 0x183   : > { %v1125_v21 = vadd.f32 %v1124_v0, %v7632_v51  ;;  %v1153_v3 = vpop.f32.mrf.mxu1  ;;  %v1094_v62 = vadd.f32 %v1093_v59, %v1065_v4  ;;  %v5556_v59 = vld [vmem:[#allocation11 + $0x320] sm:$0xf0] }
 0x184   : > { %v5559_v2 = vor.u32 %v6630_v61, %v5556_v59  ;;  %2951 = vmatpush.bf16.msrb.mxu0 %v5779_v58  ;;  %v5332_v4 = vld [vmem:[#allocation11 + $0x160] sm:$0xf0]  ;;  %v6674_v58 = vld [vmem:[#allocation11 + $0x45c] sm:$0xf0] }
 0x185   : > { %v1154_v5 = vadd.f32 %v1153_v3, %v1125_v21  ;;  %v1287_v24 = vmax.f32 %v1094_v62, 0.0  ;;  %v6574_v3 = vld [vmem:[#allocation11 + $0x144] sm:$0xf]  ;;  %v5715_v59 = vor.u32 %v6674_v58, %v5714_v57 }
 0x186   : > { %3037 = vmatpush.bf16.msra.mxu3 %v5559_v2  ;;  %v6598_v2 = vld [vmem:[#allocation11 + $0x204] sm:$0xf] }
 0x187   : > { %v1292_v9 = vmax.f32 %v1154_v5, 0.0 }
 0x188   : > { %v1066_v10 = vpop.f32.mrf.mxu2  ;;  %2952 = vmatpush.bf16.msrb.mxu0 %v5747_v34 }
 0x189   : > { %v7640_v11 = vpack.c.bf16 %v1292_v9, %v1288_v8  ;;  %v1067_v63 = vadd.f32 %v1066_v10, %v7636_v1  ;;  %v1095_v12 = vpop.f32.mrf.mxu3  ;;  %v6034_v8 = vld [vmem:[#allocation11 + $0x6c0] sm:$0xf]  ;;  %v5335_v10 = vor.u32 %v6574_v3, %v5332_v4 }
 0x18a   : > { %v1127_v15 = vpop.f32.mrf.mxu0  ;;  %v6754_v9 = vld [vmem:[#allocation11 + $0x6dc] sm:$0xf0] }
 0x18b   : > { %v1096_v19 = vadd.f32 %v1095_v12, %v1067_v63  ;;  %v1156_v20 = vpop.f32.mrf.mxu1  ;;  %2926 = vmatmul.bf16.vlgmr.msrb.gmra.mxu3 %v7640_v11  ;;  %v1128_v29 = vadd.f32 %v1127_v15, %v7632_v51  ;;  %v6035_v63 = vor.u32 %v6754_v9, %v6034_v8  ;;  %v6622_v12 = vld [vmem:[#allocation11 + $0x2c4] sm:$0xf]  ;;  %3007 = vmatpush.bf16.msra.mxu2 %v5335_v10 }
 0x18c   : > { %v5527_v16 = vor.u32 %v6622_v12, %v5524_v13  ;;  %2953 = vmatpush.bf16.msrb.mxu0 %v5715_v59  ;;  %v6542_v8 = vld [vmem:[#allocation11 + $0x44] sm:$0xf] }
 0x18d   : > { %v1291_v25 = vmax.f32 %v1096_v19, 0.0  ;;  %v1157_v45 = vadd.f32 %v1156_v20, %v1128_v29  ;;  %2980 = vmatpush.bf16.msrb.mxu1 %v6035_v63  ;;  %v5204_v9 = vld [vmem:[#allocation11 + $0x60] sm:$0xf0] }
 0x18e   : > { %3038 = vmatpush.bf16.msra.mxu3 %v5527_v16  ;;  %v5207_v13 = vor.u32 %v6542_v8, %v5204_v9 }
 0x18f   : > { %v7644_v28 = vpack.c.bf16 %v1291_v25, %v1287_v24  ;;  %v1296_v60 = vmax.f32 %v1157_v45, 0.0  ;;  %v6002_v24 = vld [vmem:[#allocation11 + $0x680] sm:$0xf]  ;;  %3008 = vmatpush.bf16.msra.mxu2 %v5303_v23 }
 0x190   : > { %v1069_v33 = vpop.f32.mrf.mxu2  ;;  %v6746_v25 = vld [vmem:[#allocation11 + $0x69c] sm:$0xf0] }
 0x191   : > { %v1098_v38 = vpop.f32.mrf.mxu3  ;;  %2897 = vmatmul.bf16.vlgmr.msrb.gmra.mxu2 %v7644_v28  ;;  %v1070_v53 = vadd.f32 %v1069_v33, %v7636_v1  ;;  %v6003_v32 = vor.u32 %v6746_v25, %v6002_v24  ;;  %v5683_v24 = vor.u32 %v6666_v18, %v5682_v17  ;;  %v5172_v25 = vld [vmem:[#allocation11 + $0x20] sm:$0xf0] }
 0x192   : > { %v1129_v42 = vpop.f32.mrf.mxu0  ;;  %3039 = vmatpush.bf16.msra.mxu3 %v5495_v39  ;;  %v6718_v39 = vld [vmem:[#allocation11 + $0x5c4] sm:$0xf] }
 0x193   : > { %v1130_v47 = vadd.f32 %v1129_v42, %v7632_v51  ;;  %v1158_v48 = vpop.f32.mrf.mxu1  ;;  %v1099_v5 = vadd.f32 %v1098_v38, %v1070_v53  ;;  %2981 = vmatpush.bf16.msrb.mxu1 %v6003_v32  ;;  %3009 = vmatpush.bf16.msra.mxu2 %v5271_v40  ;;  %v6550_v53 = vld [vmem:[#allocation11 + $0x84] sm:$0xf] }
 0x194   : > { %2954 = vmatpush.bf16.msrb.mxu0 %v5683_v24  ;;  %v5908_v40 = vld [vmem:[#allocation11 + $0x5e0] sm:$0xf0] }
 0x195   : > { %v1159_v54 = vadd.f32 %v1158_v48, %v1130_v47  ;;  %v1295_v19 = vmax.f32 %v1099_v5, 0.0  ;;  %v5428_v5 = vld [vmem:[#allocation11 + $0x220] sm:$0xf0] }
 0x196   : > { %3040 = vmatpush.bf16.msra.mxu3 %v5463_v52  ;;  %v6164_v52 = vld [vmem:[#allocation11 + $0x7e0] sm:$0xf0] }
 0x197   : > { %v1300_v0 = vmax.f32 %v1159_v54, 0.0  ;;  %v5236_v54 = vld [vmem:[#allocation11 + $0xa0] sm:$0xf0]  ;;  %2982 = vmatpush.bf16.msrb.mxu1 %v5971_v49 }
 0x198   : > { %v1071_v21 = vpop.f32.mrf.mxu2  ;;  %v5239_v61 = vor.u32 %v6550_v53, %v5236_v54  ;;  %v6167_v53 = vor.u32 %v6782_v50, %v6164_v52  ;;  %v6766_v24 = vld [vmem:[#allocation11 + $0x744] sm:$0xf]  ;;  %v5402_v52 = vld [vmem:[#allocation11 + $0x1c8] sm:$0xf] }
 0x199   : > { %v7650_v22 = vpack.c.bf16 %v1300_v0, %v1296_v60  ;;  %v1072_v6 = vadd.f32 %v1071_v21, %v7636_v1  ;;  %v1100_v7 = vpop.f32.mrf.mxu3  ;;  %v5938_v60 = vld [vmem:[#allocation11 + $0x600] sm:$0xf]  ;;  %v6068_v50 = vld [vmem:[#allocation11 + $0x720] sm:$0xf0] }
 0x19a   : > { %v1132_v62 = vpop.f32.mrf.mxu0  ;;  %v6730_v0 = vld [vmem:[#allocation11 + $0x61c] sm:$0xf0]  ;;  %3010 = vmatpush.bf16.msra.mxu2 %v5239_v61 }
 0x19b   : > { %v1101_v14 = vadd.f32 %v1100_v7, %v1072_v6  ;;  %v1161_v15 = vpop.f32.mrf.mxu1  ;;  %2931 = vmatmul.bf16.gmra.mxu3 %v7650_v22  ;;  %v1133_v29 = vadd.f32 %v1132_v62, %v7632_v51  ;;  %v5939_v4 = vor.u32 %v6730_v0, %v5938_v60  ;;  %v5431_v7 = vor.u32 %v6598_v2, %v5428_v5  ;;  %v5876_v60 = vld [vmem:[#allocation11 + $0x5a0] sm:$0xf0] }
 0x19d   : > { %v1299_v20 = vmax.f32 %v1101_v14, 0.0  ;;  %v1162_v45 = vadd.f32 %v1161_v15, %v1133_v29  ;;  %2983 = vmatpush.bf16.msrb.mxu1 %v5939_v4  ;;  %3041 = vmatpush.bf16.msra.mxu3 %v5431_v7  ;;  %v7681_v4 = vperm.slane %v7629_v46, 2 }
 0x19e   : > { %3011 = vmatpush.bf16.msra.mxu2 %v5207_v13  ;;  %v6702_v13 = vld [vmem:[#allocation11 + $0x544] sm:$0xf] }
 0x19f   : > { %v7654_v27 = vpack.c.bf16 %v1299_v20, %v1295_v19  ;;  %v1304_v21 = vmax.f32 %v1162_v45, 0.0  ;;  %v6534_v19 = vld [vmem:[#allocation11 + $0x4] sm:$0xf] }
 0x1a0   : > { %v1074_v33 = vpop.f32.mrf.mxu2  ;;  %v5175_v26 = vor.u32 %v6534_v19, %v5172_v25  ;;  %v6100_v25 = vld [vmem:[#allocation11 + $0x760] sm:$0xf0] }
 0x1a1   : > { %v1103_v38 = vpop.f32.mrf.mxu3  ;;  %2902 = vmatmul.bf16.gmra.mxu2 %v7654_v27  ;;  %v1075_v55 = vadd.f32 %v1074_v33, %v7636_v1  ;;  %3092 = vmatpush.bf16.msra.mxu1 %v6167_v53 }
 0x1a2   : > { %v1134_v42 = vpop.f32.mrf.mxu0  ;;  %3012 = vmatpush.bf16.msra.mxu2 %v5175_v26 }
 0x1a3   : > { %v1135_v47 = vadd.f32 %v1134_v42, %v7632_v51  ;;  %v1163_v48 = vpop.f32.mrf.mxu1  ;;  %v1104_v10 = vadd.f32 %v1103_v38, %v1075_v55  ;;  %v5911_v42 = vor.u32 %v6718_v39, %v5908_v40  ;;  %v7674_v55 = vperm.slane %v7629_v46, 3  ;;  %v6651_v39 = vld [vmem:[#allocation11 + $0x3a4] sm:$0xf0] }
 0x1a5   : > { %v1164_v56 = vadd.f32 %v1163_v48, %v1135_v47  ;;  %v1303_v20 = vmax.f32 %v1104_v10, 0.0  ;;  %3063 = vmatpush.bf16.msra.mxu0 %v5911_v42 }
 0x1a7   : > { %v1308_v3 = vmax.f32 %v1164_v56, 0.0 }
 0x1a8   : > { %v1076_v6 = vpop.f32.mrf.mxu2 }
 0x1a9   : > { %v7660_v62 = vpack.c.bf16 %v1308_v3, %v1304_v21  ;;  %v1077_v63 = vadd.f32 %v1076_v6, %v7636_v1  ;;  %v1105_v12 = vpop.f32.mrf.mxu3  ;;  %v6774_v21 = vld [vmem:[#allocation11 + $0x784] sm:$0xf] }
 0x1aa   : > { %v1137_v14 = vpop.f32.mrf.mxu0  ;;  %v6132_v3 = vld [vmem:[#allocation11 + $0x7a0] sm:$0xf0] }
 0x1ab   : > { %v1106_v15 = vadd.f32 %v1105_v12, %v1077_v63  ;;  %v1166_v16 = vpop.f32.mrf.mxu1  ;;  %2936 = vmatmul.bf16.gmra.mxu3 %v7660_v62  ;;  %v1138_v30 = vadd.f32 %v1137_v14, %v7632_v51  ;;  %v6135_v6 = vor.u32 %v6774_v21, %v6132_v3  ;;  %v5844_v14 = vld [vmem:[#allocation11 + $0x560] sm:$0xf0]  ;;  %v5370_v21 = vld [vmem:[#allocation11 + $0x188] sm:$0xf] }
 0x1ac   : > { %v6587_v3 = vld [vmem:[#allocation11 + $0x1a4] sm:$0xf0] }
 0x1ad   : > { %v1307_v23 = vmax.f32 %v1106_v15, 0.0  ;;  %v1167_v34 = vadd.f32 %v1166_v16, %v1138_v30  ;;  %3093 = vmatpush.bf16.msra.mxu1 %v6135_v6  ;;  %v5847_v15 = vor.u32 %v6702_v13, %v5844_v14  ;;  %v6103_v30 = vor.u32 %v6766_v24, %v6100_v25  ;;  %v6750_v25 = vld [vmem:[#allocation11 + $0x6c4] sm:$0xf] }
 0x1af   : > { %v7664_v29 = vpack.c.bf16 %v1307_v23, %v1303_v20  ;;  %v1312_v43 = vmax.f32 %v1167_v34, 0.0 }
 0x1b0   : > { %v1079_v31 = vpop.f32.mrf.mxu2 }
 0x1b1   : > { %v1108_v32 = vpop.f32.mrf.mxu3  ;;  %2907 = vmatmul.bf16.gmra.mxu2 %v7664_v29  ;;  %v1080_v37 = vadd.f32 %v1079_v31, %v7636_v1  ;;  %v5658_v31 = vld [vmem:[#allocation11 + $0x3c8] sm:$0xf]  ;;  %3094 = vmatpush.bf16.msra.mxu1 %v6103_v30 }
 0x1b2   : > { %v1139_v33 = vpop.f32.mrf.mxu0 }
 0x1b3   : > { %v1140_v35 = vadd.f32 %v1139_v33, %v7632_v51  ;;  %v1168_v36 = vpop.f32.mrf.mxu1  ;;  %v1109_v45 = vadd.f32 %v1108_v32, %v1080_v37  ;;  %v6659_v32 = vld [vmem:[#allocation11 + $0x3e4] sm:$0xf0] }
 0x1b5   : > { %v1169_v38 = vadd.f32 %v1168_v36, %v1140_v35  ;;  %v1311_v57 = vmax.f32 %v1109_v45, 0.0  ;;  %v5659_v35 = vor.u32 %v6659_v32, %v5658_v31 }
 0x1b7   : > { %v1316_v44 = vmax.f32 %v1169_v38, 0.0  ;;  %3150 = vmatpush.bf16.msrb.mxu3 %v5659_v35  ;;  %v5626_v38 = vld [vmem:[#allocation11 + $0x388] sm:$0xf] }
 0x1b8   : > { %v1081_v41 = vpop.f32.mrf.mxu2 }
 0x1b9   : > { %v7670_v47 = vpack.c.bf16 %v1316_v44, %v1312_v43  ;;  %v1082_v48 = vadd.f32 %v1081_v41, %v7636_v1  ;;  %v1110_v49 = vpop.f32.mrf.mxu3  ;;  %v6710_v1 = vld [vmem:[#allocation11 + $0x584] sm:$0xf]  ;;  %v5627_v41 = vor.u32 %v6651_v39, %v5626_v38  ;;  %v5306_v38 = vld [vmem:[#allocation11 + $0x108] sm:$0xf] }
 0x1ba   : > { %v1238_v51 = vpop.f32.mrf.mxu0  ;;  %v5879_v2 = vor.u32 %v6710_v1, %v5876_v60  ;;  %v6694_v43 = vld [vmem:[#allocation11 + $0x504] sm:$0xf]  ;;  %v6571_v39 = vld [vmem:[#allocation11 + $0x124] sm:$0xf0] }
 0x1bb   : > { %v1111_v54 = vadd.f32 %v1110_v49, %v1082_v48  ;;  %v1267_v56 = vpop.f32.mrf.mxu1  ;;  %2941 = vmatmul.bf16.gmra.mxu3 %v7670_v47  ;;  %v1239_v59 = vadd.f32 %v1238_v51, %v7674_v55  ;;  %v5812_v44 = vld [vmem:[#allocation11 + $0x520] sm:$0xf0] }
 0x1bc   : > { %3064 = vmatpush.bf16.msra.mxu0 %v5879_v2  ;;  %v5815_v48 = vor.u32 %v6694_v43, %v5812_v44  ;;  %v6758_v49 = vld [vmem:[#allocation11 + $0x704] sm:$0xf]  ;;  %3151 = vmatpush.bf16.msrb.mxu3 %v5627_v41  ;;  %v5307_v44 = vor.u32 %v6571_v39, %v5306_v38 }
 0x1bd   : > { %v1315_v58 = vmax.f32 %v1111_v54, 0.0  ;;  %v1268_v8 = vadd.f32 %v1267_v56, %v1239_v59  ;;  %v6071_v53 = vor.u32 %v6758_v49, %v6068_v50  ;;  %v6595_v54 = vld [vmem:[#allocation11 + $0x1e4] sm:$0xf0]  ;;  %v6742_v41 = vld [vmem:[#allocation11 + $0x684] sm:$0xf] }
 0x1be   : > { %v6643_v59 = vld [vmem:[#allocation11 + $0x364] sm:$0xf0] }
 0x1bf   : > { %v7677_v61 = vpack.c.bf16 %v1315_v58, %v1311_v57  ;;  %v1290_v16 = vmax.f32 %v1268_v8, 0.0  ;;  %v5403_v57 = vor.u32 %v6595_v54, %v5402_v52  ;;  %v5594_v58 = vld [vmem:[#allocation11 + $0x348] sm:$0xf]  ;;  %3095 = vmatpush.bf16.msra.mxu1 %v6071_v53  ;;  %v5780_v8 = vld [vmem:[#allocation11 + $0x4e0] sm:$0xf0] }
 0x1c0   : > { %v1180_v0 = vpop.f32.mrf.mxu2  ;;  %3065 = vmatpush.bf16.msra.mxu0 %v5847_v15  ;;  %v5595_v2 = vor.u32 %v6643_v59, %v5594_v58  ;;  %v6678_v52 = vld [vmem:[#allocation11 + $0x484] sm:$0xf]  ;;  %v5274_v58 = vld [vmem:[#allocation11 + $0xc8] sm:$0xf] }
 0x1c1   : > { %v1209_v5 = vpop.f32.mrf.mxu3  ;;  %2912 = vmatmul.bf16.gmra.mxu2 %v7677_v61  ;;  %v1181_v63 = vadd.f32 %v1180_v0, %v7681_v4  ;;  %v6563_v59 = vld [vmem:[#allocation11 + $0xe4] sm:$0xf0] }
 0x1c2   : > { %v1240_v7 = vpop.f32.mrf.mxu0  ;;  %3121 = vmatpush.bf16.msrb.mxu2 %v5403_v57  ;;  %3152 = vmatpush.bf16.msrb.mxu3 %v5595_v2  ;;  %v6619_v57 = vld [vmem:[#allocation11 + $0x2a4] sm:$0xf0]  ;;  %v5716_v2 = vld [vmem:[#allocation11 + $0x460] sm:$0xf0] }
 0x1c3   : > { %v1241_v9 = vadd.f32 %v1240_v7, %v7674_v55  ;;  %v1269_v10 = vpop.f32.mrf.mxu1  ;;  %v1210_v18 = vadd.f32 %v1209_v5, %v1181_v63  ;;  %v6686_v7 = vld [vmem:[#allocation11 + $0x4c4] sm:$0xf]  ;;  %v5562_v63 = vld [vmem:[#allocation11 + $0x308] sm:$0xf] }
 0x1c4   : > { %3066 = vmatpush.bf16.msra.mxu0 %v5815_v48  ;;  %v5498_v48 = vld [vmem:[#allocation11 + $0x288] sm:$0xf] }
 0x1c5   : > { %v1270_v12 = vadd.f32 %v1269_v10, %v1241_v9  ;;  %v1289_v36 = vmax.f32 %v1210_v18, 0.0  ;;  %v5371_v9 = vor.u32 %v6587_v3, %v5370_v21  ;;  %v5783_v10 = vor.u32 %v6686_v7, %v5780_v8  ;;  %v6734_v3 = vld [vmem:[#allocation11 + $0x644] sm:$0xf]  ;;  %v5466_v8 = vld [vmem:[#allocation11 + $0x248] sm:$0xf] }
 0x1c6   : > { %v5275_v21 = vor.u32 %v6563_v59, %v5274_v58  ;;  %v5972_v7 = vld [vmem:[#allocation11 + $0x660] sm:$0xf0] }
 0x1c7   : > { %v1294_v46 = vmax.f32 %v1270_v12, 0.0  ;;  %v6635_v12 = vld [vmem:[#allocation11 + $0x324] sm:$0xf0]  ;;  %3122 = vmatpush.bf16.msrb.mxu2 %v5371_v9 }
 0x1c8   : > { %v1182_v17 = vpop.f32.mrf.mxu2  ;;  %v5563_v15 = vor.u32 %v6635_v12, %v5562_v63  ;;  %3067 = vmatpush.bf16.msra.mxu0 %v5783_v10  ;;  %v6611_v9 = vld [vmem:[#allocation11 + $0x264] sm:$0xf0] }
 0x1c9   : > { %v7686_v19 = vpack.c.bf16 %v1294_v46, %v1290_v16  ;;  %v1183_v20 = vadd.f32 %v1182_v17, %v7681_v4  ;;  %v1211_v23 = vpop.f32.mrf.mxu3  ;;  %v5338_v46 = vld [vmem:[#allocation11 + $0x148] sm:$0xf] }
 0x1ca   : > { %v1243_v26 = vpop.f32.mrf.mxu0  ;;  %v6579_v17 = vld [vmem:[#allocation11 + $0x164] sm:$0xf0]  ;;  %3153 = vmatpush.bf16.msrb.mxu3 %v5563_v15 }
 0x1cb   : > { %v1212_v33 = vadd.f32 %v1211_v23, %v1183_v20  ;;  %v1272_v34 = vpop.f32.mrf.mxu1  ;;  %2984 = vmatmul.bf16.vlgmr.msrb.gmra.mxu1 %v7686_v19  ;;  %3042 = vmatmul.bf16.vlgmr.msra.gmra.mxu3 %v7640_v11  ;;  %v1244_v42 = vadd.f32 %v1243_v26, %v7674_v55  ;;  %v6036_v26 = vld [vmem:[#allocation11 + $0x6e0] sm:$0xf0]  ;;  %v5339_v30 = vor.u32 %v6579_v17, %v5338_v46  ;;  %v5242_v15 = vld [vmem:[#allocation11 + $0x88] sm:$0xf] }
 0x1cc   : > { %v6039_v32 = vor.u32 %v6750_v25, %v6036_v26  ;;  %v6726_v46 = vld [vmem:[#allocation11 + $0x604] sm:$0xf]  ;;  %v6603_v26 = vld [vmem:[#allocation11 + $0x224] sm:$0xf0] }
 0x1cd   : > { %v1293_v37 = vmax.f32 %v1212_v33, 0.0  ;;  %v1273_v1 = vadd.f32 %v1272_v34, %v1244_v42  ;;  %v5530_v33 = vld [vmem:[#allocation11 + $0x2c8] sm:$0xf]  ;;  %3123 = vmatpush.bf16.msrb.mxu2 %v5339_v30  ;;  %v6662_v30 = vld [vmem:[#allocation11 + $0x404] sm:$0xf] }
 0x1ce   : > { %v6627_v34 = vld [vmem:[#allocation11 + $0x2e4] sm:$0xf0]  ;;  %3096 = vmatpush.bf16.msra.mxu1 %v6039_v32 }
 0x1cf   : > { %v7691_v40 = vpack.c.bf16 %v1293_v37, %v1289_v36  ;;  %v1298_v13 = vmax.f32 %v1273_v1, 0.0  ;;  %v5531_v37 = vor.u32 %v6627_v34, %v5530_v33  ;;  %v5210_v34 = vld [vmem:[#allocation11 + $0x48] sm:$0xf] }
 0x1d0   : > { %v1185_v45 = vpop.f32.mrf.mxu2 }
 0x1d1   : > { %v1214_v51 = vpop.f32.mrf.mxu3  ;;  %2955 = vmatmul.bf16.vlgmr.msrb.gmra.mxu0 %v7691_v40  ;;  %3013 = vmatmul.bf16.vlgmr.msra.gmra.mxu2 %v7644_v28  ;;  %v1186_v5 = vadd.f32 %v1185_v45, %v7681_v4  ;;  %v6004_v45 = vld [vmem:[#allocation11 + $0x6a0] sm:$0xf0] }
 0x1d2   : > { %v1245_v56 = vpop.f32.mrf.mxu0  ;;  %3154 = vmatpush.bf16.msrb.mxu3 %v5531_v37  ;;  %v6007_v53 = vor.u32 %v6742_v41, %v6004_v45  ;;  %3124 = vmatpush.bf16.msrb.mxu2 %v5307_v44 }
 0x1d3   : > { %v1246_v60 = vadd.f32 %v1245_v56, %v7674_v55  ;;  %v1274_v0 = vpop.f32.mrf.mxu1  ;;  %v1215_v18 = vadd.f32 %v1214_v51, %v1186_v5  ;;  %v5748_v51 = vld [vmem:[#allocation11 + $0x4a0] sm:$0xf0] }
 0x1d4   : > { %v5751_v56 = vor.u32 %v6678_v52, %v5748_v51  ;;  %3097 = vmatpush.bf16.msra.mxu1 %v6007_v53  ;;  %v5178_v51 = vld [vmem:[#allocation11 + $0x8] sm:$0xf] }
 0x1d5   : > { %v1275_v6 = vadd.f32 %v1274_v0, %v1246_v60  ;;  %v1297_v42 = vmax.f32 %v1215_v18, 0.0  ;;  %v5499_v60 = vor.u32 %v6619_v57, %v5498_v48  ;;  %v6670_v0 = vld [vmem:[#allocation11 + $0x444] sm:$0xf]  ;;  %v6539_v53 = vld [vmem:[#allocation11 + $0x24] sm:$0xf0] }
 0x1d6   : > { %3068 = vmatpush.bf16.msra.mxu0 %v5751_v56  ;;  %3125 = vmatpush.bf16.msrb.mxu2 %v5275_v21  ;;  %v5940_v18 = vld [vmem:[#allocation11 + $0x620] sm:$0xf0]  ;;  %v5179_v57 = vor.u32 %v6539_v53, %v5178_v51  ;;  %v6170_v21 = vld [vmem:[#allocation11 + $0x7c8] sm:$0xf] }
 0x1d7   : > { %v1302_v14 = vmax.f32 %v1275_v6, 0.0  ;;  %v5719_v6 = vor.u32 %v6670_v0, %v5716_v2  ;;  %3155 = vmatpush.bf16.msrb.mxu3 %v5499_v60  ;;  %v5943_v32 = vor.u32 %v6726_v46, %v5940_v18  ;;  %v5914_v0 = vld [vmem:[#allocation11 + $0x5c8] sm:$0xf] }
 0x1d8   : > { %v1187_v16 = vpop.f32.mrf.mxu2  ;;  %v6723_v2 = vld [vmem:[#allocation11 + $0x5e4] sm:$0xf0] }
 0x1d9   : > { %v7698_v20 = vpack.c.bf16 %v1302_v14, %v1298_v13  ;;  %v1188_v23 = vadd.f32 %v1187_v16, %v7681_v4  ;;  %v1216_v24 = vpop.f32.mrf.mxu3  ;;  %v5975_v13 = vor.u32 %v6734_v3, %v5972_v7  ;;  %v5467_v14 = vor.u32 %v6611_v9, %v5466_v8  ;;  %v6555_v16 = vld [vmem:[#allocation11 + $0xa4] sm:$0xf0] }
 0x1da   : > { %v1248_v31 = vpop.f32.mrf.mxu0  ;;  %v5243_v17 = vor.u32 %v6555_v16, %v5242_v15  ;;  %3069 = vmatpush.bf16.msra.mxu0 %v5719_v6  ;;  %v6787_v6 = vld [vmem:[#allocation11 + $0x7e4] sm:$0xf0] }
 0x1db   : > { %v1217_v35 = vadd.f32 %v1216_v24, %v1188_v23  ;;  %v1277_v36 = vpop.f32.mrf.mxu1  ;;  %2989 = vmatmul.bf16.gmra.mxu1 %v7698_v20  ;;  %3047 = vmatmul.bf16.gmra.mxu3 %v7650_v22  ;;  %v1249_v50 = vadd.f32 %v1248_v31, %v7674_v55  ;;  %v5434_v23 = vld [vmem:[#allocation11 + $0x208] sm:$0xf]  ;;  %v5684_v31 = vld [vmem:[#allocation11 + $0x420] sm:$0xf0]  ;;  %v6171_v9 = vor.u32 %v6787_v6, %v6170_v21 }
 0x1dc   : > { %3098 = vmatpush.bf16.msra.mxu1 %v5975_v13  ;;  %v5687_v33 = vor.u32 %v6662_v30, %v5684_v31  ;;  %3156 = vmatpush.bf16.msrb.mxu3 %v5467_v14  ;;  %v5435_v39 = vor.u32 %v6603_v26, %v5434_v23  ;;  %v5882_v13 = vld [vmem:[#allocation11 + $0x588] sm:$0xf] }
 0x1dd   : > { %v1301_v43 = vmax.f32 %v1217_v35, 0.0  ;;  %v1278_v10 = vadd.f32 %v1277_v36, %v1249_v50  ;;  %v6547_v35 = vld [vmem:[#allocation11 + $0x64] sm:$0xf0]  ;;  %3126 = vmatpush.bf16.msrb.mxu2 %v5243_v17 }
 0x1de   : > { %3070 = vmatpush.bf16.msra.mxu0 %v5687_v33  ;;  %v6715_v14 = vld [vmem:[#allocation11 + $0x5a4] sm:$0xf0] }
 0x1df   : > { %v7703_v49 = vpack.c.bf16 %v1301_v43, %v1297_v42  ;;  %v1306_v36 = vmax.f32 %v1278_v10, 0.0  ;;  %v5211_v42 = vor.u32 %v6547_v35, %v5210_v34  ;;  %v5883_v46 = vor.u32 %v6715_v14, %v5882_v13  ;;  %v6138_v26 = vld [vmem:[#allocation11 + $0x788] sm:$0xf]  ;;  %v6583_v14 = vld [vmem:[#allocation11 + $0x18c] sm:$0xf] }
 0x1e0   : > { %v1190_v54 = vpop.f32.mrf.mxu2  ;;  %3099 = vmatpush.bf16.msra.mxu1 %v5943_v32  ;;  %3157 = vmatpush.bf16.msrb.mxu3 %v5435_v39  ;;  %v6779_v30 = vld [vmem:[#allocation11 + $0x7a4] sm:$0xf0] }
 0x1e1   : > { %v1219_v1 = vpop.f32.mrf.mxu3  ;;  %2960 = vmatmul.bf16.gmra.mxu0 %v7703_v49  ;;  %3018 = vmatmul.bf16.gmra.mxu2 %v7654_v27  ;;  %v1191_v24 = vadd.f32 %v1190_v54, %v7681_v4  ;;  %v6139_v31 = vor.u32 %v6779_v30, %v6138_v26  ;;  %v6707_v35 = vld [vmem:[#allocation11 + $0x564] sm:$0xf0]  ;;  %v6575_v30 = vld [vmem:[#allocation11 + $0x14c] sm:$0xf] }
 0x1e2   : > { %v1250_v5 = vpop.f32.mrf.mxu0  ;;  %3127 = vmatpush.bf16.msrb.mxu2 %v5211_v42  ;;  %v5818_v42 = vld [vmem:[#allocation11 + $0x508] sm:$0xf] }
 0x1e3   : > { %v1251_v63 = vadd.f32 %v1250_v5, %v7674_v55  ;;  %v1279_v12 = vpop.f32.mrf.mxu1  ;;  %v1220_v43 = vadd.f32 %v1219_v1, %v1191_v24  ;;  %v5915_v5 = vor.u32 %v6723_v2, %v5914_v0  ;;  %v6591_v0 = vld [vmem:[#allocation11 + $0x1cc] sm:$0xf]  ;;  %v5786_v21 = vld [vmem:[#allocation11 + $0x4c8] sm:$0xf] }
 0x1e4   : > { %3208 = vmatpush.bf16.msrb.mxu1 %v6171_v9  ;;  %v5404_v2 = vld [vmem:[#allocation11 + $0x1e8] sm:$0xf0]  ;;  %v6042_v6 = vld [vmem:[#allocation11 + $0x6c8] sm:$0xf] }
 0x1e5   : > { %v1280_v25 = vadd.f32 %v1279_v12, %v1251_v63  ;;  %v1305_v54 = vmax.f32 %v1220_v43, 0.0  ;;  %3179 = vmatpush.bf16.msrb.mxu0 %v5915_v5  ;;  %v6699_v43 = vld [vmem:[#allocation11 + $0x524] sm:$0xf0]  ;;  %v5407_v5 = vor.u32 %v6591_v0, %v5404_v2  ;;  %v6639_v9 = vld [vmem:[#allocation11 + $0x34c] sm:$0xf] }
 0x1e6   : > { %3128 = vmatpush.bf16.msrb.mxu2 %v5179_v57  ;;  %v6647_v57 = vld [vmem:[#allocation11 + $0x38c] sm:$0xf]  ;;  %v6683_v26 = vld [vmem:[#allocation11 + $0x4a4] sm:$0xf0] }
 0x1e7   : > { %v1310_v37 = vmax.f32 %v1280_v25, 0.0  ;;  %v5722_v0 = vld [vmem:[#allocation11 + $0x448] sm:$0xf] }
 0x1e8   : > { %v1192_v38 = vpop.f32.mrf.mxu2  ;;  %3209 = vmatpush.bf16.msrb.mxu1 %v6139_v31  ;;  %v5340_v31 = vld [vmem:[#allocation11 + $0x168] sm:$0xf0]  ;;  %v6675_v2 = vld [vmem:[#allocation11 + $0x464] sm:$0xf0] }
 0x1e9   : > { %v7710_v44 = vpack.c.bf16 %v1310_v37, %v1306_v36  ;;  %v1193_v41 = vadd.f32 %v1192_v38, %v7681_v4  ;;  %v1221_v45 = vpop.f32.mrf.mxu3  ;;  %3180 = vmatpush.bf16.msrb.mxu0 %v5883_v46  ;;  %v6106_v36 = vld [vmem:[#allocation11 + $0x748] sm:$0xf] }
 0x1ea   : > { %v1253_v48 = vpop.f32.mrf.mxu0  ;;  %v6771_v38 = vld [vmem:[#allocation11 + $0x764] sm:$0xf0]  ;;  %3237 = vmatpush.bf16.msra.mxu2 %v5407_v5  ;;  %v5723_v5 = vor.u32 %v6675_v2, %v5722_v0 }
 0x1eb   : > { %v1222_v50 = vadd.f32 %v1221_v45, %v1193_v41  ;;  %v1282_v52 = vpop.f32.mrf.mxu1  ;;  %2994 = vmatmul.bf16.gmra.mxu1 %v7710_v44  ;;  %3052 = vmatmul.bf16.gmra.mxu3 %v7660_v62  ;;  %v1254_v59 = vadd.f32 %v1253_v48, %v7674_v55  ;;  %v6107_v39 = vor.u32 %v6771_v38, %v6106_v36  ;;  %v6655_v45 = vld [vmem:[#allocation11 + $0x3cc] sm:$0xf]  ;;  %v6747_v38 = vld [vmem:[#allocation11 + $0x6a4] sm:$0xf0] }
 0x1ec   : > { %v5819_v41 = vor.u32 %v6699_v43, %v5818_v42  ;;  %v5660_v48 = vld [vmem:[#allocation11 + $0x3e8] sm:$0xf0] }
 0x1ed   : > { %v1309_v56 = vmax.f32 %v1222_v50, 0.0  ;;  %v1283_v7 = vadd.f32 %v1282_v52, %v1254_v59  ;;  %3210 = vmatpush.bf16.msrb.mxu1 %v6107_v39  ;;  %v6074_v50 = vld [vmem:[#allocation11 + $0x708] sm:$0xf]  ;;  %v5663_v51 = vor.u32 %v6655_v45, %v5660_v48  ;;  %v5628_v59 = vld [vmem:[#allocation11 + $0x3a8] sm:$0xf0] }
 0x1ee   : > { %v6763_v52 = vld [vmem:[#allocation11 + $0x724] sm:$0xf0]  ;;  %v5532_v36 = vld [vmem:[#allocation11 + $0x2e8] sm:$0xf0] }
 0x1ef   : > { %v7715_v58 = vpack.c.bf16 %v1309_v56, %v1305_v54  ;;  %v1314_v15 = vmax.f32 %v1283_v7, 0.0  ;;  %v6075_v53 = vor.u32 %v6763_v52, %v6074_v50  ;;  %v7733_v54 = vld [vmem:[#allocation13] sm:$0xff]  ;;  %3266 = vmatpush.bf16.msra.mxu3 %v5663_v51  ;;  %v5308_v45 = vld [vmem:[#allocation11 + $0x128] sm:$0xf0] }
 0x1f0   : > { %v1195_v1 = vpop.f32.mrf.mxu2  ;;  %v6615_v51 = vld [vmem:[#allocation11 + $0x28c] sm:$0xf] }
 0x1f1   : > { %v1224_v60 = vpop.f32.mrf.mxu3  ;;  %2965 = vmatmul.bf16.gmra.mxu0 %v7715_v58  ;;  %3023 = vmatmul.bf16.gmra.mxu2 %v7664_v29  ;;  %v1196_v63 = vadd.f32 %v1195_v1, %v7681_v4  ;;  %v5631_v1 = vor.u32 %v6647_v57, %v5628_v59  ;;  %v6559_v59 = vld [vmem:[#allocation11 + $0xcc] sm:$0xf] }
 0x1f2   : > { %v1255_v3 = vpop.f32.mrf.mxu0  ;;  %3211 = vmatpush.bf16.msrb.mxu1 %v6075_v53  ;;  %v5500_v53 = vld [vmem:[#allocation11 + $0x2a8] sm:$0xf0] }
 0x1f3   : > { %v1256_v8 = vadd.f32 %v1255_v3, %v7674_v55  ;;  %v1284_v10 = vpop.f32.mrf.mxu1  ;;  %v1225_v18 = vadd.f32 %v1224_v60, %v1196_v63  ;;  %v7736_v60 = vperm.slane %v7733_v54, 0  ;;  %v6691_v3 = vld [vmem:[#allocation11 + $0x4e4] sm:$0xf0]  ;;  %3267 = vmatpush.bf16.msra.mxu3 %v5631_v1  ;;  %v5276_v1 = vld [vmem:[#allocation11 + $0xe8] sm:$0xf0] }
 0x1f4   : > { %v5787_v7 = vor.u32 %v6691_v3, %v5786_v21  ;;  %v5279_v21 = vor.u32 %v6559_v59, %v5276_v1  ;;  %v5978_v3 = vld [vmem:[#allocation11 + $0x648] sm:$0xf] }
 0x1f5   : > { %v1285_v12 = vadd.f32 %v1284_v10, %v1256_v8  ;;  %v1313_v32 = vmax.f32 %v1225_v18, 0.0  ;;  %v6755_v8 = vld [vmem:[#allocation11 + $0x6e4] sm:$0xf0]  ;;  %v5596_v10 = vld [vmem:[#allocation11 + $0x368] sm:$0xf0] }
 0x1f6   : > { %v6043_v63 = vor.u32 %v6755_v8, %v6042_v6  ;;  %v6631_v18 = vld [vmem:[#allocation11 + $0x30c] sm:$0xf]  ;;  %v6739_v6 = vld [vmem:[#allocation11 + $0x664] sm:$0xf0] }
 0x1f7   : > { %v1318_v16 = vmax.f32 %v1285_v12, 0.0  ;;  %v5599_v12 = vor.u32 %v6639_v9, %v5596_v10  ;;  %v5468_v8 = vld [vmem:[#allocation11 + $0x268] sm:$0xf0]  ;;  %v5979_v9 = vor.u32 %v6739_v6, %v5978_v3 }
 0x1f8   : > { %v1197_v17 = vpop.f32.mrf.mxu2  ;;  %3212 = vmatpush.bf16.msrb.mxu1 %v6043_v63  ;;  %v5884_v6 = vld [vmem:[#allocation11 + $0x5a8] sm:$0xf0] }
 0x1f9   : > { %v7722_v23 = vpack.c.bf16 %v1318_v16, %v1314_v15  ;;  %v1198_v24 = vadd.f32 %v1197_v17, %v7681_v4  ;;  %v1226_v55 = vpop.f32.mrf.mxu3  ;;  %v5850_v4 = vld [vmem:[#allocation11 + $0x548] sm:$0xf]  ;;  %v5372_v15 = vld [vmem:[#allocation11 + $0x1a8] sm:$0xf0]  ;;  %3268 = vmatpush.bf16.msra.mxu3 %v5599_v12 }
 0x1fa   : > { %v5851_v37 = vor.u32 %v6707_v35, %v5850_v4  ;;  %v5375_v46 = vor.u32 %v6583_v14, %v5372_v15  ;;  %v5343_v4 = vor.u32 %v6575_v30, %v5340_v31  ;;  %v6623_v35 = vld [vmem:[#allocation11 + $0x2cc] sm:$0xf]  ;;  %v5690_v30 = vld [vmem:[#allocation11 + $0x408] sm:$0xf] }
 0x1fb   : > { %v1227_v25 = vadd.f32 %v1226_v55, %v1198_v24  ;;  %2999 = vmatmul.bf16.gmra.mxu1 %v7722_v23  ;;  %3057 = vmatmul.bf16.gmra.mxu3 %v7670_v47  ;;  %v5564_v24 = vld [vmem:[#allocation11 + $0x328] sm:$0xf0]  ;;  %v5754_v55 = vld [vmem:[#allocation11 + $0x488] sm:$0xf]  ;;  %v5535_v39 = vor.u32 %v6623_v35, %v5532_v36 }
 0x1fc   : > { %3181 = vmatpush.bf16.msrb.mxu0 %v5851_v37  ;;  %3238 = vmatpush.bf16.msra.mxu2 %v5375_v46  ;;  %v6010_v37 = vld [vmem:[#allocation11 + $0x688] sm:$0xf]  ;;  %v6551_v12 = vld [vmem:[#allocation11 + $0x8c] sm:$0xf] }
 0x1fd   : > { %v1317_v33 = vmax.f32 %v1227_v25, 0.0  ;;  %v5567_v25 = vor.u32 %v6631_v18, %v5564_v24  ;;  %v6011_v43 = vor.u32 %v6747_v38, %v6010_v37  ;;  %v5946_v46 = vld [vmem:[#allocation11 + $0x608] sm:$0xf]  ;;  %v6599_v18 = vld [vmem:[#allocation11 + $0x20c] sm:$0xf] }
 0x1fe   : > { %v6667_v31 = vld [vmem:[#allocation11 + $0x424] sm:$0xf0]  ;;  %v5212_v35 = vld [vmem:[#allocation11 + $0x68] sm:$0xf0] }
 0x1ff   : > { %v7727_v34 = vpack.c.bf16 %v1317_v33, %v1313_v32  ;;  %v5755_v33 = vor.u32 %v6683_v26, %v5754_v55  ;;  %3269 = vmatpush.bf16.msra.mxu3 %v5567_v25  ;;  %3213 = vmatpush.bf16.msrb.mxu1 %v6011_v43  ;;  %v5436_v55 = vld [vmem:[#allocation11 + $0x228] sm:$0xf0] }
 0x200   : > { %3182 = vmatpush.bf16.msrb.mxu0 %v5819_v41  ;;  %3239 = vmatpush.bf16.msra.mxu2 %v5343_v4  ;;  %v6567_v41 = vld [vmem:[#allocation11 + $0x10c] sm:$0xf]  ;;  %v5439_v26 = vor.u32 %v6599_v18, %v5436_v55  ;;  %v5691_v4 = vor.u32 %v6667_v31, %v5690_v30  ;;  %v5666_v31 = vld [vmem:[#allocation11 + $0x3d0] sm:$0xf] }
 0x201   : > { %2970 = vmatmul.bf16.gmra.mxu0 %v7727_v34  ;;  %3028 = vmatmul.bf16.gmra.mxu2 %v7677_v61  ;;  %v5311_v50 = vor.u32 %v6567_v41, %v5308_v45  ;;  %v6535_v38 = vld [vmem:[#allocation11 + $0xc] sm:$0xf] }
 0x203   : > { %3270 = vmatpush.bf16.msra.mxu3 %v5535_v39  ;;  %3214 = vmatpush.bf16.msrb.mxu1 %v5979_v9  ;;  %v5180_v39 = vld [vmem:[#allocation11 + $0x28] sm:$0xf0] }
 0x204   : > { %3183 = vmatpush.bf16.msrb.mxu0 %v5787_v7  ;;  %3240 = vmatpush.bf16.msra.mxu2 %v5311_v50  ;;  %v6607_v7 = vld [vmem:[#allocation11 + $0x24c] sm:$0xf]  ;;  %v5183_v43 = vor.u32 %v6535_v38, %v5180_v39 }
 0x205   : > { %v5471_v10 = vor.u32 %v6607_v7, %v5468_v8  ;;  %v5916_v50 = vld [vmem:[#allocation11 + $0x5e8] sm:$0xf0] }
 0x206   : > { %v6775_v7 = vld [vmem:[#allocation11 + $0x78c] sm:$0xf] }
 0x208   : > { %3184 = vmatpush.bf16.msrb.mxu0 %v5755_v33  ;;  %3241 = vmatpush.bf16.msra.mxu2 %v5279_v21  ;;  %v6543_v33 = vld [vmem:[#allocation11 + $0x4c] sm:$0xf] }
 0x209   : > { %v5215_v36 = vor.u32 %v6543_v33, %v5212_v35  ;;  %v6660_v33 = vld [vmem:[#allocation11 + $0x3ec] sm:$0xf0]  ;;  %v5820_v35 = vld [vmem:[#allocation11 + $0x528] sm:$0xf0] }
 0x20b   : > { %3100 = vmatmul.bf16.vlgmr.msra.gmra.mxu1 %v7686_v19  ;;  %3158 = vmatmul.bf16.vlgmr.msrb.gmra.mxu3 %v7640_v11 }
 0x20c   : > { %3185 = vmatpush.bf16.msrb.mxu0 %v5723_v5  ;;  %v6711_v5 = vld [vmem:[#allocation11 + $0x58c] sm:$0xf] }
 0x20d   : > { %v5887_v9 = vor.u32 %v6711_v5, %v5884_v6  ;;  %v5602_v6 = vld [vmem:[#allocation11 + $0x350] sm:$0xf] }
 0x20e   : > { %v2927_v56 = vpop.f32.mrf.mxu3 }
 0x210   : > { %3186 = vmatpush.bf16.msrb.mxu0 %v5691_v4  ;;  %v6695_v4 = vld [vmem:[#allocation11 + $0x50c] sm:$0xf] }
 0x211   : > { %3071 = vmatmul.bf16.vlgmr.msra.gmra.mxu0 %v7691_v40  ;;  %3129 = vmatmul.bf16.vlgmr.msrb.gmra.mxu2 %v7644_v28  ;;  %v5823_v39 = vor.u32 %v6695_v4, %v5820_v35 }
 0x214   : > { %v2898_v13 = vpop.f32.mrf.mxu2 }
 0x215   : > { %v2899_v16 = vadd.f32 %v2898_v13, %v7736_v60  ;;  %v5244_v13 = vld [vmem:[#allocation11 + $0xa8] sm:$0xf0] }
 0x216   : > { %v2929_v17 = vpop.f32.mrf.mxu3  ;;  %v5247_v15 = vor.u32 %v6551_v12, %v5244_v13  ;;  %v6703_v13 = vld [vmem:[#allocation11 + $0x54c] sm:$0xf] }
 0x217   : > { %v7741_v32 = vadd.f32 %v2927_v56, %v2899_v16  ;;  %v5503_v56 = vor.u32 %v6615_v51, %v5500_v53 }
 0x218   : > { %3242 = vmatpush.bf16.msra.mxu2 %v5247_v15  ;;  %v6767_v15 = vld [vmem:[#allocation11 + $0x74c] sm:$0xf] }
 0x219   : > { %3271 = vmatpush.bf16.msra.mxu3 %v5503_v56  ;;  %v6172_v56 = vld [vmem:[#allocation11 + $0x7e8] sm:$0xf0] }
 0x21b   : > { %3105 = vmatmul.bf16.gmra.mxu1 %v7698_v20  ;;  %3163 = vmatmul.bf16.gmra.mxu3 %v7650_v22 }
 0x21c   : > { %v2900_v42 = vpop.f32.mrf.mxu2  ;;  %3243 = vmatpush.bf16.msra.mxu2 %v5215_v36  ;;  %v6759_v36 = vld [vmem:[#allocation11 + $0x70c] sm:$0xf] }
 0x21d   : > { %v2901_v48 = vadd.f32 %v2900_v42, %v7736_v60  ;;  %3272 = vmatpush.bf16.msra.mxu3 %v5471_v10  ;;  %v6140_v10 = vld [vmem:[#allocation11 + $0x7a8] sm:$0xf0] }
 0x21e   : > { %v2932_v52 = vpop.f32.mrf.mxu3 }
 0x21f   : > { %v7746_v57 = vadd.f32 %v2929_v17, %v2901_v48  ;;  %v6731_v17 = vld [vmem:[#allocation11 + $0x624] sm:$0xf0]  ;;  %v6719_v48 = vld [vmem:[#allocation11 + $0x5cc] sm:$0xf] }
 0x220   : > { %v5947_v24 = vor.u32 %v6731_v17, %v5946_v46  ;;  %3244 = vmatpush.bf16.msra.mxu2 %v5183_v43  ;;  %v5919_v53 = vor.u32 %v6719_v48, %v5916_v50  ;;  %v6108_v17 = vld [vmem:[#allocation11 + $0x768] sm:$0xf0] }
 0x221   : > { %3076 = vmatmul.bf16.gmra.mxu0 %v7703_v49  ;;  %3134 = vmatmul.bf16.gmra.mxu2 %v7654_v27 }
 0x222   : > { %3215 = vmatpush.bf16.msrb.mxu1 %v5947_v24  ;;  %3273 = vmatpush.bf16.msra.mxu3 %v5439_v26  ;;  %v6111_v24 = vor.u32 %v6767_v15, %v6108_v17  ;;  %v5378_v15 = vld [vmem:[#allocation11 + $0x190] sm:$0xf] }
 0x223   : > { %3295 = vmatpush.bf16.msra.mxu0 %v5919_v53  ;;  %v6588_v17 = vld [vmem:[#allocation11 + $0x1ac] sm:$0xf0] }
 0x224   : > { %v2903_v63 = vpop.f32.mrf.mxu2 }
 0x225   : > { %v2904_v14 = vadd.f32 %v2903_v63, %v7736_v60  ;;  %v6143_v63 = vor.u32 %v6775_v7, %v6140_v10  ;;  %v6644_v7 = vld [vmem:[#allocation11 + $0x36c] sm:$0xf0] }
 0x226   : > { %v2934_v16 = vpop.f32.mrf.mxu3 }
 0x227   : > { %v7751_v25 = vadd.f32 %v2932_v52, %v2904_v14  ;;  %v6783_v52 = vld [vmem:[#allocation11 + $0x7cc] sm:$0xf]  ;;  %3296 = vmatpush.bf16.msra.mxu0 %v5887_v9  ;;  %v5603_v9 = vor.u32 %v6644_v7, %v5602_v6 }
 0x228   : > { %v6175_v1 = vor.u32 %v6783_v52, %v6172_v56  ;;  %v5852_v14 = vld [vmem:[#allocation11 + $0x568] sm:$0xf0]  ;;  %v5634_v52 = vld [vmem:[#allocation11 + $0x390] sm:$0xf] }
 0x229   : > { %v5855_v46 = vor.u32 %v6703_v13, %v5852_v14  ;;  %v6751_v13 = vld [vmem:[#allocation11 + $0x6cc] sm:$0xf] }
 0x22a   : > { %3324 = vmatpush.bf16.msra.mxu1 %v6175_v1  ;;  %v6044_v14 = vld [vmem:[#allocation11 + $0x6e8] sm:$0xf0] }
 0x22b   : > { %3110 = vmatmul.bf16.gmra.mxu1 %v7710_v44  ;;  %3168 = vmatmul.bf16.gmra.mxu3 %v7660_v62 }
 0x22c   : > { %v2905_v37 = vpop.f32.mrf.mxu2  ;;  %3297 = vmatpush.bf16.msra.mxu0 %v5855_v46  ;;  %v6047_v46 = vor.u32 %v6751_v13, %v6044_v14 }
 0x22d   : > { %v2906_v42 = vadd.f32 %v2905_v37, %v7736_v60  ;;  %v5667_v37 = vor.u32 %v6660_v33, %v5666_v31  ;;  %v6636_v31 = vld [vmem:[#allocation11 + $0x32c] sm:$0xf0] }
 0x22e   : > { %v2937_v41 = vpop.f32.mrf.mxu3  ;;  %3325 = vmatpush.bf16.msra.mxu1 %v6143_v63 }
 0x22f   : > { %v7756_v45 = vadd.f32 %v2934_v16, %v2906_v42  ;;  %v6076_v42 = vld [vmem:[#allocation11 + $0x728] sm:$0xf0]  ;;  %3382 = vmatpush.bf16.msrb.mxu3 %v5667_v37  ;;  %v5346_v37 = vld [vmem:[#allocation11 + $0x150] sm:$0xf] }
 0x230   : > { %3298 = vmatpush.bf16.msra.mxu0 %v5823_v39 }
 0x231   : > { %3081 = vmatmul.bf16.gmra.mxu0 %v7715_v58  ;;  %3139 = vmatmul.bf16.gmra.mxu2 %v7664_v29 }
 0x232   : > { %3326 = vmatpush.bf16.msra.mxu1 %v6111_v24 }
 0x234   : > { %v2908_v51 = vpop.f32.mrf.mxu2 }
 0x235   : > { %v2909_v59 = vadd.f32 %v2908_v51, %v7736_v60  ;;  %v6652_v51 = vld [vmem:[#allocation11 + $0x3ac] sm:$0xf0] }
 0x236   : > { %v2939_v0 = vpop.f32.mrf.mxu3  ;;  %v5635_v56 = vor.u32 %v6652_v51, %v5634_v52  ;;  %v5756_v51 = vld [vmem:[#allocation11 + $0x4a8] sm:$0xf0] }
 0x237   : > { %v7761_v2 = vadd.f32 %v2937_v41, %v2909_v59  ;;  %v6079_v41 = vor.u32 %v6759_v36, %v6076_v42 }
 0x238   : > { %3383 = vmatpush.bf16.msrb.mxu3 %v5635_v56 }
 0x239   : > { %3327 = vmatpush.bf16.msra.mxu1 %v6079_v41  ;;  %v6628_v41 = vld [vmem:[#allocation11 + $0x2ec] sm:$0xf0] }
 0x23b   : > { %3115 = vmatmul.bf16.gmra.mxu1 %v7722_v23  ;;  %3173 = vmatmul.bf16.gmra.mxu3 %v7670_v47 }
 0x23c   : > { %v2910_v21 = vpop.f32.mrf.mxu2  ;;  %3384 = vmatpush.bf16.msrb.mxu3 %v5603_v9 }
 0x23d   : > { %v2911_v3 = vadd.f32 %v2910_v21, %v7736_v60  ;;  %v6596_v21 = vld [vmem:[#allocation11 + $0x1ec] sm:$0xf0]  ;;  %3328 = vmatpush.bf16.msra.mxu1 %v6047_v46 }
 0x23e   : > { %v2942_v8 = vpop.f32.mrf.mxu3  ;;  %v5282_v46 = vld [vmem:[#allocation11 + $0xd0] sm:$0xf] }
 0x23f   : > { %v7766_v12 = vadd.f32 %v2939_v0, %v2911_v3  ;;  %v5410_v0 = vld [vmem:[#allocation11 + $0x1d0] sm:$0xf] }
 0x240   : > { %v5411_v5 = vor.u32 %v6596_v21, %v5410_v0  ;;  %v6743_v0 = vld [vmem:[#allocation11 + $0x68c] sm:$0xf] }
 0x241   : > { %3086 = vmatmul.bf16.gmra.mxu0 %v7727_v34  ;;  %3144 = vmatmul.bf16.gmra.mxu2 %v7677_v61  ;;  %v6012_v21 = vld [vmem:[#allocation11 + $0x6a8] sm:$0xf0] }
 0x242   : > { %3353 = vmatpush.bf16.msrb.mxu2 %v5411_v5  ;;  %v5314_v5 = vld [vmem:[#allocation11 + $0x110] sm:$0xf]  ;;  %v6015_v7 = vor.u32 %v6743_v0, %v6012_v21 }
 0x243   : > { %v6604_v21 = vld [vmem:[#allocation11 + $0x22c] sm:$0xf0] }
 0x244   : > { %v2913_v16 = vpop.f32.mrf.mxu2  ;;  %3329 = vmatpush.bf16.msra.mxu1 %v6015_v7 }
 0x245   : > { %v2914_v18 = vadd.f32 %v2913_v16, %v7736_v60 }
 0x246   : > { %v2944_v55 = vpop.f32.mrf.mxu3 }
 0x247   : > { %v7771_v26 = vadd.f32 %v2942_v8, %v2914_v18  ;;  %v5788_v8 = vld [vmem:[#allocation11 + $0x4e8] sm:$0xf0] }
 0x248   : > { %v2985_v30 = vpop.f32.mrf.mxu1 }
 0x24b   : > { %3216 = vmatmul.bf16.vlgmr.msrb.gmra.mxu1 %v7686_v19  ;;  %3274 = vmatmul.bf16.vlgmr.msra.gmra.mxu3 %v7640_v11 }
 0x24c   : > { %v2915_v38 = vpop.f32.mrf.mxu2 }
 0x24d   : > { %v2916_v43 = vadd.f32 %v2915_v38, %v7736_v60  ;;  %v7782_v60 = vperm.slane %v7733_v54, 1  ;;  %v6580_v38 = vld [vmem:[#allocation11 + $0x16c] sm:$0xf0] }
 0x24e   : > { %v2956_v48 = vpop.f32.mrf.mxu0  ;;  %v3043_v50 = vpop.f32.mrf.mxu3  ;;  %v5347_v42 = vor.u32 %v6580_v38, %v5346_v37 }
 0x24f   : > { %v2957_v53 = vadd.f32 %v2956_v48, %v7741_v32  ;;  %v7777_v59 = vadd.f32 %v2944_v55, %v2916_v43  ;;  %v6687_v32 = vld [vmem:[#allocation11 + $0x4cc] sm:$0xf]  ;;  %v5379_v55 = vor.u32 %v6588_v17, %v5378_v15  ;;  %v5538_v43 = vld [vmem:[#allocation11 + $0x2d0] sm:$0xf] }
 0x250   : > { %v2987_v1 = vpop.f32.mrf.mxu1  ;;  %v5791_v63 = vor.u32 %v6687_v32, %v5788_v8  ;;  %v6564_v17 = vld [vmem:[#allocation11 + $0xec] sm:$0xf0] }
 0x251   : > { %v2986_v3 = vadd.f32 %v2985_v30, %v2957_v53  ;;  %3187 = vmatmul.bf16.vlgmr.msrb.gmra.mxu0 %v7691_v40  ;;  %3245 = vmatmul.bf16.vlgmr.msra.gmra.mxu2 %v7644_v28  ;;  %v5570_v30 = vld [vmem:[#allocation11 + $0x310] sm:$0xf]  ;;  %v5539_v53 = vor.u32 %v6628_v41, %v5538_v43 }
 0x252   : > { %3299 = vmatpush.bf16.msra.mxu0 %v5791_v63  ;;  %v5571_v4 = vor.u32 %v6636_v31, %v5570_v30  ;;  %3354 = vmatpush.bf16.msrb.mxu2 %v5379_v55  ;;  %v6620_v63 = vld [vmem:[#allocation11 + $0x2ac] sm:$0xf0]  ;;  %v5283_v55 = vor.u32 %v6564_v17, %v5282_v46  ;;  %v6735_v30 = vld [vmem:[#allocation11 + $0x64c] sm:$0xf] }
 0x253   : > { %v3817_v48 = vmax.f32 %v2986_v3, 0.0  ;;  %v6572_v3 = vld [vmem:[#allocation11 + $0x12c] sm:$0xf0]  ;;  %v5980_v31 = vld [vmem:[#allocation11 + $0x668] sm:$0xf0] }
 0x254   : > { %v3014_v10 = vpop.f32.mrf.mxu2  ;;  %3385 = vmatpush.bf16.msrb.mxu3 %v5571_v4  ;;  %v5315_v9 = vor.u32 %v6572_v3, %v5314_v5  ;;  %v6671_v4 = vld [vmem:[#allocation11 + $0x44c] sm:$0xf]  ;;  %v5983_v37 = vor.u32 %v6735_v30, %v5980_v31  ;;  %v6556_v43 = vld [vmem:[#allocation11 + $0xac] sm:$0xf0] }
 0x255   : > { %v3015_v16 = vadd.f32 %v3014_v10, %v7782_v60  ;;  %v5506_v10 = vld [vmem:[#allocation11 + $0x290] sm:$0xf] }
 0x256   : > { %v2958_v18 = vpop.f32.mrf.mxu0  ;;  %v3045_v24 = vpop.f32.mrf.mxu3  ;;  %3355 = vmatpush.bf16.msrb.mxu2 %v5347_v42  ;;  %v5507_v14 = vor.u32 %v6620_v63, %v5506_v10  ;;  %v5250_v42 = vld [vmem:[#allocation11 + $0x90] sm:$0xf]  ;;  %3330 = vmatpush.bf16.msra.mxu1 %v5983_v37 }
 0x257   : > { %v2959_v33 = vadd.f32 %v2958_v18, %v7746_v57  ;;  %v7786_v35 = vadd.f32 %v3043_v50, %v3015_v16  ;;  %v6679_v57 = vld [vmem:[#allocation11 + $0x48c] sm:$0xf]  ;;  %v5218_v3 = vld [vmem:[#allocation11 + $0x50] sm:$0xf] }
 0x258   : > { %v2990_v36 = vpop.f32.mrf.mxu1  ;;  %v5759_v56 = vor.u32 %v6679_v57, %v5756_v51  ;;  %3386 = vmatpush.bf16.msrb.mxu3 %v5539_v53  ;;  %v6727_v51 = vld [vmem:[#allocation11 + $0x60c] sm:$0xf]  ;;  %v5186_v17 = vld [vmem:[#allocation11 + $0x10] sm:$0xf] }
 0x259   : > { %v2988_v39 = vadd.f32 %v2987_v1, %v2959_v33  ;;  %v5474_v33 = vld [vmem:[#allocation11 + $0x250] sm:$0xf]  ;;  %v5948_v53 = vld [vmem:[#allocation11 + $0x628] sm:$0xf0] }
 0x25a   : > { %3300 = vmatpush.bf16.msra.mxu0 %v5759_v56  ;;  %3356 = vmatpush.bf16.msrb.mxu2 %v5315_v9  ;;  %v5951_v0 = vor.u32 %v6727_v51, %v5948_v53 }
 0x25b   : > { %v3825_v52 = vmax.f32 %v2988_v39, 0.0  ;;  %3221 = vmatmul.bf16.gmra.mxu1 %v7698_v20  ;;  %3279 = vmatmul.bf16.gmra.mxu3 %v7650_v22  ;;  %v6612_v39 = vld [vmem:[#allocation11 + $0x26c] sm:$0xf0] }
 0x25c   : > { %v3016_v50 = vpop.f32.mrf.mxu2  ;;  %3387 = vmatpush.bf16.msrb.mxu3 %v5507_v14  ;;  %v5475_v41 = vor.u32 %v6612_v39, %v5474_v33  ;;  %3331 = vmatpush.bf16.msra.mxu1 %v5951_v0  ;;  %v5692_v14 = vld [vmem:[#allocation11 + $0x428] sm:$0xf0]  ;;  %v6724_v39 = vld [vmem:[#allocation11 + $0x5ec] sm:$0xf0] }
 0x25d   : > { %v7790_v1 = vpack.c.bf16 %v3825_v52, %v3817_v48  ;;  %v3017_v6 = vadd.f32 %v3016_v50, %v7782_v60  ;;  %v5251_v48 = vor.u32 %v6556_v43, %v5250_v42  ;;  %v5442_v50 = vld [vmem:[#allocation11 + $0x210] sm:$0xf] }
 0x25e   : > { %v2961_v32 = vpop.f32.mrf.mxu0  ;;  %v3048_v8 = vpop.f32.mrf.mxu3  ;;  %3357 = vmatpush.bf16.msrb.mxu2 %v5283_v55  ;;  %v5443_v7 = vor.u32 %v6604_v21, %v5442_v50  ;;  %v6540_v55 = vld [vmem:[#allocation11 + $0x2c] sm:$0xf0] }
 0x25f   : > { %v2962_v13 = vadd.f32 %v2961_v32, %v7751_v25  ;;  %v7794_v15 = vadd.f32 %v3045_v24, %v3017_v6  ;;  %v5724_v25 = vld [vmem:[#allocation11 + $0x468] sm:$0xf0]  ;;  %v6548_v32 = vld [vmem:[#allocation11 + $0x6c] sm:$0xf0]  ;;  %v5187_v31 = vor.u32 %v6540_v55, %v5186_v17 }
 0x260   : > { %v2992_v16 = vpop.f32.mrf.mxu1  ;;  %v5727_v24 = vor.u32 %v6671_v4, %v5724_v25  ;;  %3388 = vmatpush.bf16.msrb.mxu3 %v5475_v41  ;;  %v5219_v10 = vor.u32 %v6548_v32, %v5218_v3  ;;  %v6788_v41 = vld [vmem:[#allocation11 + $0x7ec] sm:$0xf0] }
 0x261   : > { %v2991_v18 = vadd.f32 %v2990_v36, %v2962_v13  ;;  %3192 = vmatmul.bf16.gmra.mxu0 %v7703_v49  ;;  %3250 = vmatmul.bf16.gmra.mxu2 %v7654_v27  ;;  %v5890_v3 = vld [vmem:[#allocation11 + $0x590] sm:$0xf] }
 0x262   : > { %3301 = vmatpush.bf16.msra.mxu0 %v5727_v24  ;;  %3358 = vmatpush.bf16.msrb.mxu2 %v5251_v48  ;;  %v5922_v24 = vld [vmem:[#allocation11 + $0x5d0] sm:$0xf] }
 0x263   : > { %v3833_v63 = vmax.f32 %v2991_v18, 0.0  ;;  %v5923_v43 = vor.u32 %v6724_v39, %v5922_v24  ;;  %v6716_v32 = vld [vmem:[#allocation11 + $0x5ac] sm:$0xf0] }
 0x264   : > { %v3019_v38 = vpop.f32.mrf.mxu2  ;;  %3389 = vmatpush.bf16.msrb.mxu3 %v5443_v7 }
 0x265   : > { %v3020_v36 = vadd.f32 %v3019_v38, %v7782_v60 }
 0x266   : > { %v2963_v52 = vpop.f32.mrf.mxu0  ;;  %v3050_v57 = vpop.f32.mrf.mxu3  ;;  %3359 = vmatpush.bf16.msrb.mxu2 %v5219_v10 }
 0x267   : > { %v2964_v56 = vadd.f32 %v2963_v52, %v7756_v45  ;;  %v7800_v5 = vadd.f32 %v3048_v8, %v3020_v36  ;;  %v6663_v45 = vld [vmem:[#allocation11 + $0x40c] sm:$0xf]  ;;  %v6178_v36 = vld [vmem:[#allocation11 + $0x7d0] sm:$0xf] }
 0x268   : > { %v2995_v6 = vpop.f32.mrf.mxu1  ;;  %v5695_v8 = vor.u32 %v6663_v45, %v5692_v14  ;;  %v6179_v52 = vor.u32 %v6788_v41, %v6178_v36  ;;  %v6780_v45 = vld [vmem:[#allocation11 + $0x7ac] sm:$0xf0] }
 0x269   : > { %v2993_v9 = vadd.f32 %v2992_v16, %v2964_v56 }
 0x26a   : > { %3302 = vmatpush.bf16.msra.mxu0 %v5695_v8  ;;  %3360 = vmatpush.bf16.msrb.mxu2 %v5187_v31  ;;  %v6708_v31 = vld [vmem:[#allocation11 + $0x56c] sm:$0xf0] }
 0x26b   : > { %v3841_v13 = vmax.f32 %v2993_v9, 0.0  ;;  %3226 = vmatmul.bf16.gmra.mxu1 %v7710_v44  ;;  %3284 = vmatmul.bf16.gmra.mxu3 %v7660_v62  ;;  %v6146_v9 = vld [vmem:[#allocation11 + $0x790] sm:$0xf] }
 0x26c   : > { %v3021_v46 = vpop.f32.mrf.mxu2  ;;  %3440 = vmatpush.bf16.msrb.mxu1 %v6179_v52  ;;  %v5668_v52 = vld [vmem:[#allocation11 + $0x3f0] sm:$0xf0] }
 0x26d   : > { %v3022_v30 = vadd.f32 %v3021_v46, %v7782_v60  ;;  %v7805_v16 = vpack.c.bf16 %v3841_v13, %v3833_v63  ;;  %v5891_v13 = vor.u32 %v6716_v32, %v5890_v3  ;;  %v6147_v46 = vor.u32 %v6780_v45, %v6146_v9 }
 0x26e   : > { %v2966_v33 = vpop.f32.mrf.mxu0  ;;  %v3053_v18 = vpop.f32.mrf.mxu3  ;;  %3411 = vmatpush.bf16.msrb.mxu0 %v5923_v43 }
 0x26f   : > { %v2967_v4 = vadd.f32 %v2966_v33, %v7761_v2  ;;  %v7808_v25 = vadd.f32 %v3050_v57, %v3022_v30  ;;  %v5858_v30 = vld [vmem:[#allocation11 + $0x550] sm:$0xf] }
 0x270   : > { %v2997_v37 = vpop.f32.mrf.mxu1  ;;  %3441 = vmatpush.bf16.msrb.mxu1 %v6147_v46 }
 0x271   : > { %v2996_v38 = vadd.f32 %v2995_v6, %v2967_v4  ;;  %3197 = vmatmul.bf16.gmra.mxu0 %v7715_v58  ;;  %3255 = vmatmul.bf16.gmra.mxu2 %v7664_v29  ;;  %v6114_v4 = vld [vmem:[#allocation11 + $0x750] sm:$0xf] }
 0x272   : > { %3412 = vmatpush.bf16.msrb.mxu0 %v5891_v13  ;;  %v5636_v13 = vld [vmem:[#allocation11 + $0x3b0] sm:$0xf0] }
 0x273   : > { %v3849_v0 = vmax.f32 %v2996_v38, 0.0 }
 0x274   : > { %v3024_v42 = vpop.f32.mrf.mxu2 }
 0x275   : > { %v3025_v48 = vadd.f32 %v3024_v42, %v7782_v60 }
 0x276   : > { %v2968_v51 = vpop.f32.mrf.mxu0  ;;  %v3055_v2 = vpop.f32.mrf.mxu3 }
 0x277   : > { %v2969_v57 = vadd.f32 %v2968_v51, %v7766_v12  ;;  %v7814_v53 = vadd.f32 %v3053_v18, %v3025_v48  ;;  %v5859_v18 = vor.u32 %v6708_v31, %v5858_v30  ;;  %v6656_v48 = vld [vmem:[#allocation11 + $0x3d4] sm:$0xf] }
 0x278   : > { %v3000_v50 = vpop.f32.mrf.mxu1  ;;  %v5412_v30 = vld [vmem:[#allocation11 + $0x1f0] sm:$0xf0] }
 0x279   : > { %v2998_v56 = vadd.f32 %v2997_v37, %v2969_v57  ;;  %v6772_v37 = vld [vmem:[#allocation11 + $0x76c] sm:$0xf0]  ;;  %3413 = vmatpush.bf16.msrb.mxu0 %v5859_v18  ;;  %v6640_v18 = vld [vmem:[#allocation11 + $0x354] sm:$0xf] }
 0x27a   : > { %v5826_v57 = vld [vmem:[#allocation11 + $0x510] sm:$0xf] }
 0x27b   : > { %v3857_v21 = vmax.f32 %v2998_v56, 0.0  ;;  %3231 = vmatmul.bf16.gmra.mxu1 %v7722_v23  ;;  %3289 = vmatmul.bf16.gmra.mxu3 %v7670_v47  ;;  %v5671_v56 = vor.u32 %v6656_v48, %v5668_v52  ;;  %v5380_v52 = vld [vmem:[#allocation11 + $0x1b0] sm:$0xf0] }
 0x27c   : > { %v3026_v6 = vpop.f32.mrf.mxu2 }
 0x27d   : > { %v3027_v7 = vadd.f32 %v3026_v6, %v7782_v60  ;;  %v7819_v10 = vpack.c.bf16 %v3857_v21, %v3849_v0  ;;  %v6082_v6 = vld [vmem:[#allocation11 + $0x710] sm:$0xf]  ;;  %3498 = vmatpush.bf16.msra.mxu3 %v5671_v56 }
 0x27e   : > { %v2971_v12 = vpop.f32.mrf.mxu0  ;;  %v3058_v63 = vpop.f32.mrf.mxu3 }
 0x27f   : > { %v2972_v14 = vadd.f32 %v2971_v12, %v7771_v26  ;;  %v7822_v8 = vadd.f32 %v3055_v2, %v3027_v7  ;;  %v6115_v26 = vor.u32 %v6772_v37, %v6114_v4  ;;  %v5604_v4 = vld [vmem:[#allocation11 + $0x370] sm:$0xf0]  ;;  %v6692_v37 = vld [vmem:[#allocation11 + $0x4ec] sm:$0xf0] }
 0x280   : > { %v3002_v17 = vpop.f32.mrf.mxu1 }
 0x281   : > { %v3001_v55 = vadd.f32 %v3000_v50, %v2972_v14  ;;  %3202 = vmatmul.bf16.gmra.mxu0 %v7727_v34  ;;  %3260 = vmatmul.bf16.gmra.mxu2 %v7677_v61  ;;  %v6700_v50 = vld [vmem:[#allocation11 + $0x52c] sm:$0xf0] }
 0x282   : > { %3442 = vmatpush.bf16.msrb.mxu1 %v6115_v26  ;;  %v5827_v21 = vor.u32 %v6700_v50, %v5826_v57  ;;  %v6632_v57 = vld [vmem:[#allocation11 + $0x314] sm:$0xf] }
 0x283   : > { %v3865_v51 = vmax.f32 %v3001_v55, 0.0  ;;  %v6592_v55 = vld [vmem:[#allocation11 + $0x1d4] sm:$0xf] }
 0x284   : > { %v3029_v33 = vpop.f32.mrf.mxu2  ;;  %3414 = vmatpush.bf16.msrb.mxu0 %v5827_v21  ;;  %v5572_v50 = vld [vmem:[#allocation11 + $0x330] sm:$0xf0] }
 0x285   : > { %v3030_v38 = vadd.f32 %v3029_v33, %v7782_v60  ;;  %v5415_v33 = vor.u32 %v6592_v55, %v5412_v30  ;;  %v6684_v55 = vld [vmem:[#allocation11 + $0x4ac] sm:$0xf0] }
 0x286   : > { %v2973_v24 = vpop.f32.mrf.mxu0  ;;  %v3060_v39 = vpop.f32.mrf.mxu3 }
 0x287   : > { %v2974_v42 = vadd.f32 %v2973_v24, %v7777_v59  ;;  %v7828_v43 = vadd.f32 %v3058_v63, %v3030_v38  ;;  %v6764_v59 = vld [vmem:[#allocation11 + $0x72c] sm:$0xf0]  ;;  %v6648_v63 = vld [vmem:[#allocation11 + $0x394] sm:$0xf]  ;;  %3469 = vmatpush.bf16.msra.mxu2 %v5415_v33  ;;  %v5607_v38 = vor.u32 %v6640_v18, %v5604_v4 }
 0x288   : > { %v3101_v36 = vpop.f32.mrf.mxu1  ;;  %v6083_v3 = vor.u32 %v6764_v59, %v6082_v6  ;;  %v5639_v14 = vor.u32 %v6648_v63, %v5636_v13  ;;  %v6576_v59 = vld [vmem:[#allocation11 + $0x154] sm:$0xf]  ;;  %v6018_v18 = vld [vmem:[#allocation11 + $0x690] sm:$0xf] }
 0x289   : > { %v3003_v41 = vadd.f32 %v3002_v17, %v2974_v42  ;;  %v6756_v42 = vld [vmem:[#allocation11 + $0x6ec] sm:$0xf0]  ;;  %v6624_v63 = vld [vmem:[#allocation11 + $0x2d4] sm:$0xf] }
 0x28a   : > { %3443 = vmatpush.bf16.msrb.mxu1 %v6083_v3  ;;  %3499 = vmatpush.bf16.msra.mxu3 %v5639_v14  ;;  %v5540_v13 = vld [vmem:[#allocation11 + $0x2f0] sm:$0xf0]  ;;  %v6748_v4 = vld [vmem:[#allocation11 + $0x6ac] sm:$0xf0] }
 0x28b   : > { %v3873_v2 = vmax.f32 %v3003_v41, 0.0  ;;  %3332 = vmatmul.bf16.vlgmr.msra.gmra.mxu1 %v7686_v19  ;;  %3390 = vmatmul.bf16.vlgmr.msrb.gmra.mxu3 %v7640_v11  ;;  %v5543_v30 = vor.u32 %v6624_v63, %v5540_v13  ;;  %v5476_v13 = vld [vmem:[#allocation11 + $0x270] sm:$0xf0] }
 0x28c   : > { %v3031_v0 = vpop.f32.mrf.mxu2 }
 0x28d   : > { %v3032_v7 = vadd.f32 %v3031_v0, %v7782_v60  ;;  %v7833_v32 = vpack.c.bf16 %v3873_v2, %v3865_v51  ;;  %v7841_v60 = vperm.slane %v7733_v54, 2  ;;  %v5575_v0 = vor.u32 %v6632_v57, %v5572_v50  ;;  %v5284_v57 = vld [vmem:[#allocation11 + $0xf0] sm:$0xf0] }
 0x28e   : > { %v3072_v9 = vpop.f32.mrf.mxu0  ;;  %v3159_v12 = vpop.f32.mrf.mxu3  ;;  %3500 = vmatpush.bf16.msra.mxu3 %v5607_v38  ;;  %v6019_v38 = vor.u32 %v6748_v4, %v6018_v18  ;;  %v6732_v18 = vld [vmem:[#allocation11 + $0x62c] sm:$0xf0]  ;;  %v6600_v4 = vld [vmem:[#allocation11 + $0x214] sm:$0xf] }
 0x28f   : > { %v3073_v45 = vadd.f32 %v3072_v9, %v7786_v35  ;;  %v7836_v46 = vadd.f32 %v3060_v39, %v3032_v7  ;;  %v5794_v35 = vld [vmem:[#allocation11 + $0x4d0] sm:$0xf]  ;;  %v5348_v7 = vld [vmem:[#allocation11 + $0x170] sm:$0xf0] }
 0x290   : > { %v3103_v17 = vpop.f32.mrf.mxu1  ;;  %v5795_v24 = vor.u32 %v6692_v37, %v5794_v35  ;;  %v6050_v39 = vld [vmem:[#allocation11 + $0x6d0] sm:$0xf]  ;;  %v5351_v9 = vor.u32 %v6576_v59, %v5348_v7  ;;  %v6568_v35 = vld [vmem:[#allocation11 + $0x114] sm:$0xf] }
 0x291   : > { %v3102_v31 = vadd.f32 %v3101_v36, %v3073_v45  ;;  %3303 = vmatmul.bf16.vlgmr.msra.gmra.mxu0 %v7691_v40  ;;  %3361 = vmatmul.bf16.vlgmr.msrb.gmra.mxu2 %v7644_v28  ;;  %v6584_v36 = vld [vmem:[#allocation11 + $0x194] sm:$0xf]  ;;  %v6051_v48 = vor.u32 %v6756_v42, %v6050_v39  ;;  %v6740_v59 = vld [vmem:[#allocation11 + $0x66c] sm:$0xf0] }
 0x292   : > { %3415 = vmatpush.bf16.msrb.mxu0 %v5795_v24  ;;  %v5383_v2 = vor.u32 %v6584_v36, %v5380_v52  ;;  %3501 = vmatpush.bf16.msra.mxu3 %v5575_v0  ;;  %v6616_v42 = vld [vmem:[#allocation11 + $0x294] sm:$0xf]  ;;  %v5986_v0 = vld [vmem:[#allocation11 + $0x650] sm:$0xf] }
 0x293   : > { %3444 = vmatpush.bf16.msrb.mxu1 %v6051_v48  ;;  %v3818_v45 = vmax.f32 %v3102_v31, 0.0  ;;  %v5316_v31 = vld [vmem:[#allocation11 + $0x130] sm:$0xf0] }
 0x294   : > { %v3130_v26 = vpop.f32.mrf.mxu2  ;;  %3470 = vmatpush.bf16.msra.mxu2 %v5383_v2  ;;  %v5319_v39 = vor.u32 %v6568_v35, %v5316_v31  ;;  %v5508_v36 = vld [vmem:[#allocation11 + $0x2b0] sm:$0xf0] }
 0x295   : > { %v3131_v41 = vadd.f32 %v3130_v26, %v7841_v60  ;;  %v5511_v48 = vor.u32 %v6616_v42, %v5508_v36  ;;  %v6560_v2 = vld [vmem:[#allocation11 + $0xd4] sm:$0xf] }
 0x296   : > { %v3074_v51 = vpop.f32.mrf.mxu0  ;;  %v3161_v54 = vpop.f32.mrf.mxu3  ;;  %3502 = vmatpush.bf16.msra.mxu3 %v5543_v30  ;;  %v6608_v7 = vld [vmem:[#allocation11 + $0x254] sm:$0xf] }
 0x297   : > { %v3075_v56 = vadd.f32 %v3074_v51, %v7794_v15  ;;  %v7845_v21 = vadd.f32 %v3159_v12, %v3131_v41  ;;  %v5762_v15 = vld [vmem:[#allocation11 + $0x490] sm:$0xf]  ;;  %3445 = vmatpush.bf16.msrb.mxu1 %v6019_v38  ;;  %v5444_v38 = vld [vmem:[#allocation11 + $0x230] sm:$0xf0] }
 0x298   : > { %v3106_v6 = vpop.f32.mrf.mxu1  ;;  %v5763_v33 = vor.u32 %v6684_v55, %v5762_v15  ;;  %3471 = vmatpush.bf16.msra.mxu2 %v5351_v9  ;;  %v5987_v9 = vor.u32 %v6740_v59, %v5986_v0  ;;  %v5479_v15 = vor.u32 %v6608_v7, %v5476_v13  ;;  %v6544_v42 = vld [vmem:[#allocation11 + $0x54] sm:$0xf] }
 0x299   : > { %v3104_v3 = vadd.f32 %v3103_v17, %v3075_v56  ;;  %v5287_v56 = vor.u32 %v6560_v2, %v5284_v57  ;;  %v5220_v36 = vld [vmem:[#allocation11 + $0x70] sm:$0xf0] }
 0x29a   : > { %3416 = vmatpush.bf16.msrb.mxu0 %v5763_v33  ;;  %3503 = vmatpush.bf16.msra.mxu3 %v5511_v48  ;;  %v5954_v33 = vld [vmem:[#allocation11 + $0x610] sm:$0xf]  ;;  %v5223_v48 = vor.u32 %v6544_v42, %v5220_v36  ;;  %v6536_v59 = vld [vmem:[#allocation11 + $0x14] sm:$0xf] }
 0x29b   : > { %v3826_v14 = vmax.f32 %v3104_v3, 0.0  ;;  %3337 = vmatmul.bf16.gmra.mxu1 %v7698_v20  ;;  %3395 = vmatmul.bf16.gmra.mxu3 %v7650_v22  ;;  %v5730_v3 = vld [vmem:[#allocation11 + $0x450] sm:$0xf]  ;;  %v5188_v7 = vld [vmem:[#allocation11 + $0x30] sm:$0xf0] }
 0x29c   : > { %v3132_v12 = vpop.f32.mrf.mxu2  ;;  %3472 = vmatpush.bf16.msra.mxu2 %v5319_v39  ;;  %3446 = vmatpush.bf16.msrb.mxu1 %v5987_v9  ;;  %v5447_v39 = vor.u32 %v6600_v4, %v5444_v38 }
 0x29d   : > { %v7849_v17 = vpack.c.bf16 %v3826_v14, %v3818_v45  ;;  %v3133_v37 = vadd.f32 %v3132_v12, %v7841_v60  ;;  %v6552_v45 = vld [vmem:[#allocation11 + $0x94] sm:$0xf] }
 0x29e   : > { %v3077_v26 = vpop.f32.mrf.mxu0  ;;  %v3164_v24 = vpop.f32.mrf.mxu3  ;;  %v5252_v14 = vld [vmem:[#allocation11 + $0xb0] sm:$0xf0]  ;;  %3504 = vmatpush.bf16.msra.mxu3 %v5479_v15 }
 0x29f   : > { %v3078_v41 = vadd.f32 %v3077_v26, %v7800_v5  ;;  %v7853_v52 = vadd.f32 %v3161_v54, %v3133_v37  ;;  %v6676_v5 = vld [vmem:[#allocation11 + $0x46c] sm:$0xf0]  ;;  %v5255_v55 = vor.u32 %v6552_v45, %v5252_v14  ;;  %v5955_v37 = vor.u32 %v6732_v18, %v5954_v33  ;;  %v6720_v14 = vld [vmem:[#allocation11 + $0x5d4] sm:$0xf] }
 0x2a0   : > { %v3108_v51 = vpop.f32.mrf.mxu1  ;;  %v5731_v54 = vor.u32 %v6676_v5, %v5730_v3  ;;  %3473 = vmatpush.bf16.msra.mxu2 %v5287_v56  ;;  %v6668_v56 = vld [vmem:[#allocation11 + $0x42c] sm:$0xf0]  ;;  %v5191_v5 = vor.u32 %v6536_v59, %v5188_v7  ;;  %v6180_v33 = vld [vmem:[#allocation11 + $0x7f0] sm:$0xf0] }
 0x2a1   : > { %v3107_v50 = vadd.f32 %v3106_v6, %v3078_v41  ;;  %3308 = vmatmul.bf16.gmra.mxu0 %v7703_v49  ;;  %3366 = vmatmul.bf16.gmra.mxu2 %v7654_v27 }
 0x2a2   : > { %3417 = vmatpush.bf16.msrb.mxu0 %v5731_v54  ;;  %3447 = vmatpush.bf16.msrb.mxu1 %v5955_v37 }
 0x2a3   : > { %v3834_v2 = vmax.f32 %v3107_v50, 0.0  ;;  %3505 = vmatpush.bf16.msra.mxu3 %v5447_v39 }
 0x2a4   : > { %v3135_v63 = vpop.f32.mrf.mxu2  ;;  %3474 = vmatpush.bf16.msra.mxu2 %v5255_v55 }
 0x2a5   : > { %v3136_v6 = vadd.f32 %v3135_v63, %v7841_v60 }
 0x2a6   : > { %v3079_v30 = vpop.f32.mrf.mxu0  ;;  %v3166_v12 = vpop.f32.mrf.mxu3 }
 0x2a7   : > { %v3080_v35 = vadd.f32 %v3079_v30, %v7808_v25  ;;  %v7859_v31 = vadd.f32 %v3164_v24, %v3136_v6  ;;  %v5698_v25 = vld [vmem:[#allocation11 + $0x410] sm:$0xf]  ;;  %v5924_v6 = vld [vmem:[#allocation11 + $0x5f0] sm:$0xf0] }
 0x2a8   : > { %v3111_v26 = vpop.f32.mrf.mxu1  ;;  %v5699_v24 = vor.u32 %v6668_v56, %v5698_v25  ;;  %3475 = vmatpush.bf16.msra.mxu2 %v5223_v48  ;;  %v5927_v55 = vor.u32 %v6720_v14, %v5924_v6  ;;  %v6784_v30 = vld [vmem:[#allocation11 + $0x7d4] sm:$0xf] }
 0x2a9   : > { %v3109_v41 = vadd.f32 %v3108_v51, %v3080_v35  ;;  %v6183_v4 = vor.u32 %v6784_v30, %v6180_v33  ;;  %v6712_v48 = vld [vmem:[#allocation11 + $0x594] sm:$0xf] }
 0x2aa   : > { %3418 = vmatpush.bf16.msrb.mxu0 %v5699_v24  ;;  %v6148_v24 = vld [vmem:[#allocation11 + $0x7b0] sm:$0xf0] }
 0x2ab   : > { %v3842_v57 = vmax.f32 %v3109_v41, 0.0  ;;  %3342 = vmatmul.bf16.gmra.mxu1 %v7710_v44  ;;  %3400 = vmatmul.bf16.gmra.mxu3 %v7660_v62  ;;  %v6768_v14 = vld [vmem:[#allocation11 + $0x754] sm:$0xf] }
 0x2ac   : > { %v3137_v0 = vpop.f32.mrf.mxu2  ;;  %3476 = vmatpush.bf16.msra.mxu2 %v5191_v5  ;;  %3556 = vmatpush.bf16.msra.mxu1 %v6183_v4  ;;  %v6116_v6 = vld [vmem:[#allocation11 + $0x770] sm:$0xf0] }
 0x2ad   : > { %v3138_v3 = vadd.f32 %v3137_v0, %v7841_v60  ;;  %v7864_v51 = vpack.c.bf16 %v3842_v57, %v3834_v2  ;;  %v5892_v2 = vld [vmem:[#allocation11 + $0x5b0] sm:$0xf0] }
 0x2ae   : > { %v3082_v9 = vpop.f32.mrf.mxu0  ;;  %v3169_v50 = vpop.f32.mrf.mxu3  ;;  %3527 = vmatpush.bf16.msra.mxu0 %v5927_v55  ;;  %v6776_v57 = vld [vmem:[#allocation11 + $0x794] sm:$0xf]  ;;  %v5895_v0 = vor.u32 %v6712_v48, %v5892_v2 }
 0x2af   : > { %v3083_v63 = vadd.f32 %v3082_v9, %v7814_v53  ;;  %v7867_v54 = vadd.f32 %v3166_v12, %v3138_v3  ;;  %v6151_v7 = vor.u32 %v6776_v57, %v6148_v24  ;;  %v6760_v2 = vld [vmem:[#allocation11 + $0x714] sm:$0xf] }
 0x2b0   : > { %v3113_v13 = vpop.f32.mrf.mxu1 }
 0x2b1   : > { %v3112_v45 = vadd.f32 %v3111_v26, %v3083_v63  ;;  %3313 = vmatmul.bf16.gmra.mxu0 %v7715_v58  ;;  %3371 = vmatmul.bf16.gmra.mxu2 %v7664_v29  ;;  %v5860_v63 = vld [vmem:[#allocation11 + $0x570] sm:$0xf0] }
 0x2b2   : > { %3528 = vmatpush.bf16.msra.mxu0 %v5895_v0  ;;  %3557 = vmatpush.bf16.msra.mxu1 %v6151_v7  ;;  %v6653_v7 = vld [vmem:[#allocation11 + $0x3b4] sm:$0xf0] }
 0x2b3   : > { %v3850_v39 = vmax.f32 %v3112_v45, 0.0 }
 0x2b4   : > { %v3140_v15 = vpop.f32.mrf.mxu2 }
 0x2b5   : > { %v3141_v18 = vadd.f32 %v3140_v15, %v7841_v60 }
 0x2b6   : > { %v3084_v35 = vpop.f32.mrf.mxu0  ;;  %v3171_v53 = vpop.f32.mrf.mxu3 }
 0x2b7   : > { %v3085_v12 = vadd.f32 %v3084_v35, %v7822_v8  ;;  %v7873_v37 = vadd.f32 %v3169_v50, %v3141_v18  ;;  %v6704_v50 = vld [vmem:[#allocation11 + $0x554] sm:$0xf] }
 0x2b8   : > { %v3116_v38 = vpop.f32.mrf.mxu1  ;;  %v5863_v45 = vor.u32 %v6704_v50, %v5860_v63 }
 0x2b9   : > { %v3114_v26 = vadd.f32 %v3113_v13, %v3085_v12  ;;  %v6661_v12 = vld [vmem:[#allocation11 + $0x3f4] sm:$0xf0] }
 0x2ba   : > { %3529 = vmatpush.bf16.msra.mxu0 %v5863_v45  ;;  %v6597_v45 = vld [vmem:[#allocation11 + $0x1f4] sm:$0xf0] }
 0x2bb   : > { %v3858_v42 = vmax.f32 %v3114_v26, 0.0  ;;  %3347 = vmatmul.bf16.gmra.mxu1 %v7722_v23  ;;  %3405 = vmatmul.bf16.gmra.mxu3 %v7670_v47 }
 0x2bc   : > { %v3142_v36 = vpop.f32.mrf.mxu2 }
 0x2bd   : > { %v3143_v41 = vadd.f32 %v3142_v36, %v7841_v60  ;;  %v7878_v25 = vpack.c.bf16 %v3858_v42, %v3850_v39  ;;  %v6696_v39 = vld [vmem:[#allocation11 + $0x514] sm:$0xf] }
 0x2be   : > { %v3087_v8 = vpop.f32.mrf.mxu0  ;;  %v3174_v56 = vpop.f32.mrf.mxu3  ;;  %v5828_v42 = vld [vmem:[#allocation11 + $0x530] sm:$0xf0] }
 0x2bf   : > { %v3088_v59 = vadd.f32 %v3087_v8, %v7828_v43  ;;  %v7881_v3 = vadd.f32 %v3171_v53, %v3143_v41  ;;  %v6119_v43 = vor.u32 %v6768_v14, %v6116_v6  ;;  %v5674_v53 = vld [vmem:[#allocation11 + $0x3d8] sm:$0xf]  ;;  %v5831_v48 = vor.u32 %v6696_v39, %v5828_v42 }
 0x2c0   : > { %v3118_v5 = vpop.f32.mrf.mxu1  ;;  %v5675_v36 = vor.u32 %v6661_v12, %v5674_v53  ;;  %v6052_v12 = vld [vmem:[#allocation11 + $0x6f0] sm:$0xf0]  ;;  %v6589_v42 = vld [vmem:[#allocation11 + $0x1b4] sm:$0xf0] }
 0x2c1   : > { %v3117_v9 = vadd.f32 %v3116_v38, %v3088_v59  ;;  %3318 = vmatmul.bf16.gmra.mxu0 %v7727_v34  ;;  %3376 = vmatmul.bf16.gmra.mxu2 %v7677_v61  ;;  %v5642_v59 = vld [vmem:[#allocation11 + $0x398] sm:$0xf] }
 0x2c2   : > { %3558 = vmatpush.bf16.msra.mxu1 %v6119_v43  ;;  %3614 = vmatpush.bf16.msrb.mxu3 %v5675_v36  ;;  %v6645_v43 = vld [vmem:[#allocation11 + $0x374] sm:$0xf0] }
 0x2c3   : > { %v3866_v38 = vmax.f32 %v3117_v9, 0.0  ;;  %3530 = vmatpush.bf16.msra.mxu0 %v5831_v48  ;;  %v5643_v9 = vor.u32 %v6653_v7, %v5642_v59  ;;  %v5354_v7 = vld [vmem:[#allocation11 + $0x158] sm:$0xf] }
 0x2c4   : > { %v3145_v13 = vpop.f32.mrf.mxu2 }
 0x2c5   : > { %v3146_v15 = vadd.f32 %v3145_v13, %v7841_v60  ;;  %v5418_v13 = vld [vmem:[#allocation11 + $0x1d8] sm:$0xf] }
 0x2c6   : > { %v3089_v55 = vpop.f32.mrf.mxu0  ;;  %v3176_v30 = vpop.f32.mrf.mxu3  ;;  %3615 = vmatpush.bf16.msrb.mxu3 %v5643_v9 }
 0x2c7   : > { %v3090_v33 = vadd.f32 %v3089_v55, %v7836_v46  ;;  %v7887_v18 = vadd.f32 %v3174_v56, %v3146_v15  ;;  %v6084_v46 = vld [vmem:[#allocation11 + $0x730] sm:$0xf0]  ;;  %v5419_v15 = vor.u32 %v6597_v45, %v5418_v13  ;;  %v5546_v45 = vld [vmem:[#allocation11 + $0x2d8] sm:$0xf] }
 0x2c8   : > { %v3217_v4 = vpop.f32.mrf.mxu1  ;;  %v6087_v8 = vor.u32 %v6760_v2, %v6084_v46  ;;  %v6688_v55 = vld [vmem:[#allocation11 + $0x4d4] sm:$0xf]  ;;  %v5578_v2 = vld [vmem:[#allocation11 + $0x318] sm:$0xf] }
 0x2c9   : > { %v3119_v35 = vadd.f32 %v3118_v5, %v3090_v33  ;;  %3585 = vmatpush.bf16.msrb.mxu2 %v5419_v15  ;;  %v6637_v46 = vld [vmem:[#allocation11 + $0x334] sm:$0xf0] }
 0x2ca   : > { %3559 = vmatpush.bf16.msra.mxu1 %v6087_v8  ;;  %v5579_v8 = vor.u32 %v6637_v46, %v5578_v2  ;;  %v6629_v15 = vld [vmem:[#allocation11 + $0x2f4] sm:$0xf0] }
 0x2cb   : > { %v3874_v26 = vmax.f32 %v3119_v35, 0.0  ;;  %3448 = vmatmul.bf16.vlgmr.msrb.gmra.mxu1 %v7686_v19  ;;  %3506 = vmatmul.bf16.vlgmr.msra.gmra.mxu3 %v7640_v11 }
 0x2cc   : > { %v3147_v41 = vpop.f32.mrf.mxu2 }
 0x2cd   : > { %v3148_v57 = vadd.f32 %v3147_v41, %v7841_v60  ;;  %v7892_v56 = vpack.c.bf16 %v3874_v26, %v3866_v38  ;;  %v7899_v60 = vld [vmem:[#allocation13] sm:$0xff]  ;;  %v5386_v38 = vld [vmem:[#allocation11 + $0x198] sm:$0xf] }
 0x2ce   : > { %v3188_v0 = vpop.f32.mrf.mxu0  ;;  %v3275_v24 = vpop.f32.mrf.mxu3  ;;  %v7902_v6 = vperm.slane %v7899_v60, 3  ;;  %v5387_v48 = vor.u32 %v6589_v42, %v5386_v38 }
 0x2cf   : > { %v3189_v5 = vadd.f32 %v3188_v0, %v7845_v21  ;;  %v7895_v50 = vadd.f32 %v3176_v30, %v3148_v57  ;;  %v5610_v21 = vld [vmem:[#allocation11 + $0x358] sm:$0xf]  ;;  %v5796_v30 = vld [vmem:[#allocation11 + $0x4f0] sm:$0xf0] }
 0x2d0   : > { %v3219_v63 = vpop.f32.mrf.mxu1  ;;  %v5611_v33 = vor.u32 %v6645_v43, %v5610_v21  ;;  %v5799_v53 = vor.u32 %v6688_v55, %v5796_v30  ;;  %3586 = vmatpush.bf16.msrb.mxu2 %v5387_v48  ;;  %v5764_v55 = vld [vmem:[#allocation11 + $0x4b0] sm:$0xf0]  ;;  %v5547_v30 = vor.u32 %v6629_v15, %v5546_v45  ;;  %v6621_v48 = vld [vmem:[#allocation11 + $0x2b4] sm:$0xf0] }
 0x2d1   : > { %v3218_v14 = vadd.f32 %v3217_v4, %v3189_v5  ;;  %3419 = vmatmul.bf16.vlgmr.msrb.gmra.mxu0 %v7691_v40  ;;  %3477 = vmatmul.bf16.vlgmr.msra.gmra.mxu2 %v7644_v28  ;;  %v6752_v4 = vld [vmem:[#allocation11 + $0x6d4] sm:$0xf]  ;;  %v6581_v5 = vld [vmem:[#allocation11 + $0x174] sm:$0xf0] }
 0x2d2   : > { %v6055_v39 = vor.u32 %v6752_v4, %v6052_v12  ;;  %3531 = vmatpush.bf16.msra.mxu0 %v5799_v53  ;;  %3616 = vmatpush.bf16.msrb.mxu3 %v5611_v33  ;;  %v5355_v13 = vor.u32 %v6581_v5, %v5354_v7  ;;  %v6020_v53 = vld [vmem:[#allocation11 + $0x6b0] sm:$0xf0]  ;;  %v5322_v4 = vld [vmem:[#allocation11 + $0x118] sm:$0xf] }
 0x2d3   : > { %v3819_v21 = vmax.f32 %v3218_v14, 0.0  ;;  %v6573_v14 = vld [vmem:[#allocation11 + $0x134] sm:$0xf0]  ;;  %v6736_v45 = vld [vmem:[#allocation11 + $0x654] sm:$0xf] }
 0x2d4   : > { %v3246_v35 = vpop.f32.mrf.mxu2  ;;  %3560 = vmatpush.bf16.msra.mxu1 %v6055_v39  ;;  %3587 = vmatpush.bf16.msrb.mxu2 %v5355_v13  ;;  %v5323_v42 = vor.u32 %v6573_v14, %v5322_v4  ;;  %v5290_v7 = vld [vmem:[#allocation11 + $0xd8] sm:$0xf]  ;;  %v5988_v15 = vld [vmem:[#allocation11 + $0x670] sm:$0xf0] }
 0x2d5   : > { %v3247_v26 = vadd.f32 %v3246_v35, %v7902_v6  ;;  %v6744_v35 = vld [vmem:[#allocation11 + $0x694] sm:$0xf]  ;;  %v6565_v5 = vld [vmem:[#allocation11 + $0xf4] sm:$0xf0] }
 0x2d6   : > { %v3190_v36 = vpop.f32.mrf.mxu0  ;;  %v3277_v41 = vpop.f32.mrf.mxu3  ;;  %3617 = vmatpush.bf16.msrb.mxu3 %v5579_v8  ;;  %v6023_v38 = vor.u32 %v6744_v35, %v6020_v53  ;;  %v5291_v13 = vor.u32 %v6565_v5, %v5290_v7  ;;  %v5956_v14 = vld [vmem:[#allocation11 + $0x630] sm:$0xf0]  ;;  %v5226_v5 = vld [vmem:[#allocation11 + $0x58] sm:$0xf] }
 0x2d7   : > { %v3191_v57 = vadd.f32 %v3190_v36, %v7853_v52  ;;  %v7906_v0 = vadd.f32 %v3275_v24, %v3247_v26  ;;  %v6680_v52 = vld [vmem:[#allocation11 + $0x494] sm:$0xf]  ;;  %v5514_v36 = vld [vmem:[#allocation11 + $0x298] sm:$0xf] }
 0x2d8   : > { %v3222_v59 = vpop.f32.mrf.mxu1  ;;  %v5767_v33 = vor.u32 %v6680_v52, %v5764_v55  ;;  %3561 = vmatpush.bf16.msra.mxu1 %v6023_v38  ;;  %v5515_v46 = vor.u32 %v6621_v48, %v5514_v36  ;;  %3588 = vmatpush.bf16.msrb.mxu2 %v5323_v42  ;;  %v5991_v52 = vor.u32 %v6736_v45, %v5988_v15  ;;  %v6728_v38 = vld [vmem:[#allocation11 + $0x614] sm:$0xf]  ;;  %v6605_v48 = vld [vmem:[#allocation11 + $0x234] sm:$0xf0] }
 0x2d9   : > { %v3220_v9 = vadd.f32 %v3219_v63, %v3191_v57  ;;  %v5959_v36 = vor.u32 %v6728_v38, %v5956_v14  ;;  %v5930_v38 = vld [vmem:[#allocation11 + $0x5d8] sm:$0xf] }
 0x2da   : > { %3532 = vmatpush.bf16.msra.mxu0 %v5767_v33  ;;  %3618 = vmatpush.bf16.msrb.mxu3 %v5547_v30  ;;  %v6613_v30 = vld [vmem:[#allocation11 + $0x274] sm:$0xf0] }
 0x2db   : > { %v3827_v43 = vmax.f32 %v3220_v9, 0.0  ;;  %3453 = vmatmul.bf16.gmra.mxu1 %v7698_v20  ;;  %3511 = vmatmul.bf16.gmra.mxu3 %v7650_v22  ;;  %v6557_v33 = vld [vmem:[#allocation11 + $0xb4] sm:$0xf0] }
 0x2dc   : > { %v3248_v24 = vpop.f32.mrf.mxu2  ;;  %3589 = vmatpush.bf16.msrb.mxu2 %v5291_v13  ;;  %3562 = vmatpush.bf16.msra.mxu1 %v5991_v52  ;;  %v6549_v13 = vld [vmem:[#allocation11 + $0x74] sm:$0xf0] }
 0x2dd   : > { %v7910_v63 = vpack.c.bf16 %v3827_v43, %v3819_v21  ;;  %v3249_v12 = vadd.f32 %v3248_v24, %v7902_v6  ;;  %v5482_v21 = vld [vmem:[#allocation11 + $0x258] sm:$0xf]  ;;  %v6672_v43 = vld [vmem:[#allocation11 + $0x454] sm:$0xf]  ;;  %v5227_v15 = vor.u32 %v6549_v13, %v5226_v5 }
 0x2de   : > { %v3193_v26 = vpop.f32.mrf.mxu0  ;;  %v3280_v39 = vpop.f32.mrf.mxu3  ;;  %3619 = vmatpush.bf16.msrb.mxu3 %v5515_v46  ;;  %v5258_v24 = vld [vmem:[#allocation11 + $0x98] sm:$0xf]  ;;  %v5483_v35 = vor.u32 %v6613_v30, %v5482_v21 }
 0x2df   : > { %v3194_v2 = vadd.f32 %v3193_v26, %v7859_v31  ;;  %v7914_v57 = vadd.f32 %v3277_v41, %v3249_v12  ;;  %v5732_v31 = vld [vmem:[#allocation11 + $0x470] sm:$0xf0]  ;;  %v5259_v53 = vor.u32 %v6557_v33, %v5258_v24  ;;  %v5450_v26 = vld [vmem:[#allocation11 + $0x218] sm:$0xf] }
 0x2e0   : > { %v3224_v8 = vpop.f32.mrf.mxu1  ;;  %v5735_v41 = vor.u32 %v6672_v43, %v5732_v31  ;;  %v5451_v7 = vor.u32 %v6605_v48, %v5450_v26  ;;  %3563 = vmatpush.bf16.msra.mxu1 %v5959_v36  ;;  %v5700_v31 = vld [vmem:[#allocation11 + $0x430] sm:$0xf0]  ;;  %v6725_v14 = vld [vmem:[#allocation11 + $0x5f4] sm:$0xf0] }
 0x2e1   : > { %v3223_v9 = vadd.f32 %v3222_v59, %v3194_v2  ;;  %3424 = vmatmul.bf16.gmra.mxu0 %v7703_v49  ;;  %3482 = vmatmul.bf16.gmra.mxu2 %v7654_v27  ;;  %v6186_v36 = vld [vmem:[#allocation11 + $0x7d8] sm:$0xf] }
 0x2e2   : > { %3533 = vmatpush.bf16.msra.mxu0 %v5735_v41  ;;  %3620 = vmatpush.bf16.msrb.mxu3 %v5483_v35  ;;  %v6541_v41 = vld [vmem:[#allocation11 + $0x34] sm:$0xf0] }
 0x2e3   : > { %3590 = vmatpush.bf16.msrb.mxu2 %v5259_v53  ;;  %v3835_v21 = vmax.f32 %v3223_v9, 0.0  ;;  %v6789_v48 = vld [vmem:[#allocation11 + $0x7f4] sm:$0xf0] }
 0x2e4   : > { %v3251_v55 = vpop.f32.mrf.mxu2  ;;  %v6187_v5 = vor.u32 %v6789_v48, %v6186_v36  ;;  %v6122_v48 = vld [vmem:[#allocation11 + $0x758] sm:$0xf] }
 0x2e5   : > { %v3252_v59 = vadd.f32 %v3251_v55, %v7902_v6  ;;  %v5194_v55 = vld [vmem:[#allocation11 + $0x18] sm:$0xf] }
 0x2e6   : > { %v3195_v4 = vpop.f32.mrf.mxu0  ;;  %v3282_v12 = vpop.f32.mrf.mxu3  ;;  %3621 = vmatpush.bf16.msrb.mxu3 %v5451_v7  ;;  %v5195_v24 = vor.u32 %v6541_v41, %v5194_v55  ;;  %3672 = vmatpush.bf16.msrb.mxu1 %v6187_v5  ;;  %v6154_v55 = vld [vmem:[#allocation11 + $0x798] sm:$0xf] }
 0x2e7   : > { %v3196_v42 = vadd.f32 %v3195_v4, %v7867_v54  ;;  %v7920_v2 = vadd.f32 %v3280_v39, %v3252_v59  ;;  %v6664_v54 = vld [vmem:[#allocation11 + $0x414] sm:$0xf]  ;;  %3591 = vmatpush.bf16.msrb.mxu2 %v5227_v15 }
 0x2e8   : > { %v3227_v46 = vpop.f32.mrf.mxu1  ;;  %v5703_v39 = vor.u32 %v6664_v54, %v5700_v31 }
 0x2e9   : > { %v3225_v45 = vadd.f32 %v3224_v8, %v3196_v42  ;;  %v5931_v42 = vor.u32 %v6725_v14, %v5930_v38  ;;  %v5866_v14 = vld [vmem:[#allocation11 + $0x558] sm:$0xf] }
 0x2ea   : > { %3534 = vmatpush.bf16.msra.mxu0 %v5703_v39  ;;  %v6717_v39 = vld [vmem:[#allocation11 + $0x5b4] sm:$0xf0] }
 0x2eb   : > { %v3843_v43 = vmax.f32 %v3225_v45, 0.0  ;;  %3458 = vmatmul.bf16.gmra.mxu1 %v7710_v44  ;;  %3516 = vmatmul.bf16.gmra.mxu3 %v7660_v62 }
 0x2ec   : > { %v3253_v52 = vpop.f32.mrf.mxu2  ;;  %3592 = vmatpush.bf16.msrb.mxu2 %v5195_v24 }
 0x2ed   : > { %v3254_v30 = vadd.f32 %v3253_v52, %v7902_v6  ;;  %v7925_v8 = vpack.c.bf16 %v3843_v43, %v3835_v21  ;;  %v5898_v52 = vld [vmem:[#allocation11 + $0x598] sm:$0xf] }
 0x2ee   : > { %v3198_v33 = vpop.f32.mrf.mxu0  ;;  %v3285_v9 = vpop.f32.mrf.mxu3  ;;  %3643 = vmatpush.bf16.msrb.mxu0 %v5931_v42  ;;  %v5899_v24 = vor.u32 %v6717_v39, %v5898_v52  ;;  %v5834_v39 = vld [vmem:[#allocation11 + $0x518] sm:$0xf] }
 0x2ef   : > { %v3199_v59 = vadd.f32 %v3198_v33, %v7873_v37  ;;  %v7928_v35 = vadd.f32 %v3282_v12, %v3254_v30  ;;  %v6781_v33 = vld [vmem:[#allocation11 + $0x7b4] sm:$0xf0] }
 0x2f0   : > { %v3229_v53 = vpop.f32.mrf.mxu1 }
 0x2f1   : > { %v3228_v4 = vadd.f32 %v3227_v46, %v3199_v59  ;;  %3429 = vmatmul.bf16.gmra.mxu0 %v7715_v58  ;;  %3487 = vmatmul.bf16.gmra.mxu2 %v7664_v29  ;;  %v6155_v59 = vor.u32 %v6781_v33, %v6154_v55  ;;  %v6701_v55 = vld [vmem:[#allocation11 + $0x534] sm:$0xf0] }
 0x2f2   : > { %3644 = vmatpush.bf16.msrb.mxu0 %v5899_v24  ;;  %v5835_v33 = vor.u32 %v6701_v55, %v5834_v39  ;;  %v6058_v55 = vld [vmem:[#allocation11 + $0x6d8] sm:$0xf] }
 0x2f3   : > { %v3851_v21 = vmax.f32 %v3228_v4, 0.0  ;;  %3673 = vmatpush.bf16.msrb.mxu1 %v6155_v59 }
 0x2f4   : > { %v3256_v26 = vpop.f32.mrf.mxu2 }
 0x2f5   : > { %v3257_v7 = vadd.f32 %v3256_v26, %v7902_v6  ;;  %v6709_v26 = vld [vmem:[#allocation11 + $0x574] sm:$0xf0] }
 0x2f6   : > { %v3200_v13 = vpop.f32.mrf.mxu0  ;;  %v3287_v37 = vpop.f32.mrf.mxu3  ;;  %v5867_v36 = vor.u32 %v6709_v26, %v5866_v14  ;;  %v6649_v26 = vld [vmem:[#allocation11 + $0x39c] sm:$0xf] }
 0x2f7   : > { %v3201_v12 = vadd.f32 %v3200_v13, %v7881_v3  ;;  %v7934_v46 = vadd.f32 %v3285_v9, %v3257_v7  ;;  %v6773_v7 = vld [vmem:[#allocation11 + $0x774] sm:$0xf0] }
 0x2f8   : > { %v3232_v45 = vpop.f32.mrf.mxu1  ;;  %3645 = vmatpush.bf16.msrb.mxu0 %v5867_v36 }
 0x2f9   : > { %v3230_v15 = vadd.f32 %v3229_v53, %v3201_v12 }
 0x2fb   : > { %v3859_v43 = vmax.f32 %v3230_v15, 0.0  ;;  %3463 = vmatmul.bf16.gmra.mxu1 %v7722_v23  ;;  %3521 = vmatmul.bf16.gmra.mxu3 %v7670_v47 }
 0x2fc   : > { %v3258_v54 = vpop.f32.mrf.mxu2  ;;  %3646 = vmatpush.bf16.msrb.mxu0 %v5835_v33 }
 0x2fd   : > { %v3259_v31 = vadd.f32 %v3258_v54, %v7902_v6  ;;  %v7939_v41 = vpack.c.bf16 %v3859_v43, %v3851_v21  ;;  %v6657_v43 = vld [vmem:[#allocation11 + $0x3dc] sm:$0xf] }
 0x2fe   : > { %v3203_v3 = vpop.f32.mrf.mxu0  ;;  %v3290_v30 = vpop.f32.mrf.mxu3  ;;  %v5676_v54 = vld [vmem:[#allocation11 + $0x3f8] sm:$0xf0] }
 0x2ff   : > { %v3204_v9 = vadd.f32 %v3203_v3, %v7887_v18  ;;  %v7942_v53 = vadd.f32 %v3287_v37, %v3259_v31  ;;  %v6123_v18 = vor.u32 %v6773_v7, %v6122_v48  ;;  %v5679_v3 = vor.u32 %v6657_v43, %v5676_v54  ;;  %v6641_v43 = vld [vmem:[#allocation11 + $0x35c] sm:$0xf] }
 0x300   : > { %v3234_v4 = vpop.f32.mrf.mxu1  ;;  %v5612_v54 = vld [vmem:[#allocation11 + $0x378] sm:$0xf0] }
 0x301   : > { %v3233_v38 = vadd.f32 %v3232_v45, %v3204_v9  ;;  %3434 = vmatmul.bf16.gmra.mxu0 %v7727_v34  ;;  %3492 = vmatmul.bf16.gmra.mxu2 %v7677_v61  ;;  %v6090_v9 = vld [vmem:[#allocation11 + $0x718] sm:$0xf] }
 0x302   : > { %3674 = vmatpush.bf16.msrb.mxu1 %v6123_v18  ;;  %3730 = vmatpush.bf16.msra.mxu3 %v5679_v3  ;;  %v6593_v18 = vld [vmem:[#allocation11 + $0x1dc] sm:$0xf]  ;;  %v6757_v3 = vld [vmem:[#allocation11 + $0x6f4] sm:$0xf0] }
 0x303   : > { %v3867_v31 = vmax.f32 %v3233_v38, 0.0  ;;  %v6059_v33 = vor.u32 %v6757_v3, %v6058_v55  ;;  %v6026_v3 = vld [vmem:[#allocation11 + $0x698] sm:$0xf] }
 0x304   : > { %v3261_v42 = vpop.f32.mrf.mxu2 }
 0x305   : > { %v3262_v5 = vadd.f32 %v3261_v42, %v7902_v6  ;;  %v5644_v42 = vld [vmem:[#allocation11 + $0x3b8] sm:$0xf0] }
 0x306   : > { %v3205_v13 = vpop.f32.mrf.mxu0  ;;  %v3292_v37 = vpop.f32.mrf.mxu3  ;;  %v5647_v48 = vor.u32 %v6649_v26, %v5644_v42 }
 0x307   : > { %v3206_v12 = vadd.f32 %v3205_v13, %v7895_v50  ;;  %v7948_v45 = vadd.f32 %v3290_v30, %v3262_v5  ;;  %v6765_v50 = vld [vmem:[#allocation11 + $0x734] sm:$0xf0]  ;;  %v5420_v13 = vld [vmem:[#allocation11 + $0x1f8] sm:$0xf0] }
 0x308   : > { %v3333_v15 = vpop.f32.mrf.mxu1  ;;  %v6091_v59 = vor.u32 %v6765_v50, %v6090_v9  ;;  %3731 = vmatpush.bf16.msra.mxu3 %v5647_v48  ;;  %v5388_v9 = vld [vmem:[#allocation11 + $0x1b8] sm:$0xf0] }
 0x309   : > { %v3235_v21 = vadd.f32 %v3234_v4, %v3206_v12 }
 0x30a   : > { %3675 = vmatpush.bf16.msrb.mxu1 %v6091_v59  ;;  %v6633_v59 = vld [vmem:[#allocation11 + $0x31c] sm:$0xf] }
 0x30b   : > { %v3875_v52 = vmax.f32 %v3235_v21, 0.0  ;;  %3564 = vmatmul.bf16.vlgmr.msra.gmra.mxu1 %v7686_v19  ;;  %3622 = vmatmul.bf16.vlgmr.msrb.gmra.mxu3 %v7640_v11  ;;  %v5423_v21 = vor.u32 %v6593_v18, %v5420_v13  ;;  %v6577_v18 = vld [vmem:[#allocation11 + $0x15c] sm:$0xf] }
 0x30c   : > { %v3263_v24 = vpop.f32.mrf.mxu2  ;;  %v5356_v13 = vld [vmem:[#allocation11 + $0x178] sm:$0xf0] }
 0x30d   : > { %v3264_v30 = vadd.f32 %v3263_v24, %v7902_v6  ;;  %v7953_v4 = vpack.c.bf16 %v3875_v52, %v3867_v31  ;;  %v7961_v6 = vperm.slane %v7899_v60, 4  ;;  %v6693_v31 = vld [vmem:[#allocation11 + $0x4f4] sm:$0xf0]  ;;  %3701 = vmatpush.bf16.msra.mxu2 %v5423_v21 }
 0x30e   : > { %v3304_v14 = vpop.f32.mrf.mxu0  ;;  %v3391_v38 = vpop.f32.mrf.mxu3  ;;  %3676 = vmatpush.bf16.msrb.mxu1 %v6059_v33 }
 0x30f   : > { %v3305_v36 = vadd.f32 %v3304_v14, %v7906_v0  ;;  %v7956_v7 = vadd.f32 %v3292_v37, %v3264_v30  ;;  %v5802_v0 = vld [vmem:[#allocation11 + $0x4d8] sm:$0xf]  ;;  %v5615_v37 = vor.u32 %v6641_v43, %v5612_v54  ;;  %v5580_v14 = vld [vmem:[#allocation11 + $0x338] sm:$0xf0]  ;;  %v5359_v43 = vor.u32 %v6577_v18, %v5356_v13 }
 0x310   : > { %v3335_v5 = vpop.f32.mrf.mxu1  ;;  %v5803_v39 = vor.u32 %v6693_v31, %v5802_v0  ;;  %v5583_v42 = vor.u32 %v6633_v59, %v5580_v14  ;;  %v6625_v54 = vld [vmem:[#allocation11 + $0x2dc] sm:$0xf] }
 0x311   : > { %v3334_v12 = vadd.f32 %v3333_v15, %v3305_v36  ;;  %3535 = vmatmul.bf16.vlgmr.msra.gmra.mxu0 %v7691_v40  ;;  %3593 = vmatmul.bf16.vlgmr.msrb.gmra.mxu2 %v7644_v28  ;;  %v6585_v15 = vld [vmem:[#allocation11 + $0x19c] sm:$0xf] }
 0x312   : > { %3647 = vmatpush.bf16.msrb.mxu0 %v5803_v39  ;;  %3732 = vmatpush.bf16.msra.mxu3 %v5615_v37  ;;  %v5391_v30 = vor.u32 %v6585_v15, %v5388_v9  ;;  %v5548_v0 = vld [vmem:[#allocation11 + $0x2f8] sm:$0xf0]  ;;  %v6749_v15 = vld [vmem:[#allocation11 + $0x6b4] sm:$0xf0] }
 0x313   : > { %v3820_v31 = vmax.f32 %v3334_v12, 0.0  ;;  %v5551_v39 = vor.u32 %v6625_v54, %v5548_v0  ;;  %v6027_v9 = vor.u32 %v6749_v15, %v6026_v3  ;;  %v5324_v12 = vld [vmem:[#allocation11 + $0x138] sm:$0xf0] }
 0x314   : > { %v3362_v52 = vpop.f32.mrf.mxu2  ;;  %3702 = vmatpush.bf16.msra.mxu2 %v5391_v30  ;;  %v6617_v14 = vld [vmem:[#allocation11 + $0x29c] sm:$0xf] }
 0x315   : > { %v3363_v24 = vadd.f32 %v3362_v52, %v7961_v6  ;;  %v6685_v52 = vld [vmem:[#allocation11 + $0x4b4] sm:$0xf0]  ;;  %3677 = vmatpush.bf16.msrb.mxu1 %v6027_v9  ;;  %v5292_v54 = vld [vmem:[#allocation11 + $0xf8] sm:$0xf0] }
 0x316   : > { %v3306_v50 = vpop.f32.mrf.mxu0  ;;  %v3393_v60 = vpop.f32.mrf.mxu3  ;;  %3733 = vmatpush.bf16.msra.mxu3 %v5583_v42  ;;  %v5484_v3 = vld [vmem:[#allocation11 + $0x278] sm:$0xf0] }
 0x317   : > { %v3307_v26 = vadd.f32 %v3306_v50, %v7914_v57  ;;  %v7965_v36 = vadd.f32 %v3391_v38, %v3363_v24  ;;  %v5770_v57 = vld [vmem:[#allocation11 + $0x498] sm:$0xf]  ;;  %v6569_v24 = vld [vmem:[#allocation11 + $0x11c] sm:$0xf] }
 0x318   : > { %v3338_v48 = vpop.f32.mrf.mxu1  ;;  %v5771_v55 = vor.u32 %v6685_v52, %v5770_v57  ;;  %3703 = vmatpush.bf16.msra.mxu2 %v5359_v43  ;;  %v5327_v59 = vor.u32 %v6569_v24, %v5324_v12  ;;  %v6561_v43 = vld [vmem:[#allocation11 + $0xdc] sm:$0xf]  ;;  %v6741_v57 = vld [vmem:[#allocation11 + $0x674] sm:$0xf0] }
 0x319   : > { %v3336_v21 = vadd.f32 %v3335_v5, %v3307_v26  ;;  %v5516_v26 = vld [vmem:[#allocation11 + $0x2b8] sm:$0xf0] }
 0x31a   : > { %3648 = vmatpush.bf16.msrb.mxu0 %v5771_v55  ;;  %3734 = vmatpush.bf16.msra.mxu3 %v5551_v39  ;;  %v5519_v18 = vor.u32 %v6617_v14, %v5516_v26  ;;  %v6609_v52 = vld [vmem:[#allocation11 + $0x25c] sm:$0xf]  ;;  %v5738_v39 = vld [vmem:[#allocation11 + $0x458] sm:$0xf] }
 0x31b   : > { %v3828_v37 = vmax.f32 %v3336_v21, 0.0  ;;  %3569 = vmatmul.bf16.gmra.mxu1 %v7698_v20  ;;  %3627 = vmatmul.bf16.gmra.mxu3 %v7650_v22  ;;  %v6553_v15 = vld [vmem:[#allocation11 + $0x9c] sm:$0xf]  ;;  %v6733_v14 = vld [vmem:[#allocation11 + $0x634] sm:$0xf0] }
 0x31c   : > { %v3364_v38 = vpop.f32.mrf.mxu2  ;;  %3704 = vmatpush.bf16.msra.mxu2 %v5327_v59  ;;  %v5260_v24 = vld [vmem:[#allocation11 + $0xb8] sm:$0xf0]  ;;  %v5962_v59 = vld [vmem:[#allocation11 + $0x618] sm:$0xf] }
 0x31d   : > { %v7969_v5 = vpack.c.bf16 %v3828_v37, %v3820_v31  ;;  %v3365_v33 = vadd.f32 %v3364_v38, %v7961_v6  ;;  %v5295_v31 = vor.u32 %v6561_v43, %v5292_v54  ;;  %v5994_v37 = vld [vmem:[#allocation11 + $0x658] sm:$0xf]  ;;  %v5263_v9 = vor.u32 %v6553_v15, %v5260_v24  ;;  %v6601_v26 = vld [vmem:[#allocation11 + $0x21c] sm:$0xf] }
 0x31e   : > { %v3309_v50 = vpop.f32.mrf.mxu0  ;;  %v3396_v30 = vpop.f32.mrf.mxu3  ;;  %3735 = vmatpush.bf16.msra.mxu3 %v5519_v18  ;;  %v5995_v38 = vor.u32 %v6741_v57, %v5994_v37  ;;  %v5963_v18 = vor.u32 %v6733_v14, %v5962_v59  ;;  %v5452_v43 = vld [vmem:[#allocation11 + $0x238] sm:$0xf0] }
 0x31f   : > { %v3310_v42 = vadd.f32 %v3309_v50, %v7920_v2  ;;  %v7973_v13 = vadd.f32 %v3393_v60, %v3365_v33  ;;  %v6677_v2 = vld [vmem:[#allocation11 + $0x474] sm:$0xf0]  ;;  %v5487_v33 = vor.u32 %v6609_v52, %v5484_v3  ;;  %v5455_v37 = vor.u32 %v6601_v26, %v5452_v43  ;;  %v6545_v57 = vld [vmem:[#allocation11 + $0x5c] sm:$0xf] }
 0x320   : > { %v3340_v21 = vpop.f32.mrf.mxu1  ;;  %v5739_v60 = vor.u32 %v6677_v2, %v5738_v39  ;;  %3705 = vmatpush.bf16.msra.mxu2 %v5295_v31  ;;  %3678 = vmatpush.bf16.msrb.mxu1 %v5995_v38  ;;  %v5228_v39 = vld [vmem:[#allocation11 + $0x78] sm:$0xf0] }
 0x321   : > { %v3339_v0 = vadd.f32 %v3338_v48, %v3310_v42  ;;  %3540 = vmatmul.bf16.gmra.mxu0 %v7703_v49  ;;  %3598 = vmatmul.bf16.gmra.mxu2 %v7654_v27  ;;  %v5231_v2 = vor.u32 %v6545_v57, %v5228_v39  ;;  %v6537_v15 = vld [vmem:[#allocation11 + $0x1c] sm:$0xf] }
 0x322   : > { %3649 = vmatpush.bf16.msrb.mxu0 %v5739_v60  ;;  %3736 = vmatpush.bf16.msra.mxu3 %v5487_v33  ;;  %v6669_v60 = vld [vmem:[#allocation11 + $0x434] sm:$0xf0]  ;;  %v5196_v24 = vld [vmem:[#allocation11 + $0x38] sm:$0xf0] }
 0x323   : > { %v3836_v38 = vmax.f32 %v3339_v0, 0.0  ;;  %v5199_v33 = vor.u32 %v6537_v15, %v5196_v24  ;;  %v6785_v57 = vld [vmem:[#allocation11 + $0x7dc] sm:$0xf] }
 0x324   : > { %v3367_v55 = vpop.f32.mrf.mxu2  ;;  %3706 = vmatpush.bf16.msra.mxu2 %v5263_v9  ;;  %3679 = vmatpush.bf16.msrb.mxu1 %v5963_v18  ;;  %v5932_v18 = vld [vmem:[#allocation11 + $0x5f8] sm:$0xf0] }
 0x325   : > { %v3368_v48 = vadd.f32 %v3367_v55, %v7961_v6  ;;  %v6188_v39 = vld [vmem:[#allocation11 + $0x7f8] sm:$0xf0] }
 0x326   : > { %v3311_v12 = vpop.f32.mrf.mxu0  ;;  %v3398_v50 = vpop.f32.mrf.mxu3  ;;  %3737 = vmatpush.bf16.msra.mxu3 %v5455_v37  ;;  %v6713_v24 = vld [vmem:[#allocation11 + $0x59c] sm:$0xf] }
 0x327   : > { %v3312_v42 = vadd.f32 %v3311_v12, %v7928_v35  ;;  %v7979_v54 = vadd.f32 %v3396_v30, %v3368_v48  ;;  %v5706_v35 = vld [vmem:[#allocation11 + $0x418] sm:$0xf] }
 0x328   : > { %v3343_v31 = vpop.f32.mrf.mxu1  ;;  %v5707_v30 = vor.u32 %v6669_v60, %v5706_v35  ;;  %3707 = vmatpush.bf16.msra.mxu2 %v5231_v2  ;;  %v6191_v2 = vor.u32 %v6785_v57, %v6188_v39  ;;  %v6705_v57 = vld [vmem:[#allocation11 + $0x55c] sm:$0xf] }
 0x329   : > { %v3341_v52 = vadd.f32 %v3340_v21, %v3312_v42  ;;  %v6721_v42 = vld [vmem:[#allocation11 + $0x5dc] sm:$0xf] }
 0x32a   : > { %3650 = vmatpush.bf16.msrb.mxu0 %v5707_v30  ;;  %v5935_v37 = vor.u32 %v6721_v42, %v5932_v18  ;;  %3788 = vmatpush.bf16.msra.mxu1 %v6191_v2  ;;  %v6156_v42 = vld [vmem:[#allocation11 + $0x7b8] sm:$0xf0] }
 0x32b   : > { %v3844_v55 = vmax.f32 %v3341_v52, 0.0  ;;  %3574 = vmatmul.bf16.gmra.mxu1 %v7710_v44  ;;  %3632 = vmatmul.bf16.gmra.mxu3 %v7660_v62  ;;  %v5868_v39 = vld [vmem:[#allocation11 + $0x578] sm:$0xf0] }
 0x32c   : > { %v3369_v3 = vpop.f32.mrf.mxu2  ;;  %3708 = vmatpush.bf16.msra.mxu2 %v5199_v33  ;;  %v6777_v33 = vld [vmem:[#allocation11 + $0x79c] sm:$0xf]  ;;  %v5871_v2 = vor.u32 %v6705_v57, %v5868_v39 }
 0x32d   : > { %v3370_v48 = vadd.f32 %v3369_v3, %v7961_v6  ;;  %v7984_v21 = vpack.c.bf16 %v3844_v55, %v3836_v38  ;;  %v6092_v57 = vld [vmem:[#allocation11 + $0x738] sm:$0xf0] }
 0x32e   : > { %v3314_v9 = vpop.f32.mrf.mxu0  ;;  %v3401_v0 = vpop.f32.mrf.mxu3  ;;  %3759 = vmatpush.bf16.msra.mxu0 %v5935_v37 }
 0x32f   : > { %v3315_v12 = vadd.f32 %v3314_v9, %v7934_v46  ;;  %v7987_v59 = vadd.f32 %v3398_v50, %v3370_v48  ;;  %v5900_v48 = vld [vmem:[#allocation11 + $0x5b8] sm:$0xf0] }
 0x330   : > { %v3345_v14 = vpop.f32.mrf.mxu1 }
 0x331   : > { %v3344_v26 = vadd.f32 %v3343_v31, %v3315_v12  ;;  %3545 = vmatmul.bf16.gmra.mxu0 %v7715_v58  ;;  %3603 = vmatmul.bf16.gmra.mxu2 %v7664_v29 }
 0x333   : > { %v3852_v60 = vmax.f32 %v3344_v26, 0.0  ;;  %v6159_v26 = vor.u32 %v6777_v33, %v6156_v42  ;;  %v6697_v33 = vld [vmem:[#allocation11 + $0x51c] sm:$0xf] }
 0x334   : > { %v3372_v43 = vpop.f32.mrf.mxu2 }
 0x335   : > { %v3373_v52 = vadd.f32 %v3372_v43, %v7961_v6  ;;  %3789 = vmatpush.bf16.msra.mxu1 %v6159_v26  ;;  %v6761_v26 = vld [vmem:[#allocation11 + $0x71c] sm:$0xf] }
 0x336   : > { %v3316_v38 = vpop.f32.mrf.mxu0  ;;  %v3403_v46 = vpop.f32.mrf.mxu3  ;;  %v6095_v39 = vor.u32 %v6761_v26, %v6092_v57 }
 0x337   : > { %v3317_v50 = vadd.f32 %v3316_v38, %v7942_v53  ;;  %v7993_v31 = vadd.f32 %v3401_v0, %v3373_v52  ;;  %v5903_v0 = vor.u32 %v6713_v24, %v5900_v48  ;;  %v6769_v38 = vld [vmem:[#allocation11 + $0x75c] sm:$0xf] }
 0x338   : > { %v3348_v55 = vpop.f32.mrf.mxu1 }
 0x339   : > { %v3346_v35 = vadd.f32 %v3345_v14, %v3317_v50  ;;  %3760 = vmatpush.bf16.msra.mxu0 %v5903_v0  ;;  %v6124_v50 = vld [vmem:[#allocation11 + $0x778] sm:$0xf0]  ;;  %v6805_v0 = vld [vmem:[#allocation14 + $0x78] sm:$0xff] }
 0x33a   : > { %4458 = vmatpush.bf16.msrb.mxu3 %v6805_v0 }
 0x33b   : > { %v3860_v3 = vmax.f32 %v3346_v35, 0.0  ;;  %3579 = vmatmul.bf16.gmra.mxu1 %v7722_v23  ;;  %3637 = vmatmul.bf16.gmra.mxu3 %v7670_v47 }
 0x33c   : > { %v3374_v30 = vpop.f32.mrf.mxu2 }
 0x33d   : > { %v3375_v15 = vadd.f32 %v3374_v30, %v7961_v6  ;;  %v7998_v9 = vpack.c.bf16 %v3860_v3, %v3852_v60  ;;  %3761 = vmatpush.bf16.msra.mxu0 %v5871_v2 }
 0x33e   : > { %v3319_v53 = vpop.f32.mrf.mxu0  ;;  %v3406_v12 = vpop.f32.mrf.mxu3 }
 0x33f   : > { %v3320_v14 = vadd.f32 %v3319_v53, %v7948_v45  ;;  %v8001_v18 = vadd.f32 %v3403_v46, %v3375_v15  ;;  %v6127_v45 = vor.u32 %v6769_v38, %v6124_v50  ;;  %v5836_v53 = vld [vmem:[#allocation11 + $0x538] sm:$0xf0] }
 0x340   : > { %v3350_v43 = vpop.f32.mrf.mxu1 }
 0x341   : > { %v3349_v37 = vadd.f32 %v3348_v55, %v3320_v14  ;;  %3550 = vmatmul.bf16.gmra.mxu0 %v7727_v34  ;;  %3608 = vmatmul.bf16.gmra.mxu2 %v7677_v61  ;;  %v5839_v14 = vor.u32 %v6697_v33, %v5836_v53 }
 0x342   : > { %3790 = vmatpush.bf16.msra.mxu1 %v6127_v45  ;;  %v5804_v45 = vld [vmem:[#allocation11 + $0x4f8] sm:$0xf0] }
 0x343   : > { %v3868_v24 = vmax.f32 %v3349_v37, 0.0  ;;  %3762 = vmatpush.bf16.msra.mxu0 %v5839_v14  ;;  %v6795_v14 = vld [vmem:[#allocation14 + $0x28] sm:$0xff] }
 0x344   : > { %v3377_v52 = vpop.f32.mrf.mxu2 }
 0x345   : > { %v3378_v35 = vadd.f32 %v3377_v52, %v7961_v6 }
 0x346   : > { %v3321_v60 = vpop.f32.mrf.mxu0  ;;  %v3408_v46 = vpop.f32.mrf.mxu3  ;;  %3791 = vmatpush.bf16.msra.mxu1 %v6095_v39  ;;  %v5772_v39 = vld [vmem:[#allocation11 + $0x4b8] sm:$0xf0] }
 0x347   : > { %v3322_v3 = vadd.f32 %v3321_v60, %v7956_v7  ;;  %v8007_v55 = vadd.f32 %v3406_v12, %v3378_v35  ;;  %v6689_v35 = vld [vmem:[#allocation11 + $0x4dc] sm:$0xf]  ;;  %v6803_v60 = vld [vmem:[#allocation14 + $0x68] sm:$0xff] }
 0x348   : > { %v3449_v30 = vpop.f32.mrf.mxu1 }
 0x349   : > { %v3351_v15 = vadd.f32 %v3350_v43, %v3322_v3 }
 0x34b   : > { %v3876_v48 = vmax.f32 %v3351_v15, 0.0  ;;  %3680 = vmatmul.bf16.vlgmr.msrb.gmra.mxu1 %v7686_v19  ;;  %3738 = vmatmul.bf16.vlgmr.msra.gmra.mxu3 %v7640_v11  ;;  %v6804_v11 = vld [vmem:[#allocation14 + $0x70] sm:$0xff]  ;;  %v5807_v15 = vor.u32 %v6689_v35, %v5804_v45  ;;  %v6794_v45 = vld [vmem:[#allocation14 + $0x20] sm:$0xff] }
 0x34c   : > { %v3379_v42 = vpop.f32.mrf.mxu2  ;;  %4459 = vmatpush.bf16.msrb.mxu3 %v6804_v11 }
 0x34d   : > { %v3380_v7 = vadd.f32 %v3379_v42, %v7961_v6  ;;  %v8012_v12 = vpack.c.bf16 %v3876_v48, %v3868_v24  ;;  %v6797_v6 = vld [vmem:[#allocation14 + $0x38] sm:$0xff]  ;;  %v6060_v24 = vld [vmem:[#allocation11 + $0x6f8] sm:$0xf0]  ;;  %3763 = vmatpush.bf16.msra.mxu0 %v5807_v15 }
 0x34e   : > { %v3420_v43 = vpop.f32.mrf.mxu0  ;;  %v8014_v37 = vpop.f32.mrf.mxu3  ;;  %4429 = vmatpush.bf16.msrb.mxu2 %v6797_v6  ;;  %v6028_v6 = vld [vmem:[#allocation11 + $0x6b8] sm:$0xf0] }
 0x34f   : > { %v3421_v52 = vadd.f32 %v3420_v43, %v7965_v36  ;;  %v8017_v2 = vadd.f32 %v3408_v46, %v3380_v7  ;;  %v6753_v36 = vld [vmem:[#allocation11 + $0x6dc] sm:$0xf]  ;;  %v6801_v43 = vld [vmem:[#allocation14 + $0x58] sm:$0xff] }
 0x350   : > { %v3451_v38 = vpop.f32.mrf.mxu1  ;;  %v6063_v48 = vor.u32 %v6753_v36, %v6060_v24  ;;  %v6796_v46 = vld [vmem:[#allocation14 + $0x30] sm:$0xff]  ;;  %4460 = vmatpush.bf16.msrb.mxu3 %v6803_v60 }
 0x351   : > { %v3450_v50 = vadd.f32 %v3449_v30, %v3421_v52  ;;  %3651 = vmatmul.bf16.vlgmr.msrb.gmra.mxu0 %v7691_v40  ;;  %3709 = vmatmul.bf16.vlgmr.msra.gmra.mxu2 %v7644_v28  ;;  %v6802_v30 = vld [vmem:[#allocation14 + $0x60] sm:$0xff]  ;;  %v6681_v7 = vld [vmem:[#allocation11 + $0x49c] sm:$0xf] }
 0x352   : > { %3792 = vmatpush.bf16.msra.mxu1 %v6063_v48  ;;  %4430 = vmatpush.bf16.msrb.mxu2 %v6796_v46  ;;  %v5775_v11 = vor.u32 %v6681_v7, %v5772_v39  ;;  %v6800_v15 = vld [vmem:[#allocation14 + $0x50] sm:$0xff]  ;;  %v6793_v48 = vld [vmem:[#allocation14 + $0x18] sm:$0xff] }
 0x353   : > { %v3821_v26 = vmax.f32 %v3450_v50, 0.0  ;;  %v6737_v46 = vld [vmem:[#allocation11 + $0x65c] sm:$0xf] }
 0x354   : > { %v8021_v3 = vpop.f32.mrf.mxu2  ;;  %4461 = vmatpush.bf16.msrb.mxu3 %v6802_v30  ;;  %3764 = vmatpush.bf16.msra.mxu0 %v5775_v11  ;;  %v5740_v30 = vld [vmem:[#allocation11 + $0x478] sm:$0xf0] }
 0x355   : > { %v5964_v39 = vld [vmem:[#allocation11 + $0x638] sm:$0xf0] }
 0x356   : > { %v3422_v33 = vpop.f32.mrf.mxu0  ;;  %v8023_v53 = vpop.f32.mrf.mxu3  ;;  %4431 = vmatpush.bf16.msrb.mxu2 %v6795_v14  ;;  %v6799_v14 = vld [vmem:[#allocation14 + $0x48] sm:$0xff] }
 0x357   : > { %v3423_v28 = vadd.f32 %v3422_v33, %v7973_v13  ;;  %v6745_v13 = vld [vmem:[#allocation11 + $0x69c] sm:$0xf] }
 0x358   : > { %v3454_v0 = vpop.f32.mrf.mxu1  ;;  %4462 = vmatpush.bf16.msrb.mxu3 %v6801_v43  ;;  %v5996_v33 = vld [vmem:[#allocation11 + $0x678] sm:$0xf0] }
 0x359   : > { %v3452_v42 = vadd.f32 %v3451_v38, %v3423_v28  ;;  %v6031_v38 = vor.u32 %v6745_v13, %v6028_v6  ;;  %v6673_v28 = vld [vmem:[#allocation11 + $0x45c] sm:$0xf]  ;;  %v6798_v13 = vld [vmem:[#allocation14 + $0x40] sm:$0xff] }
 0x35a   : > { %4432 = vmatpush.bf16.msrb.mxu2 %v6794_v45  ;;  %v6791_v45 = vld [vmem:[#allocation14 + $0x8] sm:$0xff] }
 0x35b   : > { %v3829_v57 = vmax.f32 %v3452_v42, 0.0  ;;  %3685 = vmatmul.bf16.gmra.mxu1 %v7698_v20  ;;  %3743 = vmatmul.bf16.gmra.mxu3 %v7650_v22  ;;  %v5999_v42 = vor.u32 %v6737_v46, %v5996_v33  ;;  %v6790_v33 = vld [vmem:[#allocation14] sm:$0xff] }
 0x35c   : > { %v8028_v52 = vpop.f32.mrf.mxu2  ;;  %3793 = vmatpush.bf16.msra.mxu1 %v6031_v38  ;;  %4463 = vmatpush.bf16.msrb.mxu3 %v6800_v15  ;;  %v6665_v15 = vld [vmem:[#allocation11 + $0x41c] sm:$0xf] }
 0x35d   : > { %v8030_v35 = vpack.c.bf16 %v3829_v57, %v3821_v26  ;;  %v6792_v57 = vld [vmem:[#allocation14 + $0x10] sm:$0xff] }
 0x35e   : > { %v3425_v50 = vpop.f32.mrf.mxu0  ;;  %v8032_v60 = vpop.f32.mrf.mxu3  ;;  %4433 = vmatpush.bf16.msrb.mxu2 %v6793_v48  ;;  %v5708_v48 = vld [vmem:[#allocation11 + $0x438] sm:$0xf0] }
 0x35f   : > { %v3426_v22 = vadd.f32 %v3425_v50, %v7979_v54  ;;  %v5743_v54 = vor.u32 %v6673_v28, %v5740_v30 }
 0x360   : > { %v3456_v36 = vpop.f32.mrf.mxu1  ;;  %3794 = vmatpush.bf16.msra.mxu1 %v5999_v42  ;;  %4464 = vmatpush.bf16.msrb.mxu3 %v6799_v14 }
 0x361   : > { %v3455_v24 = vadd.f32 %v3454_v0, %v3426_v22  ;;  %3656 = vmatmul.bf16.gmra.mxu0 %v7703_v49  ;;  %3714 = vmatmul.bf16.gmra.mxu2 %v7654_v27  ;;  %v6729_v0 = vld [vmem:[#allocation11 + $0x61c] sm:$0xf] }
 0x362   : > { %3765 = vmatpush.bf16.msra.mxu0 %v5743_v54  ;;  %v5967_v11 = vor.u32 %v6729_v0, %v5964_v39  ;;  %4434 = vmatpush.bf16.msrb.mxu2 %v6792_v57 }
 0x363   : > { %v3837_v50 = vmax.f32 %v3455_v24, 0.0 }
 0x364   : > { %v8037_v26 = vpop.f32.mrf.mxu2  ;;  %3795 = vmatpush.bf16.msra.mxu1 %v5967_v11  ;;  %4465 = vmatpush.bf16.msrb.mxu3 %v6798_v13  ;;  %v6813_v13 = vld [vmem:[#allocation14 + $0xb8] sm:$0xff] }
 0x366   : > { %v3427_v7 = vpop.f32.mrf.mxu0  ;;  %v8040_v43 = vpop.f32.mrf.mxu3  ;;  %4435 = vmatpush.bf16.msrb.mxu2 %v6791_v45 }
 0x367   : > { %v3428_v27 = vadd.f32 %v3427_v7, %v7987_v59  ;;  %v5711_v59 = vor.u32 %v6665_v15, %v5708_v48 }
 0x368   : > { %v3459_v6 = vpop.f32.mrf.mxu1 }
 0x369   : > { %v3457_v38 = vadd.f32 %v3456_v36, %v3428_v27  ;;  %3766 = vmatpush.bf16.msra.mxu0 %v5711_v59 }
 0x36a   : > { %4436 = vmatpush.bf16.msrb.mxu2 %v6790_v33 }
 0x36b   : > { %v3845_v22 = vmax.f32 %v3457_v38, 0.0  ;;  %3690 = vmatmul.bf16.gmra.mxu1 %v7710_v44  ;;  %3748 = vmatmul.bf16.gmra.mxu3 %v7660_v62 }
 0x36c   : > { %v8044_v46 = vpop.f32.mrf.mxu2 }
 0x36d   : > { %v8046_v28 = vpack.c.bf16 %v3845_v22, %v3837_v50  ;;  %4487 = vmatpush.bf16.msrb.mxu0 %v6813_v13  ;;  %v6821_v50 = vld [vmem:[#allocation14 + $0xf8] sm:$0xff] }
 0x36e   : > { %v3430_v30 = vpop.f32.mrf.mxu0  ;;  %v8049_v14 = vpop.f32.mrf.mxu3  ;;  %4516 = vmatpush.bf16.msrb.mxu1 %v6821_v50  ;;  %v6834_v50 = vld [vmem:[#allocation14 + $0x160] sm:$0xff] }
 0x36f   : > { %v3431_v36 = vadd.f32 %v3430_v30, %v7993_v31 }
 0x370   : > { %v3461_v42 = vpop.f32.mrf.mxu1 }
 0x371   : > { %v3460_v24 = vadd.f32 %v3459_v6, %v3431_v36  ;;  %3661 = vmatmul.bf16.gmra.mxu0 %v7715_v58  ;;  %3719 = vmatmul.bf16.gmra.mxu2 %v7664_v29 }
 0x373   : > { %v3853_v39 = vmax.f32 %v3460_v24, 0.0 }
 0x374   : > { %v8053_v62 = vpop.f32.mrf.mxu2 }
 0x376   : > { %v3432_v54 = vpop.f32.mrf.mxu0  ;;  %v8056_v11 = vpop.f32.mrf.mxu3 }
 0x377   : > { %v3433_v57 = vadd.f32 %v3432_v54, %v8001_v18  ;;  %v6811_v54 = vld [vmem:[#allocation14 + $0xa8] sm:$0xff] }
 0x378   : > { %v3464_v7 = vpop.f32.mrf.mxu1 }
 0x379   : > { %v3462_v0 = vadd.f32 %v3461_v42, %v3433_v57  ;;  %v6837_v42 = vld [vmem:[#allocation14 + $0x178] sm:$0xff] }
 0x37a   : > { %4574 = vmatpush.bf16.msra.mxu3 %v6837_v42  ;;  %v6816_v42 = vld [vmem:[#allocation14 + $0xd0] sm:$0xff] }
 0x37b   : > { %v3861_v27 = vmax.f32 %v3462_v0, 0.0  ;;  %3695 = vmatmul.bf16.gmra.mxu1 %v7722_v23  ;;  %3753 = vmatmul.bf16.gmra.mxu3 %v7670_v47  ;;  %v6812_v47 = vld [vmem:[#allocation14 + $0xb0] sm:$0xff] }
 0x37c   : > { %v8060_v31 = vpop.f32.mrf.mxu2  ;;  %4488 = vmatpush.bf16.msrb.mxu0 %v6812_v47  ;;  %v6836_v0 = vld [vmem:[#allocation14 + $0x170] sm:$0xff]  ;;  %v6827_v47 = vld [vmem:[#allocation14 + $0x128] sm:$0xff] }
 0x37d   : > { %v8062_v6 = vpack.c.bf16 %v3861_v27, %v3853_v39  ;;  %v6835_v27 = vld [vmem:[#allocation14 + $0x168] sm:$0xff] }
 0x37e   : > { %v3435_v29 = vpop.f32.mrf.mxu0  ;;  %v8069_v15 = vpop.f32.mrf.mxu3  ;;  %4575 = vmatpush.bf16.msra.mxu3 %v6836_v0 }
 0x37f   : > { %v3436_v38 = vadd.f32 %v3435_v29, %v8007_v55  ;;  %v6810_v29 = vld [vmem:[#allocation14 + $0xa0] sm:$0xff] }
 0x380   : > { %v3466_v18 = vpop.f32.mrf.mxu1  ;;  %4489 = vmatpush.bf16.msrb.mxu0 %v6811_v54  ;;  %v6832_v54 = vld [vmem:[#allocation14 + $0x150] sm:$0xff] }
 0x381   : > { %v3465_v45 = vadd.f32 %v3464_v7, %v3436_v38  ;;  %3666 = vmatmul.bf16.gmra.mxu0 %v7727_v34  ;;  %3724 = vmatmul.bf16.gmra.mxu2 %v7677_v61  ;;  %v6820_v61 = vld [vmem:[#allocation14 + $0xf0] sm:$0xff] }
 0x382   : > { %4517 = vmatpush.bf16.msrb.mxu1 %v6820_v61  ;;  %v6828_v38 = vld [vmem:[#allocation14 + $0x130] sm:$0xff]  ;;  %4576 = vmatpush.bf16.msra.mxu3 %v6835_v27 }
 0x383   : > { %v3869_v30 = vmax.f32 %v3465_v45, 0.0  ;;  %v6818_v45 = vld [vmem:[#allocation14 + $0xe0] sm:$0xff]  ;;  %v6808_v27 = vld [vmem:[#allocation14 + $0x90] sm:$0xff] }
 0x384   : > { %v8067_v22 = vpop.f32.mrf.mxu2  ;;  %4490 = vmatpush.bf16.msrb.mxu0 %v6810_v29  ;;  %v6824_v29 = vld [vmem:[#allocation14 + $0x110] sm:$0xff] }
 0x386   : > { %v3437_v48 = vpop.f32.mrf.mxu0  ;;  %v8082_v7 = vpop.f32.mrf.mxu3  ;;  %4577 = vmatpush.bf16.msra.mxu3 %v6834_v50  ;;  %v6830_v50 = vld [vmem:[#allocation14 + $0x140] sm:$0xff] }
 0x387   : > { %v3438_v59 = vadd.f32 %v3437_v48, %v8017_v2  ;;  %v6817_v48 = vld [vmem:[#allocation14 + $0xd8] sm:$0xff] }
 0x388   : > { %v8072_v33 = vpop.f32.mrf.mxu1 }
 0x389   : > { %v3467_v55 = vadd.f32 %v3466_v18, %v3438_v59  ;;  %v6833_v59 = vld [vmem:[#allocation14 + $0x158] sm:$0xff] }
 0x38a   : > { %4578 = vmatpush.bf16.msra.mxu3 %v6833_v59 }
 0x38b   : > { %v3877_v36 = vmax.f32 %v3467_v55, 0.0  ;;  %3796 = vmatmul.bf16.vlgmr.msra.gmra.mxu1 %v7686_v19  ;;  %4466 = vmatmul.bf16.vlgmr.msrb.gmra.mxu3 %v7849_v17  ;;  %v6829_v19 = vld [vmem:[#allocation14 + $0x138] sm:$0xff]  ;;  %v6819_v17 = vld [vmem:[#allocation14 + $0xe8] sm:$0xff] }
 0x38c   : > { %v8076_v24 = vpop.f32.mrf.mxu2  ;;  %4545 = vmatpush.bf16.msra.mxu2 %v6829_v19  ;;  %4518 = vmatpush.bf16.msrb.mxu1 %v6819_v17  ;;  %v6809_v55 = vld [vmem:[#allocation14 + $0x98] sm:$0xff]  ;;  %v6815_v19 = vld [vmem:[#allocation14 + $0xc8] sm:$0xff] }
 0x38d   : > { %v8078_v57 = vpack.c.bf16 %v3877_v36, %v3869_v30  ;;  %v6826_v30 = vld [vmem:[#allocation14 + $0x120] sm:$0xff]  ;;  %4491 = vmatpush.bf16.msrb.mxu0 %v6809_v55  ;;  %v6831_v17 = vld [vmem:[#allocation14 + $0x148] sm:$0xff] }
 0x38e   : > { %v8080_v2 = vpop.f32.mrf.mxu0  ;;  %4579 = vmatpush.bf16.msra.mxu3 %v6832_v54  ;;  %v6806_v55 = vld [vmem:[#allocation14 + $0x80] sm:$0xff] }
 0x390   : > { %v8084_v39 = vpop.f32.mrf.mxu1  ;;  %4546 = vmatpush.bf16.msra.mxu2 %v6828_v38  ;;  %4519 = vmatpush.bf16.msrb.mxu1 %v6818_v45  ;;  %v6814_v45 = vld [vmem:[#allocation14 + $0xc0] sm:$0xff] }
 0x391   : > { %3767 = vmatmul.bf16.vlgmr.msra.gmra.mxu0 %v7691_v40  ;;  %4437 = vmatmul.bf16.vlgmr.msrb.gmra.mxu2 %v7790_v1  ;;  %v8094_v1 = vpop.f32.mrf.mxu3 }
 0x392   : > { %4580 = vmatpush.bf16.msra.mxu3 %v6831_v17  ;;  %4492 = vmatpush.bf16.msrb.mxu0 %v6808_v27 }
 0x394   : > { %v8088_v13 = vpop.f32.mrf.mxu2  ;;  %4547 = vmatpush.bf16.msra.mxu2 %v6827_v47  ;;  %4520 = vmatpush.bf16.msrb.mxu1 %v6817_v48  ;;  %v6807_v47 = vld [vmem:[#allocation14 + $0x88] sm:$0xff] }
 0x395   : > { %v6823_v48 = vld [vmem:[#allocation14 + $0x108] sm:$0xff] }
 0x396   : > { %v8090_v18 = vpop.f32.mrf.mxu0  ;;  %4581 = vmatpush.bf16.msra.mxu3 %v6830_v50  ;;  %4493 = vmatpush.bf16.msrb.mxu0 %v6807_v47 }
 0x398   : > { %v8092_v40 = vpop.f32.mrf.mxu1  ;;  %4548 = vmatpush.bf16.msra.mxu2 %v6826_v30  ;;  %4521 = vmatpush.bf16.msrb.mxu1 %v6816_v42  ;;  %v6822_v30 = vld [vmem:[#allocation14 + $0x100] sm:$0xff] }
 0x39a   : > { %4494 = vmatpush.bf16.msrb.mxu0 %v6806_v55 }
 0x39b   : > { %3801 = vmatmul.bf16.gmra.mxu1 %v7698_v20  ;;  %4471 = vmatmul.bf16.gmra.mxu3 %v7864_v51  ;;  %v6825_v20 = vld [vmem:[#allocation14 + $0x118] sm:$0xff]  ;;  %v8106_v51 = vpop.f32.mrf.mxu3 }
 0x39c   : > { %v8098_v36 = vpop.f32.mrf.mxu2  ;;  %4549 = vmatpush.bf16.msra.mxu2 %v6825_v20  ;;  %4522 = vmatpush.bf16.msrb.mxu1 %v6815_v19 }
 0x39e   : > { %v8100_v61 = vpop.f32.mrf.mxu0 }
 0x3a0   : > { %v8102_v0 = vpop.f32.mrf.mxu1  ;;  %4550 = vmatpush.bf16.msra.mxu2 %v6824_v29  ;;  %4523 = vmatpush.bf16.msrb.mxu1 %v6814_v45 }
 0x3a1   : > { %3772 = vmatmul.bf16.gmra.mxu0 %v7703_v49  ;;  %4442 = vmatmul.bf16.gmra.mxu2 %v7805_v16 }
 0x3a3   : > { %v8116_v59 = vpop.f32.mrf.mxu3 }
 0x3a4   : > { %v8110_v49 = vpop.f32.mrf.mxu2  ;;  %4551 = vmatpush.bf16.msra.mxu2 %v6823_v48 }
 0x3a6   : > { %v8108_v38 = vpop.f32.mrf.mxu0 }
 0x3a8   : > { %v8112_v16 = vpop.f32.mrf.mxu1  ;;  %4552 = vmatpush.bf16.msra.mxu2 %v6822_v30 }
 0x3ab   : > { %3806 = vmatmul.bf16.gmra.mxu1 %v7710_v44  ;;  %4476 = vmatmul.bf16.gmra.mxu3 %v7878_v25  ;;  %v8126_v44 = vld [vmem:[#allocation13] sm:$0xff]  ;;  %v8135_v27 = vpop.f32.mrf.mxu3 }
 0x3ac   : > { %v8124_v20 = vpop.f32.mrf.mxu2  ;;  %v8129_v25 = vperm.slane %v8126_v44, 5 }
 0x3ae   : > { %v8118_v42 = vpop.f32.mrf.mxu0  ;;  %v3481_v17 = vadd.f32 %v8028_v52, %v8129_v25  ;;  %v6845_v52 = vld [vmem:[#allocation14 + $0x1b8] sm:$0xff] }
 0x3af   : > { %4603 = vmatpush.bf16.msra.mxu0 %v6845_v52 }
 0x3b0   : > { %v8120_v54 = vpop.f32.mrf.mxu1 }
 0x3b1   : > { %3777 = vmatmul.bf16.gmra.mxu0 %v7715_v58  ;;  %4447 = vmatmul.bf16.gmra.mxu2 %v7819_v10  ;;  %v3479_v58 = vadd.f32 %v8021_v3, %v8129_v25  ;;  %v3510_v10 = vadd.f32 %v8023_v53, %v3481_v17 }
 0x3b3   : > { %v3508_v50 = vadd.f32 %v8014_v37, %v3479_v58  ;;  %v3539_v47 = vadd.f32 %v8090_v18, %v3510_v10  ;;  %v8154_v53 = vpop.f32.mrf.mxu3  ;;  %v6844_v18 = vld [vmem:[#allocation14 + $0x1b0] sm:$0xff]  ;;  %v3486_v58 = vadd.f32 %v8044_v46, %v8129_v25 }
 0x3b4   : > { %v8144_v45 = vpop.f32.mrf.mxu2  ;;  %4604 = vmatpush.bf16.msra.mxu0 %v6844_v18  ;;  %v6842_v18 = vld [vmem:[#allocation14 + $0x1a0] sm:$0xff] }
 0x3b5   : > { %v3537_v55 = vadd.f32 %v8080_v2, %v3508_v50  ;;  %v3568_v3 = vadd.f32 %v8084_v39, %v3539_v47  ;;  %v6852_v47 = vld [vmem:[#allocation14 + $0x1f0] sm:$0xff] }
 0x3b6   : > { %v8131_v19 = vpop.f32.mrf.mxu0 }
 0x3b7   : > { %v3830_v37 = vmax.f32 %v3568_v3, 0.0 }
 0x3b8   : > { %v8137_v29 = vpop.f32.mrf.mxu1 }
 0x3bb   : > { %3811 = vmatmul.bf16.gmra.mxu1 %v7722_v23  ;;  %4481 = vmatmul.bf16.gmra.mxu3 %v7892_v56  ;;  %v3566_v23 = vadd.f32 %v8072_v33, %v3537_v55  ;;  %v6853_v56 = vld [vmem:[#allocation14 + $0x1f8] sm:$0xff]  ;;  %v3515_v33 = vadd.f32 %v8040_v43, %v3486_v58  ;;  %v8170_v50 = vpop.f32.mrf.mxu3  ;;  %v6843_v55 = vld [vmem:[#allocation14 + $0x1a8] sm:$0xff]  ;;  %v3491_v58 = vadd.f32 %v8060_v31, %v8129_v25 }
 0x3bc   : > { %4632 = vmatpush.bf16.msra.mxu1 %v6853_v56  ;;  %v8159_v17 = vpop.f32.mrf.mxu2  ;;  %4605 = vmatpush.bf16.msra.mxu0 %v6843_v55 }
 0x3bd   : > { %v3822_v39 = vmax.f32 %v3566_v23, 0.0  ;;  %v3544_v46 = vadd.f32 %v8108_v38, %v3515_v33 }
 0x3be   : > { %v8148_v48 = vpop.f32.mrf.mxu0 }
 0x3bf   : > { %v3573_v56 = vadd.f32 %v8102_v0, %v3544_v46 }
 0x3c0   : > { %v8151_v30 = vpop.f32.mrf.mxu1  ;;  %4633 = vmatpush.bf16.msra.mxu1 %v6852_v47  ;;  %4606 = vmatpush.bf16.msra.mxu0 %v6842_v18  ;;  %v6841_v47 = vld [vmem:[#allocation14 + $0x198] sm:$0xff] }
 0x3c1   : > { %3782 = vmatmul.bf16.gmra.mxu0 %v7727_v34  ;;  %4452 = vmatmul.bf16.gmra.mxu2 %v7833_v32  ;;  %v3484_v34 = vadd.f32 %v8037_v26, %v8129_v25  ;;  %v3886_v32 = vpack.c.bf16 %v3830_v37, %v3822_v39  ;;  %v3846_v38 = vmax.f32 %v3573_v56, 0.0  ;;  %v6840_v56 = vld [vmem:[#allocation14 + $0x190] sm:$0xff] }
 0x3c3   : > { %v3513_v52 = vadd.f32 %v8032_v60, %v3484_v34  ;;  %v6851_v60 = vld [vmem:[#allocation14 + $0x1e8] sm:$0xff]  ;;  %v8186_v37 = vpop.f32.mrf.mxu3  ;;  %v3520_v34 = vadd.f32 %v8056_v11, %v3491_v58  ;;  %v6848_v58 = vld [vmem:[#allocation14 + $0x1d0] sm:$0xff] }
 0x3c4   : > { %v8178_v26 = vpop.f32.mrf.mxu2  ;;  %4634 = vmatpush.bf16.msra.mxu1 %v6851_v60  ;;  %4607 = vmatpush.bf16.msra.mxu0 %v6841_v47 }
 0x3c5   : > { %v3542_v23 = vadd.f32 %v8100_v61, %v3513_v52  ;;  %v3549_v31 = vadd.f32 %v8131_v19, %v3520_v34 }
 0x3c6   : > { %v8161_v2 = vpop.f32.mrf.mxu0 }
 0x3c7   : > { %v3578_v11 = vadd.f32 %v8120_v54, %v3549_v31 }
 0x3c8   : > { %v8165_v10 = vpop.f32.mrf.mxu1  ;;  %4608 = vmatpush.bf16.msra.mxu0 %v6840_v56 }
 0x3cb   : > { %4524 = vmatmul.bf16.vlgmr.msrb.gmra.mxu1 %v7969_v5  ;;  %4582 = vmatmul.bf16.vlgmr.msra.gmra.mxu3 %v3886_v32  ;;  %v3571_v5 = vadd.f32 %v8092_v40, %v3542_v23  ;;  %v6850_v32 = vld [vmem:[#allocation14 + $0x1e0] sm:$0xff]  ;;  %v3862_v23 = vmax.f32 %v3578_v11, 0.0  ;;  %v8243_v11 = vperm.slane %v8126_v44, 6 }
 0x3cc   : > { %v8196_v40 = vpop.f32.mrf.mxu2  ;;  %4635 = vmatpush.bf16.msra.mxu1 %v6850_v32 }
 0x3cd   : > { %v3838_v39 = vmax.f32 %v3571_v5, 0.0  ;;  %v3496_v5 = vadd.f32 %v8076_v24, %v8129_v25 }
 0x3ce   : > { %v8175_v3 = vpop.f32.mrf.mxu0 }
 0x3cf   : > { %v3525_v18 = vadd.f32 %v8082_v7, %v3496_v5 }
 0x3d0   : > { %v8180_v43 = vpop.f32.mrf.mxu1 }
 0x3d1   : > { %4495 = vmatmul.bf16.vlgmr.msrb.gmra.mxu0 %v7910_v63  ;;  %4553 = vmatmul.bf16.vlgmr.msra.gmra.mxu2 %v8030_v35  ;;  %v3489_v63 = vadd.f32 %v8053_v62, %v8129_v25  ;;  %v3894_v35 = vpack.c.bf16 %v3846_v38, %v3838_v39  ;;  %v8205_v62 = vpop.f32.mrf.mxu3  ;;  %v6839_v38 = vld [vmem:[#allocation14 + $0x188] sm:$0xff]  ;;  %v3554_v39 = vadd.f32 %v8161_v2, %v3525_v18 }
 0x3d2   : > { %4609 = vmatpush.bf16.msra.mxu0 %v6839_v38  ;;  %v6847_v2 = vld [vmem:[#allocation14 + $0x1c8] sm:$0xff] }
 0x3d3   : > { %v3518_v33 = vadd.f32 %v8049_v14, %v3489_v63  ;;  %v6849_v14 = vld [vmem:[#allocation14 + $0x1d8] sm:$0xff]  ;;  %v6838_v63 = vld [vmem:[#allocation14 + $0x180] sm:$0xff]  ;;  %v3583_v7 = vadd.f32 %v8151_v30, %v3554_v39 }
 0x3d4   : > { %v8213_v19 = vpop.f32.mrf.mxu2  ;;  %4636 = vmatpush.bf16.msra.mxu1 %v6849_v14 }
 0x3d5   : > { %v3547_v46 = vadd.f32 %v8118_v42, %v3518_v33  ;;  %v3878_v32 = vmax.f32 %v3583_v7, 0.0 }
 0x3d6   : > { %v8188_v61 = vpop.f32.mrf.mxu0  ;;  %4610 = vmatpush.bf16.msra.mxu0 %v6838_v63 }
 0x3d8   : > { %v8192_v0 = vpop.f32.mrf.mxu1  ;;  %4637 = vmatpush.bf16.msra.mxu1 %v6848_v58 }
 0x3db   : > { %4529 = vmatmul.bf16.gmra.mxu1 %v7984_v21  ;;  %4587 = vmatmul.bf16.gmra.mxu3 %v3894_v35  ;;  %v3576_v21 = vadd.f32 %v8112_v16, %v3547_v46 }
 0x3dc   : > { %v3712_v35 = vpop.f32.mrf.mxu2  ;;  %4638 = vmatpush.bf16.msra.mxu1 %v6847_v2 }
 0x3dd   : > { %v3854_v60 = vmax.f32 %v3576_v21, 0.0  ;;  %v3595_v21 = vadd.f32 %v8088_v13, %v8243_v11 }
 0x3de   : > { %v8202_v52 = vpop.f32.mrf.mxu0 }
 0x3df   : > { %v3902_v16 = vpack.c.bf16 %v3862_v23, %v3854_v60  ;;  %v3624_v56 = vadd.f32 %v8094_v1, %v3595_v21  ;;  %v3602_v1 = vadd.f32 %v8124_v20, %v8243_v11 }
 0x3e0   : > { %v8207_v55 = vpop.f32.mrf.mxu1 }
 0x3e1   : > { %4500 = vmatmul.bf16.gmra.mxu0 %v7925_v8  ;;  %4558 = vmatmul.bf16.gmra.mxu2 %v8046_v28  ;;  %v3494_v8 = vadd.f32 %v8067_v22, %v8129_v25  ;;  %v8223_v28 = vpop.f32.mrf.mxu3  ;;  %v3653_v5 = vadd.f32 %v8175_v3, %v3624_v56 }
 0x3e3   : > { %v3523_v24 = vadd.f32 %v8069_v15, %v3494_v8  ;;  %v3682_v38 = vadd.f32 %v8165_v10, %v3653_v5 }
 0x3e4   : > { %v3715_v47 = vpop.f32.mrf.mxu2 }
 0x3e5   : > { %v3552_v22 = vadd.f32 %v8148_v48, %v3523_v24 }
 0x3e6   : > { %v8215_v42 = vpop.f32.mrf.mxu0 }
 0x3e8   : > { %v8219_v54 = vpop.f32.mrf.mxu1 }
 0x3e9   : > { %v3741_v15 = vpop.f32.mrf.mxu3 }
 0x3eb   : > { %4534 = vmatmul.bf16.gmra.mxu1 %v7998_v9  ;;  %4592 = vmatmul.bf16.gmra.mxu3 %v3902_v16  ;;  %v3581_v9 = vadd.f32 %v8137_v29, %v3552_v22 }
 0x3ed   : > { %v3870_v31 = vmax.f32 %v3581_v9, 0.0 }
 0x3ee   : > { %v8229_v34 = vpop.f32.mrf.mxu0 }
 0x3ef   : > { %v3910_v46 = vpack.c.bf16 %v3878_v32, %v3870_v31 }
 0x3f0   : > { %v8232_v25 = vpop.f32.mrf.mxu1 }
 0x3f1   : > { %4505 = vmatmul.bf16.gmra.mxu0 %v7939_v41  ;;  %4563 = vmatmul.bf16.gmra.mxu2 %v8062_v6  ;;  %v6846_v41 = vld [vmem:[#allocation14 + $0x1c0] sm:$0xff]  ;;  %v3597_v6 = vadd.f32 %v8098_v36, %v8243_v11  ;;  %v3744_v29 = vpop.f32.mrf.mxu3 }
 0x3f2   : > { %4639 = vmatpush.bf16.msra.mxu1 %v6846_v41 }
 0x3f3   : > { %v3626_v23 = vadd.f32 %v8106_v51, %v3597_v6  ;;  %v8265_v51 = vperm.slane %v8126_v44, 7  ;;  %v3631_v44 = vadd.f32 %v8135_v27, %v3602_v1 }
 0x3f5   : > { %v3655_v36 = vadd.f32 %v8188_v61, %v3626_v23  ;;  %v3823_v61 = vmax.f32 %v3682_v38, 0.0  ;;  %v3711_v3 = vadd.f32 %v8213_v19, %v8265_v51  ;;  %v3713_v10 = vadd.f32 %v3712_v35, %v8265_v51 }
 0x3f6   : > { %v8238_v33 = vpop.f32.mrf.mxu0  ;;  %v3660_v22 = vadd.f32 %v8215_v42, %v3631_v44  ;;  %v3607_v42 = vadd.f32 %v8159_v17, %v8243_v11 }
 0x3f7   : > { %v3684_v8 = vadd.f32 %v8180_v43, %v3655_v36  ;;  %v3600_v43 = vadd.f32 %v8110_v49, %v8243_v11  ;;  %v3740_v63 = vadd.f32 %v8223_v28, %v3711_v3  ;;  %v3742_v9 = vadd.f32 %v3741_v15, %v3713_v10 }
 0x3f8   : > { %v8240_v48 = vpop.f32.mrf.mxu1  ;;  %v3689_v32 = vadd.f32 %v8207_v55, %v3660_v22  ;;  %v3605_v55 = vadd.f32 %v8144_v45, %v8243_v11 }
 0x3f9   : > { %v3746_v13 = vpop.f32.mrf.mxu3  ;;  %v3629_v20 = vadd.f32 %v8116_v59, %v3600_v43 }
 0x3fa   : > { %v3847_v28 = vmax.f32 %v3689_v32, 0.0  ;;  %v3634_v17 = vadd.f32 %v8154_v53, %v3605_v55 }
 0x3fb   : > { %4539 = vmatmul.bf16.gmra.mxu1 %v8012_v12  ;;  %4597 = vmatmul.bf16.gmra.mxu3 %v3910_v46  ;;  %v3717_v12 = vpop.f32.mrf.mxu2  ;;  %v3658_v7 = vadd.f32 %v8202_v52, %v3629_v20  ;;  %v3716_v52 = vadd.f32 %v3715_v47, %v8265_v51 }
 0x3fc   : > { %v3663_v1 = vadd.f32 %v8229_v34, %v3634_v17 }
 0x3fd   : > { %v3687_v46 = vadd.f32 %v8192_v0, %v3658_v7  ;;  %v3745_v38 = vadd.f32 %v3744_v29, %v3716_v52 }
 0x3fe   : > { %v8248_v30 = vpop.f32.mrf.mxu0 }
 0x3ff   : > { %v3839_v23 = vmax.f32 %v3687_v46, 0.0 }
 0x400   : > { %v8252_v14 = vpop.f32.mrf.mxu1 }
 0x401   : > { %4510 = vmatmul.bf16.gmra.mxu0 %v7953_v4  ;;  %4568 = vmatmul.bf16.gmra.mxu2 %v8078_v57  ;;  %v3831_v4 = vmax.f32 %v3684_v8, 0.0  ;;  %v8277_v39 = vpop.f32.mrf.mxu3  ;;  %v3895_v36 = vpack.c.bf16 %v3847_v28, %v3839_v23  ;;  %v3718_v8 = vadd.f32 %v3717_v12, %v8265_v51  ;;  %v3692_v12 = vadd.f32 %v8219_v54, %v3663_v1 }
 0x403   : > { %v8267_v57 = vpop.f32.mrf.mxu2  ;;  %v3887_v58 = vpack.c.bf16 %v3831_v4, %v3823_v61  ;;  %v3747_v3 = vadd.f32 %v3746_v13, %v3718_v8 }
 0x404   : > { %v3721_v34 = vadd.f32 %v8267_v57, %v8265_v51 }
 0x406   : > { %v8260_v60 = vpop.f32.mrf.mxu0 }
 0x408   : > { %v3797_v16 = vpop.f32.mrf.mxu1 }
 0x409   : > { %v3751_v6 = vpop.f32.mrf.mxu3 }
 0x40b   : > { %v3722_v49 = vpop.f32.mrf.mxu2 }
 0x40c   : > { %v3723_v7 = vadd.f32 %v3722_v49, %v8265_v51 }
 0x40e   : > { %v3768_v18 = vpop.f32.mrf.mxu0 }
 0x40f   : > { %v3769_v19 = vadd.f32 %v3768_v18, %v3740_v63  ;;  %v3855_v63 = vmax.f32 %v3692_v12, 0.0 }
 0x410   : > { %v3799_v24 = vpop.f32.mrf.mxu1 }
 0x411   : > { %4611 = vmatmul.bf16.vlgmr.msra.gmra.mxu0 %v3887_v58  ;;  %v3798_v35 = vadd.f32 %v3797_v16, %v3769_v19  ;;  %v3636_v16 = vadd.f32 %v8170_v50, %v3607_v42  ;;  %v3754_v61 = vpop.f32.mrf.mxu3 }
 0x413   : > { %v3824_v21 = vmax.f32 %v3798_v35, 0.0  ;;  %v3725_v5 = vpop.f32.mrf.mxu2  ;;  %v3665_v4 = vadd.f32 %v8238_v33, %v3636_v16  ;;  %v3612_v33 = vadd.f32 %v8196_v40, %v8243_v11 }
 0x414   : > { %v3726_v42 = vadd.f32 %v3725_v5, %v8265_v51 }
 0x415   : > { %v3694_v18 = vadd.f32 %v8232_v25, %v3665_v4  ;;  %v3610_v25 = vadd.f32 %v8178_v26, %v8243_v11  ;;  %v3752_v11 = vadd.f32 %v3751_v6, %v3723_v7 }
 0x416   : > { %v3770_v2 = vpop.f32.mrf.mxu0 }
 0x417   : > { %v3771_v31 = vadd.f32 %v3770_v2, %v3742_v9  ;;  %v3863_v10 = vmax.f32 %v3694_v18, 0.0  ;;  %v3641_v9 = vadd.f32 %v8205_v62, %v3612_v33  ;;  %v3750_v2 = vadd.f32 %v8277_v39, %v3721_v34 }
 0x418   : > { %v3802_v27 = vpop.f32.mrf.mxu1  ;;  %v3639_v40 = vadd.f32 %v8186_v37, %v3610_v25 }
 0x419   : > { %v3800_v41 = vadd.f32 %v3799_v24, %v3771_v31  ;;  %v3756_v22 = vpop.f32.mrf.mxu3  ;;  %v3903_v54 = vpack.c.bf16 %v3863_v10, %v3855_v63  ;;  %v3670_v57 = vadd.f32 %v8260_v60, %v3641_v9  ;;  %v8342_v9 = vld [vmem:[%s8428_s8] ss:$0 sm:$0xff] }
 0x41a   : > { %v3668_v26 = vadd.f32 %v8248_v30, %v3639_v40 }
 0x41b   : > { %v3832_v59 = vmax.f32 %v3800_v41, 0.0  ;;  %v3727_v29 = vpop.f32.mrf.mxu2 }
 0x41c   : > { %v3697_v62 = vadd.f32 %v8240_v48, %v3668_v26 }
 0x41d   : > { %v3888_v15 = vpack.c.bf16 %v3832_v59, %v3824_v21 }
 0x41e   : > { %v3773_v56 = vpop.f32.mrf.mxu0  ;;  %v3871_v60 = vmax.f32 %v3697_v62, 0.0 }
 0x41f   : > { %4640 = vmatmul.bf16.vlgmr.msra.gmra.mxu1 %v3888_v15  ;;  %v3774_v47 = vadd.f32 %v3773_v56, %v3745_v38  ;;  %v3755_v15 = vadd.f32 %v3754_v61, %v3726_v42 }
 0x420   : > { %v3804_v0 = vpop.f32.mrf.mxu1 }
 0x421   : > { %4616 = vmatmul.bf16.gmra.mxu0 %v3895_v36  ;;  %v3803_v43 = vadd.f32 %v3802_v27, %v3774_v47  ;;  %v3699_v27 = vadd.f32 %v8252_v14, %v3670_v57  ;;  %v4467_v41 = vpop.f32.mrf.mxu3  ;;  %v3728_v14 = vadd.f32 %v3727_v29, %v8265_v51 }
 0x423   : > { %v3840_v44 = vmax.f32 %v3803_v43, 0.0  ;;  %v8308_v35 = vpop.f32.mrf.mxu2  ;;  %v3879_v21 = vmax.f32 %v3699_v27, 0.0  ;;  %v3757_v36 = vadd.f32 %v3756_v22, %v3728_v14 }
 0x424   : > { %v4439_v40 = vadd.f32 %v8342_v9, %v8308_v35 }
 0x425   : > { %v3911_v6 = vpack.c.bf16 %v3879_v21, %v3871_v60 }
 0x426   : > { %v3775_v45 = vpop.f32.mrf.mxu0  ;;  %v4468_v26 = vadd.f32 %v4467_v41, %v4439_v40 }
 0x427   : > { %v3776_v58 = vadd.f32 %v3775_v45, %v3747_v3 }
 0x428   : > { %v3807_v24 = vpop.f32.mrf.mxu1 }
 0x429   : > { %v3805_v50 = vadd.f32 %v3804_v0, %v3776_v58  ;;  %v4469_v56 = vpop.f32.mrf.mxu3 }
 0x42b   : > { %v3848_v53 = vmax.f32 %v3805_v50, 0.0  ;;  %v4440_v52 = vpop.f32.mrf.mxu2 }
 0x42d   : > { %v3896_v13 = vpack.c.bf16 %v3848_v53, %v3840_v44 }
 0x42e   : > { %v3778_v20 = vpop.f32.mrf.mxu0 }
 0x42f   : > { %4645 = vmatmul.bf16.gmra.mxu1 %v3896_v13  ;;  %v3779_v32 = vadd.f32 %v3778_v20, %v3750_v2 }
 0x430   : > { %v3809_v19 = vpop.f32.mrf.mxu1 }
 0x431   : > { %4621 = vmatmul.bf16.gmra.mxu0 %v3903_v54  ;;  %v3808_v46 = vadd.f32 %v3807_v24, %v3779_v32  ;;  %v4472_v47 = vpop.f32.mrf.mxu3 }
 0x433   : > { %v3856_v37 = vmax.f32 %v3808_v46, 0.0  ;;  %v4443_v38 = vpop.f32.mrf.mxu2  ;;  %v4441_v46 = vadd.f32 %v8342_v9, %v4440_v52 }
 0x434   : > { %v4444_v35 = vadd.f32 %v8342_v9, %v4443_v38 }
 0x435   : > { %v4470_v21 = vadd.f32 %v4469_v56, %v4441_v46 }
 0x436   : > { %v3780_v31 = vpop.f32.mrf.mxu0  ;;  %v4473_v14 = vadd.f32 %v4472_v47, %v4444_v35 }
 0x437   : > { %v3781_v49 = vadd.f32 %v3780_v31, %v3752_v11 }
 0x438   : > { %v3812_v28 = vpop.f32.mrf.mxu1 }
 0x439   : > { %v3810_v39 = vadd.f32 %v3809_v19, %v3781_v49  ;;  %v4474_v61 = vpop.f32.mrf.mxu3 }
 0x43b   : > { %v3864_v59 = vmax.f32 %v3810_v39, 0.0  ;;  %v4445_v18 = vpop.f32.mrf.mxu2 }
 0x43c   : > { %v4446_v56 = vadd.f32 %v8342_v9, %v4445_v18 }
 0x43d   : > { %v3904_v23 = vpack.c.bf16 %v3864_v59, %v3856_v37 }
 0x43e   : > { %v3783_v30 = vpop.f32.mrf.mxu0 }
 0x43f   : > { %4650 = vmatmul.bf16.gmra.mxu1 %v3904_v23  ;;  %v3784_v48 = vadd.f32 %v3783_v30, %v3755_v15 }
 0x440   : > { %v3814_v55 = vpop.f32.mrf.mxu1 }
 0x441   : > { %4626 = vmatmul.bf16.gmra.mxu0 %v3911_v6  ;;  %v3813_v8 = vadd.f32 %v3812_v28, %v3784_v48  ;;  %v8315_v12 = vpop.f32.mrf.mxu3 }
 0x443   : > { %v3872_v4 = vmax.f32 %v3813_v8, 0.0  ;;  %v4448_v58 = vpop.f32.mrf.mxu2 }
 0x446   : > { %v3785_v0 = vpop.f32.mrf.mxu0 }
 0x447   : > { %v3786_v16 = vadd.f32 %v3785_v0, %v3757_v36 }
 0x448   : > { %v4525_v3 = vpop.f32.mrf.mxu1 }
 0x449   : > { %v3815_v17 = vadd.f32 %v3814_v55, %v3786_v16  ;;  %v8319_v44 = vpop.f32.mrf.mxu3 }
 0x44b   : > { %v3880_v5 = vmax.f32 %v3815_v17, 0.0  ;;  %v8317_v29 = vpop.f32.mrf.mxu2 }
 0x44d   : > { %v3912_v1 = vpack.c.bf16 %v3880_v5, %v3872_v4  ;;  %v4475_v4 = vadd.f32 %v4474_v61, %v4446_v56 }
 0x44e   : > { %v4496_v45 = vpop.f32.mrf.mxu0 }
 0x44f   : > { %4655 = vmatmul.bf16.gmra.mxu1 %v3912_v1  ;;  %v4497_v27 = vadd.f32 %v4496_v45, %v4468_v26  ;;  %v4449_v45 = vadd.f32 %v8342_v9, %v4448_v58 }
 0x450   : > { %v4527_v43 = vpop.f32.mrf.mxu1 }
 0x451   : > { %v8325_v34 = vpop.f32.mrf.mxu3  ;;  %v4526_v49 = vadd.f32 %v4525_v3, %v4497_v27 }
 0x453   : > { %v8323_v63 = vpop.f32.mrf.mxu2 }
 0x456   : > { %v4498_v51 = vpop.f32.mrf.mxu0 }
 0x457   : > { %v4499_v59 = vadd.f32 %v4498_v51, %v4470_v21 }
 0x458   : > { %v4530_v50 = vpop.f32.mrf.mxu1 }
 0x459   : > { %v8335_v54 = vpop.f32.mrf.mxu3  ;;  %v4528_v23 = vadd.f32 %v4527_v43, %v4499_v59 }
 0x45b   : > { %v8331_v25 = vpop.f32.mrf.mxu2 }
 0x45e   : > { %v4501_v24 = vpop.f32.mrf.mxu0 }
 0x45f   : > { %v4502_v55 = vadd.f32 %v4501_v24, %v4473_v14 }
 0x460   : > { %v4532_v53 = vpop.f32.mrf.mxu1 }
 0x461   : > { %v4583_v57 = vpop.f32.mrf.mxu3  ;;  %v4531_v8 = vadd.f32 %v4530_v50, %v4502_v55  ;;  %v4478_v50 = vadd.f32 %v8315_v12, %v4449_v45 }
 0x463   : > { %v4554_v7 = vpop.f32.mrf.mxu2 }
 0x464   : > { %v4555_v28 = vadd.f32 %v4554_v7, %v4526_v49 }
 0x466   : > { %v4503_v10 = vpop.f32.mrf.mxu0  ;;  %v4584_v42 = vadd.f32 %v4583_v57, %v4555_v28 }
 0x467   : > { %v4504_v47 = vadd.f32 %v4503_v10, %v4475_v4  ;;  %v4451_v10 = vadd.f32 %v8342_v9, %v8317_v29 }
 0x468   : > { %v8327_v13 = vpop.f32.mrf.mxu1 }
 0x469   : > { %v4585_v62 = vpop.f32.mrf.mxu3  ;;  %v4533_v43 = vadd.f32 %v4532_v53, %v4504_v47  ;;  %v4480_v49 = vadd.f32 %v8319_v44, %v4451_v10 }
 0x46b   : > { %v4556_v11 = vpop.f32.mrf.mxu2 }
 0x46c   : > { %v4557_v6 = vadd.f32 %v4556_v11, %v4528_v23 }
 0x46e   : > { %v8321_v33 = vpop.f32.mrf.mxu0  ;;  %v4586_v36 = vadd.f32 %v4585_v62, %v4557_v6 }
 0x46f   : > { %v4507_v61 = vadd.f32 %v8321_v33, %v4478_v50  ;;  %v4454_v33 = vadd.f32 %v8342_v9, %v8323_v63 }
 0x470   : > { %v8337_v19 = vpop.f32.mrf.mxu1 }
 0x471   : > { %v4588_v15 = vpop.f32.mrf.mxu3  ;;  %v4536_v58 = vadd.f32 %v8327_v13, %v4507_v61 }
 0x473   : > { %v4559_v60 = vpop.f32.mrf.mxu2 }
 0x474   : > { %v4560_v17 = vadd.f32 %v4559_v60, %v4531_v8 }
 0x476   : > { %v8329_v20 = vpop.f32.mrf.mxu0  ;;  %v4589_v51 = vadd.f32 %v4588_v15, %v4560_v17 }
 0x477   : > { %v4509_v28 = vadd.f32 %v8329_v20, %v4480_v49 }
 0x478   : > { %v8348_v32 = vpop.f32.mrf.mxu1 }
 0x479   : > { %v4590_v1 = vpop.f32.mrf.mxu3 }
 0x47b   : > { %v4561_v0 = vpop.f32.mrf.mxu2 }
 0x47c   : > { %v4562_v40 = vadd.f32 %v4561_v0, %v4533_v43 }
 0x47e   : > { %v8333_v22 = vpop.f32.mrf.mxu0  ;;  %v4591_v11 = vadd.f32 %v4590_v1, %v4562_v40 }
 0x480   : > { %v8351_v39 = vpop.f32.mrf.mxu1 }
 0x481   : > { %v4593_v26 = vpop.f32.mrf.mxu3 }
 0x483   : > { %v4564_v7 = vpop.f32.mrf.mxu2 }
 0x484   : > { %v4565_v46 = vadd.f32 %v4564_v7, %v4536_v58 }
 0x486   : > { %v8344_v2 = vpop.f32.mrf.mxu0  ;;  %v4594_v29 = vadd.f32 %v4593_v26, %v4565_v46 }
 0x489   : > { %v4595_v21 = vpop.f32.mrf.mxu3 }
 0x48b   : > { %v4566_v62 = vpop.f32.mrf.mxu2 }
 0x48e   : > { %v4612_v31 = vpop.f32.mrf.mxu0 }
 0x48f   : > { %v4613_v41 = vadd.f32 %v4612_v31, %v4584_v42  ;;  %v4483_v42 = vadd.f32 %v8325_v34, %v4454_v33 }
 0x491   : > { %v4512_v23 = vadd.f32 %v8333_v22, %v4483_v42 }
 0x493   : > { %v4569_v20 = vpop.f32.mrf.mxu2 }
 0x496   : > { %v4614_v37 = vpop.f32.mrf.mxu0 }
 0x497   : > { %v4615_v16 = vadd.f32 %v4614_v37, %v4586_v36  ;;  %v4538_v37 = vadd.f32 %v8337_v19, %v4509_v28 }
 0x499   : > { %v4567_v35 = vadd.f32 %v4566_v62, %v4538_v37 }
 0x49b   : > { %v4596_v63 = vadd.f32 %v4595_v21, %v4567_v35  ;;  %v4571_v56 = vpop.f32.mrf.mxu2 }
 0x49c   : > { %v4641_v30 = vpop.f32.mrf.mxu1 }
 0x49d   : > { %v4642_v52 = vadd.f32 %v4641_v30, %v4613_v41  ;;  %v4456_v41 = vadd.f32 %v8342_v9, %v8331_v25  ;;  %v4541_v30 = vadd.f32 %v8348_v32, %v4512_v23 }
 0x49e   : > { %v4617_v48 = vpop.f32.mrf.mxu0 }
 0x49f   : > { %4661 = vst [vmem:[%s8356_s25] sm:$0xff] %v4642_v52  ;;  %v4618_v24 = vadd.f32 %v4617_v48, %v4589_v51  ;;  %v4570_v14 = vadd.f32 %v4569_v20, %v4541_v30  ;;  %v4485_v15 = vadd.f32 %v8335_v54, %v4456_v41  ;;  %v4598_v52 = vpop.f32.mrf.mxu3 }
 0x4a1   : > { %v4514_v22 = vadd.f32 %v8344_v2, %v4485_v15  ;;  %v4599_v55 = vadd.f32 %v4598_v52, %v4570_v14 }
 0x4a3   : > { %v4543_v25 = vadd.f32 %v8351_v39, %v4514_v22 }
 0x4a4   : > { %v4643_v38 = vpop.f32.mrf.mxu1 }
 0x4a5   : > { %v4644_v5 = vadd.f32 %v4643_v38, %v4615_v16  ;;  %v4572_v36 = vadd.f32 %v4571_v56, %v4543_v25 }
 0x4a6   : > { %v4619_v3 = vpop.f32.mrf.mxu0 }
 0x4a7   : > { %4662 = vst [vmem:[%s8356_s25 + $0x8] sm:$0xff] %v4644_v5  ;;  %v4620_v53 = vadd.f32 %v4619_v3, %v4591_v11  ;;  %v4600_v54 = vpop.f32.mrf.mxu3 }
 0x4a8   : > { %v4601_v8 = vadd.f32 %v4600_v54, %v4572_v36 }
 0x4ac   : > { %v4646_v18 = vpop.f32.mrf.mxu1 }
 0x4ad   : > { %v4647_v57 = vadd.f32 %v4646_v18, %v4618_v24 }
 0x4ae   : > { %v4622_v31 = vpop.f32.mrf.mxu0 }
 0x4af   : > { %4663 = vst [vmem:[%s8356_s25 + $0x10] sm:$0xff] %v4647_v57  ;;  %v4623_v59 = vadd.f32 %v4622_v31, %v4594_v29 }
 0x4b4   : > { %v4648_v27 = vpop.f32.mrf.mxu1 }
 0x4b5   : > { %v4649_v12 = vadd.f32 %v4648_v27, %v4620_v53 }
 0x4b6   : > { %v4624_v13 = vpop.f32.mrf.mxu0 }
 0x4b7   : > { %4664 = vst [vmem:[%s8356_s25 + $0x18] sm:$0xff] %v4649_v12  ;;  %v4625_v19 = vadd.f32 %v4624_v13, %v4596_v63 }
 0x4bc   : > { %v4651_v60 = vpop.f32.mrf.mxu1 }
 0x4bd   : > { %v4652_v44 = vadd.f32 %v4651_v60, %v4623_v59 }
 0x4be   : > { %v4627_v48 = vpop.f32.mrf.mxu0 }
 0x4bf   : > { %4665 = vst [vmem:[%s8356_s25 + $0x20] sm:$0xff] %v4652_v44  ;;  %v4628_v9 = vadd.f32 %v4627_v48, %v4599_v55 }
 0x4c4   : > { %v4653_v6 = vpop.f32.mrf.mxu1 }
 0x4c5   : > { %v4654_v34 = vadd.f32 %v4653_v6, %v4625_v19 }
 0x4c6   : > { %v4629_v2 = vpop.f32.mrf.mxu0 }
 0x4c7   : > { %4666 = vst [vmem:[%s8356_s25 + $0x28] sm:$0xff] %v4654_v34  ;;  %v4630_v39 = vadd.f32 %v4629_v2, %v4601_v8 }
 0x4cc   : > { %v4656_v32 = vpop.f32.mrf.mxu1 }
 0x4cd   : > { %v4657_v0 = vadd.f32 %v4656_v32, %v4628_v9 }
 0x4cf   : > { %4667 = vst [vmem:[%s8356_s25 + $0x30] sm:$0xff] %v4657_v0 }
 0x4d4   : > { %v4658_v16 = vpop.f32.mrf.mxu1 }
 0x4d5   : > { %v4659_v38 = vadd.f32 %v4658_v16, %v4630_v39 }
 0x4d7   : > { %4668 = vst [vmem:[%s8356_s25 + $0x38] sm:$0xff] %v4659_v38 }
 0x4d8   : > { %7268 = shalt.err (!%p7265_p9)
}
 0x4d9   : > { %s7340_s15 = smov 128   ;;  %s7341_s25 = smov 8  }
 0x4da   : > { %6901 = dma.vmem_to_hbm [thread:$0]  (%p7491_p13), %s4683_s22, 1024, %s4685_s26, %s4670_s16, %s7340_s15, %s7340_s15, %s7341_s25  }
 0x4db PF: > { %s4699_s14 = sand.u32 1, %s7311_s30   ;;  %p8446_p10 = scmp.ge.s32.totalorder %s7323_s12, 2 }
 0x4dc   : > { %s4700_s29 = scalar_lea.sflag [#allocation4], %s4699_s14 }
 0x4dd   : > { %p6930_p11 = pnand %p8446_p10, %p7496_p4 }
 0x4df   : > { %p6931_p0 = pneg %p6930_p11 }
 0x4e1   : > { %7306 = dma.done.wait (%p6931_p0), %s4700_s29, 1024  }
 0x4e2   : > { %7308 = vsyncadd (%p6931_p0), %s4700_s29, 4294966272  ;;  %p26_p2 = scmp.ge.s32.totalorder %s7471_s13, 4   ;;  %s8447_s30 = smov %s7315_s10 }
 0x4e3   : > { %s8448_s10 = smov %s7319_s11  ;;  %s8449_s11 = smov %s7483_s20 }
 0x4e4   : > { %s8450_s12 = smov %s7471_s13  ;;  %28 = sbr.rel (!%p26_p2) target bundleno = 13 (0xd), region = 129 }
 0x4e9   :  { %4706 = vsyncpa [#allocation3], 1 }
 0x4ea   :  { %4708 = vsyncpa [#allocation3 + $0x1], 1 }
 0x4eb   :  { %4709 = vsyncpa [#allocation6], 1 }
 0x4ec   :  { %4710 = vsyncpa [#allocation9], 1 }
 0x4ed   :  { %4711 = vsyncpa [#allocation12], 1 }
 0x4ee   :  { %4712 = vsyncpa [#allocation15], 1 }
 0x4ef   :  { %4713 = vsyncpa [#allocation4], 1 }
 0x4f0   :  { %4715 = vsyncpa [#allocation4 + $0x1], 1 }

</bundles_post_ra>
